<compile_context>
chip_gen: v7x
topology: tpu7x:2x2x1
jax: 0.10.0
libtpu: 0.0.40
codegen_flags: <defaults>
</compile_context>

<pallas_src>
import jax
import jax.numpy as jnp
from jax.experimental import pallas as pl
from jax.experimental.pallas import tpu as pltpu

EMB = 300
EMB_PAD = 384            # 3 * 128, lane-aligned layer-0 input width
HIDDEN = 128
NUM_LAYERS = 4
HEAD_HIDDEN = 84
NUM_CLASSES = 2
HEAD_PAD = 128           # lane-padded width for both head layers and the output
SUBLANE = 8              # f32 sublane tile


# ------------------------ fused LSTM(4 layers) + head kernel ------------------------
def _fused_lstm_head_kernel(x_ref, wih0_ref, wihr_ref, whh_ref, b_ref,
                            w1_ref, b1_ref, w2_ref, b2_ref,
                            out_ref,
                            gx_scr, hseq_scr, hfin_scr):
    """Whole forward pass (4 LSTM layers + MLP head) in one VMEM-resident pass.

    x_ref    : (T*Bp, EMB_PAD)  embedded inputs, time-major, batch-padded
    wih0_ref : (EMB_PAD, 4H)    layer-0 input weights (pre-transposed, zero-padded)
    wihr_ref : (3, H, 4H)       layer 1..3 input weights
    whh_ref  : (4, H, 4H)       recurrent weights
    b_ref    : (4, 1, 4H)       b_ih + b_hh, folded per layer
    w1/b1    : (4H, 128)/(1,128)   Linear(512, 84) lane-padded 84 -> 128
    w2/b2    : (128, 128)/(1,128)  Linear(84, 2)  padded 84 -> 128 / 2 -> 128
    out_ref  : (Bp, 128)        softmax probabilities in lanes [0, NUM_CLASSES)
    gx_scr   : (T*Bp, 4H)       hoisted input projection of the current layer
    hseq_scr : (T*Bp, H)        hidden sequence of the current layer
    hfin_scr : (Bp, 4H)         flattened h_n (== h_n.transpose(0,1) + Flatten)
    """
    H = HIDDEN
    Bp = hfin_scr.shape[0]
    T = hseq_scr.shape[0] // Bp

    def run_recurrence(layer):
        # Only h @ W_hh is on the serial path; x @ W_ih (+bias) already lives in
        # gx_scr.  Fully unrolled straight-line loop (equivalent to
        # lax.fori_loop(..., unroll=True)) with static, sublane-aligned slices.
        w_hh = whh_ref[layer]                                     # (H, 4H)
        h = jnp.zeros((Bp, H), jnp.float32)
        c = jnp.zeros((Bp, H), jnp.float32)
        for t in range(T):
            row = t * Bp
            gates = gx_scr[pl.ds(row, Bp), :] + jnp.dot(
                h, w_hh, preferred_element_type=jnp.float32)      # (Bp, 4H)
            i = jax.nn.sigmoid(gates[:, 0 * H:1 * H])             # PyTorch gate
            f = jax.nn.sigmoid(gates[:, 1 * H:2 * H])             # order: i,f,g,o
            g = jnp.tanh(gates[:, 2 * H:3 * H])
            o = jax.nn.sigmoid(gates[:, 3 * H:4 * H])
            c = f * c + i * g
            h = o * jnp.tanh(c)
            hseq_scr[pl.ds(row, Bp), :] = h
        hfin_scr[:, layer * H:(layer + 1) * H] = h                # h_n[layer]

    # Layer 0: hoisted input projection over the whole sequence (M = T*Bp).
    gx_scr[...] = jnp.dot(x_ref[...], wih0_ref[...],
                          preferred_element_type=jnp.float32) + b_ref[0]
    run_recurrence(0)

    # Layers 1..3: input is the previous layer's full hidden sequence.
    for layer in range(1, NUM_LAYERS):
        gx_scr[...] = jnp.dot(hseq_scr[...], wihr_ref[layer - 1],
                              preferred_element_type=jnp.float32) + b_ref[layer]
        run_recurrence(layer)

    # Fused MLP head: Flatten(h_n.transpose(0,1)) -> Linear -> ReLU
    # -> Dropout(identity, eval) -> Linear -> Softmax.
    # TODO(synk): nn.Dropout(p=0.5) is identity in eval mode; training-mode RNG dropout not implemented.
    z = jnp.dot(hfin_scr[...], w1_ref[...],
                preferred_element_type=jnp.float32) + b1_ref[...]
    z = jnp.maximum(z, 0.0)                                       # ReLU
    logits = jnp.dot(z, w2_ref[...],
                     preferred_element_type=jnp.float32) + b2_ref[...]
    # Only the first NUM_CLASSES lanes are real classes; mask padding pre-softmax.
    lane = jax.lax.broadcasted_iota(jnp.int32, logits.shape, 1)
    logits = jnp.where(lane < NUM_CLASSES, logits, jnp.float32(-1e30))
    out_ref[...] = jax.nn.softmax(logits, axis=-1)


# ----------------------------------- wrapper -----------------------------------
def model_forward(tokens, prep):
    """tokens: (B, T) int32.  Returns class probabilities (B, 2) float32."""
    B, T = tokens.shape
    Bp = ((B + SUBLANE - 1) // SUBLANE) * SUBLANE

    # Embedding lookup (gather) kept as plain-JAX glue; table pre-padded to 384.
    x = jnp.take(prep["emb"], tokens, axis=0)            # (B, T, EMB_PAD)
    x = jnp.transpose(x, (1, 0, 2))                      # time-major (T, B, EMB_PAD)
    x = jnp.pad(x, ((0, 0), (0, Bp - B), (0, 0)))        # pad batch to sublane tile
    x = x.reshape(T * Bp, EMB_PAD)

    H4 = 4 * HIDDEN
    probs_padded = pl.pallas_call(
        _fused_lstm_head_kernel,
        out_shape=jax.ShapeDtypeStruct((Bp, HEAD_PAD), jnp.float32),
        grid_spec=pltpu.PrefetchScalarGridSpec(
            num_scalar_prefetch=0,
            grid=(1,),
            in_specs=[
                pl.BlockSpec((T * Bp, EMB_PAD), lambda i: (0, 0)),
                pl.BlockSpec((EMB_PAD, H4), lambda i: (0, 0)),
                pl.BlockSpec((NUM_LAYERS - 1, HIDDEN, H4), lambda i: (0, 0, 0)),
                pl.BlockSpec((NUM_LAYERS, HIDDEN, H4), lambda i: (0, 0, 0)),
                pl.BlockSpec((NUM_LAYERS, 1, H4), lambda i: (0, 0, 0)),
                pl.BlockSpec((NUM_LAYERS * HIDDEN, HEAD_PAD), lambda i: (0, 0)),
                pl.BlockSpec((1, HEAD_PAD), lambda i: (0, 0)),
                pl.BlockSpec((HEAD_PAD, HEAD_PAD), lambda i: (0, 0)),
                pl.BlockSpec((1, HEAD_PAD), lambda i: (0, 0)),
            ],
            out_specs=pl.BlockSpec((Bp, HEAD_PAD), lambda i: (0, 0)),
            scratch_shapes=[
                pltpu.VMEM((T * Bp, H4), jnp.float32),       # gx_scr
                pltpu.VMEM((T * Bp, HIDDEN), jnp.float32),   # hseq_scr
                pltpu.VMEM((Bp, H4), jnp.float32),           # hfin_scr
            ],
        ),
        compiler_params=pltpu.CompilerParams(
            dimension_semantics=("arbitrary",),
        ),
    )(x, prep["wih0"], prep["wih_rest"], prep["whh"], prep["bias"],
      prep["w1"], prep["b1"], prep["w2"], prep["b2"])

    return probs_padded[:B, :NUM_CLASSES]


# ------------------------------ parameter handling ------------------------------
def prepare_params(params):
    """One-time conversion of PyTorch-layout params to kernel layout:
    transpose, fold b_ih+b_hh, stack per-layer weights, (8,128)-friendly padding.
    Call once, not per forward step."""
    emb = jnp.pad(params["emb"], ((0, 0), (0, EMB_PAD - EMB)))

    wih0, wih_rest, whh_all, bias_all = None, [], [], []
    for l in range(NUM_LAYERS):
        w_ih, w_hh, b_ih, b_hh = params["lstm"][l]
        w_ih_t = jnp.transpose(w_ih)                    # (Din, 4H)
        if l == 0:
            wih0 = jnp.pad(w_ih_t, ((0, EMB_PAD - EMB), (0, 0)))   # (384, 4H)
        else:
            wih_rest.append(w_ih_t)                     # (H, 4H)
        whh_all.append(jnp.transpose(w_hh))             # (H, 4H)
        bias_all.append((b_ih + b_hh)[None, :])         # (1, 4H)

    w1, b1, w2, b2 = params["head"]
    pad1 = HEAD_PAD - HEAD_HIDDEN
    pad2 = HEAD_PAD - NUM_CLASSES
    return {
        "emb": emb,
        "wih0": wih0,
        "wih_rest": jnp.stack(wih_rest),                # (3, H, 4H)
        "whh": jnp.stack(whh_all),                      # (4, H, 4H)
        "bias": jnp.stack(bias_all),                    # (4, 1, 4H)
        "w1": jnp.pad(jnp.transpose(w1), ((0, 0), (0, pad1))),            # (512, 128)
        "b1": jnp.pad(b1, (0, pad1))[None, :],                            # (1, 128)
        "w2": jnp.pad(jnp.transpose(w2), ((0, pad1), (0, pad2))),         # (128, 128)
        "b2": jnp.pad(b2, (0, pad2))[None, :],                            # (1, 128)
    }


def init_params(key, vocab_size):
    """PyTorch-layout parameters (same layout/order as nn.LSTM / nn.Linear)."""
    def uni(k, shape, scale=0.08):
        return jax.random.uniform(k, shape, jnp.float32, -scale, scale)

    keys = iter(jax.random.split(key, 64))
    params = {"emb": uni(next(keys), (vocab_size, EMB), 0.1)}

    lstm = []
    for l in range(NUM_LAYERS):
        din = EMB if l == 0 else HIDDEN
        lstm.append((
            uni(next(keys), (4 * HIDDEN, din)),          # weight_ih_l{l}
            uni(next(keys), (4 * HIDDEN, HIDDEN)),       # weight_hh_l{l}
            uni(next(keys), (4 * HIDDEN,)),              # bias_ih_l{l}
            uni(next(keys), (4 * HIDDEN,)),              # bias_hh_l{l}
        ))
    params["lstm"] = lstm

    params["head"] = (
        uni(next(keys), (HEAD_HIDDEN, NUM_LAYERS * HIDDEN)),   # Linear(512, 84) weight
        uni(next(keys), (HEAD_HIDDEN,)),                       # bias
        uni(next(keys), (NUM_CLASSES, HEAD_HIDDEN)),           # Linear(84, 2) weight
        uni(next(keys), (NUM_CLASSES,)),                       # bias
    )
    return params


if __name__ == "__main__":
    key = jax.random.PRNGKey(0)
    k_params, k_tokens = jax.random.split(key)

    vocab_size = 50
    B, T = 2, 8

    params = init_params(k_params, vocab_size)
    prep = prepare_params(params)
    tokens = jax.random.randint(k_tokens, (B, T), 0, vocab_size, dtype=jnp.int32)

    fwd = jax.jit(model_forward)
    probs = jax.block_until_ready(fwd(tokens, prep))

    assert probs.shape == (B, NUM_CLASSES), probs.shape
    assert bool(jnp.all(jnp.isfinite(probs)))
    row_sums = jnp.sum(probs, axis=-1)
    assert bool(jnp.all(jnp.abs(row_sums - 1.0) < 1e-4)), row_sums

    print("KERNEL_OK")
</pallas_src>

<mosaic_0001>
module attributes {stable_mosaic.version = 11 : i64} {
  func.func @_fused_lstm_head_kernel(%arg0: i32, %arg1: memref<64x384xf32, #tpu.memory_space<vmem>>, %arg2: memref<384x512xf32, #tpu.memory_space<vmem>>, %arg3: memref<3x128x512xf32, #tpu.memory_space<vmem>>, %arg4: memref<4x128x512xf32, #tpu.memory_space<vmem>>, %arg5: memref<4x1x512xf32, #tpu.memory_space<vmem>>, %arg6: memref<512x128xf32, #tpu.memory_space<vmem>>, %arg7: memref<1x128xf32, #tpu.memory_space<vmem>>, %arg8: memref<128x128xf32, #tpu.memory_space<vmem>>, %arg9: memref<1x128xf32, #tpu.memory_space<vmem>>, %arg10: memref<8x128xf32, #tpu.memory_space<vmem>>, %arg11: memref<64x512xf32, #tpu.memory_space<vmem>>, %arg12: memref<64x128xf32, #tpu.memory_space<vmem>>, %arg13: memref<8x512xf32, #tpu.memory_space<vmem>>) attributes {dimension_semantics = [#tpu.dimension_semantics<arbitrary>], iteration_bounds = array<i64: 1>, scalar_prefetch = 0 : i64, scratch_operands = 3 : i64, tpu.core_type = #tpu.core_type<tc>, window_params = [{pipeline_mode = #tpu.pipeline_mode<synchronous>, transform_indices = @transform_0, window_bounds = array<i64: 64, 384>}, {pipeline_mode = #tpu.pipeline_mode<synchronous>, transform_indices = @transform_1, window_bounds = array<i64: 384, 512>}, {pipeline_mode = #tpu.pipeline_mode<synchronous>, transform_indices = @transform_2, window_bounds = array<i64: 3, 128, 512>}, {pipeline_mode = #tpu.pipeline_mode<synchronous>, transform_indices = @transform_3, window_bounds = array<i64: 4, 128, 512>}, {pipeline_mode = #tpu.pipeline_mode<synchronous>, transform_indices = @transform_4, window_bounds = array<i64: 4, 1, 512>}, {pipeline_mode = #tpu.pipeline_mode<synchronous>, transform_indices = @transform_5, window_bounds = array<i64: 512, 128>}, {pipeline_mode = #tpu.pipeline_mode<synchronous>, transform_indices = @transform_6, window_bounds = array<i64: 1, 128>}, {pipeline_mode = #tpu.pipeline_mode<synchronous>, transform_indices = @transform_7, window_bounds = array<i64: 128, 128>}, {pipeline_mode = #tpu.pipeline_mode<synchronous>, transform_indices = @transform_8, window_bounds = array<i64: 1, 128>}, {pipeline_mode = #tpu.pipeline_mode<synchronous>, transform_indices = @transform_9, window_bounds = array<i64: 8, 128>}]} {
    %c0 = arith.constant 0 : index
    %c0_0 = arith.constant 0 : index
    %0 = vector.load %arg1[%c0, %c0_0] : memref<64x384xf32, #tpu.memory_space<vmem>>, vector<64x384xf32>
    %c0_1 = arith.constant 0 : index
    %c0_2 = arith.constant 0 : index
    %1 = vector.load %arg2[%c0_1, %c0_2] : memref<384x512xf32, #tpu.memory_space<vmem>>, vector<384x512xf32>
    %cst = arith.constant dense<0.000000e+00> : vector<64x512xf32>
    %2 = tpu.matmul %0, %1, %cst {dimension_numbers = #tpu.dot_dimension_numbers<[1], [0], [0], [1], [0, 0, 1, 1], [], []>} : vector<64x384xf32>, vector<384x512xf32>, vector<64x512xf32> -> vector<64x512xf32>
    %c0_3 = arith.constant 0 : index
    %c0_4 = arith.constant 0 : index
    %c0_5 = arith.constant 0 : index
    %3 = vector.load %arg5[%c0_3, %c0_4, %c0_5] : memref<4x1x512xf32, #tpu.memory_space<vmem>>, vector<1x1x512xf32>
    %4 = vector.shape_cast %3 : vector<1x1x512xf32> to vector<1x512xf32>
    %5 = vector.broadcast %4 : vector<1x512xf32> to vector<64x512xf32>
    %6 = arith.addf %2, %5 : vector<64x512xf32>
    %c0_6 = arith.constant 0 : index
    %c0_7 = arith.constant 0 : index
    %7 = vector.load %arg11[%c0_6, %c0_7] : memref<64x512xf32, #tpu.memory_space<vmem>>, vector<64x512xf32>
    tpu.vector_store %arg11[%c0_6, %c0_7], %6 {strides = array<i32>} : memref<64x512xf32, #tpu.memory_space<vmem>>, vector<64x512xf32>,
    %c0_8 = arith.constant 0 : index
    %c0_9 = arith.constant 0 : index
    %c0_10 = arith.constant 0 : index
    %8 = vector.load %arg4[%c0_8, %c0_9, %c0_10] : memref<4x128x512xf32, #tpu.memory_space<vmem>>, vector<1x128x512xf32>
    %9 = vector.shape_cast %8 : vector<1x128x512xf32> to vector<128x512xf32>
    %cst_11 = arith.constant 0.000000e+00 : f32
    %10 = vector.broadcast %cst_11 : f32 to vector<8x128xf32>
    %cst_12 = arith.constant 0.000000e+00 : f32
    %11 = vector.broadcast %cst_12 : f32 to vector<8x128xf32>
    %c0_13 = arith.constant 0 : index
    %c0_14 = arith.constant 0 : index
    %12 = vector.load %arg11[%c0_13, %c0_14] : memref<64x512xf32, #tpu.memory_space<vmem>>, vector<8x512xf32>
    %cst_15 = arith.constant dense<0.000000e+00> : vector<8x512xf32>
    %13 = tpu.matmul %10, %9, %cst_15 {dimension_numbers = #tpu.dot_dimension_numbers<[1], [0], [0], [1], [0, 0, 1, 1], [], []>} : vector<8x128xf32>, vector<128x512xf32>, vector<8x512xf32> -> vector<8x512xf32>
    %14 = arith.addf %12, %13 : vector<8x512xf32>
    %15 = vector.extract_strided_slice %14 {offsets = [0, 0], sizes = [8, 128], strides = [1, 1]} : vector<8x512xf32> to vector<8x128xf32>
    %16 = arith.negf %15 : vector<8x128xf32>
    %17 = math.exp %16 : vector<8x128xf32>
    %cst_16 = arith.constant 1.000000e+00 : f32
    %18 = vector.broadcast %cst_16 : f32 to vector<8x128xf32>
    %19 = arith.addf %18, %17 : vector<8x128xf32>
    %20 = arith.divf %18, %19 : vector<8x128xf32>
    %21 = vector.extract_strided_slice %14 {offsets = [0, 128], sizes = [8, 128], strides = [1, 1]} : vector<8x512xf32> to vector<8x128xf32>
    %22 = arith.negf %21 : vector<8x128xf32>
    %23 = math.exp %22 : vector<8x128xf32>
    %cst_17 = arith.constant 1.000000e+00 : f32
    %24 = vector.broadcast %cst_17 : f32 to vector<8x128xf32>
    %25 = arith.addf %24, %23 : vector<8x128xf32>
    %26 = arith.divf %24, %25 : vector<8x128xf32>
    %27 = vector.extract_strided_slice %14 {offsets = [0, 256], sizes = [8, 128], strides = [1, 1]} : vector<8x512xf32> to vector<8x128xf32>
    %28 = math.tanh %27 : vector<8x128xf32>
    %29 = vector.extract_strided_slice %14 {offsets = [0, 384], sizes = [8, 128], strides = [1, 1]} : vector<8x512xf32> to vector<8x128xf32>
    %30 = arith.negf %29 : vector<8x128xf32>
    %31 = math.exp %30 : vector<8x128xf32>
    %cst_18 = arith.constant 1.000000e+00 : f32
    %32 = vector.broadcast %cst_18 : f32 to vector<8x128xf32>
    %33 = arith.addf %32, %31 : vector<8x128xf32>
    %34 = arith.divf %32, %33 : vector<8x128xf32>
    %35 = arith.mulf %26, %11 : vector<8x128xf32>
    %36 = arith.mulf %20, %28 : vector<8x128xf32>
    %37 = arith.addf %35, %36 : vector<8x128xf32>
    %38 = math.tanh %37 : vector<8x128xf32>
    %39 = arith.mulf %34, %38 : vector<8x128xf32>
    %c0_19 = arith.constant 0 : index
    %c0_20 = arith.constant 0 : index
    %40 = vector.load %arg12[%c0_19, %c0_20] : memref<64x128xf32, #tpu.memory_space<vmem>>, vector<8x128xf32>
    tpu.vector_store %arg12[%c0_19, %c0_20], %39 {strides = array<i32>} : memref<64x128xf32, #tpu.memory_space<vmem>>, vector<8x128xf32>,
    %c8 = arith.constant 8 : index
    %c0_21 = arith.constant 0 : index
    %41 = vector.load %arg11[%c8, %c0_21] : memref<64x512xf32, #tpu.memory_space<vmem>>, vector<8x512xf32>
    %cst_22 = arith.constant dense<0.000000e+00> : vector<8x512xf32>
    %42 = tpu.matmul %39, %9, %cst_22 {dimension_numbers = #tpu.dot_dimension_numbers<[1], [0], [0], [1], [0, 0, 1, 1], [], []>} : vector<8x128xf32>, vector<128x512xf32>, vector<8x512xf32> -> vector<8x512xf32>
    %43 = arith.addf %41, %42 : vector<8x512xf32>
    %44 = vector.extract_strided_slice %43 {offsets = [0, 0], sizes = [8, 128], strides = [1, 1]} : vector<8x512xf32> to vector<8x128xf32>
    %45 = arith.negf %44 : vector<8x128xf32>
    %46 = math.exp %45 : vector<8x128xf32>
    %cst_23 = arith.constant 1.000000e+00 : f32
    %47 = vector.broadcast %cst_23 : f32 to vector<8x128xf32>
    %48 = arith.addf %47, %46 : vector<8x128xf32>
    %49 = arith.divf %47, %48 : vector<8x128xf32>
    %50 = vector.extract_strided_slice %43 {offsets = [0, 128], sizes = [8, 128], strides = [1, 1]} : vector<8x512xf32> to vector<8x128xf32>
    %51 = arith.negf %50 : vector<8x128xf32>
    %52 = math.exp %51 : vector<8x128xf32>
    %cst_24 = arith.constant 1.000000e+00 : f32
    %53 = vector.broadcast %cst_24 : f32 to vector<8x128xf32>
    %54 = arith.addf %53, %52 : vector<8x128xf32>
    %55 = arith.divf %53, %54 : vector<8x128xf32>
    %56 = vector.extract_strided_slice %43 {offsets = [0, 256], sizes = [8, 128], strides = [1, 1]} : vector<8x512xf32> to vector<8x128xf32>
    %57 = math.tanh %56 : vector<8x128xf32>
    %58 = vector.extract_strided_slice %43 {offsets = [0, 384], sizes = [8, 128], strides = [1, 1]} : vector<8x512xf32> to vector<8x128xf32>
    %59 = arith.negf %58 : vector<8x128xf32>
    %60 = math.exp %59 : vector<8x128xf32>
    %cst_25 = arith.constant 1.000000e+00 : f32
    %61 = vector.broadcast %cst_25 : f32 to vector<8x128xf32>
    %62 = arith.addf %61, %60 : vector<8x128xf32>
    %63 = arith.divf %61, %62 : vector<8x128xf32>
    %64 = arith.mulf %55, %37 : vector<8x128xf32>
    %65 = arith.mulf %49, %57 : vector<8x128xf32>
    %66 = arith.addf %64, %65 : vector<8x128xf32>
    %67 = math.tanh %66 : vector<8x128xf32>
    %68 = arith.mulf %63, %67 : vector<8x128xf32>
    %c8_26 = arith.constant 8 : index
    %c0_27 = arith.constant 0 : index
    %69 = vector.load %arg12[%c8_26, %c0_27] : memref<64x128xf32, #tpu.memory_space<vmem>>, vector<8x128xf32>
    tpu.vector_store %arg12[%c8_26, %c0_27], %68 {strides = array<i32>} : memref<64x128xf32, #tpu.memory_space<vmem>>, vector<8x128xf32>,
    %c16 = arith.constant 16 : index
    %c0_28 = arith.constant 0 : index
    %70 = vector.load %arg11[%c16, %c0_28] : memref<64x512xf32, #tpu.memory_space<vmem>>, vector<8x512xf32>
    %cst_29 = arith.constant dense<0.000000e+00> : vector<8x512xf32>
    %71 = tpu.matmul %68, %9, %cst_29 {dimension_numbers = #tpu.dot_dimension_numbers<[1], [0], [0], [1], [0, 0, 1, 1], [], []>} : vector<8x128xf32>, vector<128x512xf32>, vector<8x512xf32> -> vector<8x512xf32>
    %72 = arith.addf %70, %71 : vector<8x512xf32>
    %73 = vector.extract_strided_slice %72 {offsets = [0, 0], sizes = [8, 128], strides = [1, 1]} : vector<8x512xf32> to vector<8x128xf32>
    %74 = arith.negf %73 : vector<8x128xf32>
    %75 = math.exp %74 : vector<8x128xf32>
    %cst_30 = arith.constant 1.000000e+00 : f32
    %76 = vector.broadcast %cst_30 : f32 to vector<8x128xf32>
    %77 = arith.addf %76, %75 : vector<8x128xf32>
    %78 = arith.divf %76, %77 : vector<8x128xf32>
    %79 = vector.extract_strided_slice %72 {offsets = [0, 128], sizes = [8, 128], strides = [1, 1]} : vector<8x512xf32> to vector<8x128xf32>
    %80 = arith.negf %79 : vector<8x128xf32>
    %81 = math.exp %80 : vector<8x128xf32>
    %cst_31 = arith.constant 1.000000e+00 : f32
    %82 = vector.broadcast %cst_31 : f32 to vector<8x128xf32>
    %83 = arith.addf %82, %81 : vector<8x128xf32>
    %84 = arith.divf %82, %83 : vector<8x128xf32>
    %85 = vector.extract_strided_slice %72 {offsets = [0, 256], sizes = [8, 128], strides = [1, 1]} : vector<8x512xf32> to vector<8x128xf32>
    %86 = math.tanh %85 : vector<8x128xf32>
    %87 = vector.extract_strided_slice %72 {offsets = [0, 384], sizes = [8, 128], strides = [1, 1]} : vector<8x512xf32> to vector<8x128xf32>
    %88 = arith.negf %87 : vector<8x128xf32>
    %89 = math.exp %88 : vector<8x128xf32>
    %cst_32 = arith.constant 1.000000e+00 : f32
    %90 = vector.broadcast %cst_32 : f32 to vector<8x128xf32>
    %91 = arith.addf %90, %89 : vector<8x128xf32>
    %92 = arith.divf %90, %91 : vector<8x128xf32>
    %93 = arith.mulf %84, %66 : vector<8x128xf32>
    %94 = arith.mulf %78, %86 : vector<8x128xf32>
    %95 = arith.addf %93, %94 : vector<8x128xf32>
    %96 = math.tanh %95 : vector<8x128xf32>
    %97 = arith.mulf %92, %96 : vector<8x128xf32>
    %c16_33 = arith.constant 16 : index
    %c0_34 = arith.constant 0 : index
    %98 = vector.load %arg12[%c16_33, %c0_34] : memref<64x128xf32, #tpu.memory_space<vmem>>, vector<8x128xf32>
    tpu.vector_store %arg12[%c16_33, %c0_34], %97 {strides = array<i32>} : memref<64x128xf32, #tpu.memory_space<vmem>>, vector<8x128xf32>,
    %c24 = arith.constant 24 : index
    %c0_35 = arith.constant 0 : index
    %99 = vector.load %arg11[%c24, %c0_35] : memref<64x512xf32, #tpu.memory_space<vmem>>, vector<8x512xf32>
    %cst_36 = arith.constant dense<0.000000e+00> : vector<8x512xf32>
    %100 = tpu.matmul %97, %9, %cst_36 {dimension_numbers = #tpu.dot_dimension_numbers<[1], [0], [0], [1], [0, 0, 1, 1], [], []>} : vector<8x128xf32>, vector<128x512xf32>, vector<8x512xf32> -> vector<8x512xf32>
    %101 = arith.addf %99, %100 : vector<8x512xf32>
    %102 = vector.extract_strided_slice %101 {offsets = [0, 0], sizes = [8, 128], strides = [1, 1]} : vector<8x512xf32> to vector<8x128xf32>
    %103 = arith.negf %102 : vector<8x128xf32>
    %104 = math.exp %103 : vector<8x128xf32>
    %cst_37 = arith.constant 1.000000e+00 : f32
    %105 = vector.broadcast %cst_37 : f32 to vector<8x128xf32>
    %106 = arith.addf %105, %104 : vector<8x128xf32>
    %107 = arith.divf %105, %106 : vector<8x128xf32>
    %108 = vector.extract_strided_slice %101 {offsets = [0, 128], sizes = [8, 128], strides = [1, 1]} : vector<8x512xf32> to vector<8x128xf32>
    %109 = arith.negf %108 : vector<8x128xf32>
    %110 = math.exp %109 : vector<8x128xf32>
    %cst_38 = arith.constant 1.000000e+00 : f32
    %111 = vector.broadcast %cst_38 : f32 to vector<8x128xf32>
    %112 = arith.addf %111, %110 : vector<8x128xf32>
    %113 = arith.divf %111, %112 : vector<8x128xf32>
    %114 = vector.extract_strided_slice %101 {offsets = [0, 256], sizes = [8, 128], strides = [1, 1]} : vector<8x512xf32> to vector<8x128xf32>
    %115 = math.tanh %114 : vector<8x128xf32>
    %116 = vector.extract_strided_slice %101 {offsets = [0, 384], sizes = [8, 128], strides = [1, 1]} : vector<8x512xf32> to vector<8x128xf32>
    %117 = arith.negf %116 : vector<8x128xf32>
    %118 = math.exp %117 : vector<8x128xf32>
    %cst_39 = arith.constant 1.000000e+00 : f32
    %119 = vector.broadcast %cst_39 : f32 to vector<8x128xf32>
    %120 = arith.addf %119, %118 : vector<8x128xf32>
    %121 = arith.divf %119, %120 : vector<8x128xf32>
    %122 = arith.mulf %113, %95 : vector<8x128xf32>
    %123 = arith.mulf %107, %115 : vector<8x128xf32>
    %124 = arith.addf %122, %123 : vector<8x128xf32>
    %125 = math.tanh %124 : vector<8x128xf32>
    %126 = arith.mulf %121, %125 : vector<8x128xf32>
    %c24_40 = arith.constant 24 : index
    %c0_41 = arith.constant 0 : index
    %127 = vector.load %arg12[%c24_40, %c0_41] : memref<64x128xf32, #tpu.memory_space<vmem>>, vector<8x128xf32>
    tpu.vector_store %arg12[%c24_40, %c0_41], %126 {strides = array<i32>} : memref<64x128xf32, #tpu.memory_space<vmem>>, vector<8x128xf32>,
    %c32 = arith.constant 32 : index
    %c0_42 = arith.constant 0 : index
    %128 = vector.load %arg11[%c32, %c0_42] : memref<64x512xf32, #tpu.memory_space<vmem>>, vector<8x512xf32>
    %cst_43 = arith.constant dense<0.000000e+00> : vector<8x512xf32>
    %129 = tpu.matmul %126, %9, %cst_43 {dimension_numbers = #tpu.dot_dimension_numbers<[1], [0], [0], [1], [0, 0, 1, 1], [], []>} : vector<8x128xf32>, vector<128x512xf32>, vector<8x512xf32> -> vector<8x512xf32>
    %130 = arith.addf %128, %129 : vector<8x512xf32>
    %131 = vector.extract_strided_slice %130 {offsets = [0, 0], sizes = [8, 128], strides = [1, 1]} : vector<8x512xf32> to vector<8x128xf32>
    %132 = arith.negf %131 : vector<8x128xf32>
    %133 = math.exp %132 : vector<8x128xf32>
    %cst_44 = arith.constant 1.000000e+00 : f32
    %134 = vector.broadcast %cst_44 : f32 to vector<8x128xf32>
    %135 = arith.addf %134, %133 : vector<8x128xf32>
    %136 = arith.divf %134, %135 : vector<8x128xf32>
    %137 = vector.extract_strided_slice %130 {offsets = [0, 128], sizes = [8, 128], strides = [1, 1]} : vector<8x512xf32> to vector<8x128xf32>
    %138 = arith.negf %137 : vector<8x128xf32>
    %139 = math.exp %138 : vector<8x128xf32>
    %cst_45 = arith.constant 1.000000e+00 : f32
    %140 = vector.broadcast %cst_45 : f32 to vector<8x128xf32>
    %141 = arith.addf %140, %139 : vector<8x128xf32>
    %142 = arith.divf %140, %141 : vector<8x128xf32>
    %143 = vector.extract_strided_slice %130 {offsets = [0, 256], sizes = [8, 128], strides = [1, 1]} : vector<8x512xf32> to vector<8x128xf32>
    %144 = math.tanh %143 : vector<8x128xf32>
    %145 = vector.extract_strided_slice %130 {offsets = [0, 384], sizes = [8, 128], strides = [1, 1]} : vector<8x512xf32> to vector<8x128xf32>
    %146 = arith.negf %145 : vector<8x128xf32>
    %147 = math.exp %146 : vector<8x128xf32>
    %cst_46 = arith.constant 1.000000e+00 : f32
    %148 = vector.broadcast %cst_46 : f32 to vector<8x128xf32>
    %149 = arith.addf %148, %147 : vector<8x128xf32>
    %150 = arith.divf %148, %149 : vector<8x128xf32>
    %151 = arith.mulf %142, %124 : vector<8x128xf32>
    %152 = arith.mulf %136, %144 : vector<8x128xf32>
    %153 = arith.addf %151, %152 : vector<8x128xf32>
    %154 = math.tanh %153 : vector<8x128xf32>
    %155 = arith.mulf %150, %154 : vector<8x128xf32>
    %c32_47 = arith.constant 32 : index
    %c0_48 = arith.constant 0 : index
    %156 = vector.load %arg12[%c32_47, %c0_48] : memref<64x128xf32, #tpu.memory_space<vmem>>, vector<8x128xf32>
    tpu.vector_store %arg12[%c32_47, %c0_48], %155 {strides = array<i32>} : memref<64x128xf32, #tpu.memory_space<vmem>>, vector<8x128xf32>,
    %c40 = arith.constant 40 : index
    %c0_49 = arith.constant 0 : index
    %157 = vector.load %arg11[%c40, %c0_49] : memref<64x512xf32, #tpu.memory_space<vmem>>, vector<8x512xf32>
    %cst_50 = arith.constant dense<0.000000e+00> : vector<8x512xf32>
    %158 = tpu.matmul %155, %9, %cst_50 {dimension_numbers = #tpu.dot_dimension_numbers<[1], [0], [0], [1], [0, 0, 1, 1], [], []>} : vector<8x128xf32>, vector<128x512xf32>, vector<8x512xf32> -> vector<8x512xf32>
    %159 = arith.addf %157, %158 : vector<8x512xf32>
    %160 = vector.extract_strided_slice %159 {offsets = [0, 0], sizes = [8, 128], strides = [1, 1]} : vector<8x512xf32> to vector<8x128xf32>
    %161 = arith.negf %160 : vector<8x128xf32>
    %162 = math.exp %161 : vector<8x128xf32>
    %cst_51 = arith.constant 1.000000e+00 : f32
    %163 = vector.broadcast %cst_51 : f32 to vector<8x128xf32>
    %164 = arith.addf %163, %162 : vector<8x128xf32>
    %165 = arith.divf %163, %164 : vector<8x128xf32>
    %166 = vector.extract_strided_slice %159 {offsets = [0, 128], sizes = [8, 128], strides = [1, 1]} : vector<8x512xf32> to vector<8x128xf32>
    %167 = arith.negf %166 : vector<8x128xf32>
    %168 = math.exp %167 : vector<8x128xf32>
    %cst_52 = arith.constant 1.000000e+00 : f32
    %169 = vector.broadcast %cst_52 : f32 to vector<8x128xf32>
    %170 = arith.addf %169, %168 : vector<8x128xf32>
    %171 = arith.divf %169, %170 : vector<8x128xf32>
    %172 = vector.extract_strided_slice %159 {offsets = [0, 256], sizes = [8, 128], strides = [1, 1]} : vector<8x512xf32> to vector<8x128xf32>
    %173 = math.tanh %172 : vector<8x128xf32>
    %174 = vector.extract_strided_slice %159 {offsets = [0, 384], sizes = [8, 128], strides = [1, 1]} : vector<8x512xf32> to vector<8x128xf32>
    %175 = arith.negf %174 : vector<8x128xf32>
    %176 = math.exp %175 : vector<8x128xf32>
    %cst_53 = arith.constant 1.000000e+00 : f32
    %177 = vector.broadcast %cst_53 : f32 to vector<8x128xf32>
    %178 = arith.addf %177, %176 : vector<8x128xf32>
    %179 = arith.divf %177, %178 : vector<8x128xf32>
    %180 = arith.mulf %171, %153 : vector<8x128xf32>
    %181 = arith.mulf %165, %173 : vector<8x128xf32>
    %182 = arith.addf %180, %181 : vector<8x128xf32>
    %183 = math.tanh %182 : vector<8x128xf32>
    %184 = arith.mulf %179, %183 : vector<8x128xf32>
    %c40_54 = arith.constant 40 : index
    %c0_55 = arith.constant 0 : index
    %185 = vector.load %arg12[%c40_54, %c0_55] : memref<64x128xf32, #tpu.memory_space<vmem>>, vector<8x128xf32>
    tpu.vector_store %arg12[%c40_54, %c0_55], %184 {strides = array<i32>} : memref<64x128xf32, #tpu.memory_space<vmem>>, vector<8x128xf32>,
    %c48 = arith.constant 48 : index
    %c0_56 = arith.constant 0 : index
    %186 = vector.load %arg11[%c48, %c0_56] : memref<64x512xf32, #tpu.memory_space<vmem>>, vector<8x512xf32>
    %cst_57 = arith.constant dense<0.000000e+00> : vector<8x512xf32>
    %187 = tpu.matmul %184, %9, %cst_57 {dimension_numbers = #tpu.dot_dimension_numbers<[1], [0], [0], [1], [0, 0, 1, 1], [], []>} : vector<8x128xf32>, vector<128x512xf32>, vector<8x512xf32> -> vector<8x512xf32>
    %188 = arith.addf %186, %187 : vector<8x512xf32>
    %189 = vector.extract_strided_slice %188 {offsets = [0, 0], sizes = [8, 128], strides = [1, 1]} : vector<8x512xf32> to vector<8x128xf32>
    %190 = arith.negf %189 : vector<8x128xf32>
    %191 = math.exp %190 : vector<8x128xf32>
    %cst_58 = arith.constant 1.000000e+00 : f32
    %192 = vector.broadcast %cst_58 : f32 to vector<8x128xf32>
    %193 = arith.addf %192, %191 : vector<8x128xf32>
    %194 = arith.divf %192, %193 : vector<8x128xf32>
    %195 = vector.extract_strided_slice %188 {offsets = [0, 128], sizes = [8, 128], strides = [1, 1]} : vector<8x512xf32> to vector<8x128xf32>
    %196 = arith.negf %195 : vector<8x128xf32>
    %197 = math.exp %196 : vector<8x128xf32>
    %cst_59 = arith.constant 1.000000e+00 : f32
    %198 = vector.broadcast %cst_59 : f32 to vector<8x128xf32>
    %199 = arith.addf %198, %197 : vector<8x128xf32>
    %200 = arith.divf %198, %199 : vector<8x128xf32>
    %201 = vector.extract_strided_slice %188 {offsets = [0, 256], sizes = [8, 128], strides = [1, 1]} : vector<8x512xf32> to vector<8x128xf32>
    %202 = math.tanh %201 : vector<8x128xf32>
    %203 = vector.extract_strided_slice %188 {offsets = [0, 384], sizes = [8, 128], strides = [1, 1]} : vector<8x512xf32> to vector<8x128xf32>
    %204 = arith.negf %203 : vector<8x128xf32>
    %205 = math.exp %204 : vector<8x128xf32>
    %cst_60 = arith.constant 1.000000e+00 : f32
    %206 = vector.broadcast %cst_60 : f32 to vector<8x128xf32>
    %207 = arith.addf %206, %205 : vector<8x128xf32>
    %208 = arith.divf %206, %207 : vector<8x128xf32>
    %209 = arith.mulf %200, %182 : vector<8x128xf32>
    %210 = arith.mulf %194, %202 : vector<8x128xf32>
    %211 = arith.addf %209, %210 : vector<8x128xf32>
    %212 = math.tanh %211 : vector<8x128xf32>
    %213 = arith.mulf %208, %212 : vector<8x128xf32>
    %c48_61 = arith.constant 48 : index
    %c0_62 = arith.constant 0 : index
    %214 = vector.load %arg12[%c48_61, %c0_62] : memref<64x128xf32, #tpu.memory_space<vmem>>, vector<8x128xf32>
    tpu.vector_store %arg12[%c48_61, %c0_62], %213 {strides = array<i32>} : memref<64x128xf32, #tpu.memory_space<vmem>>, vector<8x128xf32>,
    %c56 = arith.constant 56 : index
    %c0_63 = arith.constant 0 : index
    %215 = vector.load %arg11[%c56, %c0_63] : memref<64x512xf32, #tpu.memory_space<vmem>>, vector<8x512xf32>
    %cst_64 = arith.constant dense<0.000000e+00> : vector<8x512xf32>
    %216 = tpu.matmul %213, %9, %cst_64 {dimension_numbers = #tpu.dot_dimension_numbers<[1], [0], [0], [1], [0, 0, 1, 1], [], []>} : vector<8x128xf32>, vector<128x512xf32>, vector<8x512xf32> -> vector<8x512xf32>
    %217 = arith.addf %215, %216 : vector<8x512xf32>
    %218 = vector.extract_strided_slice %217 {offsets = [0, 0], sizes = [8, 128], strides = [1, 1]} : vector<8x512xf32> to vector<8x128xf32>
    %219 = arith.negf %218 : vector<8x128xf32>
    %220 = math.exp %219 : vector<8x128xf32>
    %cst_65 = arith.constant 1.000000e+00 : f32
    %221 = vector.broadcast %cst_65 : f32 to vector<8x128xf32>
    %222 = arith.addf %221, %220 : vector<8x128xf32>
    %223 = arith.divf %221, %222 : vector<8x128xf32>
    %224 = vector.extract_strided_slice %217 {offsets = [0, 128], sizes = [8, 128], strides = [1, 1]} : vector<8x512xf32> to vector<8x128xf32>
    %225 = arith.negf %224 : vector<8x128xf32>
    %226 = math.exp %225 : vector<8x128xf32>
    %cst_66 = arith.constant 1.000000e+00 : f32
    %227 = vector.broadcast %cst_66 : f32 to vector<8x128xf32>
    %228 = arith.addf %227, %226 : vector<8x128xf32>
    %229 = arith.divf %227, %228 : vector<8x128xf32>
    %230 = vector.extract_strided_slice %217 {offsets = [0, 256], sizes = [8, 128], strides = [1, 1]} : vector<8x512xf32> to vector<8x128xf32>
    %231 = math.tanh %230 : vector<8x128xf32>
    %232 = vector.extract_strided_slice %217 {offsets = [0, 384], sizes = [8, 128], strides = [1, 1]} : vector<8x512xf32> to vector<8x128xf32>
    %233 = arith.negf %232 : vector<8x128xf32>
    %234 = math.exp %233 : vector<8x128xf32>
    %cst_67 = arith.constant 1.000000e+00 : f32
    %235 = vector.broadcast %cst_67 : f32 to vector<8x128xf32>
    %236 = arith.addf %235, %234 : vector<8x128xf32>
    %237 = arith.divf %235, %236 : vector<8x128xf32>
    %238 = arith.mulf %229, %211 : vector<8x128xf32>
    %239 = arith.mulf %223, %231 : vector<8x128xf32>
    %240 = arith.addf %238, %239 : vector<8x128xf32>
    %241 = math.tanh %240 : vector<8x128xf32>
    %242 = arith.mulf %237, %241 : vector<8x128xf32>
    %c56_68 = arith.constant 56 : index
    %c0_69 = arith.constant 0 : index
    %243 = vector.load %arg12[%c56_68, %c0_69] : memref<64x128xf32, #tpu.memory_space<vmem>>, vector<8x128xf32>
    tpu.vector_store %arg12[%c56_68, %c0_69], %242 {strides = array<i32>} : memref<64x128xf32, #tpu.memory_space<vmem>>, vector<8x128xf32>,
    %c0_70 = arith.constant 0 : index
    %c0_71 = arith.constant 0 : index
    %244 = vector.load %arg13[%c0_70, %c0_71] : memref<8x512xf32, #tpu.memory_space<vmem>>, vector<8x128xf32>
    tpu.vector_store %arg13[%c0_70, %c0_71], %242 {strides = array<i32>} : memref<8x512xf32, #tpu.memory_space<vmem>>, vector<8x128xf32>,
    %c0_72 = arith.constant 0 : index
    %c0_73 = arith.constant 0 : index
    %245 = vector.load %arg12[%c0_72, %c0_73] : memref<64x128xf32, #tpu.memory_space<vmem>>, vector<64x128xf32>
    %c0_74 = arith.constant 0 : index
    %c0_75 = arith.constant 0 : index
    %c0_76 = arith.constant 0 : index
    %246 = vector.load %arg3[%c0_74, %c0_75, %c0_76] : memref<3x128x512xf32, #tpu.memory_space<vmem>>, vector<1x128x512xf32>
    %247 = vector.shape_cast %246 : vector<1x128x512xf32> to vector<128x512xf32>
    %cst_77 = arith.constant dense<0.000000e+00> : vector<64x512xf32>
    %248 = tpu.matmul %245, %247, %cst_77 {dimension_numbers = #tpu.dot_dimension_numbers<[1], [0], [0], [1], [0, 0, 1, 1], [], []>} : vector<64x128xf32>, vector<128x512xf32>, vector<64x512xf32> -> vector<64x512xf32>
    %c1 = arith.constant 1 : index
    %c0_78 = arith.constant 0 : index
    %c0_79 = arith.constant 0 : index
    %249 = vector.load %arg5[%c1, %c0_78, %c0_79] : memref<4x1x512xf32, #tpu.memory_space<vmem>>, vector<1x1x512xf32>
    %250 = vector.shape_cast %249 : vector<1x1x512xf32> to vector<1x512xf32>
    %251 = vector.broadcast %250 : vector<1x512xf32> to vector<64x512xf32>
    %252 = arith.addf %248, %251 : vector<64x512xf32>
    %c0_80 = arith.constant 0 : index
    %c0_81 = arith.constant 0 : index
    %253 = vector.load %arg11[%c0_80, %c0_81] : memref<64x512xf32, #tpu.memory_space<vmem>>, vector<64x512xf32>
    tpu.vector_store %arg11[%c0_80, %c0_81], %252 {strides = array<i32>} : memref<64x512xf32, #tpu.memory_space<vmem>>, vector<64x512xf32>,
    %c1_82 = arith.constant 1 : index
    %c0_83 = arith.constant 0 : index
    %c0_84 = arith.constant 0 : index
    %254 = vector.load %arg4[%c1_82, %c0_83, %c0_84] : memref<4x128x512xf32, #tpu.memory_space<vmem>>, vector<1x128x512xf32>
    %255 = vector.shape_cast %254 : vector<1x128x512xf32> to vector<128x512xf32>
    %cst_85 = arith.constant 0.000000e+00 : f32
    %256 = vector.broadcast %cst_85 : f32 to vector<8x128xf32>
    %cst_86 = arith.constant 0.000000e+00 : f32
    %257 = vector.broadcast %cst_86 : f32 to vector<8x128xf32>
    %c0_87 = arith.constant 0 : index
    %c0_88 = arith.constant 0 : index
    %258 = vector.load %arg11[%c0_87, %c0_88] : memref<64x512xf32, #tpu.memory_space<vmem>>, vector<8x512xf32>
    %cst_89 = arith.constant dense<0.000000e+00> : vector<8x512xf32>
    %259 = tpu.matmul %256, %255, %cst_89 {dimension_numbers = #tpu.dot_dimension_numbers<[1], [0], [0], [1], [0, 0, 1, 1], [], []>} : vector<8x128xf32>, vector<128x512xf32>, vector<8x512xf32> -> vector<8x512xf32>
    %260 = arith.addf %258, %259 : vector<8x512xf32>
    %261 = vector.extract_strided_slice %260 {offsets = [0, 0], sizes = [8, 128], strides = [1, 1]} : vector<8x512xf32> to vector<8x128xf32>
    %262 = arith.negf %261 : vector<8x128xf32>
    %263 = math.exp %262 : vector<8x128xf32>
    %cst_90 = arith.constant 1.000000e+00 : f32
    %264 = vector.broadcast %cst_90 : f32 to vector<8x128xf32>
    %265 = arith.addf %264, %263 : vector<8x128xf32>
    %266 = arith.divf %264, %265 : vector<8x128xf32>
    %267 = vector.extract_strided_slice %260 {offsets = [0, 128], sizes = [8, 128], strides = [1, 1]} : vector<8x512xf32> to vector<8x128xf32>
    %268 = arith.negf %267 : vector<8x128xf32>
    %269 = math.exp %268 : vector<8x128xf32>
    %cst_91 = arith.constant 1.000000e+00 : f32
    %270 = vector.broadcast %cst_91 : f32 to vector<8x128xf32>
    %271 = arith.addf %270, %269 : vector<8x128xf32>
    %272 = arith.divf %270, %271 : vector<8x128xf32>
    %273 = vector.extract_strided_slice %260 {offsets = [0, 256], sizes = [8, 128], strides = [1, 1]} : vector<8x512xf32> to vector<8x128xf32>
    %274 = math.tanh %273 : vector<8x128xf32>
    %275 = vector.extract_strided_slice %260 {offsets = [0, 384], sizes = [8, 128], strides = [1, 1]} : vector<8x512xf32> to vector<8x128xf32>
    %276 = arith.negf %275 : vector<8x128xf32>
    %277 = math.exp %276 : vector<8x128xf32>
    %cst_92 = arith.constant 1.000000e+00 : f32
    %278 = vector.broadcast %cst_92 : f32 to vector<8x128xf32>
    %279 = arith.addf %278, %277 : vector<8x128xf32>
    %280 = arith.divf %278, %279 : vector<8x128xf32>
    %281 = arith.mulf %272, %257 : vector<8x128xf32>
    %282 = arith.mulf %266, %274 : vector<8x128xf32>
    %283 = arith.addf %281, %282 : vector<8x128xf32>
    %284 = math.tanh %283 : vector<8x128xf32>
    %285 = arith.mulf %280, %284 : vector<8x128xf32>
    %c0_93 = arith.constant 0 : index
    %c0_94 = arith.constant 0 : index
    %286 = vector.load %arg12[%c0_93, %c0_94] : memref<64x128xf32, #tpu.memory_space<vmem>>, vector<8x128xf32>
    tpu.vector_store %arg12[%c0_93, %c0_94], %285 {strides = array<i32>} : memref<64x128xf32, #tpu.memory_space<vmem>>, vector<8x128xf32>,
    %c8_95 = arith.constant 8 : index
    %c0_96 = arith.constant 0 : index
    %287 = vector.load %arg11[%c8_95, %c0_96] : memref<64x512xf32, #tpu.memory_space<vmem>>, vector<8x512xf32>
    %cst_97 = arith.constant dense<0.000000e+00> : vector<8x512xf32>
    %288 = tpu.matmul %285, %255, %cst_97 {dimension_numbers = #tpu.dot_dimension_numbers<[1], [0], [0], [1], [0, 0, 1, 1], [], []>} : vector<8x128xf32>, vector<128x512xf32>, vector<8x512xf32> -> vector<8x512xf32>
    %289 = arith.addf %287, %288 : vector<8x512xf32>
    %290 = vector.extract_strided_slice %289 {offsets = [0, 0], sizes = [8, 128], strides = [1, 1]} : vector<8x512xf32> to vector<8x128xf32>
    %291 = arith.negf %290 : vector<8x128xf32>
    %292 = math.exp %291 : vector<8x128xf32>
    %cst_98 = arith.constant 1.000000e+00 : f32
    %293 = vector.broadcast %cst_98 : f32 to vector<8x128xf32>
    %294 = arith.addf %293, %292 : vector<8x128xf32>
    %295 = arith.divf %293, %294 : vector<8x128xf32>
    %296 = vector.extract_strided_slice %289 {offsets = [0, 128], sizes = [8, 128], strides = [1, 1]} : vector<8x512xf32> to vector<8x128xf32>
    %297 = arith.negf %296 : vector<8x128xf32>
    %298 = math.exp %297 : vector<8x128xf32>
    %cst_99 = arith.constant 1.000000e+00 : f32
    %299 = vector.broadcast %cst_99 : f32 to vector<8x128xf32>
    %300 = arith.addf %299, %298 : vector<8x128xf32>
    %301 = arith.divf %299, %300 : vector<8x128xf32>
    %302 = vector.extract_strided_slice %289 {offsets = [0, 256], sizes = [8, 128], strides = [1, 1]} : vector<8x512xf32> to vector<8x128xf32>
    %303 = math.tanh %302 : vector<8x128xf32>
    %304 = vector.extract_strided_slice %289 {offsets = [0, 384], sizes = [8, 128], strides = [1, 1]} : vector<8x512xf32> to vector<8x128xf32>
    %305 = arith.negf %304 : vector<8x128xf32>
    %306 = math.exp %305 : vector<8x128xf32>
    %cst_100 = arith.constant 1.000000e+00 : f32
    %307 = vector.broadcast %cst_100 : f32 to vector<8x128xf32>
    %308 = arith.addf %307, %306 : vector<8x128xf32>
    %309 = arith.divf %307, %308 : vector<8x128xf32>
    %310 = arith.mulf %301, %283 : vector<8x128xf32>
    %311 = arith.mulf %295, %303 : vector<8x128xf32>
    %312 = arith.addf %310, %311 : vector<8x128xf32>
    %313 = math.tanh %312 : vector<8x128xf32>
    %314 = arith.mulf %309, %313 : vector<8x128xf32>
    %c8_101 = arith.constant 8 : index
    %c0_102 = arith.constant 0 : index
    %315 = vector.load %arg12[%c8_101, %c0_102] : memref<64x128xf32, #tpu.memory_space<vmem>>, vector<8x128xf32>
    tpu.vector_store %arg12[%c8_101, %c0_102], %314 {strides = array<i32>} : memref<64x128xf32, #tpu.memory_space<vmem>>, vector<8x128xf32>,
    %c16_103 = arith.constant 16 : index
    %c0_104 = arith.constant 0 : index
    %316 = vector.load %arg11[%c16_103, %c0_104] : memref<64x512xf32, #tpu.memory_space<vmem>>, vector<8x512xf32>
    %cst_105 = arith.constant dense<0.000000e+00> : vector<8x512xf32>
    %317 = tpu.matmul %314, %255, %cst_105 {dimension_numbers = #tpu.dot_dimension_numbers<[1], [0], [0], [1], [0, 0, 1, 1], [], []>} : vector<8x128xf32>, vector<128x512xf32>, vector<8x512xf32> -> vector<8x512xf32>
    %318 = arith.addf %316, %317 : vector<8x512xf32>
    %319 = vector.extract_strided_slice %318 {offsets = [0, 0], sizes = [8, 128], strides = [1, 1]} : vector<8x512xf32> to vector<8x128xf32>
    %320 = arith.negf %319 : vector<8x128xf32>
    %321 = math.exp %320 : vector<8x128xf32>
    %cst_106 = arith.constant 1.000000e+00 : f32
    %322 = vector.broadcast %cst_106 : f32 to vector<8x128xf32>
    %323 = arith.addf %322, %321 : vector<8x128xf32>
    %324 = arith.divf %322, %323 : vector<8x128xf32>
    %325 = vector.extract_strided_slice %318 {offsets = [0, 128], sizes = [8, 128], strides = [1, 1]} : vector<8x512xf32> to vector<8x128xf32>
    %326 = arith.negf %325 : vector<8x128xf32>
    %327 = math.exp %326 : vector<8x128xf32>
    %cst_107 = arith.constant 1.000000e+00 : f32
    %328 = vector.broadcast %cst_107 : f32 to vector<8x128xf32>
    %329 = arith.addf %328, %327 : vector<8x128xf32>
    %330 = arith.divf %328, %329 : vector<8x128xf32>
    %331 = vector.extract_strided_slice %318 {offsets = [0, 256], sizes = [8, 128], strides = [1, 1]} : vector<8x512xf32> to vector<8x128xf32>
    %332 = math.tanh %331 : vector<8x128xf32>
    %333 = vector.extract_strided_slice %318 {offsets = [0, 384], sizes = [8, 128], strides = [1, 1]} : vector<8x512xf32> to vector<8x128xf32>
    %334 = arith.negf %333 : vector<8x128xf32>
    %335 = math.exp %334 : vector<8x128xf32>
    %cst_108 = arith.constant 1.000000e+00 : f32
    %336 = vector.broadcast %cst_108 : f32 to vector<8x128xf32>
    %337 = arith.addf %336, %335 : vector<8x128xf32>
    %338 = arith.divf %336, %337 : vector<8x128xf32>
    %339 = arith.mulf %330, %312 : vector<8x128xf32>
    %340 = arith.mulf %324, %332 : vector<8x128xf32>
    %341 = arith.addf %339, %340 : vector<8x128xf32>
    %342 = math.tanh %341 : vector<8x128xf32>
    %343 = arith.mulf %338, %342 : vector<8x128xf32>
    %c16_109 = arith.constant 16 : index
    %c0_110 = arith.constant 0 : index
    %344 = vector.load %arg12[%c16_109, %c0_110] : memref<64x128xf32, #tpu.memory_space<vmem>>, vector<8x128xf32>
    tpu.vector_store %arg12[%c16_109, %c0_110], %343 {strides = array<i32>} : memref<64x128xf32, #tpu.memory_space<vmem>>, vector<8x128xf32>,
    %c24_111 = arith.constant 24 : index
    %c0_112 = arith.constant 0 : index
    %345 = vector.load %arg11[%c24_111, %c0_112] : memref<64x512xf32, #tpu.memory_space<vmem>>, vector<8x512xf32>
    %cst_113 = arith.constant dense<0.000000e+00> : vector<8x512xf32>
    %346 = tpu.matmul %343, %255, %cst_113 {dimension_numbers = #tpu.dot_dimension_numbers<[1], [0], [0], [1], [0, 0, 1, 1], [], []>} : vector<8x128xf32>, vector<128x512xf32>, vector<8x512xf32> -> vector<8x512xf32>
    %347 = arith.addf %345, %346 : vector<8x512xf32>
    %348 = vector.extract_strided_slice %347 {offsets = [0, 0], sizes = [8, 128], strides = [1, 1]} : vector<8x512xf32> to vector<8x128xf32>
    %349 = arith.negf %348 : vector<8x128xf32>
    %350 = math.exp %349 : vector<8x128xf32>
    %cst_114 = arith.constant 1.000000e+00 : f32
    %351 = vector.broadcast %cst_114 : f32 to vector<8x128xf32>
    %352 = arith.addf %351, %350 : vector<8x128xf32>
    %353 = arith.divf %351, %352 : vector<8x128xf32>
    %354 = vector.extract_strided_slice %347 {offsets = [0, 128], sizes = [8, 128], strides = [1, 1]} : vector<8x512xf32> to vector<8x128xf32>
    %355 = arith.negf %354 : vector<8x128xf32>
    %356 = math.exp %355 : vector<8x128xf32>
    %cst_115 = arith.constant 1.000000e+00 : f32
    %357 = vector.broadcast %cst_115 : f32 to vector<8x128xf32>
    %358 = arith.addf %357, %356 : vector<8x128xf32>
    %359 = arith.divf %357, %358 : vector<8x128xf32>
    %360 = vector.extract_strided_slice %347 {offsets = [0, 256], sizes = [8, 128], strides = [1, 1]} : vector<8x512xf32> to vector<8x128xf32>
    %361 = math.tanh %360 : vector<8x128xf32>
    %362 = vector.extract_strided_slice %347 {offsets = [0, 384], sizes = [8, 128], strides = [1, 1]} : vector<8x512xf32> to vector<8x128xf32>
    %363 = arith.negf %362 : vector<8x128xf32>
    %364 = math.exp %363 : vector<8x128xf32>
    %cst_116 = arith.constant 1.000000e+00 : f32
    %365 = vector.broadcast %cst_116 : f32 to vector<8x128xf32>
    %366 = arith.addf %365, %364 : vector<8x128xf32>
    %367 = arith.divf %365, %366 : vector<8x128xf32>
    %368 = arith.mulf %359, %341 : vector<8x128xf32>
    %369 = arith.mulf %353, %361 : vector<8x128xf32>
    %370 = arith.addf %368, %369 : vector<8x128xf32>
    %371 = math.tanh %370 : vector<8x128xf32>
    %372 = arith.mulf %367, %371 : vector<8x128xf32>
    %c24_117 = arith.constant 24 : index
    %c0_118 = arith.constant 0 : index
    %373 = vector.load %arg12[%c24_117, %c0_118] : memref<64x128xf32, #tpu.memory_space<vmem>>, vector<8x128xf32>
    tpu.vector_store %arg12[%c24_117, %c0_118], %372 {strides = array<i32>} : memref<64x128xf32, #tpu.memory_space<vmem>>, vector<8x128xf32>,
    %c32_119 = arith.constant 32 : index
    %c0_120 = arith.constant 0 : index
    %374 = vector.load %arg11[%c32_119, %c0_120] : memref<64x512xf32, #tpu.memory_space<vmem>>, vector<8x512xf32>
    %cst_121 = arith.constant dense<0.000000e+00> : vector<8x512xf32>
    %375 = tpu.matmul %372, %255, %cst_121 {dimension_numbers = #tpu.dot_dimension_numbers<[1], [0], [0], [1], [0, 0, 1, 1], [], []>} : vector<8x128xf32>, vector<128x512xf32>, vector<8x512xf32> -> vector<8x512xf32>
    %376 = arith.addf %374, %375 : vector<8x512xf32>
    %377 = vector.extract_strided_slice %376 {offsets = [0, 0], sizes = [8, 128], strides = [1, 1]} : vector<8x512xf32> to vector<8x128xf32>
    %378 = arith.negf %377 : vector<8x128xf32>
    %379 = math.exp %378 : vector<8x128xf32>
    %cst_122 = arith.constant 1.000000e+00 : f32
    %380 = vector.broadcast %cst_122 : f32 to vector<8x128xf32>
    %381 = arith.addf %380, %379 : vector<8x128xf32>
    %382 = arith.divf %380, %381 : vector<8x128xf32>
    %383 = vector.extract_strided_slice %376 {offsets = [0, 128], sizes = [8, 128], strides = [1, 1]} : vector<8x512xf32> to vector<8x128xf32>
    %384 = arith.negf %383 : vector<8x128xf32>
    %385 = math.exp %384 : vector<8x128xf32>
    %cst_123 = arith.constant 1.000000e+00 : f32
    %386 = vector.broadcast %cst_123 : f32 to vector<8x128xf32>
    %387 = arith.addf %386, %385 : vector<8x128xf32>
    %388 = arith.divf %386, %387 : vector<8x128xf32>
    %389 = vector.extract_strided_slice %376 {offsets = [0, 256], sizes = [8, 128], strides = [1, 1]} : vector<8x512xf32> to vector<8x128xf32>
    %390 = math.tanh %389 : vector<8x128xf32>
    %391 = vector.extract_strided_slice %376 {offsets = [0, 384], sizes = [8, 128], strides = [1, 1]} : vector<8x512xf32> to vector<8x128xf32>
    %392 = arith.negf %391 : vector<8x128xf32>
    %393 = math.exp %392 : vector<8x128xf32>
    %cst_124 = arith.constant 1.000000e+00 : f32
    %394 = vector.broadcast %cst_124 : f32 to vector<8x128xf32>
    %395 = arith.addf %394, %393 : vector<8x128xf32>
    %396 = arith.divf %394, %395 : vector<8x128xf32>
    %397 = arith.mulf %388, %370 : vector<8x128xf32>
    %398 = arith.mulf %382, %390 : vector<8x128xf32>
    %399 = arith.addf %397, %398 : vector<8x128xf32>
    %400 = math.tanh %399 : vector<8x128xf32>
    %401 = arith.mulf %396, %400 : vector<8x128xf32>
    %c32_125 = arith.constant 32 : index
    %c0_126 = arith.constant 0 : index
    %402 = vector.load %arg12[%c32_125, %c0_126] : memref<64x128xf32, #tpu.memory_space<vmem>>, vector<8x128xf32>
    tpu.vector_store %arg12[%c32_125, %c0_126], %401 {strides = array<i32>} : memref<64x128xf32, #tpu.memory_space<vmem>>, vector<8x128xf32>,
    %c40_127 = arith.constant 40 : index
    %c0_128 = arith.constant 0 : index
    %403 = vector.load %arg11[%c40_127, %c0_128] : memref<64x512xf32, #tpu.memory_space<vmem>>, vector<8x512xf32>
    %cst_129 = arith.constant dense<0.000000e+00> : vector<8x512xf32>
    %404 = tpu.matmul %401, %255, %cst_129 {dimension_numbers = #tpu.dot_dimension_numbers<[1], [0], [0], [1], [0, 0, 1, 1], [], []>} : vector<8x128xf32>, vector<128x512xf32>, vector<8x512xf32> -> vector<8x512xf32>
    %405 = arith.addf %403, %404 : vector<8x512xf32>
    %406 = vector.extract_strided_slice %405 {offsets = [0, 0], sizes = [8, 128], strides = [1, 1]} : vector<8x512xf32> to vector<8x128xf32>
    %407 = arith.negf %406 : vector<8x128xf32>
    %408 = math.exp %407 : vector<8x128xf32>
    %cst_130 = arith.constant 1.000000e+00 : f32
    %409 = vector.broadcast %cst_130 : f32 to vector<8x128xf32>
    %410 = arith.addf %409, %408 : vector<8x128xf32>
    %411 = arith.divf %409, %410 : vector<8x128xf32>
    %412 = vector.extract_strided_slice %405 {offsets = [0, 128], sizes = [8, 128], strides = [1, 1]} : vector<8x512xf32> to vector<8x128xf32>
    %413 = arith.negf %412 : vector<8x128xf32>
    %414 = math.exp %413 : vector<8x128xf32>
    %cst_131 = arith.constant 1.000000e+00 : f32
    %415 = vector.broadcast %cst_131 : f32 to vector<8x128xf32>
    %416 = arith.addf %415, %414 : vector<8x128xf32>
    %417 = arith.divf %415, %416 : vector<8x128xf32>
    %418 = vector.extract_strided_slice %405 {offsets = [0, 256], sizes = [8, 128], strides = [1, 1]} : vector<8x512xf32> to vector<8x128xf32>
    %419 = math.tanh %418 : vector<8x128xf32>
    %420 = vector.extract_strided_slice %405 {offsets = [0, 384], sizes = [8, 128], strides = [1, 1]} : vector<8x512xf32> to vector<8x128xf32>
    %421 = arith.negf %420 : vector<8x128xf32>
    %422 = math.exp %421 : vector<8x128xf32>
    %cst_132 = arith.constant 1.000000e+00 : f32
    %423 = vector.broadcast %cst_132 : f32 to vector<8x128xf32>
    %424 = arith.addf %423, %422 : vector<8x128xf32>
    %425 = arith.divf %423, %424 : vector<8x128xf32>
    %426 = arith.mulf %417, %399 : vector<8x128xf32>
    %427 = arith.mulf %411, %419 : vector<8x128xf32>
    %428 = arith.addf %426, %427 : vector<8x128xf32>
    %429 = math.tanh %428 : vector<8x128xf32>
    %430 = arith.mulf %425, %429 : vector<8x128xf32>
    %c40_133 = arith.constant 40 : index
    %c0_134 = arith.constant 0 : index
    %431 = vector.load %arg12[%c40_133, %c0_134] : memref<64x128xf32, #tpu.memory_space<vmem>>, vector<8x128xf32>
    tpu.vector_store %arg12[%c40_133, %c0_134], %430 {strides = array<i32>} : memref<64x128xf32, #tpu.memory_space<vmem>>, vector<8x128xf32>,
    %c48_135 = arith.constant 48 : index
    %c0_136 = arith.constant 0 : index
    %432 = vector.load %arg11[%c48_135, %c0_136] : memref<64x512xf32, #tpu.memory_space<vmem>>, vector<8x512xf32>
    %cst_137 = arith.constant dense<0.000000e+00> : vector<8x512xf32>
    %433 = tpu.matmul %430, %255, %cst_137 {dimension_numbers = #tpu.dot_dimension_numbers<[1], [0], [0], [1], [0, 0, 1, 1], [], []>} : vector<8x128xf32>, vector<128x512xf32>, vector<8x512xf32> -> vector<8x512xf32>
    %434 = arith.addf %432, %433 : vector<8x512xf32>
    %435 = vector.extract_strided_slice %434 {offsets = [0, 0], sizes = [8, 128], strides = [1, 1]} : vector<8x512xf32> to vector<8x128xf32>
    %436 = arith.negf %435 : vector<8x128xf32>
    %437 = math.exp %436 : vector<8x128xf32>
    %cst_138 = arith.constant 1.000000e+00 : f32
    %438 = vector.broadcast %cst_138 : f32 to vector<8x128xf32>
    %439 = arith.addf %438, %437 : vector<8x128xf32>
    %440 = arith.divf %438, %439 : vector<8x128xf32>
    %441 = vector.extract_strided_slice %434 {offsets = [0, 128], sizes = [8, 128], strides = [1, 1]} : vector<8x512xf32> to vector<8x128xf32>
    %442 = arith.negf %441 : vector<8x128xf32>
    %443 = math.exp %442 : vector<8x128xf32>
    %cst_139 = arith.constant 1.000000e+00 : f32
    %444 = vector.broadcast %cst_139 : f32 to vector<8x128xf32>
    %445 = arith.addf %444, %443 : vector<8x128xf32>
    %446 = arith.divf %444, %445 : vector<8x128xf32>
    %447 = vector.extract_strided_slice %434 {offsets = [0, 256], sizes = [8, 128], strides = [1, 1]} : vector<8x512xf32> to vector<8x128xf32>
    %448 = math.tanh %447 : vector<8x128xf32>
    %449 = vector.extract_strided_slice %434 {offsets = [0, 384], sizes = [8, 128], strides = [1, 1]} : vector<8x512xf32> to vector<8x128xf32>
    %450 = arith.negf %449 : vector<8x128xf32>
    %451 = math.exp %450 : vector<8x128xf32>
    %cst_140 = arith.constant 1.000000e+00 : f32
    %452 = vector.broadcast %cst_140 : f32 to vector<8x128xf32>
    %453 = arith.addf %452, %451 : vector<8x128xf32>
    %454 = arith.divf %452, %453 : vector<8x128xf32>
    %455 = arith.mulf %446, %428 : vector<8x128xf32>
    %456 = arith.mulf %440, %448 : vector<8x128xf32>
    %457 = arith.addf %455, %456 : vector<8x128xf32>
    %458 = math.tanh %457 : vector<8x128xf32>
    %459 = arith.mulf %454, %458 : vector<8x128xf32>
    %c48_141 = arith.constant 48 : index
    %c0_142 = arith.constant 0 : index
    %460 = vector.load %arg12[%c48_141, %c0_142] : memref<64x128xf32, #tpu.memory_space<vmem>>, vector<8x128xf32>
    tpu.vector_store %arg12[%c48_141, %c0_142], %459 {strides = array<i32>} : memref<64x128xf32, #tpu.memory_space<vmem>>, vector<8x128xf32>,
    %c56_143 = arith.constant 56 : index
    %c0_144 = arith.constant 0 : index
    %461 = vector.load %arg11[%c56_143, %c0_144] : memref<64x512xf32, #tpu.memory_space<vmem>>, vector<8x512xf32>
    %cst_145 = arith.constant dense<0.000000e+00> : vector<8x512xf32>
    %462 = tpu.matmul %459, %255, %cst_145 {dimension_numbers = #tpu.dot_dimension_numbers<[1], [0], [0], [1], [0, 0, 1, 1], [], []>} : vector<8x128xf32>, vector<128x512xf32>, vector<8x512xf32> -> vector<8x512xf32>
    %463 = arith.addf %461, %462 : vector<8x512xf32>
    %464 = vector.extract_strided_slice %463 {offsets = [0, 0], sizes = [8, 128], strides = [1, 1]} : vector<8x512xf32> to vector<8x128xf32>
    %465 = arith.negf %464 : vector<8x128xf32>
    %466 = math.exp %465 : vector<8x128xf32>
    %cst_146 = arith.constant 1.000000e+00 : f32
    %467 = vector.broadcast %cst_146 : f32 to vector<8x128xf32>
    %468 = arith.addf %467, %466 : vector<8x128xf32>
    %469 = arith.divf %467, %468 : vector<8x128xf32>
    %470 = vector.extract_strided_slice %463 {offsets = [0, 128], sizes = [8, 128], strides = [1, 1]} : vector<8x512xf32> to vector<8x128xf32>
    %471 = arith.negf %470 : vector<8x128xf32>
    %472 = math.exp %471 : vector<8x128xf32>
    %cst_147 = arith.constant 1.000000e+00 : f32
    %473 = vector.broadcast %cst_147 : f32 to vector<8x128xf32>
    %474 = arith.addf %473, %472 : vector<8x128xf32>
    %475 = arith.divf %473, %474 : vector<8x128xf32>
    %476 = vector.extract_strided_slice %463 {offsets = [0, 256], sizes = [8, 128], strides = [1, 1]} : vector<8x512xf32> to vector<8x128xf32>
    %477 = math.tanh %476 : vector<8x128xf32>
    %478 = vector.extract_strided_slice %463 {offsets = [0, 384], sizes = [8, 128], strides = [1, 1]} : vector<8x512xf32> to vector<8x128xf32>
    %479 = arith.negf %478 : vector<8x128xf32>
    %480 = math.exp %479 : vector<8x128xf32>
    %cst_148 = arith.constant 1.000000e+00 : f32
    %481 = vector.broadcast %cst_148 : f32 to vector<8x128xf32>
    %482 = arith.addf %481, %480 : vector<8x128xf32>
    %483 = arith.divf %481, %482 : vector<8x128xf32>
    %484 = arith.mulf %475, %457 : vector<8x128xf32>
    %485 = arith.mulf %469, %477 : vector<8x128xf32>
    %486 = arith.addf %484, %485 : vector<8x128xf32>
    %487 = math.tanh %486 : vector<8x128xf32>
    %488 = arith.mulf %483, %487 : vector<8x128xf32>
    %c56_149 = arith.constant 56 : index
    %c0_150 = arith.constant 0 : index
    %489 = vector.load %arg12[%c56_149, %c0_150] : memref<64x128xf32, #tpu.memory_space<vmem>>, vector<8x128xf32>
    tpu.vector_store %arg12[%c56_149, %c0_150], %488 {strides = array<i32>} : memref<64x128xf32, #tpu.memory_space<vmem>>, vector<8x128xf32>,
    %c0_151 = arith.constant 0 : index
    %c128 = arith.constant 128 : index
    %490 = vector.load %arg13[%c0_151, %c128] : memref<8x512xf32, #tpu.memory_space<vmem>>, vector<8x128xf32>
    tpu.vector_store %arg13[%c0_151, %c128], %488 {strides = array<i32>} : memref<8x512xf32, #tpu.memory_space<vmem>>, vector<8x128xf32>,
    %c0_152 = arith.constant 0 : index
    %c0_153 = arith.constant 0 : index
    %491 = vector.load %arg12[%c0_152, %c0_153] : memref<64x128xf32, #tpu.memory_space<vmem>>, vector<64x128xf32>
    %c1_154 = arith.constant 1 : index
    %c0_155 = arith.constant 0 : index
    %c0_156 = arith.constant 0 : index
    %492 = vector.load %arg3[%c1_154, %c0_155, %c0_156] : memref<3x128x512xf32, #tpu.memory_space<vmem>>, vector<1x128x512xf32>
    %493 = vector.shape_cast %492 : vector<1x128x512xf32> to vector<128x512xf32>
    %cst_157 = arith.constant dense<0.000000e+00> : vector<64x512xf32>
    %494 = tpu.matmul %491, %493, %cst_157 {dimension_numbers = #tpu.dot_dimension_numbers<[1], [0], [0], [1], [0, 0, 1, 1], [], []>} : vector<64x128xf32>, vector<128x512xf32>, vector<64x512xf32> -> vector<64x512xf32>
    %c2 = arith.constant 2 : index
    %c0_158 = arith.constant 0 : index
    %c0_159 = arith.constant 0 : index
    %495 = vector.load %arg5[%c2, %c0_158, %c0_159] : memref<4x1x512xf32, #tpu.memory_space<vmem>>, vector<1x1x512xf32>
    %496 = vector.shape_cast %495 : vector<1x1x512xf32> to vector<1x512xf32>
    %497 = vector.broadcast %496 : vector<1x512xf32> to vector<64x512xf32>
    %498 = arith.addf %494, %497 : vector<64x512xf32>
    %c0_160 = arith.constant 0 : index
    %c0_161 = arith.constant 0 : index
    %499 = vector.load %arg11[%c0_160, %c0_161] : memref<64x512xf32, #tpu.memory_space<vmem>>, vector<64x512xf32>
    tpu.vector_store %arg11[%c0_160, %c0_161], %498 {strides = array<i32>} : memref<64x512xf32, #tpu.memory_space<vmem>>, vector<64x512xf32>,
    %c2_162 = arith.constant 2 : index
    %c0_163 = arith.constant 0 : index
    %c0_164 = arith.constant 0 : index
    %500 = vector.load %arg4[%c2_162, %c0_163, %c0_164] : memref<4x128x512xf32, #tpu.memory_space<vmem>>, vector<1x128x512xf32>
    %501 = vector.shape_cast %500 : vector<1x128x512xf32> to vector<128x512xf32>
    %cst_165 = arith.constant 0.000000e+00 : f32
    %502 = vector.broadcast %cst_165 : f32 to vector<8x128xf32>
    %cst_166 = arith.constant 0.000000e+00 : f32
    %503 = vector.broadcast %cst_166 : f32 to vector<8x128xf32>
    %c0_167 = arith.constant 0 : index
    %c0_168 = arith.constant 0 : index
    %504 = vector.load %arg11[%c0_167, %c0_168] : memref<64x512xf32, #tpu.memory_space<vmem>>, vector<8x512xf32>
    %cst_169 = arith.constant dense<0.000000e+00> : vector<8x512xf32>
    %505 = tpu.matmul %502, %501, %cst_169 {dimension_numbers = #tpu.dot_dimension_numbers<[1], [0], [0], [1], [0, 0, 1, 1], [], []>} : vector<8x128xf32>, vector<128x512xf32>, vector<8x512xf32> -> vector<8x512xf32>
    %506 = arith.addf %504, %505 : vector<8x512xf32>
    %507 = vector.extract_strided_slice %506 {offsets = [0, 0], sizes = [8, 128], strides = [1, 1]} : vector<8x512xf32> to vector<8x128xf32>
    %508 = arith.negf %507 : vector<8x128xf32>
    %509 = math.exp %508 : vector<8x128xf32>
    %cst_170 = arith.constant 1.000000e+00 : f32
    %510 = vector.broadcast %cst_170 : f32 to vector<8x128xf32>
    %511 = arith.addf %510, %509 : vector<8x128xf32>
    %512 = arith.divf %510, %511 : vector<8x128xf32>
    %513 = vector.extract_strided_slice %506 {offsets = [0, 128], sizes = [8, 128], strides = [1, 1]} : vector<8x512xf32> to vector<8x128xf32>
    %514 = arith.negf %513 : vector<8x128xf32>
    %515 = math.exp %514 : vector<8x128xf32>
    %cst_171 = arith.constant 1.000000e+00 : f32
    %516 = vector.broadcast %cst_171 : f32 to vector<8x128xf32>
    %517 = arith.addf %516, %515 : vector<8x128xf32>
    %518 = arith.divf %516, %517 : vector<8x128xf32>
    %519 = vector.extract_strided_slice %506 {offsets = [0, 256], sizes = [8, 128], strides = [1, 1]} : vector<8x512xf32> to vector<8x128xf32>
    %520 = math.tanh %519 : vector<8x128xf32>
    %521 = vector.extract_strided_slice %506 {offsets = [0, 384], sizes = [8, 128], strides = [1, 1]} : vector<8x512xf32> to vector<8x128xf32>
    %522 = arith.negf %521 : vector<8x128xf32>
    %523 = math.exp %522 : vector<8x128xf32>
    %cst_172 = arith.constant 1.000000e+00 : f32
    %524 = vector.broadcast %cst_172 : f32 to vector<8x128xf32>
    %525 = arith.addf %524, %523 : vector<8x128xf32>
    %526 = arith.divf %524, %525 : vector<8x128xf32>
    %527 = arith.mulf %518, %503 : vector<8x128xf32>
    %528 = arith.mulf %512, %520 : vector<8x128xf32>
    %529 = arith.addf %527, %528 : vector<8x128xf32>
    %530 = math.tanh %529 : vector<8x128xf32>
    %531 = arith.mulf %526, %530 : vector<8x128xf32>
    %c0_173 = arith.constant 0 : index
    %c0_174 = arith.constant 0 : index
    %532 = vector.load %arg12[%c0_173, %c0_174] : memref<64x128xf32, #tpu.memory_space<vmem>>, vector<8x128xf32>
    tpu.vector_store %arg12[%c0_173, %c0_174], %531 {strides = array<i32>} : memref<64x128xf32, #tpu.memory_space<vmem>>, vector<8x128xf32>,
    %c8_175 = arith.constant 8 : index
    %c0_176 = arith.constant 0 : index
    %533 = vector.load %arg11[%c8_175, %c0_176] : memref<64x512xf32, #tpu.memory_space<vmem>>, vector<8x512xf32>
    %cst_177 = arith.constant dense<0.000000e+00> : vector<8x512xf32>
    %534 = tpu.matmul %531, %501, %cst_177 {dimension_numbers = #tpu.dot_dimension_numbers<[1], [0], [0], [1], [0, 0, 1, 1], [], []>} : vector<8x128xf32>, vector<128x512xf32>, vector<8x512xf32> -> vector<8x512xf32>
    %535 = arith.addf %533, %534 : vector<8x512xf32>
    %536 = vector.extract_strided_slice %535 {offsets = [0, 0], sizes = [8, 128], strides = [1, 1]} : vector<8x512xf32> to vector<8x128xf32>
    %537 = arith.negf %536 : vector<8x128xf32>
    %538 = math.exp %537 : vector<8x128xf32>
    %cst_178 = arith.constant 1.000000e+00 : f32
    %539 = vector.broadcast %cst_178 : f32 to vector<8x128xf32>
    %540 = arith.addf %539, %538 : vector<8x128xf32>
    %541 = arith.divf %539, %540 : vector<8x128xf32>
    %542 = vector.extract_strided_slice %535 {offsets = [0, 128], sizes = [8, 128], strides = [1, 1]} : vector<8x512xf32> to vector<8x128xf32>
    %543 = arith.negf %542 : vector<8x128xf32>
    %544 = math.exp %543 : vector<8x128xf32>
    %cst_179 = arith.constant 1.000000e+00 : f32
    %545 = vector.broadcast %cst_179 : f32 to vector<8x128xf32>
    %546 = arith.addf %545, %544 : vector<8x128xf32>
    %547 = arith.divf %545, %546 : vector<8x128xf32>
    %548 = vector.extract_strided_slice %535 {offsets = [0, 256], sizes = [8, 128], strides = [1, 1]} : vector<8x512xf32> to vector<8x128xf32>
    %549 = math.tanh %548 : vector<8x128xf32>
    %550 = vector.extract_strided_slice %535 {offsets = [0, 384], sizes = [8, 128], strides = [1, 1]} : vector<8x512xf32> to vector<8x128xf32>
    %551 = arith.negf %550 : vector<8x128xf32>
    %552 = math.exp %551 : vector<8x128xf32>
    %cst_180 = arith.constant 1.000000e+00 : f32
    %553 = vector.broadcast %cst_180 : f32 to vector<8x128xf32>
    %554 = arith.addf %553, %552 : vector<8x128xf32>
    %555 = arith.divf %553, %554 : vector<8x128xf32>
    %556 = arith.mulf %547, %529 : vector<8x128xf32>
    %557 = arith.mulf %541, %549 : vector<8x128xf32>
    %558 = arith.addf %556, %557 : vector<8x128xf32>
    %559 = math.tanh %558 : vector<8x128xf32>
    %560 = arith.mulf %555, %559 : vector<8x128xf32>
    %c8_181 = arith.constant 8 : index
    %c0_182 = arith.constant 0 : index
    %561 = vector.load %arg12[%c8_181, %c0_182] : memref<64x128xf32, #tpu.memory_space<vmem>>, vector<8x128xf32>
    tpu.vector_store %arg12[%c8_181, %c0_182], %560 {strides = array<i32>} : memref<64x128xf32, #tpu.memory_space<vmem>>, vector<8x128xf32>,
    %c16_183 = arith.constant 16 : index
    %c0_184 = arith.constant 0 : index
    %562 = vector.load %arg11[%c16_183, %c0_184] : memref<64x512xf32, #tpu.memory_space<vmem>>, vector<8x512xf32>
    %cst_185 = arith.constant dense<0.000000e+00> : vector<8x512xf32>
    %563 = tpu.matmul %560, %501, %cst_185 {dimension_numbers = #tpu.dot_dimension_numbers<[1], [0], [0], [1], [0, 0, 1, 1], [], []>} : vector<8x128xf32>, vector<128x512xf32>, vector<8x512xf32> -> vector<8x512xf32>
    %564 = arith.addf %562, %563 : vector<8x512xf32>
    %565 = vector.extract_strided_slice %564 {offsets = [0, 0], sizes = [8, 128], strides = [1, 1]} : vector<8x512xf32> to vector<8x128xf32>
    %566 = arith.negf %565 : vector<8x128xf32>
    %567 = math.exp %566 : vector<8x128xf32>
    %cst_186 = arith.constant 1.000000e+00 : f32
    %568 = vector.broadcast %cst_186 : f32 to vector<8x128xf32>
    %569 = arith.addf %568, %567 : vector<8x128xf32>
    %570 = arith.divf %568, %569 : vector<8x128xf32>
    %571 = vector.extract_strided_slice %564 {offsets = [0, 128], sizes = [8, 128], strides = [1, 1]} : vector<8x512xf32> to vector<8x128xf32>
    %572 = arith.negf %571 : vector<8x128xf32>
    %573 = math.exp %572 : vector<8x128xf32>
    %cst_187 = arith.constant 1.000000e+00 : f32
    %574 = vector.broadcast %cst_187 : f32 to vector<8x128xf32>
    %575 = arith.addf %574, %573 : vector<8x128xf32>
    %576 = arith.divf %574, %575 : vector<8x128xf32>
    %577 = vector.extract_strided_slice %564 {offsets = [0, 256], sizes = [8, 128], strides = [1, 1]} : vector<8x512xf32> to vector<8x128xf32>
    %578 = math.tanh %577 : vector<8x128xf32>
    %579 = vector.extract_strided_slice %564 {offsets = [0, 384], sizes = [8, 128], strides = [1, 1]} : vector<8x512xf32> to vector<8x128xf32>
    %580 = arith.negf %579 : vector<8x128xf32>
    %581 = math.exp %580 : vector<8x128xf32>
    %cst_188 = arith.constant 1.000000e+00 : f32
    %582 = vector.broadcast %cst_188 : f32 to vector<8x128xf32>
    %583 = arith.addf %582, %581 : vector<8x128xf32>
    %584 = arith.divf %582, %583 : vector<8x128xf32>
    %585 = arith.mulf %576, %558 : vector<8x128xf32>
    %586 = arith.mulf %570, %578 : vector<8x128xf32>
    %587 = arith.addf %585, %586 : vector<8x128xf32>
    %588 = math.tanh %587 : vector<8x128xf32>
    %589 = arith.mulf %584, %588 : vector<8x128xf32>
    %c16_189 = arith.constant 16 : index
    %c0_190 = arith.constant 0 : index
    %590 = vector.load %arg12[%c16_189, %c0_190] : memref<64x128xf32, #tpu.memory_space<vmem>>, vector<8x128xf32>
    tpu.vector_store %arg12[%c16_189, %c0_190], %589 {strides = array<i32>} : memref<64x128xf32, #tpu.memory_space<vmem>>, vector<8x128xf32>,
    %c24_191 = arith.constant 24 : index
    %c0_192 = arith.constant 0 : index
    %591 = vector.load %arg11[%c24_191, %c0_192] : memref<64x512xf32, #tpu.memory_space<vmem>>, vector<8x512xf32>
    %cst_193 = arith.constant dense<0.000000e+00> : vector<8x512xf32>
    %592 = tpu.matmul %589, %501, %cst_193 {dimension_numbers = #tpu.dot_dimension_numbers<[1], [0], [0], [1], [0, 0, 1, 1], [], []>} : vector<8x128xf32>, vector<128x512xf32>, vector<8x512xf32> -> vector<8x512xf32>
    %593 = arith.addf %591, %592 : vector<8x512xf32>
    %594 = vector.extract_strided_slice %593 {offsets = [0, 0], sizes = [8, 128], strides = [1, 1]} : vector<8x512xf32> to vector<8x128xf32>
    %595 = arith.negf %594 : vector<8x128xf32>
    %596 = math.exp %595 : vector<8x128xf32>
    %cst_194 = arith.constant 1.000000e+00 : f32
    %597 = vector.broadcast %cst_194 : f32 to vector<8x128xf32>
    %598 = arith.addf %597, %596 : vector<8x128xf32>
    %599 = arith.divf %597, %598 : vector<8x128xf32>
    %600 = vector.extract_strided_slice %593 {offsets = [0, 128], sizes = [8, 128], strides = [1, 1]} : vector<8x512xf32> to vector<8x128xf32>
    %601 = arith.negf %600 : vector<8x128xf32>
    %602 = math.exp %601 : vector<8x128xf32>
    %cst_195 = arith.constant 1.000000e+00 : f32
    %603 = vector.broadcast %cst_195 : f32 to vector<8x128xf32>
    %604 = arith.addf %603, %602 : vector<8x128xf32>
    %605 = arith.divf %603, %604 : vector<8x128xf32>
    %606 = vector.extract_strided_slice %593 {offsets = [0, 256], sizes = [8, 128], strides = [1, 1]} : vector<8x512xf32> to vector<8x128xf32>
    %607 = math.tanh %606 : vector<8x128xf32>
    %608 = vector.extract_strided_slice %593 {offsets = [0, 384], sizes = [8, 128], strides = [1, 1]} : vector<8x512xf32> to vector<8x128xf32>
    %609 = arith.negf %608 : vector<8x128xf32>
    %610 = math.exp %609 : vector<8x128xf32>
    %cst_196 = arith.constant 1.000000e+00 : f32
    %611 = vector.broadcast %cst_196 : f32 to vector<8x128xf32>
    %612 = arith.addf %611, %610 : vector<8x128xf32>
    %613 = arith.divf %611, %612 : vector<8x128xf32>
    %614 = arith.mulf %605, %587 : vector<8x128xf32>
    %615 = arith.mulf %599, %607 : vector<8x128xf32>
    %616 = arith.addf %614, %615 : vector<8x128xf32>
    %617 = math.tanh %616 : vector<8x128xf32>
    %618 = arith.mulf %613, %617 : vector<8x128xf32>
    %c24_197 = arith.constant 24 : index
    %c0_198 = arith.constant 0 : index
    %619 = vector.load %arg12[%c24_197, %c0_198] : memref<64x128xf32, #tpu.memory_space<vmem>>, vector<8x128xf32>
    tpu.vector_store %arg12[%c24_197, %c0_198], %618 {strides = array<i32>} : memref<64x128xf32, #tpu.memory_space<vmem>>, vector<8x128xf32>,
    %c32_199 = arith.constant 32 : index
    %c0_200 = arith.constant 0 : index
    %620 = vector.load %arg11[%c32_199, %c0_200] : memref<64x512xf32, #tpu.memory_space<vmem>>, vector<8x512xf32>
    %cst_201 = arith.constant dense<0.000000e+00> : vector<8x512xf32>
    %621 = tpu.matmul %618, %501, %cst_201 {dimension_numbers = #tpu.dot_dimension_numbers<[1], [0], [0], [1], [0, 0, 1, 1], [], []>} : vector<8x128xf32>, vector<128x512xf32>, vector<8x512xf32> -> vector<8x512xf32>
    %622 = arith.addf %620, %621 : vector<8x512xf32>
    %623 = vector.extract_strided_slice %622 {offsets = [0, 0], sizes = [8, 128], strides = [1, 1]} : vector<8x512xf32> to vector<8x128xf32>
    %624 = arith.negf %623 : vector<8x128xf32>
    %625 = math.exp %624 : vector<8x128xf32>
    %cst_202 = arith.constant 1.000000e+00 : f32
    %626 = vector.broadcast %cst_202 : f32 to vector<8x128xf32>
    %627 = arith.addf %626, %625 : vector<8x128xf32>
    %628 = arith.divf %626, %627 : vector<8x128xf32>
    %629 = vector.extract_strided_slice %622 {offsets = [0, 128], sizes = [8, 128], strides = [1, 1]} : vector<8x512xf32> to vector<8x128xf32>
    %630 = arith.negf %629 : vector<8x128xf32>
    %631 = math.exp %630 : vector<8x128xf32>
    %cst_203 = arith.constant 1.000000e+00 : f32
    %632 = vector.broadcast %cst_203 : f32 to vector<8x128xf32>
    %633 = arith.addf %632, %631 : vector<8x128xf32>
    %634 = arith.divf %632, %633 : vector<8x128xf32>
    %635 = vector.extract_strided_slice %622 {offsets = [0, 256], sizes = [8, 128], strides = [1, 1]} : vector<8x512xf32> to vector<8x128xf32>
    %636 = math.tanh %635 : vector<8x128xf32>
    %637 = vector.extract_strided_slice %622 {offsets = [0, 384], sizes = [8, 128], strides = [1, 1]} : vector<8x512xf32> to vector<8x128xf32>
    %638 = arith.negf %637 : vector<8x128xf32>
    %639 = math.exp %638 : vector<8x128xf32>
    %cst_204 = arith.constant 1.000000e+00 : f32
    %640 = vector.broadcast %cst_204 : f32 to vector<8x128xf32>
    %641 = arith.addf %640, %639 : vector<8x128xf32>
    %642 = arith.divf %640, %641 : vector<8x128xf32>
    %643 = arith.mulf %634, %616 : vector<8x128xf32>
    %644 = arith.mulf %628, %636 : vector<8x128xf32>
    %645 = arith.addf %643, %644 : vector<8x128xf32>
    %646 = math.tanh %645 : vector<8x128xf32>
    %647 = arith.mulf %642, %646 : vector<8x128xf32>
    %c32_205 = arith.constant 32 : index
    %c0_206 = arith.constant 0 : index
    %648 = vector.load %arg12[%c32_205, %c0_206] : memref<64x128xf32, #tpu.memory_space<vmem>>, vector<8x128xf32>
    tpu.vector_store %arg12[%c32_205, %c0_206], %647 {strides = array<i32>} : memref<64x128xf32, #tpu.memory_space<vmem>>, vector<8x128xf32>,
    %c40_207 = arith.constant 40 : index
    %c0_208 = arith.constant 0 : index
    %649 = vector.load %arg11[%c40_207, %c0_208] : memref<64x512xf32, #tpu.memory_space<vmem>>, vector<8x512xf32>
    %cst_209 = arith.constant dense<0.000000e+00> : vector<8x512xf32>
    %650 = tpu.matmul %647, %501, %cst_209 {dimension_numbers = #tpu.dot_dimension_numbers<[1], [0], [0], [1], [0, 0, 1, 1], [], []>} : vector<8x128xf32>, vector<128x512xf32>, vector<8x512xf32> -> vector<8x512xf32>
    %651 = arith.addf %649, %650 : vector<8x512xf32>
    %652 = vector.extract_strided_slice %651 {offsets = [0, 0], sizes = [8, 128], strides = [1, 1]} : vector<8x512xf32> to vector<8x128xf32>
    %653 = arith.negf %652 : vector<8x128xf32>
    %654 = math.exp %653 : vector<8x128xf32>
    %cst_210 = arith.constant 1.000000e+00 : f32
    %655 = vector.broadcast %cst_210 : f32 to vector<8x128xf32>
    %656 = arith.addf %655, %654 : vector<8x128xf32>
    %657 = arith.divf %655, %656 : vector<8x128xf32>
    %658 = vector.extract_strided_slice %651 {offsets = [0, 128], sizes = [8, 128], strides = [1, 1]} : vector<8x512xf32> to vector<8x128xf32>
    %659 = arith.negf %658 : vector<8x128xf32>
    %660 = math.exp %659 : vector<8x128xf32>
    %cst_211 = arith.constant 1.000000e+00 : f32
    %661 = vector.broadcast %cst_211 : f32 to vector<8x128xf32>
    %662 = arith.addf %661, %660 : vector<8x128xf32>
    %663 = arith.divf %661, %662 : vector<8x128xf32>
    %664 = vector.extract_strided_slice %651 {offsets = [0, 256], sizes = [8, 128], strides = [1, 1]} : vector<8x512xf32> to vector<8x128xf32>
    %665 = math.tanh %664 : vector<8x128xf32>
    %666 = vector.extract_strided_slice %651 {offsets = [0, 384], sizes = [8, 128], strides = [1, 1]} : vector<8x512xf32> to vector<8x128xf32>
    %667 = arith.negf %666 : vector<8x128xf32>
    %668 = math.exp %667 : vector<8x128xf32>
    %cst_212 = arith.constant 1.000000e+00 : f32
    %669 = vector.broadcast %cst_212 : f32 to vector<8x128xf32>
    %670 = arith.addf %669, %668 : vector<8x128xf32>
    %671 = arith.divf %669, %670 : vector<8x128xf32>
    %672 = arith.mulf %663, %645 : vector<8x128xf32>
    %673 = arith.mulf %657, %665 : vector<8x128xf32>
    %674 = arith.addf %672, %673 : vector<8x128xf32>
    %675 = math.tanh %674 : vector<8x128xf32>
    %676 = arith.mulf %671, %675 : vector<8x128xf32>
    %c40_213 = arith.constant 40 : index
    %c0_214 = arith.constant 0 : index
    %677 = vector.load %arg12[%c40_213, %c0_214] : memref<64x128xf32, #tpu.memory_space<vmem>>, vector<8x128xf32>
    tpu.vector_store %arg12[%c40_213, %c0_214], %676 {strides = array<i32>} : memref<64x128xf32, #tpu.memory_space<vmem>>, vector<8x128xf32>,
    %c48_215 = arith.constant 48 : index
    %c0_216 = arith.constant 0 : index
    %678 = vector.load %arg11[%c48_215, %c0_216] : memref<64x512xf32, #tpu.memory_space<vmem>>, vector<8x512xf32>
    %cst_217 = arith.constant dense<0.000000e+00> : vector<8x512xf32>
    %679 = tpu.matmul %676, %501, %cst_217 {dimension_numbers = #tpu.dot_dimension_numbers<[1], [0], [0], [1], [0, 0, 1, 1], [], []>} : vector<8x128xf32>, vector<128x512xf32>, vector<8x512xf32> -> vector<8x512xf32>
    %680 = arith.addf %678, %679 : vector<8x512xf32>
    %681 = vector.extract_strided_slice %680 {offsets = [0, 0], sizes = [8, 128], strides = [1, 1]} : vector<8x512xf32> to vector<8x128xf32>
    %682 = arith.negf %681 : vector<8x128xf32>
    %683 = math.exp %682 : vector<8x128xf32>
    %cst_218 = arith.constant 1.000000e+00 : f32
    %684 = vector.broadcast %cst_218 : f32 to vector<8x128xf32>
    %685 = arith.addf %684, %683 : vector<8x128xf32>
    %686 = arith.divf %684, %685 : vector<8x128xf32>
    %687 = vector.extract_strided_slice %680 {offsets = [0, 128], sizes = [8, 128], strides = [1, 1]} : vector<8x512xf32> to vector<8x128xf32>
    %688 = arith.negf %687 : vector<8x128xf32>
    %689 = math.exp %688 : vector<8x128xf32>
    %cst_219 = arith.constant 1.000000e+00 : f32
    %690 = vector.broadcast %cst_219 : f32 to vector<8x128xf32>
    %691 = arith.addf %690, %689 : vector<8x128xf32>
    %692 = arith.divf %690, %691 : vector<8x128xf32>
    %693 = vector.extract_strided_slice %680 {offsets = [0, 256], sizes = [8, 128], strides = [1, 1]} : vector<8x512xf32> to vector<8x128xf32>
    %694 = math.tanh %693 : vector<8x128xf32>
    %695 = vector.extract_strided_slice %680 {offsets = [0, 384], sizes = [8, 128], strides = [1, 1]} : vector<8x512xf32> to vector<8x128xf32>
    %696 = arith.negf %695 : vector<8x128xf32>
    %697 = math.exp %696 : vector<8x128xf32>
    %cst_220 = arith.constant 1.000000e+00 : f32
    %698 = vector.broadcast %cst_220 : f32 to vector<8x128xf32>
    %699 = arith.addf %698, %697 : vector<8x128xf32>
    %700 = arith.divf %698, %699 : vector<8x128xf32>
    %701 = arith.mulf %692, %674 : vector<8x128xf32>
    %702 = arith.mulf %686, %694 : vector<8x128xf32>
    %703 = arith.addf %701, %702 : vector<8x128xf32>
    %704 = math.tanh %703 : vector<8x128xf32>
    %705 = arith.mulf %700, %704 : vector<8x128xf32>
    %c48_221 = arith.constant 48 : index
    %c0_222 = arith.constant 0 : index
    %706 = vector.load %arg12[%c48_221, %c0_222] : memref<64x128xf32, #tpu.memory_space<vmem>>, vector<8x128xf32>
    tpu.vector_store %arg12[%c48_221, %c0_222], %705 {strides = array<i32>} : memref<64x128xf32, #tpu.memory_space<vmem>>, vector<8x128xf32>,
    %c56_223 = arith.constant 56 : index
    %c0_224 = arith.constant 0 : index
    %707 = vector.load %arg11[%c56_223, %c0_224] : memref<64x512xf32, #tpu.memory_space<vmem>>, vector<8x512xf32>
    %cst_225 = arith.constant dense<0.000000e+00> : vector<8x512xf32>
    %708 = tpu.matmul %705, %501, %cst_225 {dimension_numbers = #tpu.dot_dimension_numbers<[1], [0], [0], [1], [0, 0, 1, 1], [], []>} : vector<8x128xf32>, vector<128x512xf32>, vector<8x512xf32> -> vector<8x512xf32>
    %709 = arith.addf %707, %708 : vector<8x512xf32>
    %710 = vector.extract_strided_slice %709 {offsets = [0, 0], sizes = [8, 128], strides = [1, 1]} : vector<8x512xf32> to vector<8x128xf32>
    %711 = arith.negf %710 : vector<8x128xf32>
    %712 = math.exp %711 : vector<8x128xf32>
    %cst_226 = arith.constant 1.000000e+00 : f32
    %713 = vector.broadcast %cst_226 : f32 to vector<8x128xf32>
    %714 = arith.addf %713, %712 : vector<8x128xf32>
    %715 = arith.divf %713, %714 : vector<8x128xf32>
    %716 = vector.extract_strided_slice %709 {offsets = [0, 128], sizes = [8, 128], strides = [1, 1]} : vector<8x512xf32> to vector<8x128xf32>
    %717 = arith.negf %716 : vector<8x128xf32>
    %718 = math.exp %717 : vector<8x128xf32>
    %cst_227 = arith.constant 1.000000e+00 : f32
    %719 = vector.broadcast %cst_227 : f32 to vector<8x128xf32>
    %720 = arith.addf %719, %718 : vector<8x128xf32>
    %721 = arith.divf %719, %720 : vector<8x128xf32>
    %722 = vector.extract_strided_slice %709 {offsets = [0, 256], sizes = [8, 128], strides = [1, 1]} : vector<8x512xf32> to vector<8x128xf32>
    %723 = math.tanh %722 : vector<8x128xf32>
    %724 = vector.extract_strided_slice %709 {offsets = [0, 384], sizes = [8, 128], strides = [1, 1]} : vector<8x512xf32> to vector<8x128xf32>
    %725 = arith.negf %724 : vector<8x128xf32>
    %726 = math.exp %725 : vector<8x128xf32>
    %cst_228 = arith.constant 1.000000e+00 : f32
    %727 = vector.broadcast %cst_228 : f32 to vector<8x128xf32>
    %728 = arith.addf %727, %726 : vector<8x128xf32>
    %729 = arith.divf %727, %728 : vector<8x128xf32>
    %730 = arith.mulf %721, %703 : vector<8x128xf32>
    %731 = arith.mulf %715, %723 : vector<8x128xf32>
    %732 = arith.addf %730, %731 : vector<8x128xf32>
    %733 = math.tanh %732 : vector<8x128xf32>
    %734 = arith.mulf %729, %733 : vector<8x128xf32>
    %c56_229 = arith.constant 56 : index
    %c0_230 = arith.constant 0 : index
    %735 = vector.load %arg12[%c56_229, %c0_230] : memref<64x128xf32, #tpu.memory_space<vmem>>, vector<8x128xf32>
    tpu.vector_store %arg12[%c56_229, %c0_230], %734 {strides = array<i32>} : memref<64x128xf32, #tpu.memory_space<vmem>>, vector<8x128xf32>,
    %c0_231 = arith.constant 0 : index
    %c256 = arith.constant 256 : index
    %736 = vector.load %arg13[%c0_231, %c256] : memref<8x512xf32, #tpu.memory_space<vmem>>, vector<8x128xf32>
    tpu.vector_store %arg13[%c0_231, %c256], %734 {strides = array<i32>} : memref<8x512xf32, #tpu.memory_space<vmem>>, vector<8x128xf32>,
    %c0_232 = arith.constant 0 : index
    %c0_233 = arith.constant 0 : index
    %737 = vector.load %arg12[%c0_232, %c0_233] : memref<64x128xf32, #tpu.memory_space<vmem>>, vector<64x128xf32>
    %c2_234 = arith.constant 2 : index
    %c0_235 = arith.constant 0 : index
    %c0_236 = arith.constant 0 : index
    %738 = vector.load %arg3[%c2_234, %c0_235, %c0_236] : memref<3x128x512xf32, #tpu.memory_space<vmem>>, vector<1x128x512xf32>
    %739 = vector.shape_cast %738 : vector<1x128x512xf32> to vector<128x512xf32>
    %cst_237 = arith.constant dense<0.000000e+00> : vector<64x512xf32>
    %740 = tpu.matmul %737, %739, %cst_237 {dimension_numbers = #tpu.dot_dimension_numbers<[1], [0], [0], [1], [0, 0, 1, 1], [], []>} : vector<64x128xf32>, vector<128x512xf32>, vector<64x512xf32> -> vector<64x512xf32>
    %c3 = arith.constant 3 : index
    %c0_238 = arith.constant 0 : index
    %c0_239 = arith.constant 0 : index
    %741 = vector.load %arg5[%c3, %c0_238, %c0_239] : memref<4x1x512xf32, #tpu.memory_space<vmem>>, vector<1x1x512xf32>
    %742 = vector.shape_cast %741 : vector<1x1x512xf32> to vector<1x512xf32>
    %743 = vector.broadcast %742 : vector<1x512xf32> to vector<64x512xf32>
    %744 = arith.addf %740, %743 : vector<64x512xf32>
    %c0_240 = arith.constant 0 : index
    %c0_241 = arith.constant 0 : index
    %745 = vector.load %arg11[%c0_240, %c0_241] : memref<64x512xf32, #tpu.memory_space<vmem>>, vector<64x512xf32>
    tpu.vector_store %arg11[%c0_240, %c0_241], %744 {strides = array<i32>} : memref<64x512xf32, #tpu.memory_space<vmem>>, vector<64x512xf32>,
    %c3_242 = arith.constant 3 : index
    %c0_243 = arith.constant 0 : index
    %c0_244 = arith.constant 0 : index
    %746 = vector.load %arg4[%c3_242, %c0_243, %c0_244] : memref<4x128x512xf32, #tpu.memory_space<vmem>>, vector<1x128x512xf32>
    %747 = vector.shape_cast %746 : vector<1x128x512xf32> to vector<128x512xf32>
    %cst_245 = arith.constant 0.000000e+00 : f32
    %748 = vector.broadcast %cst_245 : f32 to vector<8x128xf32>
    %cst_246 = arith.constant 0.000000e+00 : f32
    %749 = vector.broadcast %cst_246 : f32 to vector<8x128xf32>
    %c0_247 = arith.constant 0 : index
    %c0_248 = arith.constant 0 : index
    %750 = vector.load %arg11[%c0_247, %c0_248] : memref<64x512xf32, #tpu.memory_space<vmem>>, vector<8x512xf32>
    %cst_249 = arith.constant dense<0.000000e+00> : vector<8x512xf32>
    %751 = tpu.matmul %748, %747, %cst_249 {dimension_numbers = #tpu.dot_dimension_numbers<[1], [0], [0], [1], [0, 0, 1, 1], [], []>} : vector<8x128xf32>, vector<128x512xf32>, vector<8x512xf32> -> vector<8x512xf32>
    %752 = arith.addf %750, %751 : vector<8x512xf32>
    %753 = vector.extract_strided_slice %752 {offsets = [0, 0], sizes = [8, 128], strides = [1, 1]} : vector<8x512xf32> to vector<8x128xf32>
    %754 = arith.negf %753 : vector<8x128xf32>
    %755 = math.exp %754 : vector<8x128xf32>
    %cst_250 = arith.constant 1.000000e+00 : f32
    %756 = vector.broadcast %cst_250 : f32 to vector<8x128xf32>
    %757 = arith.addf %756, %755 : vector<8x128xf32>
    %758 = arith.divf %756, %757 : vector<8x128xf32>
    %759 = vector.extract_strided_slice %752 {offsets = [0, 128], sizes = [8, 128], strides = [1, 1]} : vector<8x512xf32> to vector<8x128xf32>
    %760 = arith.negf %759 : vector<8x128xf32>
    %761 = math.exp %760 : vector<8x128xf32>
    %cst_251 = arith.constant 1.000000e+00 : f32
    %762 = vector.broadcast %cst_251 : f32 to vector<8x128xf32>
    %763 = arith.addf %762, %761 : vector<8x128xf32>
    %764 = arith.divf %762, %763 : vector<8x128xf32>
    %765 = vector.extract_strided_slice %752 {offsets = [0, 256], sizes = [8, 128], strides = [1, 1]} : vector<8x512xf32> to vector<8x128xf32>
    %766 = math.tanh %765 : vector<8x128xf32>
    %767 = vector.extract_strided_slice %752 {offsets = [0, 384], sizes = [8, 128], strides = [1, 1]} : vector<8x512xf32> to vector<8x128xf32>
    %768 = arith.negf %767 : vector<8x128xf32>
    %769 = math.exp %768 : vector<8x128xf32>
    %cst_252 = arith.constant 1.000000e+00 : f32
    %770 = vector.broadcast %cst_252 : f32 to vector<8x128xf32>
    %771 = arith.addf %770, %769 : vector<8x128xf32>
    %772 = arith.divf %770, %771 : vector<8x128xf32>
    %773 = arith.mulf %764, %749 : vector<8x128xf32>
    %774 = arith.mulf %758, %766 : vector<8x128xf32>
    %775 = arith.addf %773, %774 : vector<8x128xf32>
    %776 = math.tanh %775 : vector<8x128xf32>
    %777 = arith.mulf %772, %776 : vector<8x128xf32>
    %c0_253 = arith.constant 0 : index
    %c0_254 = arith.constant 0 : index
    %778 = vector.load %arg12[%c0_253, %c0_254] : memref<64x128xf32, #tpu.memory_space<vmem>>, vector<8x128xf32>
    tpu.vector_store %arg12[%c0_253, %c0_254], %777 {strides = array<i32>} : memref<64x128xf32, #tpu.memory_space<vmem>>, vector<8x128xf32>,
    %c8_255 = arith.constant 8 : index
    %c0_256 = arith.constant 0 : index
    %779 = vector.load %arg11[%c8_255, %c0_256] : memref<64x512xf32, #tpu.memory_space<vmem>>, vector<8x512xf32>
    %cst_257 = arith.constant dense<0.000000e+00> : vector<8x512xf32>
    %780 = tpu.matmul %777, %747, %cst_257 {dimension_numbers = #tpu.dot_dimension_numbers<[1], [0], [0], [1], [0, 0, 1, 1], [], []>} : vector<8x128xf32>, vector<128x512xf32>, vector<8x512xf32> -> vector<8x512xf32>
    %781 = arith.addf %779, %780 : vector<8x512xf32>
    %782 = vector.extract_strided_slice %781 {offsets = [0, 0], sizes = [8, 128], strides = [1, 1]} : vector<8x512xf32> to vector<8x128xf32>
    %783 = arith.negf %782 : vector<8x128xf32>
    %784 = math.exp %783 : vector<8x128xf32>
    %cst_258 = arith.constant 1.000000e+00 : f32
    %785 = vector.broadcast %cst_258 : f32 to vector<8x128xf32>
    %786 = arith.addf %785, %784 : vector<8x128xf32>
    %787 = arith.divf %785, %786 : vector<8x128xf32>
    %788 = vector.extract_strided_slice %781 {offsets = [0, 128], sizes = [8, 128], strides = [1, 1]} : vector<8x512xf32> to vector<8x128xf32>
    %789 = arith.negf %788 : vector<8x128xf32>
    %790 = math.exp %789 : vector<8x128xf32>
    %cst_259 = arith.constant 1.000000e+00 : f32
    %791 = vector.broadcast %cst_259 : f32 to vector<8x128xf32>
    %792 = arith.addf %791, %790 : vector<8x128xf32>
    %793 = arith.divf %791, %792 : vector<8x128xf32>
    %794 = vector.extract_strided_slice %781 {offsets = [0, 256], sizes = [8, 128], strides = [1, 1]} : vector<8x512xf32> to vector<8x128xf32>
    %795 = math.tanh %794 : vector<8x128xf32>
    %796 = vector.extract_strided_slice %781 {offsets = [0, 384], sizes = [8, 128], strides = [1, 1]} : vector<8x512xf32> to vector<8x128xf32>
    %797 = arith.negf %796 : vector<8x128xf32>
    %798 = math.exp %797 : vector<8x128xf32>
    %cst_260 = arith.constant 1.000000e+00 : f32
    %799 = vector.broadcast %cst_260 : f32 to vector<8x128xf32>
    %800 = arith.addf %799, %798 : vector<8x128xf32>
    %801 = arith.divf %799, %800 : vector<8x128xf32>
    %802 = arith.mulf %793, %775 : vector<8x128xf32>
    %803 = arith.mulf %787, %795 : vector<8x128xf32>
    %804 = arith.addf %802, %803 : vector<8x128xf32>
    %805 = math.tanh %804 : vector<8x128xf32>
    %806 = arith.mulf %801, %805 : vector<8x128xf32>
    %c8_261 = arith.constant 8 : index
    %c0_262 = arith.constant 0 : index
    %807 = vector.load %arg12[%c8_261, %c0_262] : memref<64x128xf32, #tpu.memory_space<vmem>>, vector<8x128xf32>
    tpu.vector_store %arg12[%c8_261, %c0_262], %806 {strides = array<i32>} : memref<64x128xf32, #tpu.memory_space<vmem>>, vector<8x128xf32>,
    %c16_263 = arith.constant 16 : index
    %c0_264 = arith.constant 0 : index
    %808 = vector.load %arg11[%c16_263, %c0_264] : memref<64x512xf32, #tpu.memory_space<vmem>>, vector<8x512xf32>
    %cst_265 = arith.constant dense<0.000000e+00> : vector<8x512xf32>
    %809 = tpu.matmul %806, %747, %cst_265 {dimension_numbers = #tpu.dot_dimension_numbers<[1], [0], [0], [1], [0, 0, 1, 1], [], []>} : vector<8x128xf32>, vector<128x512xf32>, vector<8x512xf32> -> vector<8x512xf32>
    %810 = arith.addf %808, %809 : vector<8x512xf32>
    %811 = vector.extract_strided_slice %810 {offsets = [0, 0], sizes = [8, 128], strides = [1, 1]} : vector<8x512xf32> to vector<8x128xf32>
    %812 = arith.negf %811 : vector<8x128xf32>
    %813 = math.exp %812 : vector<8x128xf32>
    %cst_266 = arith.constant 1.000000e+00 : f32
    %814 = vector.broadcast %cst_266 : f32 to vector<8x128xf32>
    %815 = arith.addf %814, %813 : vector<8x128xf32>
    %816 = arith.divf %814, %815 : vector<8x128xf32>
    %817 = vector.extract_strided_slice %810 {offsets = [0, 128], sizes = [8, 128], strides = [1, 1]} : vector<8x512xf32> to vector<8x128xf32>
    %818 = arith.negf %817 : vector<8x128xf32>
    %819 = math.exp %818 : vector<8x128xf32>
    %cst_267 = arith.constant 1.000000e+00 : f32
    %820 = vector.broadcast %cst_267 : f32 to vector<8x128xf32>
    %821 = arith.addf %820, %819 : vector<8x128xf32>
    %822 = arith.divf %820, %821 : vector<8x128xf32>
    %823 = vector.extract_strided_slice %810 {offsets = [0, 256], sizes = [8, 128], strides = [1, 1]} : vector<8x512xf32> to vector<8x128xf32>
    %824 = math.tanh %823 : vector<8x128xf32>
    %825 = vector.extract_strided_slice %810 {offsets = [0, 384], sizes = [8, 128], strides = [1, 1]} : vector<8x512xf32> to vector<8x128xf32>
    %826 = arith.negf %825 : vector<8x128xf32>
    %827 = math.exp %826 : vector<8x128xf32>
    %cst_268 = arith.constant 1.000000e+00 : f32
    %828 = vector.broadcast %cst_268 : f32 to vector<8x128xf32>
    %829 = arith.addf %828, %827 : vector<8x128xf32>
    %830 = arith.divf %828, %829 : vector<8x128xf32>
    %831 = arith.mulf %822, %804 : vector<8x128xf32>
    %832 = arith.mulf %816, %824 : vector<8x128xf32>
    %833 = arith.addf %831, %832 : vector<8x128xf32>
    %834 = math.tanh %833 : vector<8x128xf32>
    %835 = arith.mulf %830, %834 : vector<8x128xf32>
    %c16_269 = arith.constant 16 : index
    %c0_270 = arith.constant 0 : index
    %836 = vector.load %arg12[%c16_269, %c0_270] : memref<64x128xf32, #tpu.memory_space<vmem>>, vector<8x128xf32>
    tpu.vector_store %arg12[%c16_269, %c0_270], %835 {strides = array<i32>} : memref<64x128xf32, #tpu.memory_space<vmem>>, vector<8x128xf32>,
    %c24_271 = arith.constant 24 : index
    %c0_272 = arith.constant 0 : index
    %837 = vector.load %arg11[%c24_271, %c0_272] : memref<64x512xf32, #tpu.memory_space<vmem>>, vector<8x512xf32>
    %cst_273 = arith.constant dense<0.000000e+00> : vector<8x512xf32>
    %838 = tpu.matmul %835, %747, %cst_273 {dimension_numbers = #tpu.dot_dimension_numbers<[1], [0], [0], [1], [0, 0, 1, 1], [], []>} : vector<8x128xf32>, vector<128x512xf32>, vector<8x512xf32> -> vector<8x512xf32>
    %839 = arith.addf %837, %838 : vector<8x512xf32>
    %840 = vector.extract_strided_slice %839 {offsets = [0, 0], sizes = [8, 128], strides = [1, 1]} : vector<8x512xf32> to vector<8x128xf32>
    %841 = arith.negf %840 : vector<8x128xf32>
    %842 = math.exp %841 : vector<8x128xf32>
    %cst_274 = arith.constant 1.000000e+00 : f32
    %843 = vector.broadcast %cst_274 : f32 to vector<8x128xf32>
    %844 = arith.addf %843, %842 : vector<8x128xf32>
    %845 = arith.divf %843, %844 : vector<8x128xf32>
    %846 = vector.extract_strided_slice %839 {offsets = [0, 128], sizes = [8, 128], strides = [1, 1]} : vector<8x512xf32> to vector<8x128xf32>
    %847 = arith.negf %846 : vector<8x128xf32>
    %848 = math.exp %847 : vector<8x128xf32>
    %cst_275 = arith.constant 1.000000e+00 : f32
    %849 = vector.broadcast %cst_275 : f32 to vector<8x128xf32>
    %850 = arith.addf %849, %848 : vector<8x128xf32>
    %851 = arith.divf %849, %850 : vector<8x128xf32>
    %852 = vector.extract_strided_slice %839 {offsets = [0, 256], sizes = [8, 128], strides = [1, 1]} : vector<8x512xf32> to vector<8x128xf32>
    %853 = math.tanh %852 : vector<8x128xf32>
    %854 = vector.extract_strided_slice %839 {offsets = [0, 384], sizes = [8, 128], strides = [1, 1]} : vector<8x512xf32> to vector<8x128xf32>
    %855 = arith.negf %854 : vector<8x128xf32>
    %856 = math.exp %855 : vector<8x128xf32>
    %cst_276 = arith.constant 1.000000e+00 : f32
    %857 = vector.broadcast %cst_276 : f32 to vector<8x128xf32>
    %858 = arith.addf %857, %856 : vector<8x128xf32>
    %859 = arith.divf %857, %858 : vector<8x128xf32>
    %860 = arith.mulf %851, %833 : vector<8x128xf32>
    %861 = arith.mulf %845, %853 : vector<8x128xf32>
    %862 = arith.addf %860, %861 : vector<8x128xf32>
    %863 = math.tanh %862 : vector<8x128xf32>
    %864 = arith.mulf %859, %863 : vector<8x128xf32>
    %c24_277 = arith.constant 24 : index
    %c0_278 = arith.constant 0 : index
    %865 = vector.load %arg12[%c24_277, %c0_278] : memref<64x128xf32, #tpu.memory_space<vmem>>, vector<8x128xf32>
    tpu.vector_store %arg12[%c24_277, %c0_278], %864 {strides = array<i32>} : memref<64x128xf32, #tpu.memory_space<vmem>>, vector<8x128xf32>,
    %c32_279 = arith.constant 32 : index
    %c0_280 = arith.constant 0 : index
    %866 = vector.load %arg11[%c32_279, %c0_280] : memref<64x512xf32, #tpu.memory_space<vmem>>, vector<8x512xf32>
    %cst_281 = arith.constant dense<0.000000e+00> : vector<8x512xf32>
    %867 = tpu.matmul %864, %747, %cst_281 {dimension_numbers = #tpu.dot_dimension_numbers<[1], [0], [0], [1], [0, 0, 1, 1], [], []>} : vector<8x128xf32>, vector<128x512xf32>, vector<8x512xf32> -> vector<8x512xf32>
    %868 = arith.addf %866, %867 : vector<8x512xf32>
    %869 = vector.extract_strided_slice %868 {offsets = [0, 0], sizes = [8, 128], strides = [1, 1]} : vector<8x512xf32> to vector<8x128xf32>
    %870 = arith.negf %869 : vector<8x128xf32>
    %871 = math.exp %870 : vector<8x128xf32>
    %cst_282 = arith.constant 1.000000e+00 : f32
    %872 = vector.broadcast %cst_282 : f32 to vector<8x128xf32>
    %873 = arith.addf %872, %871 : vector<8x128xf32>
    %874 = arith.divf %872, %873 : vector<8x128xf32>
    %875 = vector.extract_strided_slice %868 {offsets = [0, 128], sizes = [8, 128], strides = [1, 1]} : vector<8x512xf32> to vector<8x128xf32>
    %876 = arith.negf %875 : vector<8x128xf32>
    %877 = math.exp %876 : vector<8x128xf32>
    %cst_283 = arith.constant 1.000000e+00 : f32
    %878 = vector.broadcast %cst_283 : f32 to vector<8x128xf32>
    %879 = arith.addf %878, %877 : vector<8x128xf32>
    %880 = arith.divf %878, %879 : vector<8x128xf32>
    %881 = vector.extract_strided_slice %868 {offsets = [0, 256], sizes = [8, 128], strides = [1, 1]} : vector<8x512xf32> to vector<8x128xf32>
    %882 = math.tanh %881 : vector<8x128xf32>
    %883 = vector.extract_strided_slice %868 {offsets = [0, 384], sizes = [8, 128], strides = [1, 1]} : vector<8x512xf32> to vector<8x128xf32>
    %884 = arith.negf %883 : vector<8x128xf32>
    %885 = math.exp %884 : vector<8x128xf32>
    %cst_284 = arith.constant 1.000000e+00 : f32
    %886 = vector.broadcast %cst_284 : f32 to vector<8x128xf32>
    %887 = arith.addf %886, %885 : vector<8x128xf32>
    %888 = arith.divf %886, %887 : vector<8x128xf32>
    %889 = arith.mulf %880, %862 : vector<8x128xf32>
    %890 = arith.mulf %874, %882 : vector<8x128xf32>
    %891 = arith.addf %889, %890 : vector<8x128xf32>
    %892 = math.tanh %891 : vector<8x128xf32>
    %893 = arith.mulf %888, %892 : vector<8x128xf32>
    %c32_285 = arith.constant 32 : index
    %c0_286 = arith.constant 0 : index
    %894 = vector.load %arg12[%c32_285, %c0_286] : memref<64x128xf32, #tpu.memory_space<vmem>>, vector<8x128xf32>
    tpu.vector_store %arg12[%c32_285, %c0_286], %893 {strides = array<i32>} : memref<64x128xf32, #tpu.memory_space<vmem>>, vector<8x128xf32>,
    %c40_287 = arith.constant 40 : index
    %c0_288 = arith.constant 0 : index
    %895 = vector.load %arg11[%c40_287, %c0_288] : memref<64x512xf32, #tpu.memory_space<vmem>>, vector<8x512xf32>
    %cst_289 = arith.constant dense<0.000000e+00> : vector<8x512xf32>
    %896 = tpu.matmul %893, %747, %cst_289 {dimension_numbers = #tpu.dot_dimension_numbers<[1], [0], [0], [1], [0, 0, 1, 1], [], []>} : vector<8x128xf32>, vector<128x512xf32>, vector<8x512xf32> -> vector<8x512xf32>
    %897 = arith.addf %895, %896 : vector<8x512xf32>
    %898 = vector.extract_strided_slice %897 {offsets = [0, 0], sizes = [8, 128], strides = [1, 1]} : vector<8x512xf32> to vector<8x128xf32>
    %899 = arith.negf %898 : vector<8x128xf32>
    %900 = math.exp %899 : vector<8x128xf32>
    %cst_290 = arith.constant 1.000000e+00 : f32
    %901 = vector.broadcast %cst_290 : f32 to vector<8x128xf32>
    %902 = arith.addf %901, %900 : vector<8x128xf32>
    %903 = arith.divf %901, %902 : vector<8x128xf32>
    %904 = vector.extract_strided_slice %897 {offsets = [0, 128], sizes = [8, 128], strides = [1, 1]} : vector<8x512xf32> to vector<8x128xf32>
    %905 = arith.negf %904 : vector<8x128xf32>
    %906 = math.exp %905 : vector<8x128xf32>
    %cst_291 = arith.constant 1.000000e+00 : f32
    %907 = vector.broadcast %cst_291 : f32 to vector<8x128xf32>
    %908 = arith.addf %907, %906 : vector<8x128xf32>
    %909 = arith.divf %907, %908 : vector<8x128xf32>
    %910 = vector.extract_strided_slice %897 {offsets = [0, 256], sizes = [8, 128], strides = [1, 1]} : vector<8x512xf32> to vector<8x128xf32>
    %911 = math.tanh %910 : vector<8x128xf32>
    %912 = vector.extract_strided_slice %897 {offsets = [0, 384], sizes = [8, 128], strides = [1, 1]} : vector<8x512xf32> to vector<8x128xf32>
    %913 = arith.negf %912 : vector<8x128xf32>
    %914 = math.exp %913 : vector<8x128xf32>
    %cst_292 = arith.constant 1.000000e+00 : f32
    %915 = vector.broadcast %cst_292 : f32 to vector<8x128xf32>
    %916 = arith.addf %915, %914 : vector<8x128xf32>
    %917 = arith.divf %915, %916 : vector<8x128xf32>
    %918 = arith.mulf %909, %891 : vector<8x128xf32>
    %919 = arith.mulf %903, %911 : vector<8x128xf32>
    %920 = arith.addf %918, %919 : vector<8x128xf32>
    %921 = math.tanh %920 : vector<8x128xf32>
    %922 = arith.mulf %917, %921 : vector<8x128xf32>
    %c40_293 = arith.constant 40 : index
    %c0_294 = arith.constant 0 : index
    %923 = vector.load %arg12[%c40_293, %c0_294] : memref<64x128xf32, #tpu.memory_space<vmem>>, vector<8x128xf32>
    tpu.vector_store %arg12[%c40_293, %c0_294], %922 {strides = array<i32>} : memref<64x128xf32, #tpu.memory_space<vmem>>, vector<8x128xf32>,
    %c48_295 = arith.constant 48 : index
    %c0_296 = arith.constant 0 : index
    %924 = vector.load %arg11[%c48_295, %c0_296] : memref<64x512xf32, #tpu.memory_space<vmem>>, vector<8x512xf32>
    %cst_297 = arith.constant dense<0.000000e+00> : vector<8x512xf32>
    %925 = tpu.matmul %922, %747, %cst_297 {dimension_numbers = #tpu.dot_dimension_numbers<[1], [0], [0], [1], [0, 0, 1, 1], [], []>} : vector<8x128xf32>, vector<128x512xf32>, vector<8x512xf32> -> vector<8x512xf32>
    %926 = arith.addf %924, %925 : vector<8x512xf32>
    %927 = vector.extract_strided_slice %926 {offsets = [0, 0], sizes = [8, 128], strides = [1, 1]} : vector<8x512xf32> to vector<8x128xf32>
    %928 = arith.negf %927 : vector<8x128xf32>
    %929 = math.exp %928 : vector<8x128xf32>
    %cst_298 = arith.constant 1.000000e+00 : f32
    %930 = vector.broadcast %cst_298 : f32 to vector<8x128xf32>
    %931 = arith.addf %930, %929 : vector<8x128xf32>
    %932 = arith.divf %930, %931 : vector<8x128xf32>
    %933 = vector.extract_strided_slice %926 {offsets = [0, 128], sizes = [8, 128], strides = [1, 1]} : vector<8x512xf32> to vector<8x128xf32>
    %934 = arith.negf %933 : vector<8x128xf32>
    %935 = math.exp %934 : vector<8x128xf32>
    %cst_299 = arith.constant 1.000000e+00 : f32
    %936 = vector.broadcast %cst_299 : f32 to vector<8x128xf32>
    %937 = arith.addf %936, %935 : vector<8x128xf32>
    %938 = arith.divf %936, %937 : vector<8x128xf32>
    %939 = vector.extract_strided_slice %926 {offsets = [0, 256], sizes = [8, 128], strides = [1, 1]} : vector<8x512xf32> to vector<8x128xf32>
    %940 = math.tanh %939 : vector<8x128xf32>
    %941 = vector.extract_strided_slice %926 {offsets = [0, 384], sizes = [8, 128], strides = [1, 1]} : vector<8x512xf32> to vector<8x128xf32>
    %942 = arith.negf %941 : vector<8x128xf32>
    %943 = math.exp %942 : vector<8x128xf32>
    %cst_300 = arith.constant 1.000000e+00 : f32
    %944 = vector.broadcast %cst_300 : f32 to vector<8x128xf32>
    %945 = arith.addf %944, %943 : vector<8x128xf32>
    %946 = arith.divf %944, %945 : vector<8x128xf32>
    %947 = arith.mulf %938, %920 : vector<8x128xf32>
    %948 = arith.mulf %932, %940 : vector<8x128xf32>
    %949 = arith.addf %947, %948 : vector<8x128xf32>
    %950 = math.tanh %949 : vector<8x128xf32>
    %951 = arith.mulf %946, %950 : vector<8x128xf32>
    %c48_301 = arith.constant 48 : index
    %c0_302 = arith.constant 0 : index
    %952 = vector.load %arg12[%c48_301, %c0_302] : memref<64x128xf32, #tpu.memory_space<vmem>>, vector<8x128xf32>
    tpu.vector_store %arg12[%c48_301, %c0_302], %951 {strides = array<i32>} : memref<64x128xf32, #tpu.memory_space<vmem>>, vector<8x128xf32>,
    %c56_303 = arith.constant 56 : index
    %c0_304 = arith.constant 0 : index
    %953 = vector.load %arg11[%c56_303, %c0_304] : memref<64x512xf32, #tpu.memory_space<vmem>>, vector<8x512xf32>
    %cst_305 = arith.constant dense<0.000000e+00> : vector<8x512xf32>
    %954 = tpu.matmul %951, %747, %cst_305 {dimension_numbers = #tpu.dot_dimension_numbers<[1], [0], [0], [1], [0, 0, 1, 1], [], []>} : vector<8x128xf32>, vector<128x512xf32>, vector<8x512xf32> -> vector<8x512xf32>
    %955 = arith.addf %953, %954 : vector<8x512xf32>
    %956 = vector.extract_strided_slice %955 {offsets = [0, 0], sizes = [8, 128], strides = [1, 1]} : vector<8x512xf32> to vector<8x128xf32>
    %957 = arith.negf %956 : vector<8x128xf32>
    %958 = math.exp %957 : vector<8x128xf32>
    %cst_306 = arith.constant 1.000000e+00 : f32
    %959 = vector.broadcast %cst_306 : f32 to vector<8x128xf32>
    %960 = arith.addf %959, %958 : vector<8x128xf32>
    %961 = arith.divf %959, %960 : vector<8x128xf32>
    %962 = vector.extract_strided_slice %955 {offsets = [0, 128], sizes = [8, 128], strides = [1, 1]} : vector<8x512xf32> to vector<8x128xf32>
    %963 = arith.negf %962 : vector<8x128xf32>
    %964 = math.exp %963 : vector<8x128xf32>
    %cst_307 = arith.constant 1.000000e+00 : f32
    %965 = vector.broadcast %cst_307 : f32 to vector<8x128xf32>
    %966 = arith.addf %965, %964 : vector<8x128xf32>
    %967 = arith.divf %965, %966 : vector<8x128xf32>
    %968 = vector.extract_strided_slice %955 {offsets = [0, 256], sizes = [8, 128], strides = [1, 1]} : vector<8x512xf32> to vector<8x128xf32>
    %969 = math.tanh %968 : vector<8x128xf32>
    %970 = vector.extract_strided_slice %955 {offsets = [0, 384], sizes = [8, 128], strides = [1, 1]} : vector<8x512xf32> to vector<8x128xf32>
    %971 = arith.negf %970 : vector<8x128xf32>
    %972 = math.exp %971 : vector<8x128xf32>
    %cst_308 = arith.constant 1.000000e+00 : f32
    %973 = vector.broadcast %cst_308 : f32 to vector<8x128xf32>
    %974 = arith.addf %973, %972 : vector<8x128xf32>
    %975 = arith.divf %973, %974 : vector<8x128xf32>
    %976 = arith.mulf %967, %949 : vector<8x128xf32>
    %977 = arith.mulf %961, %969 : vector<8x128xf32>
    %978 = arith.addf %976, %977 : vector<8x128xf32>
    %979 = math.tanh %978 : vector<8x128xf32>
    %980 = arith.mulf %975, %979 : vector<8x128xf32>
    %c56_309 = arith.constant 56 : index
    %c0_310 = arith.constant 0 : index
    %981 = vector.load %arg12[%c56_309, %c0_310] : memref<64x128xf32, #tpu.memory_space<vmem>>, vector<8x128xf32>
    tpu.vector_store %arg12[%c56_309, %c0_310], %980 {strides = array<i32>} : memref<64x128xf32, #tpu.memory_space<vmem>>, vector<8x128xf32>,
    %c0_311 = arith.constant 0 : index
    %c384 = arith.constant 384 : index
    %982 = vector.load %arg13[%c0_311, %c384] : memref<8x512xf32, #tpu.memory_space<vmem>>, vector<8x128xf32>
    tpu.vector_store %arg13[%c0_311, %c384], %980 {strides = array<i32>} : memref<8x512xf32, #tpu.memory_space<vmem>>, vector<8x128xf32>,
    %c0_312 = arith.constant 0 : index
    %c0_313 = arith.constant 0 : index
    %983 = vector.load %arg13[%c0_312, %c0_313] : memref<8x512xf32, #tpu.memory_space<vmem>>, vector<8x512xf32>
    %c0_314 = arith.constant 0 : index
    %c0_315 = arith.constant 0 : index
    %984 = vector.load %arg6[%c0_314, %c0_315] : memref<512x128xf32, #tpu.memory_space<vmem>>, vector<512x128xf32>
    %cst_316 = arith.constant dense<0.000000e+00> : vector<8x128xf32>
    %985 = tpu.matmul %983, %984, %cst_316 {dimension_numbers = #tpu.dot_dimension_numbers<[1], [0], [0], [1], [0, 0, 1, 1], [], []>} : vector<8x512xf32>, vector<512x128xf32>, vector<8x128xf32> -> vector<8x128xf32>
    %c0_317 = arith.constant 0 : index
    %c0_318 = arith.constant 0 : index
    %986 = vector.load %arg7[%c0_317, %c0_318] : memref<1x128xf32, #tpu.memory_space<vmem>>, vector<1x128xf32>
    %987 = vector.broadcast %986 : vector<1x128xf32> to vector<8x128xf32>
    %988 = arith.addf %985, %987 : vector<8x128xf32>
    %cst_319 = arith.constant 0.000000e+00 : f32
    %989 = vector.broadcast %cst_319 : f32 to vector<8x128xf32>
    %990 = arith.maximumf %988, %989 : vector<8x128xf32>
    %c0_320 = arith.constant 0 : index
    %c0_321 = arith.constant 0 : index
    %991 = vector.load %arg8[%c0_320, %c0_321] : memref<128x128xf32, #tpu.memory_space<vmem>>, vector<128x128xf32>
    %cst_322 = arith.constant dense<0.000000e+00> : vector<8x128xf32>
    %992 = tpu.matmul %990, %991, %cst_322 {dimension_numbers = #tpu.dot_dimension_numbers<[1], [0], [0], [1], [0, 0, 1, 1], [], []>} : vector<8x128xf32>, vector<128x128xf32>, vector<8x128xf32> -> vector<8x128xf32>
    %c0_323 = arith.constant 0 : index
    %c0_324 = arith.constant 0 : index
    %993 = vector.load %arg9[%c0_323, %c0_324] : memref<1x128xf32, #tpu.memory_space<vmem>>, vector<1x128xf32>
    %994 = vector.broadcast %993 : vector<1x128xf32> to vector<8x128xf32>
    %995 = arith.addf %992, %994 : vector<8x128xf32>
    %996 = tpu.iota {dimensions = array<i32: 1>} : vector<8x128xi32>
    %c2_i32 = arith.constant 2 : i32
    %997 = vector.broadcast %c2_i32 : i32 to vector<8x128xi32>
    %998 = arith.cmpi slt, %996, %997 : vector<8x128xi32>
    %cst_325 = arith.constant -1.000000e+30 : f32
    %999 = vector.broadcast %cst_325 : f32 to vector<8x128xf32>
    %1000 = arith.select %998, %995, %999 : vector<8x128xi1>, vector<8x128xf32>
    %cst_326 = arith.constant dense<0xFF800000> : vector<8xf32>
    %1001 = vector.multi_reduction <maximumf>, %1000, %cst_326 [1] : vector<8x128xf32> to vector<8xf32>
    %cst_327 = arith.constant 0xFF800000 : f32
    %1002 = vector.broadcast %cst_327 : f32 to vector<8xf32>
    %1003 = arith.maximumf %1002, %1001 : vector<8xf32>
    %1004 = vector.shape_cast %1003 : vector<8xf32> to vector<8x1xf32>
    %1005 = vector.broadcast %1004 : vector<8x1xf32> to vector<8x128xf32>
    %1006 = arith.subf %1000, %1005 : vector<8x128xf32>
    %1007 = math.exp %1006 : vector<8x128xf32>
    %cst_328 = arith.constant dense<0.000000e+00> : vector<8xf32>
    %1008 = vector.multi_reduction <add>, %1007, %cst_328 [1] : vector<8x128xf32> to vector<8xf32>
    %1009 = vector.shape_cast %1008 : vector<8xf32> to vector<8x1xf32>
    %1010 = vector.broadcast %1009 : vector<8x1xf32> to vector<8x128xf32>
    %1011 = arith.divf %1007, %1010 : vector<8x128xf32>
    %c0_329 = arith.constant 0 : index
    %c0_330 = arith.constant 0 : index
    %1012 = vector.load %arg10[%c0_329, %c0_330] : memref<8x128xf32, #tpu.memory_space<vmem>>, vector<8x128xf32>
    tpu.vector_store %arg10[%c0_329, %c0_330], %1011 {strides = array<i32>} : memref<8x128xf32, #tpu.memory_space<vmem>>, vector<8x128xf32>,
    return
  }
  func.func @transform_0(%arg0: i32) -> (i32, i32) {
    %c0_i32 = arith.constant 0 : i32
    %c0_i32_0 = arith.constant 0 : i32
    %c0_i32_1 = arith.constant 0 : i32
    return %c0_i32, %c0_i32_0 : i32, i32
  }
  func.func @transform_1(%arg0: i32) -> (i32, i32) {
    %c0_i32 = arith.constant 0 : i32
    %c0_i32_0 = arith.constant 0 : i32
    %c0_i32_1 = arith.constant 0 : i32
    return %c0_i32, %c0_i32_0 : i32, i32
  }
  func.func @transform_2(%arg0: i32) -> (i32, i32, i32) {
    %c0_i32 = arith.constant 0 : i32
    %c0_i32_0 = arith.constant 0 : i32
    %c0_i32_1 = arith.constant 0 : i32
    %c0_i32_2 = arith.constant 0 : i32
    return %c0_i32, %c0_i32_0, %c0_i32_1 : i32, i32, i32
  }
  func.func @transform_3(%arg0: i32) -> (i32, i32, i32) {
    %c0_i32 = arith.constant 0 : i32
    %c0_i32_0 = arith.constant 0 : i32
    %c0_i32_1 = arith.constant 0 : i32
    %c0_i32_2 = arith.constant 0 : i32
    return %c0_i32, %c0_i32_0, %c0_i32_1 : i32, i32, i32
  }
  func.func @transform_4(%arg0: i32) -> (i32, i32, i32) {
    %c0_i32 = arith.constant 0 : i32
    %c0_i32_0 = arith.constant 0 : i32
    %c0_i32_1 = arith.constant 0 : i32
    %c0_i32_2 = arith.constant 0 : i32
    return %c0_i32, %c0_i32_0, %c0_i32_1 : i32, i32, i32
  }
  func.func @transform_5(%arg0: i32) -> (i32, i32) {
    %c0_i32 = arith.constant 0 : i32
    %c0_i32_0 = arith.constant 0 : i32
    %c0_i32_1 = arith.constant 0 : i32
    return %c0_i32, %c0_i32_0 : i32, i32
  }
  func.func @transform_6(%arg0: i32) -> (i32, i32) {
    %c0_i32 = arith.constant 0 : i32
    %c0_i32_0 = arith.constant 0 : i32
    %c0_i32_1 = arith.constant 0 : i32
    return %c0_i32, %c0_i32_0 : i32, i32
  }
  func.func @transform_7(%arg0: i32) -> (i32, i32) {
    %c0_i32 = arith.constant 0 : i32
    %c0_i32_0 = arith.constant 0 : i32
    %c0_i32_1 = arith.constant 0 : i32
    return %c0_i32, %c0_i32_0 : i32, i32
  }
  func.func @transform_8(%arg0: i32) -> (i32, i32) {
    %c0_i32 = arith.constant 0 : i32
    %c0_i32_0 = arith.constant 0 : i32
    %c0_i32_1 = arith.constant 0 : i32
    return %c0_i32, %c0_i32_0 : i32, i32
  }
  func.func @transform_9(%arg0: i32) -> (i32, i32) {
    %c0_i32 = arith.constant 0 : i32
    %c0_i32_0 = arith.constant 0 : i32
    %c0_i32_1 = arith.constant 0 : i32
    return %c0_i32, %c0_i32_0 : i32, i32
  }
}

</mosaic_0001>

<bundles_post_ra>
// kernel: model_forward.1
= control target key start
LH: loop header
LB: loop body
LE: loop exit
PB: predicated region body
PF: predicated region fallthrough
CT: control target
= control target key end

     0   :  { %14 = vsyncpa [#allocation6], 0  ;;  %s13980_s0 = inlined_call_operand.vmem [shape: f32[64,384], index: 0, kind: input, shape index: {}]   ;;  %s13981_s1 = inlined_call_operand.hbm [shape: f32[384,512], index: 1, kind: input, shape index: {}]   ;;  %s13982_s2 = inlined_call_operand.hbm [shape: f32[3,128,512], index: 2, kind: input, shape index: {}]   ;;  %s13983_s3 = inlined_call_operand.hbm [shape: f32[4,128,512], index: 3, kind: input, shape index: {}]   ;;  %s13984_s4 = inlined_call_operand.vmem [shape: f32[4,1,512], index: 4, kind: input, shape index: {}]   ;;  %s13985_s5 = inlined_call_operand.vmem [shape: f32[512,128], index: 5, kind: input, shape index: {}]   ;;  %s13986_s6 = inlined_call_operand.vmem [shape: f32[1,128], index: 6, kind: input, shape index: {}]   ;;  %s13987_s7 = inlined_call_operand.vmem [shape: f32[128,128], index: 7, kind: input, shape index: {}]   ;;  %s13988_s8 = inlined_call_operand.vmem [shape: f32[1,128], index: 8, kind: input, shape index: {}]   ;;  %s13989_s9 = inlined_call_operand.vmem [shape: f32[8,128], index: 9, kind: output, shape index: {}]  }
   0x1   :  { %15 = vsyncpa [#allocation8], 0  ;;  %s11673_s30 = smov [#allocation7]   ;;  %s11674_s11 = smov [#allocation5]  }
   0x2   :  { %s35_s10 = sshll.u32 %s11673_s30, 4  ;;  %s23_s12 = sshll.u32 %s11674_s11, 4  ;;  %s36_s10 = int_to_ptr.vmem [resolvable:$true] %s35_s10  ;;  %s11731_s12 = int_to_ptr.vmem [resolvable:$true] %s23_s12 }
   0x3   :  { %s11603_s15 = scalar_lea.hbm %s13982_s2, 24576 }
   0x4   :  { %p11604_p0 = scmp.ne.s32.totalorder %s13982_s2, %s11603_s15  ;;  %p11607_p1 = scmp.lt.u32.totalorder %s11603_s15, %s13982_s2 }
   0x6   :  { %p11609_p2 = pnand %p11607_p1, %p11604_p0 }
   0x8   :  { %11612 = shalt.err (!%p11609_p2)
}
   0x9   :  { %s11613_s20 = scalar_lea.vmem %s36_s10, 24576  ;;  %p11618_p4 = scmp.lt.s32.totalorder %s36_s10, %s36_s10 }
   0xa   :  { %p11614_p3 = scmp.ne.s32.totalorder %s36_s10, %s11613_s20  ;;  %p11619_p5 = scmp.lt.s32.totalorder %s11613_s20, %s11613_s20 }
   0xc   :  { %p11620_p6 = por %p11619_p5, %p11618_p4 }
   0xe   :  { %p11621_p7 = pnand %p11620_p6, %p11614_p3 }
  0x10   :  { %11624 = shalt.err (!%p11621_p7)
}
  0x11   :  { %s11675_s21 = smov 512   ;;  %s11676_s22 = smov 32  }
  0x12   :  { %41 = dma.hbm_to_vmem [thread:$0]  %s13982_s2, 24576, %s36_s10, [#allocation8], %s11675_s21, %s11675_s21, %s11676_s22  }
  0x13   :  { %s11625_s27 = scalar_lea.hbm %s13981_s1, 24576 }
  0x14   :  { %p11626_p8 = scmp.ne.s32.totalorder %s13981_s1, %s11625_s27  ;;  %p11629_p9 = scmp.lt.u32.totalorder %s11625_s27, %s13981_s1 }
  0x16   :  { %p11631_p10 = pnand %p11629_p9, %p11626_p8 }
  0x18   :  { %11634 = shalt.err (!%p11631_p10)
}
  0x19   :  { %s11635_s13 = scalar_lea.vmem %s11731_s12, 24576  ;;  %p11640_p12 = scmp.lt.s32.totalorder %s11731_s12, %s11731_s12 }
  0x1a   :  { %p11636_p11 = scmp.ne.s32.totalorder %s11731_s12, %s11635_s13  ;;  %p11641_p13 = scmp.lt.s32.totalorder %s11635_s13, %s11635_s13 }
  0x1c   :  { %p11642_p0 = por %p11641_p13, %p11640_p12 }
  0x1e   :  { %p11643_p1 = pnand %p11642_p0, %p11636_p11 }
  0x20   :  { %11646 = shalt.err (!%p11643_p1)
}
  0x21   :  { %29 = dma.hbm_to_vmem [thread:$0]  %s13981_s1, 24576, %s11731_s12, [#allocation6], %s11675_s21, %s11675_s21, %s11676_s22  }
  0x22   :  { %s11677_s14 = smov [#allocation9]   ;;  %s11647_s18 = scalar_lea.hbm %s13983_s3, 32768 }
  0x23   :  { %s47_s15 = sshll.u32 %s11677_s14, 4  ;;  %p11648_p2 = scmp.ne.s32.totalorder %s13983_s3, %s11647_s18  ;;  %s48_s15 = int_to_ptr.vmem [resolvable:$true] %s47_s15 }
  0x24   :  { %p11651_p3 = scmp.lt.u32.totalorder %s11647_s18, %s13983_s3 }
  0x26   :  { %p11653_p4 = pnand %p11651_p3, %p11648_p2 }
  0x28   :  { %11656 = shalt.err (!%p11653_p4)
}
  0x29   :  { %s11657_s25 = scalar_lea.vmem %s48_s15, 32768  ;;  %p11662_p6 = scmp.lt.s32.totalorder %s48_s15, %s48_s15 }
  0x2a   :  { %p11658_p5 = scmp.ne.s32.totalorder %s48_s15, %s11657_s25  ;;  %p11663_p7 = scmp.lt.s32.totalorder %s11657_s25, %s11657_s25 }
  0x2c   :  { %p11664_p8 = por %p11663_p7, %p11662_p6 }
  0x2e   :  { %p11665_p9 = pnand %p11664_p8, %p11658_p5 }
  0x30   :  { %11668 = shalt.err (!%p11665_p9)
}
  0x31   :  { %53 = dma.hbm_to_vmem [thread:$0]  %s13983_s3, 32768, %s48_s15, [#allocation8], %s11675_s21, %s11675_s21, %s11676_s22  }
  0x32   :  { %11669 = dma.done.wait [#allocation6], 24576  }
  0x33   :  { %11670 = vsyncadd [#allocation6], 4294942720 }
  0x34   :  { %11671 = dma.done.wait [#allocation8], 57344  }
  0x35   :  { %11672 = vsyncadd [#allocation8], 4294909952  ;;  %v98_v0 = vld [vmem:[#allocation5 + $0x8] sm:$0xff]  ;;  %v100_v2 = vld [vmem:[#allocation5 + $0x18] sm:$0xff]  ;;  %vm11680_vm0 = vmmov 0  }
  0x36   :  { %v102_v1 = vld [vmem:[#allocation5 + $0x28] sm:$0xff]  ;;  %v104_v4 = vld [vmem:[#allocation5 + $0x38] sm:$0xff]  ;;  %v97_v5 = vld [vmem:[#allocation5] sm:$0xff] }
  0x37   :  { %v8271_v3 = vpack.c.bf16 %v102_v1, %v98_v0  ;;  %v101_v6 = vld [vmem:[#allocation5 + $0x20] sm:$0xff]  ;;  %v8367_v7 = vpack.c.bf16 %v104_v4, %v100_v2  ;;  %v99_v9 = vld [vmem:[#allocation5 + $0x10] sm:$0xff]  ;;  %v106_v11 = vld [vmem:[#allocation5 + $0x48] sm:$0xff] }
  0x38   :  { %v8273_v8 = vpack.c.bf16 %v101_v6, %v97_v5  ;;  %v103_v10 = vld [vmem:[#allocation5 + $0x30] sm:$0xff]  ;;  %v110_v13 = vld [vmem:[#allocation5 + $0x68] sm:$0xff]  ;;  %v108_v14 = vld [vmem:[#allocation5 + $0x58] sm:$0xff] }
  0x39   :  { %8272 = vmatprep.subr.bf16.mxu0 %v8271_v3  ;;  %v8369_v12 = vpack.c.bf16 %v103_v10, %v99_v9  ;;  %v112_v15 = vld [vmem:[#allocation5 + $0x78] sm:$0xff]  ;;  %8368 = vmatprep.subr.bf16.mxu1 %v8367_v7  ;;  %v8275_v16 = vpack.c.bf16 %v110_v13, %v106_v11  ;;  %v105_v18 = vld [vmem:[#allocation5 + $0x40] sm:$0xff]  ;;  %v107_v20 = vld [vmem:[#allocation5 + $0x50] sm:$0xff] }
  0x3a   :  { %8274 = vmatpush1.bf16.msra.mxu0 %v8273_v8  ;;  %v8371_v17 = vpack.c.bf16 %v112_v15, %v108_v14  ;;  %v109_v19 = vld [vmem:[#allocation5 + $0x60] sm:$0xff]  ;;  %v111_v22 = vld [vmem:[#allocation5 + $0x70] sm:$0xff]  ;;  %v114_v23 = vld [vmem:[#allocation5 + $0x88] sm:$0xff] }
  0x3b   :  { %8370 = vmatpush1.bf16.msra.mxu1 %v8369_v12  ;;  %v8277_v21 = vpack.c.bf16 %v109_v19, %v105_v18  ;;  %v118_v24 = vld [vmem:[#allocation5 + $0xa8] sm:$0xff]  ;;  %8276 = vmatprep.subr.bf16.mxu0 %v8275_v16  ;;  %v8373_v25 = vpack.c.bf16 %v111_v22, %v107_v20  ;;  %v116_v27 = vld [vmem:[#allocation5 + $0x98] sm:$0xff]  ;;  %v113_v29 = vld [vmem:[#allocation5 + $0x80] sm:$0xff] }
  0x3c   :  { %8372 = vmatprep.subr.bf16.mxu1 %v8371_v17  ;;  %v8279_v26 = vpack.c.bf16 %v118_v24, %v114_v23  ;;  %v120_v28 = vld [vmem:[#allocation5 + $0xb8] sm:$0xff]  ;;  %v117_v31 = vld [vmem:[#allocation5 + $0xa0] sm:$0xff]  ;;  %v115_v32 = vld [vmem:[#allocation5 + $0x90] sm:$0xff] }
  0x3d   :  { %v8375_v30 = vpack.c.bf16 %v120_v28, %v116_v27  ;;  %v119_v33 = vld [vmem:[#allocation5 + $0xb0] sm:$0xff]  ;;  %v8281_v34 = vpack.c.bf16 %v117_v31, %v113_v29  ;;  %v122_v35 = vld [vmem:[#allocation5 + $0xc8] sm:$0xff]  ;;  %v124_v37 = vld [vmem:[#allocation5 + $0xd8] sm:$0xff] }
  0x3e   :  { %8278 = vmatpush1.bf16.msra.mxu0 %v8277_v21  ;;  %v126_v36 = vld [vmem:[#allocation5 + $0xe8] sm:$0xff]  ;;  %v8377_v38 = vpack.c.bf16 %v119_v33, %v115_v32  ;;  %v128_v40 = vld [vmem:[#allocation5 + $0xf8] sm:$0xff]  ;;  %v121_v41 = vld [vmem:[#allocation5 + $0xc0] sm:$0xff] }
  0x3f   :  { %8374 = vmatpush1.bf16.msra.mxu1 %v8373_v25  ;;  %8280 = vmatprep.subr.bf16.mxu0 %v8279_v26  ;;  %v8283_v39 = vpack.c.bf16 %v126_v36, %v122_v35  ;;  %v125_v42 = vld [vmem:[#allocation5 + $0xe0] sm:$0xff]  ;;  %v8379_v43 = vpack.c.bf16 %v128_v40, %v124_v37  ;;  %v123_v44 = vld [vmem:[#allocation5 + $0xd0] sm:$0xff]  ;;  %v130_v46 = vld [vmem:[#allocation5 + $0x108] sm:$0xff] }
  0x40   :  { %8376 = vmatprep.subr.bf16.mxu1 %v8375_v30  ;;  %v127_v45 = vld [vmem:[#allocation5 + $0xf0] sm:$0xff]  ;;  %v134_v47 = vld [vmem:[#allocation5 + $0x128] sm:$0xff]  ;;  %v132_v48 = vld [vmem:[#allocation5 + $0x118] sm:$0xff]  ;;  %v8285_v50 = vpack.c.bf16 %v125_v42, %v121_v41 }
  0x41   :  { %v136_v49 = vld [vmem:[#allocation5 + $0x138] sm:$0xff]  ;;  %v8381_v51 = vpack.c.bf16 %v127_v45, %v123_v44  ;;  %v8287_v52 = vpack.c.bf16 %v134_v47, %v130_v46  ;;  %v129_v53 = vld [vmem:[#allocation5 + $0x100] sm:$0xff]  ;;  %v131_v55 = vld [vmem:[#allocation5 + $0x110] sm:$0xff] }
  0x42   :  { %8282 = vmatpush1.bf16.msra.mxu0 %v8281_v34  ;;  %v133_v54 = vld [vmem:[#allocation5 + $0x120] sm:$0xff]  ;;  %v8383_v56 = vpack.c.bf16 %v136_v49, %v132_v48  ;;  %v135_v57 = vld [vmem:[#allocation5 + $0x130] sm:$0xff]  ;;  %v138_v58 = vld [vmem:[#allocation5 + $0x148] sm:$0xff] }
  0x43   :  { %8378 = vmatpush1.bf16.msra.mxu1 %v8377_v38  ;;  %8284 = vmatprep.subr.bf16.mxu0 %v8283_v39  ;;  %v142_v59 = vld [vmem:[#allocation5 + $0x168] sm:$0xff]  ;;  %v140_v60 = vld [vmem:[#allocation5 + $0x158] sm:$0xff]  ;;  %v8289_v62 = vpack.c.bf16 %v133_v54, %v129_v53  ;;  %v8385_v63 = vpack.c.bf16 %v135_v57, %v131_v55  ;;  %v137_v1 = vld [vmem:[#allocation5 + $0x140] sm:$0xff] }
  0x44   :  { %8380 = vmatprep.subr.bf16.mxu1 %v8379_v43  ;;  %v144_v61 = vld [vmem:[#allocation5 + $0x178] sm:$0xff]  ;;  %v8291_v0 = vpack.c.bf16 %v142_v59, %v138_v58  ;;  %v141_v2 = vld [vmem:[#allocation5 + $0x160] sm:$0xff]  ;;  %v139_v3 = vld [vmem:[#allocation5 + $0x150] sm:$0xff] }
  0x45   :  { %v8387_v4 = vpack.c.bf16 %v144_v61, %v140_v60  ;;  %v143_v5 = vld [vmem:[#allocation5 + $0x170] sm:$0xff]  ;;  %v146_v6 = vld [vmem:[#allocation5 + $0x188] sm:$0xff]  ;;  %v148_v8 = vld [vmem:[#allocation5 + $0x198] sm:$0xff]  ;;  %v8293_v10 = vpack.c.bf16 %v141_v2, %v137_v1 }
  0x46   :  { %8286 = vmatpush1.bf16.msra.mxu0 %v8285_v50  ;;  %v150_v7 = vld [vmem:[#allocation5 + $0x1a8] sm:$0xff]  ;;  %v152_v9 = vld [vmem:[#allocation5 + $0x1b8] sm:$0xff]  ;;  %v8389_v11 = vpack.c.bf16 %v143_v5, %v139_v3  ;;  %v145_v13 = vld [vmem:[#allocation5 + $0x180] sm:$0xff] }
  0x47   :  { %8382 = vmatpush1.bf16.msra.mxu1 %v8381_v51  ;;  %8288 = vmatprep.subr.bf16.mxu0 %v8287_v52  ;;  %v8295_v12 = vpack.c.bf16 %v150_v7, %v146_v6  ;;  %v149_v14 = vld [vmem:[#allocation5 + $0x1a0] sm:$0xff]  ;;  %v147_v15 = vld [vmem:[#allocation5 + $0x190] sm:$0xff]  ;;  %v8391_v16 = vpack.c.bf16 %v152_v9, %v148_v8  ;;  %v154_v18 = vld [vmem:[#allocation5 + $0x1c8] sm:$0xff] }
  0x48   :  { %8384 = vmatprep.subr.bf16.mxu1 %v8383_v56  ;;  %v151_v17 = vld [vmem:[#allocation5 + $0x1b0] sm:$0xff]  ;;  %v158_v19 = vld [vmem:[#allocation5 + $0x1e8] sm:$0xff]  ;;  %v156_v20 = vld [vmem:[#allocation5 + $0x1d8] sm:$0xff]  ;;  %v8297_v22 = vpack.c.bf16 %v149_v14, %v145_v13 }
  0x49   :  { %v160_v21 = vld [vmem:[#allocation5 + $0x1f8] sm:$0xff]  ;;  %v8393_v23 = vpack.c.bf16 %v151_v17, %v147_v15  ;;  %v8299_v24 = vpack.c.bf16 %v158_v19, %v154_v18  ;;  %v153_v25 = vld [vmem:[#allocation5 + $0x1c0] sm:$0xff]  ;;  %v155_v27 = vld [vmem:[#allocation5 + $0x1d0] sm:$0xff] }
  0x4a   :  { %8290 = vmatpush1.bf16.msra.mxu0 %v8289_v62  ;;  %v157_v26 = vld [vmem:[#allocation5 + $0x1e0] sm:$0xff]  ;;  %v8395_v28 = vpack.c.bf16 %v160_v21, %v156_v20  ;;  %v159_v29 = vld [vmem:[#allocation5 + $0x1f0] sm:$0xff]  ;;  %v162_v30 = vld [vmem:[#allocation5 + $0x208] sm:$0xff] }
  0x4b   :  { %8386 = vmatpush1.bf16.msra.mxu1 %v8385_v63  ;;  %8292 = vmatprep.subr.bf16.mxu0 %v8291_v0  ;;  %v166_v31 = vld [vmem:[#allocation5 + $0x228] sm:$0xff]  ;;  %v164_v32 = vld [vmem:[#allocation5 + $0x218] sm:$0xff]  ;;  %v8301_v34 = vpack.c.bf16 %v157_v26, %v153_v25  ;;  %v8397_v35 = vpack.c.bf16 %v159_v29, %v155_v27  ;;  %v161_v37 = vld [vmem:[#allocation5 + $0x200] sm:$0xff] }
  0x4c   :  { %8388 = vmatprep.subr.bf16.mxu1 %v8387_v4  ;;  %v168_v33 = vld [vmem:[#allocation5 + $0x238] sm:$0xff]  ;;  %v8303_v36 = vpack.c.bf16 %v166_v31, %v162_v30  ;;  %v165_v38 = vld [vmem:[#allocation5 + $0x220] sm:$0xff]  ;;  %v163_v39 = vld [vmem:[#allocation5 + $0x210] sm:$0xff] }
  0x4d   :  { %v8399_v40 = vpack.c.bf16 %v168_v33, %v164_v32  ;;  %v167_v41 = vld [vmem:[#allocation5 + $0x230] sm:$0xff]  ;;  %v170_v42 = vld [vmem:[#allocation5 + $0x248] sm:$0xff]  ;;  %v172_v44 = vld [vmem:[#allocation5 + $0x258] sm:$0xff]  ;;  %v8305_v46 = vpack.c.bf16 %v165_v38, %v161_v37 }
  0x4e   :  { %8294 = vmatpush1.bf16.msra.mxu0 %v8293_v10  ;;  %v174_v43 = vld [vmem:[#allocation5 + $0x268] sm:$0xff]  ;;  %v176_v45 = vld [vmem:[#allocation5 + $0x278] sm:$0xff]  ;;  %v8401_v47 = vpack.c.bf16 %v167_v41, %v163_v39  ;;  %v169_v49 = vld [vmem:[#allocation5 + $0x240] sm:$0xff] }
  0x4f   :  { %8390 = vmatpush1.bf16.msra.mxu1 %v8389_v11  ;;  %8296 = vmatprep.subr.bf16.mxu0 %v8295_v12  ;;  %v8307_v48 = vpack.c.bf16 %v174_v43, %v170_v42  ;;  %v173_v50 = vld [vmem:[#allocation5 + $0x260] sm:$0xff]  ;;  %v171_v51 = vld [vmem:[#allocation5 + $0x250] sm:$0xff]  ;;  %v8403_v52 = vpack.c.bf16 %v176_v45, %v172_v44  ;;  %v178_v54 = vld [vmem:[#allocation5 + $0x288] sm:$0xff] }
  0x50   :  { %8392 = vmatprep.subr.bf16.mxu1 %v8391_v16  ;;  %v175_v53 = vld [vmem:[#allocation5 + $0x270] sm:$0xff]  ;;  %v182_v55 = vld [vmem:[#allocation5 + $0x2a8] sm:$0xff]  ;;  %v180_v56 = vld [vmem:[#allocation5 + $0x298] sm:$0xff]  ;;  %v8309_v58 = vpack.c.bf16 %v173_v50, %v169_v49 }
  0x51   :  { %v184_v57 = vld [vmem:[#allocation5 + $0x2b8] sm:$0xff]  ;;  %v8405_v59 = vpack.c.bf16 %v175_v53, %v171_v51  ;;  %v8311_v60 = vpack.c.bf16 %v182_v55, %v178_v54  ;;  %v177_v61 = vld [vmem:[#allocation5 + $0x280] sm:$0xff]  ;;  %v179_v63 = vld [vmem:[#allocation5 + $0x290] sm:$0xff] }
  0x52   :  { %8298 = vmatpush1.bf16.msra.mxu0 %v8297_v22  ;;  %v181_v62 = vld [vmem:[#allocation5 + $0x2a0] sm:$0xff]  ;;  %v8407_v0 = vpack.c.bf16 %v184_v57, %v180_v56  ;;  %v183_v1 = vld [vmem:[#allocation5 + $0x2b0] sm:$0xff]  ;;  %v186_v2 = vld [vmem:[#allocation5 + $0x2c8] sm:$0xff] }
  0x53   :  { %8394 = vmatpush1.bf16.msra.mxu1 %v8393_v23  ;;  %8300 = vmatprep.subr.bf16.mxu0 %v8299_v24  ;;  %v190_v3 = vld [vmem:[#allocation5 + $0x2e8] sm:$0xff]  ;;  %v188_v4 = vld [vmem:[#allocation5 + $0x2d8] sm:$0xff]  ;;  %v8313_v6 = vpack.c.bf16 %v181_v62, %v177_v61  ;;  %v185_v7 = vld [vmem:[#allocation5 + $0x2c0] sm:$0xff]  ;;  %v8409_v8 = vpack.c.bf16 %v183_v1, %v179_v63 }
  0x54   :  { %8396 = vmatprep.subr.bf16.mxu1 %v8395_v28  ;;  %v192_v5 = vld [vmem:[#allocation5 + $0x2f8] sm:$0xff]  ;;  %v8315_v9 = vpack.c.bf16 %v190_v3, %v186_v2  ;;  %v189_v10 = vld [vmem:[#allocation5 + $0x2e0] sm:$0xff]  ;;  %v187_v11 = vld [vmem:[#allocation5 + $0x2d0] sm:$0xff] }
  0x55   :  { %v191_v12 = vld [vmem:[#allocation5 + $0x2f0] sm:$0xff]  ;;  %v8411_v13 = vpack.c.bf16 %v192_v5, %v188_v4  ;;  %v194_v14 = vld [vmem:[#allocation5 + $0x308] sm:$0xff]  ;;  %v196_v17 = vld [vmem:[#allocation5 + $0x318] sm:$0xff]  ;;  %v8317_v19 = vpack.c.bf16 %v189_v10, %v185_v7 }
  0x56   :  { %8302 = vmatpush1.bf16.msra.mxu0 %v8301_v34  ;;  %v198_v15 = vld [vmem:[#allocation5 + $0x328] sm:$0xff]  ;;  %v200_v18 = vld [vmem:[#allocation5 + $0x338] sm:$0xff]  ;;  %v8413_v20 = vpack.c.bf16 %v191_v12, %v187_v11  ;;  %v193_v22 = vld [vmem:[#allocation5 + $0x300] sm:$0xff] }
  0x57   :  { %8398 = vmatpush1.bf16.msra.mxu1 %v8397_v35  ;;  %8304 = vmatprep.subr.bf16.mxu0 %v8303_v36  ;;  %v74_v16 = vld [vmem:[%s13980_s0 + $0x8] sm:$0xff]  ;;  %v8319_v21 = vpack.c.bf16 %v198_v15, %v194_v14  ;;  %v197_v23 = vld [vmem:[#allocation5 + $0x320] sm:$0xff]  ;;  %v195_v24 = vld [vmem:[#allocation5 + $0x310] sm:$0xff]  ;;  %v8415_v25 = vpack.c.bf16 %v200_v18, %v196_v17 }
  0x58   :  { %8400 = vmatprep.subr.bf16.mxu1 %v8399_v40  ;;  %375 = vmatprep.mubr.f32.mxu0 %v74_v16  ;;  %v199_v26 = vld [vmem:[#allocation5 + $0x330] sm:$0xff]  ;;  %v202_v27 = vld [vmem:[#allocation5 + $0x348] sm:$0xff]  ;;  %v204_v29 = vld [vmem:[#allocation5 + $0x358] sm:$0xff]  ;;  %v8321_v31 = vpack.c.bf16 %v197_v23, %v193_v22 }
  0x59   :  { %601 = vmatprep.mubr.f32.mxu1 %v74_v16  ;;  %v206_v28 = vld [vmem:[#allocation5 + $0x368] sm:$0xff]  ;;  %v208_v30 = vld [vmem:[#allocation5 + $0x378] sm:$0xff]  ;;  %v8417_v32 = vpack.c.bf16 %v199_v26, %v195_v24  ;;  %v201_v34 = vld [vmem:[#allocation5 + $0x340] sm:$0xff] }
  0x5a   :  { %8306 = vmatpush1.bf16.msra.mxu0 %v8305_v46  ;;  %v8323_v33 = vpack.c.bf16 %v206_v28, %v202_v27  ;;  %v205_v35 = vld [vmem:[#allocation5 + $0x360] sm:$0xff]  ;;  %v203_v36 = vld [vmem:[#allocation5 + $0x350] sm:$0xff]  ;;  %v8419_v37 = vpack.c.bf16 %v208_v30, %v204_v29  ;;  %v210_v39 = vld [vmem:[#allocation5 + $0x388] sm:$0xff] }
  0x5b   :  { %8402 = vmatpush1.bf16.msra.mxu1 %v8401_v47  ;;  %8308 = vmatprep.subr.bf16.mxu0 %v8307_v48  ;;  %v207_v38 = vld [vmem:[#allocation5 + $0x370] sm:$0xff]  ;;  %v214_v40 = vld [vmem:[#allocation5 + $0x3a8] sm:$0xff]  ;;  %v212_v41 = vld [vmem:[#allocation5 + $0x398] sm:$0xff]  ;;  %v8325_v43 = vpack.c.bf16 %v205_v35, %v201_v34 }
  0x5c   :  { %8404 = vmatprep.subr.bf16.mxu1 %v8403_v52  ;;  %v216_v42 = vld [vmem:[#allocation5 + $0x3b8] sm:$0xff]  ;;  %v8421_v44 = vpack.c.bf16 %v207_v38, %v203_v36  ;;  %v8327_v45 = vpack.c.bf16 %v214_v40, %v210_v39  ;;  %v209_v46 = vld [vmem:[#allocation5 + $0x380] sm:$0xff]  ;;  %v211_v48 = vld [vmem:[#allocation5 + $0x390] sm:$0xff] }
  0x5d   :  { %v213_v47 = vld [vmem:[#allocation5 + $0x3a0] sm:$0xff]  ;;  %v8423_v49 = vpack.c.bf16 %v216_v42, %v212_v41  ;;  %v215_v50 = vld [vmem:[#allocation5 + $0x3b0] sm:$0xff]  ;;  %v218_v51 = vld [vmem:[#allocation5 + $0x3c8] sm:$0xff] }
  0x5e   :  { %8310 = vmatpush1.bf16.msra.mxu0 %v8309_v58  ;;  %v222_v52 = vld [vmem:[#allocation5 + $0x3e8] sm:$0xff]  ;;  %v220_v53 = vld [vmem:[#allocation5 + $0x3d8] sm:$0xff]  ;;  %v8329_v55 = vpack.c.bf16 %v213_v47, %v209_v46  ;;  %v8425_v56 = vpack.c.bf16 %v215_v50, %v211_v48  ;;  %v217_v58 = vld [vmem:[#allocation5 + $0x3c0] sm:$0xff] }
  0x5f   :  { %8406 = vmatpush1.bf16.msra.mxu1 %v8405_v59  ;;  %8312 = vmatprep.subr.bf16.mxu0 %v8311_v60  ;;  %v224_v54 = vld [vmem:[#allocation5 + $0x3f8] sm:$0xff]  ;;  %v8331_v57 = vpack.c.bf16 %v222_v52, %v218_v51  ;;  %v221_v59 = vld [vmem:[#allocation5 + $0x3e0] sm:$0xff]  ;;  %v219_v60 = vld [vmem:[#allocation5 + $0x3d0] sm:$0xff] }
  0x60   :  { %8408 = vmatprep.subr.bf16.mxu1 %v8407_v0  ;;  %v8427_v61 = vpack.c.bf16 %v224_v54, %v220_v53  ;;  %v223_v62 = vld [vmem:[#allocation5 + $0x3f0] sm:$0xff]  ;;  %v226_v63 = vld [vmem:[#allocation5 + $0x408] sm:$0xff]  ;;  %v228_v1 = vld [vmem:[#allocation5 + $0x418] sm:$0xff]  ;;  %v8333_v3 = vpack.c.bf16 %v221_v59, %v217_v58 }
  0x61   :  { %v230_v0 = vld [vmem:[#allocation5 + $0x428] sm:$0xff]  ;;  %v232_v2 = vld [vmem:[#allocation5 + $0x438] sm:$0xff]  ;;  %v8429_v4 = vpack.c.bf16 %v223_v62, %v219_v60  ;;  %v229_v7 = vld [vmem:[#allocation5 + $0x420] sm:$0xff] }
  0x62   :  { %8314 = vmatpush1.bf16.msra.mxu0 %v8313_v6  ;;  %v8335_v5 = vpack.c.bf16 %v230_v0, %v226_v63  ;;  %v225_v6 = vld [vmem:[#allocation5 + $0x400] sm:$0xff]  ;;  %v231_v10 = vld [vmem:[#allocation5 + $0x430] sm:$0xff]  ;;  %v234_v11 = vld [vmem:[#allocation5 + $0x448] sm:$0xff] }
  0x63   :  { %8410 = vmatpush1.bf16.msra.mxu1 %v8409_v8  ;;  %8316 = vmatprep.subr.bf16.mxu0 %v8315_v9  ;;  %v8431_v8 = vpack.c.bf16 %v232_v2, %v228_v1  ;;  %v227_v9 = vld [vmem:[#allocation5 + $0x410] sm:$0xff]  ;;  %v238_v12 = vld [vmem:[#allocation5 + $0x468] sm:$0xff]  ;;  %v8337_v14 = vpack.c.bf16 %v229_v7, %v225_v6  ;;  %v236_v15 = vld [vmem:[#allocation5 + $0x458] sm:$0xff] }
  0x64   :  { %8412 = vmatprep.subr.bf16.mxu1 %v8411_v13  ;;  %v73_v13 = vld [vmem:[%s13980_s0] sm:$0xff]  ;;  %v240_v16 = vld [vmem:[#allocation5 + $0x478] sm:$0xff]  ;;  %v8433_v17 = vpack.c.bf16 %v231_v10, %v227_v9  ;;  %v235_v22 = vld [vmem:[#allocation5 + $0x450] sm:$0xff] }
  0x65   :  { %v233_v18 = vld [vmem:[#allocation5 + $0x440] sm:$0xff]  ;;  %v239_v23 = vld [vmem:[#allocation5 + $0x470] sm:$0xff]  ;;  %v8435_v24 = vpack.c.bf16 %v240_v16, %v236_v15  ;;  %v246_v26 = vld [vmem:[#allocation5 + $0x4a8] sm:$0xff] }
  0x66   :  { %8318 = vmatpush1.bf16.msra.mxu0 %v8317_v19  ;;  %v237_v19 = vld [vmem:[#allocation5 + $0x460] sm:$0xff]  ;;  %v76_v27 = vld [vmem:[%s13980_s0 + $0x18] sm:$0xff]  ;;  %v243_v36 = vld [vmem:[#allocation5 + $0x490] sm:$0xff] }
  0x67   :  { %8414 = vmatpush1.bf16.msra.mxu1 %v8413_v20  ;;  %8320 = vmatprep.subr.bf16.mxu0 %v8319_v21  ;;  %v77_v20 = vld [vmem:[%s13980_s0 + $0x20] sm:$0xff]  ;;  %v8339_v21 = vpack.c.bf16 %v238_v12, %v234_v11  ;;  %v8341_v28 = vpack.c.bf16 %v237_v19, %v233_v18  ;;  %v244_v29 = vld [vmem:[#allocation5 + $0x498] sm:$0xff]  ;;  %v250_v39 = vld [vmem:[#allocation5 + $0x4c8] sm:$0xff] }
  0x68   :  { %8416 = vmatprep.subr.bf16.mxu1 %v8415_v25  ;;  %v242_v25 = vld [vmem:[#allocation5 + $0x488] sm:$0xff]  ;;  %v248_v30 = vld [vmem:[#allocation5 + $0x4b8] sm:$0xff]  ;;  %v79_v41 = vld [vmem:[%s13980_s0 + $0x30] sm:$0xff] }
  0x69   :  { %v80_v34 = vld [vmem:[%s13980_s0 + $0x38] sm:$0xff]  ;;  %v8343_v35 = vpack.c.bf16 %v246_v26, %v242_v25  ;;  %v8439_v38 = vpack.c.bf16 %v248_v30, %v244_v29  ;;  %v254_v40 = vld [vmem:[#allocation5 + $0x4e8] sm:$0xff]  ;;  %v249_v46 = vld [vmem:[#allocation5 + $0x4c0] sm:$0xff] }
  0x6a   :  { %8322 = vmatpush1.bf16.msra.mxu0 %v8321_v31  ;;  %v8437_v31 = vpack.c.bf16 %v239_v23, %v235_v22  ;;  %v253_v47 = vld [vmem:[#allocation5 + $0x4e0] sm:$0xff]  ;;  %v83_v48 = vld [vmem:[%s13980_s0 + $0x50] sm:$0xff]  ;;  %v258_v53 = vld [vmem:[#allocation5 + $0x508] sm:$0xff] }
  0x6b   :  { %8418 = vmatpush1.bf16.msra.mxu1 %v8417_v32  ;;  %8324 = vmatprep.subr.bf16.mxu0 %v8323_v33  ;;  %v241_v32 = vld [vmem:[#allocation5 + $0x480] sm:$0xff]  ;;  %v251_v50 = vld [vmem:[#allocation5 + $0x4d0] sm:$0xff]  ;;  %v262_v54 = vld [vmem:[#allocation5 + $0x528] sm:$0xff] }
  0x6c   :  { %8420 = vmatprep.subr.bf16.mxu1 %v8419_v37  ;;  %v245_v33 = vld [vmem:[#allocation5 + $0x4a0] sm:$0xff]  ;;  %v247_v37 = vld [vmem:[#allocation5 + $0x4b0] sm:$0xff]  ;;  %v264_v58 = vld [vmem:[#allocation5 + $0x538] sm:$0xff]  ;;  %v8351_v63 = vpack.c.bf16 %v262_v54, %v258_v53 }
  0x6d   :  { %v8345_v42 = vpack.c.bf16 %v245_v33, %v241_v32  ;;  %v255_v51 = vld [vmem:[#allocation5 + $0x4f0] sm:$0xff]  ;;  %v257_v60 = vld [vmem:[#allocation5 + $0x500] sm:$0xff]  ;;  %v86_v62 = vld [vmem:[%s13980_s0 + $0x68] sm:$0xff] }
  0x6e   :  { %8326 = vmatpush1.bf16.msra.mxu0 %v8325_v43  ;;  %v252_v43 = vld [vmem:[#allocation5 + $0x4d8] sm:$0xff]  ;;  %v8445_v59 = vpack.c.bf16 %v255_v51, %v251_v50  ;;  %v259_v0 = vld [vmem:[#allocation5 + $0x510] sm:$0xff]  ;;  %v265_v10 = vld [vmem:[#allocation5 + $0x540] sm:$0xff] }
  0x6f   :  { %8422 = vmatpush1.bf16.msra.mxu1 %v8421_v44  ;;  %8328 = vmatprep.subr.bf16.mxu0 %v8327_v45  ;;  %v256_v44 = vld [vmem:[#allocation5 + $0x4f8] sm:$0xff]  ;;  %v8441_v45 = vpack.c.bf16 %v247_v37, %v243_v36  ;;  %v263_v1 = vld [vmem:[#allocation5 + $0x530] sm:$0xff]  ;;  %v269_v11 = vld [vmem:[#allocation5 + $0x560] sm:$0xff] }
  0x70   :  { %8424 = vmatprep.subr.bf16.mxu1 %v8423_v49  ;;  %v8347_v49 = vpack.c.bf16 %v254_v40, %v250_v39  ;;  %v8443_v52 = vpack.c.bf16 %v256_v44, %v252_v43  ;;  %v268_v7 = vld [vmem:[#allocation5 + $0x558] sm:$0xff]  ;;  %v8449_v9 = vpack.c.bf16 %v263_v1, %v259_v0  ;;  %v89_v12 = vld [vmem:[%s13980_s0 + $0x80] sm:$0xff]  ;;  %v271_v15 = vld [vmem:[#allocation5 + $0x570] sm:$0xff]  ;;  %v11678_v0 = vmov 0.0  }
  0x71   :  { %v278_v18 = vld [vmem:[#allocation5 + $0x5a8] sm:$0xff]  ;;  %v88_v19 = vld [vmem:[%s13980_s0 + $0x78] sm:$0xff]  ;;  %v277_v25 = vld [vmem:[#allocation5 + $0x5a0] sm:$0xff] }
  0x72   :  { %8330 = vmatpush1.bf16.msra.mxu0 %v8329_v55  ;;  %v82_v55 = vld [vmem:[%s13980_s0 + $0x48] sm:$0xff]  ;;  %v280_v22 = vld [vmem:[#allocation5 + $0x5b8] sm:$0xff]  ;;  %v279_v29 = vld [vmem:[#allocation5 + $0x5b0] sm:$0xff] }
  0x73   :  { %8426 = vmatpush1.bf16.msra.mxu1 %v8425_v56  ;;  %8332 = vmatprep.subr.bf16.mxu0 %v8331_v57  ;;  %v8349_v56 = vpack.c.bf16 %v253_v47, %v249_v46  ;;  %v260_v57 = vld [vmem:[#allocation5 + $0x518] sm:$0xff]  ;;  %v286_v32 = vld [vmem:[#allocation5 + $0x5e8] sm:$0xff]  ;;  %v91_v33 = vld [vmem:[%s13980_s0 + $0x90] sm:$0xff] }
  0x74   :  { %8428 = vmatprep.subr.bf16.mxu1 %v8427_v61  ;;  %v261_v61 = vld [vmem:[#allocation5 + $0x520] sm:$0xff]  ;;  %v8447_v2 = vpack.c.bf16 %v264_v58, %v260_v57  ;;  %v92_v26 = vld [vmem:[%s13980_s0 + $0x98] sm:$0xff]  ;;  %v95_v40 = vld [vmem:[%s13980_s0 + $0xb0] sm:$0xff] }
  0x75   :  { %v8353_v6 = vpack.c.bf16 %v261_v61, %v257_v60  ;;  %v288_v36 = vld [vmem:[#allocation5 + $0x5f8] sm:$0xff]  ;;  %v285_v39 = vld [vmem:[#allocation5 + $0x5e0] sm:$0xff]  ;;  %v287_v43 = vld [vmem:[#allocation5 + $0x5f0] sm:$0xff] }
  0x76   :  { %8334 = vmatpush1.bf16.msra.mxu0 %v8333_v3  ;;  %v266_v3 = vld [vmem:[#allocation5 + $0x548] sm:$0xff]  ;;  %v802_v50 = vld [vmem:[#allocation9 + $0x38] sm:$0xff]  ;;  %v799_v53 = vld [vmem:[#allocation9 + $0x20] sm:$0xff] }
  0x77   :  { %8430 = vmatpush1.bf16.msra.mxu1 %v8429_v4  ;;  %8336 = vmatprep.subr.bf16.mxu0 %v8335_v5  ;;  %v270_v4 = vld [vmem:[#allocation5 + $0x568] sm:$0xff]  ;;  %v85_v5 = vld [vmem:[%s13980_s0 + $0x60] sm:$0xff]  ;;  %v75_v60 = vld [vmem:[%s13980_s0 + $0x10] sm:$0xff] }
  0x78   :  { %8432 = vmatprep.subr.bf16.mxu1 %v8431_v8  ;;  %v272_v8 = vld [vmem:[#allocation5 + $0x578] sm:$0xff]  ;;  %v800_v46 = vld [vmem:[#allocation9 + $0x28] sm:$0xff] }
  0x79   :  { %376 = vmatmul.mubr.f32.vlgmr.msra.gmra.mrb[0].mxu0 %v73_v13  ;;  %v8451_v16 = vpack.c.bf16 %v272_v8, %v268_v7  ;;  %v94_v47 = vld [vmem:[%s13980_s0 + $0xa8] sm:$0xff] }
  0x7a   :  { %602 = vmatmul.mubr.f32.vlgmr.msra.gmra.mrb[0].mxu1 %v73_v13  ;;  %8338 = vmatpush1.bf16.msra.mxu0 %v8337_v14  ;;  %v8355_v13 = vpack.c.bf16 %v270_v4, %v266_v3  ;;  %v267_v14 = vld [vmem:[#allocation5 + $0x550] sm:$0xff]  ;;  %v804_v58 = vld [vmem:[#allocation9 + $0x48] sm:$0xff]  ;;  %v807_v3 = vld [vmem:[#allocation9 + $0x60] sm:$0xff] }
  0x7b   :  { %8434 = vmatpush1.bf16.msra.mxu1 %v8433_v17  ;;  %381 = vmatprep.mubr.f32.mxu0 %v77_v20  ;;  %v274_v17 = vld [vmem:[#allocation5 + $0x588] sm:$0xff]  ;;  %v8453_v23 = vpack.c.bf16 %v271_v15, %v267_v14  ;;  %v811_v15 = vld [vmem:[#allocation9 + $0x80] sm:$0xff] }
  0x7c   :  { %607 = vmatprep.mubr.f32.mxu1 %v77_v20  ;;  %8340 = vmatprep.subr.bf16.mxu0 %v8339_v21  ;;  %v8357_v20 = vpack.c.bf16 %v269_v11, %v265_v10  ;;  %v276_v21 = vld [vmem:[#allocation5 + $0x598] sm:$0xff]  ;;  %v812_v8 = vld [vmem:[#allocation9 + $0x88] sm:$0xff] }
  0x7d   :  { %382 = vmatmul.mubr.f32.gmra.mrb[2].mxu0 %v76_v27  ;;  %8436 = vmatprep.subr.bf16.mxu1 %v8435_v24  ;;  %v273_v24 = vld [vmem:[#allocation5 + $0x580] sm:$0xff]  ;;  %v8455_v30 = vpack.c.bf16 %v280_v22, %v276_v21  ;;  %v78_v10 = vld [vmem:[%s13980_s0 + $0x28] sm:$0xff] }
  0x7e   :  { %608 = vmatmul.mubr.f32.gmra.mrb[2].mxu1 %v76_v27  ;;  %8342 = vmatpush1.bf16.msra.mxu0 %v8341_v28  ;;  %v8359_v27 = vpack.c.bf16 %v278_v18, %v274_v17  ;;  %v275_v28 = vld [vmem:[#allocation5 + $0x590] sm:$0xff]  ;;  %v820_v21 = vld [vmem:[#allocation9 + $0xc8] sm:$0xff] }
  0x7f   :  { %8438 = vmatpush1.bf16.msra.mxu1 %v8437_v31  ;;  %387 = vmatprep.mubr.f32.mxu0 %v80_v34  ;;  %v282_v31 = vld [vmem:[#allocation5 + $0x5c8] sm:$0xff]  ;;  %v8457_v37 = vpack.c.bf16 %v279_v29, %v275_v28  ;;  %v813_v18 = vld [vmem:[#allocation9 + $0x90] sm:$0xff]  ;;  %v819_v28 = vld [vmem:[#allocation9 + $0xc0] sm:$0xff] }
  0x80   :  { %613 = vmatprep.mubr.f32.mxu1 %v80_v34  ;;  %8344 = vmatprep.subr.bf16.mxu0 %v8343_v35  ;;  %v8361_v34 = vpack.c.bf16 %v277_v25, %v273_v24  ;;  %v284_v35 = vld [vmem:[#allocation5 + $0x5d8] sm:$0xff]  ;;  %v824_v22 = vld [vmem:[#allocation9 + $0xe8] sm:$0xff]  ;;  %v823_v29 = vld [vmem:[#allocation9 + $0xe0] sm:$0xff] }
  0x81   :  { %388 = vmatmul.mubr.f32.gmra.mrb[4].mxu0 %v79_v41  ;;  %8440 = vmatprep.subr.bf16.mxu1 %v8439_v38  ;;  %v281_v38 = vld [vmem:[#allocation5 + $0x5c0] sm:$0xff]  ;;  %v8459_v44 = vpack.c.bf16 %v288_v36, %v284_v35  ;;  %v822_v25 = vld [vmem:[#allocation9 + $0xd8] sm:$0xff]  ;;  %v832_v35 = vld [vmem:[#allocation9 + $0x128] sm:$0xff] }
  0x82   :  { %614 = vmatmul.mubr.f32.gmra.mrb[4].mxu1 %v79_v41  ;;  %8346 = vmatpush1.bf16.msra.mxu0 %v8345_v42  ;;  %v8363_v41 = vpack.c.bf16 %v286_v32, %v282_v31  ;;  %v283_v42 = vld [vmem:[#allocation5 + $0x5d0] sm:$0xff]  ;;  %v84_v36 = vld [vmem:[%s13980_s0 + $0x58] sm:$0xff] }
  0x83   :  { %8442 = vmatpush1.bf16.msra.mxu1 %v8441_v45  ;;  %393 = vmatprep.mubr.f32.mxu0 %v83_v48  ;;  %v796_v45 = vld [vmem:[#allocation9 + $0x8] sm:$0xff]  ;;  %v8461_v51 = vpack.c.bf16 %v287_v43, %v283_v42  ;;  %v821_v31 = vld [vmem:[#allocation9 + $0xd0] sm:$0xff]  ;;  %v831_v42 = vld [vmem:[#allocation9 + $0x120] sm:$0xff] }
  0x84   :  { %619 = vmatprep.mubr.f32.mxu1 %v83_v48  ;;  %8348 = vmatprep.subr.bf16.mxu0 %v8347_v49  ;;  %v8365_v48 = vpack.c.bf16 %v285_v39, %v281_v38  ;;  %v798_v49 = vld [vmem:[#allocation9 + $0x18] sm:$0xff]  ;;  %v11831_v54 = vpack.c.bf16 %v800_v46, %v796_v45  ;;  %v825_v32 = vld [vmem:[#allocation9 + $0xf0] sm:$0xff] }
  0x85   :  { %394 = vmatmul.mubr.f32.gmra.mrb[6].mxu0 %v82_v55  ;;  %8444 = vmatprep.subr.bf16.mxu1 %v8443_v52  ;;  %v795_v52 = vld [vmem:[#allocation9] sm:$0xff]  ;;  %v11833_v57 = vpack.c.bf16 %v802_v50, %v798_v49  ;;  %v830_v38 = vld [vmem:[#allocation9 + $0x118] sm:$0xff]  ;;  %v833_v45 = vld [vmem:[#allocation9 + $0x130] sm:$0xff] }
  0x86   :  { %620 = vmatmul.mubr.f32.gmra.mrb[6].mxu1 %v82_v55  ;;  %8350 = vmatpush1.bf16.msra.mxu0 %v8349_v56  ;;  %v797_v55 = vld [vmem:[#allocation9 + $0x10] sm:$0xff]  ;;  %v11838_v61 = vpack.c.bf16 %v799_v53, %v795_v52  ;;  %v834_v39 = vld [vmem:[#allocation9 + $0x138] sm:$0xff] }
  0x87   :  { %8446 = vmatpush1.bf16.msra.mxu1 %v8445_v59  ;;  %399 = vmatprep.mubr.f32.mxu0 %v86_v62  ;;  %v801_v56 = vld [vmem:[#allocation9 + $0x30] sm:$0xff]  ;;  %v808_v59 = vld [vmem:[#allocation9 + $0x68] sm:$0xff]  ;;  %v11899_v46 = vpack.c.bf16 %v834_v39, %v830_v38  ;;  %v842_v52 = vld [vmem:[#allocation9 + $0x178] sm:$0xff] }
  0x88   :  { %625 = vmatprep.mubr.f32.mxu1 %v86_v62  ;;  %8352 = vmatprep.subr.bf16.mxu0 %v8351_v63  ;;  %v806_v62 = vld [vmem:[#allocation9 + $0x58] sm:$0xff]  ;;  %v11841_v1 = vpack.c.bf16 %v801_v56, %v797_v55  ;;  %v11845_v4 = vpack.c.bf16 %v808_v59, %v804_v58  ;;  %v87_v49 = vld [vmem:[%s13980_s0 + $0x70] sm:$0xff]  ;;  %v835_v55 = vld [vmem:[#allocation9 + $0x140] sm:$0xff] }
  0x89   :  { %400 = vmatmul.mubr.f32.gmra.mrb[8].mxu0 %v85_v5  ;;  %8448 = vmatprep.subr.bf16.mxu1 %v8447_v2  ;;  %v810_v63 = vld [vmem:[#allocation9 + $0x78] sm:$0xff]  ;;  %v803_v2 = vld [vmem:[#allocation9 + $0x40] sm:$0xff]  ;;  %v837_v59 = vld [vmem:[#allocation9 + $0x150] sm:$0xff] }
  0x8a   :  { %626 = vmatmul.mubr.f32.gmra.mrb[8].mxu1 %v85_v5  ;;  %8354 = vmatpush1.bf16.msra.mxu0 %v8353_v6  ;;  %v805_v5 = vld [vmem:[#allocation9 + $0x50] sm:$0xff]  ;;  %v11848_v7 = vpack.c.bf16 %v810_v63, %v806_v62  ;;  %v11854_v11 = vpack.c.bf16 %v807_v3, %v803_v2  ;;  %v839_v56 = vld [vmem:[#allocation9 + $0x160] sm:$0xff]  ;;  %v844_v63 = vld [vmem:[#allocation9 + $0x188] sm:$0xff] }
  0x8b   :  { %8450 = vmatpush1.bf16.msra.mxu1 %v8449_v9  ;;  %405 = vmatprep.mubr.f32.mxu0 %v89_v12  ;;  %v809_v6 = vld [vmem:[#allocation9 + $0x70] sm:$0xff]  ;;  %v816_v9 = vld [vmem:[#allocation9 + $0xa8] sm:$0xff]  ;;  %v96_v38 = vld [vmem:[%s13980_s0 + $0xb8] sm:$0xff] }
  0x8c   :  { %631 = vmatprep.mubr.f32.mxu1 %v89_v12  ;;  %8356 = vmatprep.subr.bf16.mxu0 %v8355_v13  ;;  %v814_v12 = vld [vmem:[#allocation9 + $0x98] sm:$0xff]  ;;  %v11858_v14 = vpack.c.bf16 %v809_v6, %v805_v5  ;;  %v11862_v17 = vpack.c.bf16 %v816_v9, %v812_v8  ;;  %v848_v2 = vld [vmem:[#allocation9 + $0x1a8] sm:$0xff]  ;;  %v11922_v5 = vpack.c.bf16 %v839_v56, %v835_v55 }
  0x8d   :  { %406 = vmatmul.mubr.f32.gmra.mrb[10].mxu0 %v88_v19  ;;  %8452 = vmatprep.subr.bf16.mxu1 %v8451_v16  ;;  %v818_v13 = vld [vmem:[#allocation9 + $0xb8] sm:$0xff]  ;;  %v815_v16 = vld [vmem:[#allocation9 + $0xa0] sm:$0xff]  ;;  %v90_v3 = vld [vmem:[%s13980_s0 + $0x88] sm:$0xff] }
  0x8e   :  { %632 = vmatmul.mubr.f32.gmra.mrb[10].mxu1 %v88_v19  ;;  %8358 = vmatpush1.bf16.msra.mxu0 %v8357_v20  ;;  %v817_v19 = vld [vmem:[#allocation9 + $0xb0] sm:$0xff]  ;;  %v11865_v20 = vpack.c.bf16 %v818_v13, %v814_v12  ;;  %v11871_v24 = vpack.c.bf16 %v815_v16, %v811_v15  ;;  %v846_v6 = vld [vmem:[#allocation9 + $0x198] sm:$0xff]  ;;  %v847_v12 = vld [vmem:[#allocation9 + $0x1a0] sm:$0xff]  ;;  %v11930_v13 = vpack.c.bf16 %v848_v2, %v844_v63 }
  0x8f   :  { %8454 = vmatpush1.bf16.msra.mxu1 %v8453_v23  ;;  %411 = vmatprep.mubr.f32.mxu0 %v92_v26  ;;  %v81_v23 = vld [vmem:[%s13980_s0 + $0x40] sm:$0xff]  ;;  %v850_v8 = vld [vmem:[#allocation9 + $0x1b8] sm:$0xff]  ;;  %v845_v15 = vld [vmem:[#allocation9 + $0x190] sm:$0xff] }
  0x90   :  { %637 = vmatprep.mubr.f32.mxu1 %v92_v26  ;;  %8360 = vmatprep.subr.bf16.mxu0 %v8359_v27  ;;  %v826_v26 = vld [vmem:[#allocation9 + $0xf8] sm:$0xff]  ;;  %v11875_v27 = vpack.c.bf16 %v817_v19, %v813_v18  ;;  %v849_v16 = vld [vmem:[#allocation9 + $0x1b0] sm:$0xff]  ;;  %v11933_v18 = vpack.c.bf16 %v850_v8, %v846_v6  ;;  %v852_v19 = vld [vmem:[#allocation9 + $0x1c8] sm:$0xff] }
  0x91   :  { %412 = vmatmul.mubr.f32.gmra.mrb[12].mxu0 %v91_v33  ;;  %8456 = vmatprep.subr.bf16.mxu1 %v8455_v30  ;;  %v11879_v30 = vpack.c.bf16 %v824_v22, %v820_v21  ;;  %v856_v21 = vld [vmem:[#allocation9 + $0x1e8] sm:$0xff]  ;;  %v93_v22 = vld [vmem:[%s13980_s0 + $0xa0] sm:$0xff] }
  0x92   :  { %638 = vmatmul.mubr.f32.gmra.mrb[12].mxu1 %v91_v33  ;;  %8362 = vmatpush1.bf16.msra.mxu0 %v8361_v34  ;;  %v11882_v33 = vpack.c.bf16 %v826_v26, %v822_v25  ;;  %v828_v34 = vld [vmem:[#allocation9 + $0x108] sm:$0xff]  ;;  %v854_v25 = vld [vmem:[#allocation9 + $0x1d8] sm:$0xff] }
  0x93   :  { %8458 = vmatpush1.bf16.msra.mxu1 %v8457_v37  ;;  %417 = vmatprep.mubr.f32.mxu0 %v95_v40  ;;  %v11888_v37 = vpack.c.bf16 %v823_v29, %v819_v28  ;;  %v11896_v43 = vpack.c.bf16 %v832_v35, %v828_v34  ;;  %v858_v26 = vld [vmem:[#allocation9 + $0x1f8] sm:$0xff]  ;;  %v11943_v28 = vpack.c.bf16 %v849_v16, %v845_v15  ;;  %v851_v29 = vld [vmem:[#allocation9 + $0x1c0] sm:$0xff]  ;;  %v853_v34 = vld [vmem:[#allocation9 + $0x1d0] sm:$0xff] }
  0x94   :  { %643 = vmatprep.mubr.f32.mxu1 %v95_v40  ;;  %8364 = vmatprep.subr.bf16.mxu0 %v8363_v41  ;;  %v11892_v40 = vpack.c.bf16 %v825_v32, %v821_v31  ;;  %v827_v41 = vld [vmem:[#allocation9 + $0x100] sm:$0xff]  ;;  %v11947_v32 = vpack.c.bf16 %v856_v21, %v852_v19  ;;  %v857_v35 = vld [vmem:[#allocation9 + $0x1f0] sm:$0xff] }
  0x95   :  { %418 = vmatmul.mubr.f32.gmra.mrb[14].mxu0 %v94_v47  ;;  %8460 = vmatprep.subr.bf16.mxu1 %v8459_v44  ;;  %v829_v44 = vld [vmem:[#allocation9 + $0x110] sm:$0xff]  ;;  %v11905_v50 = vpack.c.bf16 %v831_v42, %v827_v41  ;;  %v855_v31 = vld [vmem:[#allocation9 + $0x1e0] sm:$0xff]  ;;  %v11960_v41 = vpack.c.bf16 %v857_v35, %v853_v34  ;;  %v13990_v42 = vlaneseq }
  0x96   :  { %644 = vmatmul.mubr.f32.gmra.mrb[14].mxu1 %v94_v47  ;;  %8366 = vmatpush1.bf16.msra.mxu0 %v8365_v48  ;;  %v836_v47 = vld [vmem:[#allocation9 + $0x148] sm:$0xff]  ;;  %v11909_v53 = vpack.c.bf16 %v833_v45, %v829_v44  ;;  %v11956_v39 = vpack.c.bf16 %v855_v31, %v851_v29 }
  0x97   :  { %8462 = vmatpush1.bf16.msra.mxu1 %v8461_v51  ;;  %488 = vmatprep.mubr.f32.mxu0 %v11678_v0  ;;  %v840_v48 = vld [vmem:[#allocation9 + $0x168] sm:$0xff]  ;;  %v838_v51 = vld [vmem:[#allocation9 + $0x158] sm:$0xff]  ;;  %v292_v44 = vshrl.u32 %v13990_v42, 7 }
  0x98   :  { %714 = vmatprep.mubr.f32.mxu1 %v11678_v0  ;;  %8464 = vmatprep.subr.bf16.mxu0 %v11831_v54  ;;  %v11913_v58 = vpack.c.bf16 %v840_v48, %v836_v47  ;;  %v11916_v62 = vpack.c.bf16 %v842_v52, %v838_v51  ;;  %v289_v47 = vld [vmem:[%s13984_s4] sm:$0xf] }
  0x99   :  { %489 = vmatmul.mubr.f32.vlgmr.msra.gmra.mrb[0].mxu0 %v75_v60  ;;  %8496 = vmatprep.subr.bf16.mxu1 %v11833_v57  ;;  %v12008_v45 = vsub.s32 0, %v292_v44  ;;  %v12013_v48 = vsub.s32 1, %v292_v44  ;;  %v12021_v55 = vsub.s32 3, %v292_v44 }
  0x9a   :  { %715 = vmatmul.mubr.f32.vlgmr.msra.gmra.mrb[0].mxu1 %v75_v60  ;;  %8466 = vmatpush1.bf16.msra.mxu0 %v11838_v61  ;;  %v841_v60 = vld [vmem:[#allocation9 + $0x170] sm:$0xff] }
  0x9b   :  { %8498 = vmatpush1.bf16.msra.mxu1 %v11841_v1  ;;  %494 = vmatprep.mubr.f32.mxu0 %v11678_v0  ;;  %v11926_v9 = vpack.c.bf16 %v841_v60, %v837_v59  ;;  %v12019_v51 = vrot.slane %v289_v47, %v12013_v48  ;;  %v12026_v8 = vrot.slane %v289_v47, %v12021_v55 }
  0x9c   :  { %720 = vmatprep.mubr.f32.mxu1 %v11678_v0  ;;  %8468 = vmatprep.subr.bf16.mxu0 %v11845_v4 }
  0x9d   :  { %495 = vmatmul.mubr.f32.gmra.mrb[2].mxu0 %v78_v10  ;;  %8500 = vmatprep.subr.bf16.mxu1 %v11848_v7 }
  0x9e   :  { %721 = vmatmul.mubr.f32.gmra.mrb[2].mxu1 %v78_v10  ;;  %8470 = vmatpush1.bf16.msra.mxu0 %v11854_v11  ;;  %v843_v10 = vld [vmem:[#allocation9 + $0x180] sm:$0xff] }
  0x9f   :  { %8502 = vmatpush1.bf16.msra.mxu1 %v11858_v14  ;;  %500 = vmatprep.mubr.f32.mxu0 %v11678_v0 }
  0xa0   :  { %726 = vmatprep.mubr.f32.mxu1 %v11678_v0  ;;  %8472 = vmatprep.subr.bf16.mxu0 %v11862_v17 }
  0xa1   :  { %501 = vmatmul.mubr.f32.gmra.mrb[4].mxu0 %v81_v23  ;;  %8504 = vmatprep.subr.bf16.mxu1 %v11865_v20 }
  0xa2   :  { %727 = vmatmul.mubr.f32.gmra.mrb[4].mxu1 %v81_v23  ;;  %8474 = vmatpush1.bf16.msra.mxu0 %v11871_v24  ;;  %v11939_v23 = vpack.c.bf16 %v847_v12, %v843_v10  ;;  %v12028_v10 = vsub.s32 2, %v292_v44 }
  0xa3   :  { %8506 = vmatpush1.bf16.msra.mxu1 %v11875_v27  ;;  %506 = vmatprep.mubr.f32.mxu0 %v11678_v0 }
  0xa4   :  { %732 = vmatprep.mubr.f32.mxu1 %v11678_v0  ;;  %8476 = vmatprep.subr.bf16.mxu0 %v11879_v30  ;;  %v12032_v15 = vrot.slane %v289_v47, %v12028_v10 }
  0xa5   :  { %507 = vmatmul.mubr.f32.gmra.mrb[6].mxu0 %v84_v36  ;;  %8508 = vmatprep.subr.bf16.mxu1 %v11882_v33 }
  0xa6   :  { %733 = vmatmul.mubr.f32.gmra.mrb[6].mxu1 %v84_v36  ;;  %8478 = vmatpush1.bf16.msra.mxu0 %v11888_v37  ;;  %v11950_v36 = vpack.c.bf16 %v858_v26, %v854_v25 }
  0xa7   :  { %8510 = vmatpush1.bf16.msra.mxu1 %v11892_v40  ;;  %512 = vmatprep.mubr.f32.mxu0 %v11678_v0 }
  0xa8   :  { %738 = vmatprep.mubr.f32.mxu1 %v11678_v0  ;;  %8480 = vmatprep.subr.bf16.mxu0 %v11896_v43 }
  0xa9   :  { %513 = vmatmul.mubr.f32.gmra.mrb[8].mxu0 %v87_v49  ;;  %8512 = vmatprep.subr.bf16.mxu1 %v11899_v46 }
  0xaa   :  { %739 = vmatmul.mubr.f32.gmra.mrb[8].mxu1 %v87_v49  ;;  %8482 = vmatpush1.bf16.msra.mxu0 %v11905_v50  ;;  %v12016_v49 = vrot.slane %v289_v47, %v12008_v45 }
  0xab   :  { %8514 = vmatpush1.bf16.msra.mxu1 %v11909_v53  ;;  %518 = vmatprep.mubr.f32.mxu0 %v11678_v0 }
  0xac   :  { %744 = vmatprep.mubr.f32.mxu1 %v11678_v0  ;;  %8484 = vmatprep.subr.bf16.mxu0 %v11913_v58 }
  0xad   :  { %519 = vmatmul.mubr.f32.gmra.mrb[10].mxu0 %v90_v3  ;;  %8516 = vmatprep.subr.bf16.mxu1 %v11916_v62 }
  0xae   :  { %745 = vmatmul.mubr.f32.gmra.mrb[10].mxu1 %v90_v3  ;;  %8486 = vmatpush1.bf16.msra.mxu0 %v11922_v5 }
  0xaf   :  { %8518 = vmatpush1.bf16.msra.mxu1 %v11926_v9  ;;  %524 = vmatprep.mubr.f32.mxu0 %v11678_v0 }
  0xb0   :  { %750 = vmatprep.mubr.f32.mxu1 %v11678_v0  ;;  %8488 = vmatprep.subr.bf16.mxu0 %v11930_v13 }
  0xb1   :  { %525 = vmatmul.mubr.f32.gmra.mrb[12].mxu0 %v93_v22  ;;  %8520 = vmatprep.subr.bf16.mxu1 %v11933_v18 }
  0xb2   :  { %751 = vmatmul.mubr.f32.gmra.mrb[12].mxu1 %v93_v22  ;;  %8490 = vmatpush1.bf16.msra.mxu0 %v11939_v23 }
  0xb3   :  { %8522 = vmatpush1.bf16.msra.mxu1 %v11943_v28  ;;  %530 = vmatprep.mubr.f32.mxu0 %v11678_v0 }
  0xb4   :  { %756 = vmatprep.mubr.f32.mxu1 %v11678_v0  ;;  %8492 = vmatprep.subr.bf16.mxu0 %v11947_v32 }
  0xb5   :  { %531 = vmatmul.mubr.f32.gmra.mrb[14].mxu0 %v96_v38  ;;  %8524 = vmatprep.subr.bf16.mxu1 %v11950_v36 }
  0xb6   :  { %757 = vmatmul.mubr.f32.gmra.mrb[14].mxu1 %v96_v38  ;;  %8494 = vmatpush1.bf16.msra.mxu0 %v11956_v39 }
  0xb7   :  { %8526 = vmatpush1.bf16.msra.mxu1 %v11960_v41  ;;  %927 = vmatprep.mubr.f32.mxu0 %v11678_v0 }
  0xb8   :  { %998 = vmatprep.mubr.f32.mxu1 %v11678_v0  ;;  %8528 = vmatprep.subr.bf16.mxu0 %v11831_v54 }
  0xb9   :  { %928 = vmatmul.mubr.f32.vlgmr.msra.gmra.mrb[0].mxu0 %v11678_v0  ;;  %8560 = vmatprep.subr.bf16.mxu1 %v11833_v57 }
  0xba   :  { %999 = vmatmul.mubr.f32.vlgmr.msra.gmra.mrb[0].mxu1 %v11678_v0  ;;  %8530 = vmatpush1.bf16.msra.mxu0 %v11838_v61 }
  0xbb   :  { %8562 = vmatpush1.bf16.msra.mxu1 %v11841_v1  ;;  %8532 = vmatprep.subr.bf16.mxu0 %v11845_v4 }
  0xbc   :  { %8564 = vmatprep.subr.bf16.mxu1 %v11848_v7  ;;  %1102 = vmatprep.mubr.f32.mxu0 %v11678_v0 }
  0xbd   :  { %1173 = vmatprep.mubr.f32.mxu1 %v11678_v0 }
  0xbe   :  { %8534 = vmatpush1.bf16.msra.mxu0 %v11854_v11 }
  0xbf   :  { %8566 = vmatpush1.bf16.msra.mxu1 %v11858_v14  ;;  %8536 = vmatprep.subr.bf16.mxu0 %v11862_v17 }
  0xc0   :  { %8568 = vmatprep.subr.bf16.mxu1 %v11865_v20 }
  0xc2   :  { %8538 = vmatpush1.bf16.msra.mxu0 %v11871_v24 }
  0xc3   :  { %8570 = vmatpush1.bf16.msra.mxu1 %v11875_v27  ;;  %8540 = vmatprep.subr.bf16.mxu0 %v11879_v30 }
  0xc4   :  { %8572 = vmatprep.subr.bf16.mxu1 %v11882_v33 }
  0xc6   :  { %8542 = vmatpush1.bf16.msra.mxu0 %v11888_v37 }
  0xc7   :  { %8574 = vmatpush1.bf16.msra.mxu1 %v11892_v40  ;;  %8544 = vmatprep.subr.bf16.mxu0 %v11896_v43 }
  0xc8   :  { %8576 = vmatprep.subr.bf16.mxu1 %v11899_v46 }
  0xca   :  { %8546 = vmatpush1.bf16.msra.mxu0 %v11905_v50 }
  0xcb   :  { %8578 = vmatpush1.bf16.msra.mxu1 %v11909_v53  ;;  %8548 = vmatprep.subr.bf16.mxu0 %v11913_v58 }
  0xcc   :  { %8580 = vmatprep.subr.bf16.mxu1 %v11916_v62 }
  0xce   :  { %8550 = vmatpush1.bf16.msra.mxu0 %v11922_v5 }
  0xcf   :  { %8582 = vmatpush1.bf16.msra.mxu1 %v11926_v9  ;;  %8552 = vmatprep.subr.bf16.mxu0 %v11930_v13 }
  0xd0   :  { %8584 = vmatprep.subr.bf16.mxu1 %v11933_v18 }
  0xd2   :  { %8554 = vmatpush1.bf16.msra.mxu0 %v11939_v23 }
  0xd3   :  { %8586 = vmatpush1.bf16.msra.mxu1 %v11943_v28  ;;  %8556 = vmatprep.subr.bf16.mxu0 %v11947_v32 }
  0xd4   :  { %8588 = vmatprep.subr.bf16.mxu1 %v11950_v36 }
  0xd6   :  { %8558 = vmatpush1.bf16.msra.mxu0 %v11956_v39 }
  0xd7   :  { %8590 = vmatpush1.bf16.msra.mxu1 %v11960_v41  ;;  %8592 = vmatprep.subr.bf16.mxu0 %v11831_v54 }
  0xd8   :  { %8624 = vmatprep.subr.bf16.mxu1 %v11833_v57 }
 0x18c   :  { %v929_v52 = vpop.f32.mrb[0].mxu0 }
 0x18d   :  { %v10791_v56 = vadd.f32 %v929_v52, %v12016_v49  ;;  %v1000_v59 = vpop.f32.mrb[0].mxu1  ;;  %v931_v60 = vpop.f32.mrb[1].mxu0 }
 0x18e   :  { %v10792_v63 = vadd.f32 %v931_v60, %v12019_v51  ;;  %v1002_v2 = vpop.f32.mrb[1].mxu1  ;;  %v10807_v19 = vadd.f32 %v1000_v59, %v12032_v15 }
 0x18f   :  { %v8048_v3 = vmul.f32 -1.442695, %v10791_v56  ;;  %v10808_v12 = vadd.f32 %v1002_v2, %v12026_v8 }
 0x190   :  { %v8049_v6 = vmul.f32 -1.442695, %v10792_v63 }
 0x191   :  { %11087 = vpow2.f32 %v8048_v3  ;;  %v8050_v16 = vmul.f32 -1.442695, %v10808_v12 }
 0x192   :  { %11089 = vpow2.f32 %v8049_v6 }
 0x193   :  { %11091 = vpow2.f32 %v8050_v16 }
 0x194   :  { %11093 = vtanh.f32 %v10807_v19 }
 0x19b   :  { %v11088_v21 = vpop.eup %11087 }
 0x19c   :  { %v11090_v22 = vpop.eup %11089  ;;  %v1012_v25 = vadd.f32 1.0, %v11088_v21 }
 0x19d   :  { %v1018_v26 = vadd.f32 1.0, %v11090_v22  ;;  %v11092_v29 = vpop.eup %11091 }
 0x19e   :  { %11095 = vrcp.f32 %v1012_v25  ;;  %v11094_v31 = vpop.eup %11093  ;;  %v1025_v44 = vadd.f32 1.0, %v11092_v29 }
 0x19f   :  { %11097 = vrcp.f32 %v1018_v26 }
 0x1a0   :  { %11099 = vrcp.f32 %v1025_v44 }
 0x1a8   :  { %v11096_v34 = vpop.eup %11095 }
 0x1a9   :  { %v11098_v35 = vpop.eup %11097  ;;  %v1029_v38 = vmul.f32 %v11096_v34, %v11094_v31 }
 0x1aa   :  { %v1028_v52 = vmul.f32 0.0, %v11098_v35  ;;  %v11100_v56 = vpop.eup %11099 }
 0x1ac   :  { %v12035_v47 = vadd.f32 %v1029_v38, %v1028_v52 }
 0x1ae   :  { %11101 = vtanh.f32 %v12035_v47 }
 0x1b8   :  { %v11102_v59 = vpop.eup %11101 }
 0x1b9   :  { %v12038_v60 = vmul.f32 %v11102_v59, %v11100_v56 }
 0x1bb   :  { %1103 = vmatmul.mubr.f32.vlgmr.msra.gmra.mrb[2].mxu0 %v12038_v60  ;;  %1174 = vmatmul.mubr.f32.vlgmr.msra.gmra.mrb[2].mxu1 %v12038_v60 }
 0x1bc   :  { %8594 = vmatpush1.bf16.msra.mxu0 %v11838_v61  ;;  %8626 = vmatpush1.bf16.msra.mxu1 %v11841_v1 }
 0x1bd   :  { %8596 = vmatprep.subr.bf16.mxu0 %v11845_v4  ;;  %8628 = vmatprep.subr.bf16.mxu1 %v11848_v7 }
 0x1be   :  { %1277 = vmatprep.mubr.f32.mxu0 %v11678_v0  ;;  %1348 = vmatprep.mubr.f32.mxu1 %v11678_v0 }
 0x1c0   :  { %8598 = vmatpush1.bf16.msra.mxu0 %v11854_v11  ;;  %8630 = vmatpush1.bf16.msra.mxu1 %v11858_v14 }
 0x1c1   :  { %8600 = vmatprep.subr.bf16.mxu0 %v11862_v17  ;;  %8632 = vmatprep.subr.bf16.mxu1 %v11865_v20 }
 0x1c4   :  { %8602 = vmatpush1.bf16.msra.mxu0 %v11871_v24  ;;  %8634 = vmatpush1.bf16.msra.mxu1 %v11875_v27 }
 0x1c5   :  { %8604 = vmatprep.subr.bf16.mxu0 %v11879_v30  ;;  %8636 = vmatprep.subr.bf16.mxu1 %v11882_v33 }
 0x1c8   :  { %8606 = vmatpush1.bf16.msra.mxu0 %v11888_v37  ;;  %8638 = vmatpush1.bf16.msra.mxu1 %v11892_v40 }
 0x1c9   :  { %8608 = vmatprep.subr.bf16.mxu0 %v11896_v43  ;;  %8640 = vmatprep.subr.bf16.mxu1 %v11899_v46 }
 0x1cc   :  { %8610 = vmatpush1.bf16.msra.mxu0 %v11905_v50  ;;  %8642 = vmatpush1.bf16.msra.mxu1 %v11909_v53 }
 0x1cd   :  { %8612 = vmatprep.subr.bf16.mxu0 %v11913_v58  ;;  %8644 = vmatprep.subr.bf16.mxu1 %v11916_v62 }
 0x1d0   :  { %8614 = vmatpush1.bf16.msra.mxu0 %v11922_v5  ;;  %8646 = vmatpush1.bf16.msra.mxu1 %v11926_v9 }
 0x1d1   :  { %8616 = vmatprep.subr.bf16.mxu0 %v11930_v13  ;;  %8648 = vmatprep.subr.bf16.mxu1 %v11933_v18 }
 0x1d4   :  { %8618 = vmatpush1.bf16.msra.mxu0 %v11939_v23  ;;  %8650 = vmatpush1.bf16.msra.mxu1 %v11943_v28 }
 0x1d5   :  { %8620 = vmatprep.subr.bf16.mxu0 %v11947_v32  ;;  %8652 = vmatprep.subr.bf16.mxu1 %v11950_v36 }
 0x1d8   :  { %8622 = vmatpush1.bf16.msra.mxu0 %v11956_v39  ;;  %8654 = vmatpush1.bf16.msra.mxu1 %v11960_v41 }
 0x1d9   :  { %8656 = vmatprep.subr.bf16.mxu0 %v11831_v54  ;;  %8688 = vmatprep.subr.bf16.mxu1 %v11833_v57 }
 0x28e   :  { %v1104_v63 = vpop.f32.mrb[2].mxu0  ;;  %v1175_v2 = vpop.f32.mrb[2].mxu1 }
 0x28f   :  { %v10793_v3 = vadd.f32 %v1104_v63, %v12016_v49  ;;  %v1106_v6 = vpop.f32.mrb[3].mxu0  ;;  %v1177_v12 = vpop.f32.mrb[3].mxu1  ;;  %v10809_v26 = vadd.f32 %v1175_v2, %v12032_v15 }
 0x290   :  { %v10794_v16 = vadd.f32 %v1106_v6, %v12019_v51  ;;  %v10810_v22 = vadd.f32 %v1177_v12, %v12026_v8 }
 0x291   :  { %v8051_v19 = vmul.f32 -1.442695, %v10793_v3 }
 0x292   :  { %v8052_v21 = vmul.f32 -1.442695, %v10794_v16  ;;  %v8053_v25 = vmul.f32 -1.442695, %v10810_v22 }
 0x293   :  { %11103 = vpow2.f32 %v8051_v19 }
 0x294   :  { %11105 = vpow2.f32 %v8052_v21 }
 0x295   :  { %11107 = vpow2.f32 %v8053_v25 }
 0x296   :  { %11109 = vtanh.f32 %v10809_v26 }
 0x29d   :  { %v11104_v29 = vpop.eup %11103 }
 0x29e   :  { %v11106_v31 = vpop.eup %11105  ;;  %v1187_v34 = vadd.f32 1.0, %v11104_v29 }
 0x29f   :  { %v1193_v35 = vadd.f32 1.0, %v11106_v31  ;;  %v11108_v38 = vpop.eup %11107 }
 0x2a0   :  { %11111 = vrcp.f32 %v1187_v34  ;;  %v11110_v44 = vpop.eup %11109  ;;  %v1200_v63 = vadd.f32 1.0, %v11108_v38 }
 0x2a1   :  { %11113 = vrcp.f32 %v1193_v35 }
 0x2a2   :  { %11115 = vrcp.f32 %v1200_v63 }
 0x2aa   :  { %v11112_v52 = vpop.eup %11111 }
 0x2ab   :  { %v11114_v56 = vpop.eup %11113  ;;  %v1204_v59 = vmul.f32 %v11112_v52, %v11110_v44 }
 0x2ac   :  { %v1203_v3 = vmul.f32 %v11114_v56, %v12035_v47  ;;  %v11116_v2 = vpop.eup %11115 }
 0x2ae   :  { %v12081_v6 = vadd.f32 %v1204_v59, %v1203_v3 }
 0x2b0   :  { %11117 = vtanh.f32 %v12081_v6 }
 0x2ba   :  { %v11118_v12 = vpop.eup %11117 }
 0x2bb   :  { %v12084_v16 = vmul.f32 %v11118_v12, %v11116_v2 }
 0x2bd   :  { %1278 = vmatmul.mubr.f32.vlgmr.msra.gmra.mrb[4].mxu0 %v12084_v16  ;;  %1349 = vmatmul.mubr.f32.vlgmr.msra.gmra.mrb[4].mxu1 %v12084_v16 }
 0x2be   :  { %8658 = vmatpush1.bf16.msra.mxu0 %v11838_v61  ;;  %8690 = vmatpush1.bf16.msra.mxu1 %v11841_v1 }
 0x2bf   :  { %8660 = vmatprep.subr.bf16.mxu0 %v11845_v4  ;;  %8692 = vmatprep.subr.bf16.mxu1 %v11848_v7 }
 0x2c0   :  { %1452 = vmatprep.mubr.f32.mxu0 %v11678_v0  ;;  %1523 = vmatprep.mubr.f32.mxu1 %v11678_v0 }
 0x2c2   :  { %8662 = vmatpush1.bf16.msra.mxu0 %v11854_v11  ;;  %8694 = vmatpush1.bf16.msra.mxu1 %v11858_v14 }
 0x2c3   :  { %8664 = vmatprep.subr.bf16.mxu0 %v11862_v17  ;;  %8696 = vmatprep.subr.bf16.mxu1 %v11865_v20 }
 0x2c6   :  { %8666 = vmatpush1.bf16.msra.mxu0 %v11871_v24  ;;  %8698 = vmatpush1.bf16.msra.mxu1 %v11875_v27 }
 0x2c7   :  { %8668 = vmatprep.subr.bf16.mxu0 %v11879_v30  ;;  %8700 = vmatprep.subr.bf16.mxu1 %v11882_v33 }
 0x2ca   :  { %8670 = vmatpush1.bf16.msra.mxu0 %v11888_v37  ;;  %8702 = vmatpush1.bf16.msra.mxu1 %v11892_v40 }
 0x2cb   :  { %8672 = vmatprep.subr.bf16.mxu0 %v11896_v43  ;;  %8704 = vmatprep.subr.bf16.mxu1 %v11899_v46 }
 0x2ce   :  { %8674 = vmatpush1.bf16.msra.mxu0 %v11905_v50  ;;  %8706 = vmatpush1.bf16.msra.mxu1 %v11909_v53 }
 0x2cf   :  { %8676 = vmatprep.subr.bf16.mxu0 %v11913_v58  ;;  %8708 = vmatprep.subr.bf16.mxu1 %v11916_v62 }
 0x2d2   :  { %8678 = vmatpush1.bf16.msra.mxu0 %v11922_v5  ;;  %8710 = vmatpush1.bf16.msra.mxu1 %v11926_v9 }
 0x2d3   :  { %8680 = vmatprep.subr.bf16.mxu0 %v11930_v13  ;;  %8712 = vmatprep.subr.bf16.mxu1 %v11933_v18 }
 0x2d6   :  { %8682 = vmatpush1.bf16.msra.mxu0 %v11939_v23  ;;  %8714 = vmatpush1.bf16.msra.mxu1 %v11943_v28 }
 0x2d7   :  { %8684 = vmatprep.subr.bf16.mxu0 %v11947_v32  ;;  %8716 = vmatprep.subr.bf16.mxu1 %v11950_v36 }
 0x2da   :  { %8686 = vmatpush1.bf16.msra.mxu0 %v11956_v39  ;;  %8718 = vmatpush1.bf16.msra.mxu1 %v11960_v41 }
 0x2db   :  { %8720 = vmatprep.subr.bf16.mxu0 %v11831_v54  ;;  %8752 = vmatprep.subr.bf16.mxu1 %v11833_v57 }
 0x390   :  { %v1279_v47 = vpop.f32.mrb[4].mxu0  ;;  %v1350_v19 = vpop.f32.mrb[4].mxu1 }
 0x391   :  { %v10795_v21 = vadd.f32 %v1279_v47, %v12016_v49  ;;  %v1281_v22 = vpop.f32.mrb[5].mxu0  ;;  %v1352_v25 = vpop.f32.mrb[5].mxu1  ;;  %v10811_v38 = vadd.f32 %v1350_v19, %v12032_v15 }
 0x392   :  { %v10796_v26 = vadd.f32 %v1281_v22, %v12019_v51  ;;  %v10812_v34 = vadd.f32 %v1352_v25, %v12026_v8 }
 0x393   :  { %v8054_v29 = vmul.f32 -1.442695, %v10795_v21 }
 0x394   :  { %v8055_v31 = vmul.f32 -1.442695, %v10796_v26  ;;  %v8056_v35 = vmul.f32 -1.442695, %v10812_v34 }
 0x395   :  { %11119 = vpow2.f32 %v8054_v29 }
 0x396   :  { %11121 = vpow2.f32 %v8055_v31 }
 0x397   :  { %11123 = vpow2.f32 %v8056_v35 }
 0x398   :  { %11125 = vtanh.f32 %v10811_v38 }
 0x39f   :  { %v11120_v44 = vpop.eup %11119 }
 0x3a0   :  { %v11122_v52 = vpop.eup %11121  ;;  %v1362_v56 = vadd.f32 1.0, %v11120_v44 }
 0x3a1   :  { %v1368_v59 = vadd.f32 1.0, %v11122_v52  ;;  %v11124_v63 = vpop.eup %11123 }
 0x3a2   :  { %11127 = vrcp.f32 %v1362_v56  ;;  %v11126_v3 = vpop.eup %11125  ;;  %v1375_v21 = vadd.f32 1.0, %v11124_v63 }
 0x3a3   :  { %11129 = vrcp.f32 %v1368_v59 }
 0x3a4   :  { %11131 = vrcp.f32 %v1375_v21 }
 0x3ac   :  { %v11128_v2 = vpop.eup %11127 }
 0x3ad   :  { %v11130_v12 = vpop.eup %11129  ;;  %v1379_v47 = vmul.f32 %v11128_v2, %v11126_v3 }
 0x3ae   :  { %v1378_v22 = vmul.f32 %v11130_v12, %v12081_v6  ;;  %v11132_v19 = vpop.eup %11131 }
 0x3b0   :  { %v12127_v25 = vadd.f32 %v1379_v47, %v1378_v22 }
 0x3b2   :  { %11133 = vtanh.f32 %v12127_v25 }
 0x3bc   :  { %v11134_v26 = vpop.eup %11133 }
 0x3bd   :  { %v12130_v29 = vmul.f32 %v11134_v26, %v11132_v19 }
 0x3bf   :  { %1453 = vmatmul.mubr.f32.vlgmr.msra.gmra.mrb[6].mxu0 %v12130_v29  ;;  %1524 = vmatmul.mubr.f32.vlgmr.msra.gmra.mrb[6].mxu1 %v12130_v29 }
 0x3c0   :  { %8722 = vmatpush1.bf16.msra.mxu0 %v11838_v61  ;;  %8754 = vmatpush1.bf16.msra.mxu1 %v11841_v1 }
 0x3c1   :  { %8724 = vmatprep.subr.bf16.mxu0 %v11845_v4  ;;  %8756 = vmatprep.subr.bf16.mxu1 %v11848_v7 }
 0x3c2   :  { %1627 = vmatprep.mubr.f32.mxu0 %v11678_v0  ;;  %1698 = vmatprep.mubr.f32.mxu1 %v11678_v0 }
 0x3c4   :  { %8726 = vmatpush1.bf16.msra.mxu0 %v11854_v11  ;;  %8758 = vmatpush1.bf16.msra.mxu1 %v11858_v14 }
 0x3c5   :  { %8728 = vmatprep.subr.bf16.mxu0 %v11862_v17  ;;  %8760 = vmatprep.subr.bf16.mxu1 %v11865_v20 }
 0x3c8   :  { %8730 = vmatpush1.bf16.msra.mxu0 %v11871_v24  ;;  %8762 = vmatpush1.bf16.msra.mxu1 %v11875_v27 }
 0x3c9   :  { %8732 = vmatprep.subr.bf16.mxu0 %v11879_v30  ;;  %8764 = vmatprep.subr.bf16.mxu1 %v11882_v33 }
 0x3cc   :  { %8734 = vmatpush1.bf16.msra.mxu0 %v11888_v37  ;;  %8766 = vmatpush1.bf16.msra.mxu1 %v11892_v40 }
 0x3cd   :  { %8736 = vmatprep.subr.bf16.mxu0 %v11896_v43  ;;  %8768 = vmatprep.subr.bf16.mxu1 %v11899_v46 }
 0x3d0   :  { %8738 = vmatpush1.bf16.msra.mxu0 %v11905_v50  ;;  %8770 = vmatpush1.bf16.msra.mxu1 %v11909_v53 }
 0x3d1   :  { %8740 = vmatprep.subr.bf16.mxu0 %v11913_v58  ;;  %8772 = vmatprep.subr.bf16.mxu1 %v11916_v62 }
 0x3d4   :  { %8742 = vmatpush1.bf16.msra.mxu0 %v11922_v5  ;;  %8774 = vmatpush1.bf16.msra.mxu1 %v11926_v9 }
 0x3d5   :  { %8744 = vmatprep.subr.bf16.mxu0 %v11930_v13  ;;  %8776 = vmatprep.subr.bf16.mxu1 %v11933_v18 }
 0x3d8   :  { %8746 = vmatpush1.bf16.msra.mxu0 %v11939_v23  ;;  %8778 = vmatpush1.bf16.msra.mxu1 %v11943_v28 }
 0x3d9   :  { %8748 = vmatprep.subr.bf16.mxu0 %v11947_v32  ;;  %8780 = vmatprep.subr.bf16.mxu1 %v11950_v36 }
 0x3dc   :  { %8750 = vmatpush1.bf16.msra.mxu0 %v11956_v39  ;;  %8782 = vmatpush1.bf16.msra.mxu1 %v11960_v41 }
 0x3dd   :  { %8784 = vmatprep.subr.bf16.mxu0 %v11831_v54  ;;  %8816 = vmatprep.subr.bf16.mxu1 %v11833_v57 }
 0x492   :  { %v1454_v6 = vpop.f32.mrb[6].mxu0  ;;  %v1525_v31 = vpop.f32.mrb[6].mxu1 }
 0x493   :  { %v10797_v34 = vadd.f32 %v1454_v6, %v12016_v49  ;;  %v1456_v35 = vpop.f32.mrb[7].mxu0  ;;  %v1527_v38 = vpop.f32.mrb[7].mxu1  ;;  %v10813_v3 = vadd.f32 %v1525_v31, %v12032_v15 }
 0x494   :  { %v10798_v44 = vadd.f32 %v1456_v35, %v12019_v51  ;;  %v10814_v59 = vadd.f32 %v1527_v38, %v12026_v8 }
 0x495   :  { %v8057_v52 = vmul.f32 -1.442695, %v10797_v34 }
 0x496   :  { %v8058_v56 = vmul.f32 -1.442695, %v10798_v44  ;;  %v8059_v63 = vmul.f32 -1.442695, %v10814_v59 }
 0x497   :  { %11135 = vpow2.f32 %v8057_v52 }
 0x498   :  { %11137 = vpow2.f32 %v8058_v56 }
 0x499   :  { %11139 = vpow2.f32 %v8059_v63 }
 0x49a   :  { %11141 = vtanh.f32 %v10813_v3 }
 0x4a1   :  { %v11136_v2 = vpop.eup %11135 }
 0x4a2   :  { %v11138_v12 = vpop.eup %11137  ;;  %v1537_v47 = vadd.f32 1.0, %v11136_v2 }
 0x4a3   :  { %v1543_v21 = vadd.f32 1.0, %v11138_v12  ;;  %v11140_v22 = vpop.eup %11139 }
 0x4a4   :  { %11143 = vrcp.f32 %v1537_v47  ;;  %v11142_v19 = vpop.eup %11141  ;;  %v1550_v35 = vadd.f32 1.0, %v11140_v22 }
 0x4a5   :  { %11145 = vrcp.f32 %v1543_v21 }
 0x4a6   :  { %11147 = vrcp.f32 %v1550_v35 }
 0x4ae   :  { %v11144_v26 = vpop.eup %11143 }
 0x4af   :  { %v11146_v6 = vpop.eup %11145  ;;  %v1554_v34 = vmul.f32 %v11144_v26, %v11142_v19 }
 0x4b0   :  { %v1553_v44 = vmul.f32 %v11146_v6, %v12127_v25  ;;  %v11148_v31 = vpop.eup %11147 }
 0x4b2   :  { %v12173_v38 = vadd.f32 %v1554_v34, %v1553_v44 }
 0x4b4   :  { %11149 = vtanh.f32 %v12173_v38 }
 0x4be   :  { %v11150_v52 = vpop.eup %11149 }
 0x4bf   :  { %v12176_v56 = vmul.f32 %v11150_v52, %v11148_v31 }
 0x4c1   :  { %1628 = vmatmul.mubr.f32.vlgmr.msra.gmra.mrb[8].mxu0 %v12176_v56  ;;  %1699 = vmatmul.mubr.f32.vlgmr.msra.gmra.mrb[8].mxu1 %v12176_v56 }
 0x4c2   :  { %8786 = vmatpush1.bf16.msra.mxu0 %v11838_v61  ;;  %8818 = vmatpush1.bf16.msra.mxu1 %v11841_v1 }
 0x4c3   :  { %8788 = vmatprep.subr.bf16.mxu0 %v11845_v4  ;;  %8820 = vmatprep.subr.bf16.mxu1 %v11848_v7 }
 0x4c4   :  { %1802 = vmatprep.mubr.f32.mxu0 %v11678_v0  ;;  %1873 = vmatprep.mubr.f32.mxu1 %v11678_v0 }
 0x4c6   :  { %8790 = vmatpush1.bf16.msra.mxu0 %v11854_v11  ;;  %8822 = vmatpush1.bf16.msra.mxu1 %v11858_v14 }
 0x4c7   :  { %8792 = vmatprep.subr.bf16.mxu0 %v11862_v17  ;;  %8824 = vmatprep.subr.bf16.mxu1 %v11865_v20 }
 0x4ca   :  { %8794 = vmatpush1.bf16.msra.mxu0 %v11871_v24  ;;  %8826 = vmatpush1.bf16.msra.mxu1 %v11875_v27 }
 0x4cb   :  { %8796 = vmatprep.subr.bf16.mxu0 %v11879_v30  ;;  %8828 = vmatprep.subr.bf16.mxu1 %v11882_v33 }
 0x4ce   :  { %8798 = vmatpush1.bf16.msra.mxu0 %v11888_v37  ;;  %8830 = vmatpush1.bf16.msra.mxu1 %v11892_v40 }
 0x4cf   :  { %8800 = vmatprep.subr.bf16.mxu0 %v11896_v43  ;;  %8832 = vmatprep.subr.bf16.mxu1 %v11899_v46 }
 0x4d2   :  { %8802 = vmatpush1.bf16.msra.mxu0 %v11905_v50  ;;  %8834 = vmatpush1.bf16.msra.mxu1 %v11909_v53 }
 0x4d3   :  { %8804 = vmatprep.subr.bf16.mxu0 %v11913_v58  ;;  %8836 = vmatprep.subr.bf16.mxu1 %v11916_v62 }
 0x4d6   :  { %8806 = vmatpush1.bf16.msra.mxu0 %v11922_v5  ;;  %8838 = vmatpush1.bf16.msra.mxu1 %v11926_v9 }
 0x4d7   :  { %8808 = vmatprep.subr.bf16.mxu0 %v11930_v13  ;;  %8840 = vmatprep.subr.bf16.mxu1 %v11933_v18 }
 0x4da   :  { %8810 = vmatpush1.bf16.msra.mxu0 %v11939_v23  ;;  %8842 = vmatpush1.bf16.msra.mxu1 %v11943_v28 }
 0x4db   :  { %8812 = vmatprep.subr.bf16.mxu0 %v11947_v32  ;;  %8844 = vmatprep.subr.bf16.mxu1 %v11950_v36 }
 0x4de   :  { %8814 = vmatpush1.bf16.msra.mxu0 %v11956_v39  ;;  %8846 = vmatpush1.bf16.msra.mxu1 %v11960_v41 }
 0x4df   :  { %8848 = vmatprep.subr.bf16.mxu0 %v11831_v54  ;;  %8880 = vmatprep.subr.bf16.mxu1 %v11833_v57 }
 0x594   :  { %v1629_v25 = vpop.f32.mrb[8].mxu0  ;;  %v1700_v59 = vpop.f32.mrb[8].mxu1 }
 0x595   :  { %v10799_v63 = vadd.f32 %v1629_v25, %v12016_v49  ;;  %v1631_v3 = vpop.f32.mrb[9].mxu0  ;;  %v1702_v2 = vpop.f32.mrb[9].mxu1  ;;  %v10815_v26 = vadd.f32 %v1700_v59, %v12032_v15 }
 0x596   :  { %v10800_v12 = vadd.f32 %v1631_v3, %v12019_v51  ;;  %v10816_v22 = vadd.f32 %v1702_v2, %v12026_v8 }
 0x597   :  { %v8060_v47 = vmul.f32 -1.442695, %v10799_v63 }
 0x598   :  { %v8061_v21 = vmul.f32 -1.442695, %v10800_v12  ;;  %v8062_v19 = vmul.f32 -1.442695, %v10816_v22 }
 0x599   :  { %11151 = vpow2.f32 %v8060_v47 }
 0x59a   :  { %11153 = vpow2.f32 %v8061_v21 }
 0x59b   :  { %11155 = vpow2.f32 %v8062_v19 }
 0x59c   :  { %11157 = vtanh.f32 %v10815_v26 }
 0x5a3   :  { %v11152_v6 = vpop.eup %11151 }
 0x5a4   :  { %v11154_v34 = vpop.eup %11153  ;;  %v1712_v35 = vadd.f32 1.0, %v11152_v6 }
 0x5a5   :  { %v1718_v44 = vadd.f32 1.0, %v11154_v34  ;;  %v11156_v31 = vpop.eup %11155 }
 0x5a6   :  { %11159 = vrcp.f32 %v1712_v35  ;;  %v11158_v52 = vpop.eup %11157  ;;  %v1725_v12 = vadd.f32 1.0, %v11156_v31 }
 0x5a7   :  { %11161 = vrcp.f32 %v1718_v44 }
 0x5a8   :  { %11163 = vrcp.f32 %v1725_v12 }
 0x5b0   :  { %v11160_v25 = vpop.eup %11159 }
 0x5b1   :  { %v11162_v63 = vpop.eup %11161  ;;  %v1729_v3 = vmul.f32 %v11160_v25, %v11158_v52 }
 0x5b2   :  { %v1728_v47 = vmul.f32 %v11162_v63, %v12173_v38  ;;  %v11164_v59 = vpop.eup %11163 }
 0x5b4   :  { %v12219_v2 = vadd.f32 %v1729_v3, %v1728_v47 }
 0x5b6   :  { %11165 = vtanh.f32 %v12219_v2 }
 0x5c0   :  { %v11166_v21 = vpop.eup %11165 }
 0x5c1   :  { %v12222_v22 = vmul.f32 %v11166_v21, %v11164_v59 }
 0x5c3   :  { %1803 = vmatmul.mubr.f32.vlgmr.msra.gmra.mrb[10].mxu0 %v12222_v22  ;;  %1874 = vmatmul.mubr.f32.vlgmr.msra.gmra.mrb[10].mxu1 %v12222_v22 }
 0x5c4   :  { %8850 = vmatpush1.bf16.msra.mxu0 %v11838_v61  ;;  %8882 = vmatpush1.bf16.msra.mxu1 %v11841_v1 }
 0x5c5   :  { %8852 = vmatprep.subr.bf16.mxu0 %v11845_v4  ;;  %8884 = vmatprep.subr.bf16.mxu1 %v11848_v7 }
 0x5c6   :  { %1977 = vmatprep.mubr.f32.mxu0 %v11678_v0  ;;  %2048 = vmatprep.mubr.f32.mxu1 %v11678_v0 }
 0x5c8   :  { %8854 = vmatpush1.bf16.msra.mxu0 %v11854_v11  ;;  %8886 = vmatpush1.bf16.msra.mxu1 %v11858_v14 }
 0x5c9   :  { %8856 = vmatprep.subr.bf16.mxu0 %v11862_v17  ;;  %8888 = vmatprep.subr.bf16.mxu1 %v11865_v20 }
 0x5cc   :  { %8858 = vmatpush1.bf16.msra.mxu0 %v11871_v24  ;;  %8890 = vmatpush1.bf16.msra.mxu1 %v11875_v27 }
 0x5cd   :  { %8860 = vmatprep.subr.bf16.mxu0 %v11879_v30  ;;  %8892 = vmatprep.subr.bf16.mxu1 %v11882_v33 }
 0x5d0   :  { %8862 = vmatpush1.bf16.msra.mxu0 %v11888_v37  ;;  %8894 = vmatpush1.bf16.msra.mxu1 %v11892_v40 }
 0x5d1   :  { %8864 = vmatprep.subr.bf16.mxu0 %v11896_v43  ;;  %8896 = vmatprep.subr.bf16.mxu1 %v11899_v46 }
 0x5d4   :  { %8866 = vmatpush1.bf16.msra.mxu0 %v11905_v50  ;;  %8898 = vmatpush1.bf16.msra.mxu1 %v11909_v53 }
 0x5d5   :  { %8868 = vmatprep.subr.bf16.mxu0 %v11913_v58  ;;  %8900 = vmatprep.subr.bf16.mxu1 %v11916_v62 }
 0x5d8   :  { %8870 = vmatpush1.bf16.msra.mxu0 %v11922_v5  ;;  %8902 = vmatpush1.bf16.msra.mxu1 %v11926_v9 }
 0x5d9   :  { %8872 = vmatprep.subr.bf16.mxu0 %v11930_v13  ;;  %8904 = vmatprep.subr.bf16.mxu1 %v11933_v18 }
 0x5dc   :  { %8874 = vmatpush1.bf16.msra.mxu0 %v11939_v23  ;;  %8906 = vmatpush1.bf16.msra.mxu1 %v11943_v28 }
 0x5dd   :  { %8876 = vmatprep.subr.bf16.mxu0 %v11947_v32  ;;  %8908 = vmatprep.subr.bf16.mxu1 %v11950_v36 }
 0x5e0   :  { %8878 = vmatpush1.bf16.msra.mxu0 %v11956_v39  ;;  %8910 = vmatpush1.bf16.msra.mxu1 %v11960_v41 }
 0x5e1   :  { %8912 = vmatprep.subr.bf16.mxu0 %v11831_v54  ;;  %8944 = vmatprep.subr.bf16.mxu1 %v11833_v57 }
 0x696   :  { %v1804_v38 = vpop.f32.mrb[10].mxu0  ;;  %v1875_v19 = vpop.f32.mrb[10].mxu1 }
 0x697   :  { %v10801_v26 = vadd.f32 %v1804_v38, %v12016_v49  ;;  %v1806_v6 = vpop.f32.mrb[11].mxu0  ;;  %v1877_v34 = vpop.f32.mrb[11].mxu1  ;;  %v10817_v63 = vadd.f32 %v1875_v19, %v12032_v15 }
 0x698   :  { %v10802_v35 = vadd.f32 %v1806_v6, %v12019_v51  ;;  %v10818_v52 = vadd.f32 %v1877_v34, %v12026_v8 }
 0x699   :  { %v8063_v44 = vmul.f32 -1.442695, %v10801_v26 }
 0x69a   :  { %v8064_v31 = vmul.f32 -1.442695, %v10802_v35  ;;  %v8065_v25 = vmul.f32 -1.442695, %v10818_v52  ;;  %v2270_v52 = vld [vmem:[#allocation7 + $0x10] sm:$0xff] }
 0x69b   :  { %11167 = vpow2.f32 %v8063_v44 }
 0x69c   :  { %11169 = vpow2.f32 %v8064_v31 }
 0x69d   :  { %11171 = vpow2.f32 %v8065_v25  ;;  %v2274_v25 = vld [vmem:[#allocation7 + $0x30] sm:$0xff] }
 0x69e   :  { %11173 = vtanh.f32 %v10817_v63  ;;  %v2277_v63 = vld [vmem:[#allocation7 + $0x48] sm:$0xff] }
 0x6a5   :  { %v11168_v54 = vpop.eup %11167 }
 0x6a6   :  { %v11170_v3 = vpop.eup %11169  ;;  %v1887_v57 = vadd.f32 1.0, %v11168_v54  ;;  %v2281_v54 = vld [vmem:[#allocation7 + $0x68] sm:$0xff] }
 0x6a7   :  { %v1893_v12 = vadd.f32 1.0, %v11170_v3  ;;  %v11172_v47 = vpop.eup %11171  ;;  %v2279_v3 = vld [vmem:[#allocation7 + $0x58] sm:$0xff] }
 0x6a8   :  { %11175 = vrcp.f32 %v1887_v57  ;;  %v11174_v59 = vpop.eup %11173  ;;  %v1900_v6 = vadd.f32 1.0, %v11172_v47  ;;  %v2283_v57 = vld [vmem:[#allocation7 + $0x78] sm:$0xff] }
 0x6a9   :  { %11177 = vrcp.f32 %v1893_v12 }
 0x6aa   :  { %11179 = vrcp.f32 %v1900_v6 }
 0x6b2   :  { %v11176_v21 = vpop.eup %11175 }
 0x6b3   :  { %v11178_v38 = vpop.eup %11177  ;;  %v1904_v26 = vmul.f32 %v11176_v21, %v11174_v59  ;;  %v9009_v21 = vpack.c.bf16 %v2274_v25, %v2270_v52  ;;  %v2300_v52 = vld [vmem:[#allocation7 + $0x100] sm:$0xff] }
 0x6b4   :  { %v1903_v35 = vmul.f32 %v11178_v38, %v12219_v2  ;;  %v11180_v19 = vpop.eup %11179  ;;  %v2272_v2 = vld [vmem:[#allocation7 + $0x20] sm:$0xff] }
 0x6b5   :  { %v2276_v38 = vld [vmem:[#allocation7 + $0x40] sm:$0xff] }
 0x6b6   :  { %v12265_v34 = vadd.f32 %v1904_v26, %v1903_v35  ;;  %v2280_v26 = vld [vmem:[#allocation7 + $0x60] sm:$0xff]  ;;  %v8979_v35 = vpack.c.bf16 %v2281_v54, %v2277_v63 }
 0x6b7   :  { %v2304_v25 = vld [vmem:[#allocation7 + $0x120] sm:$0xff] }
 0x6b8   :  { %11181 = vtanh.f32 %v12265_v34 }
 0x6c2   :  { %v11182_v44 = vpop.eup %11181 }
 0x6c3   :  { %v12268_v31 = vmul.f32 %v11182_v44, %v11180_v19  ;;  %v2278_v19 = vld [vmem:[#allocation7 + $0x50] sm:$0xff] }
 0x6c4   :  { %v2282_v44 = vld [vmem:[#allocation7 + $0x70] sm:$0xff] }
 0x6c5   :  { %1978 = vmatmul.mubr.f32.vlgmr.msra.gmra.mrb[12].mxu0 %v12268_v31  ;;  %2049 = vmatmul.mubr.f32.vlgmr.msra.gmra.mrb[12].mxu1 %v12268_v31 }
 0x6c6   :  { %8914 = vmatpush1.bf16.msra.mxu0 %v11838_v61  ;;  %8946 = vmatpush1.bf16.msra.mxu1 %v11841_v1  ;;  %v2269_v61 = vld [vmem:[#allocation7 + $0x8] sm:$0xff] }
 0x6c7   :  { %8916 = vmatprep.subr.bf16.mxu0 %v11845_v4  ;;  %8948 = vmatprep.subr.bf16.mxu1 %v11848_v7  ;;  %v2273_v1 = vld [vmem:[#allocation7 + $0x28] sm:$0xff]  ;;  %v2271_v4 = vld [vmem:[#allocation7 + $0x18] sm:$0xff] }
 0x6c8   :  { %2152 = vmatprep.mubr.f32.mxu0 %v11678_v0  ;;  %2223 = vmatprep.mubr.f32.mxu1 %v11678_v0  ;;  %v8975_v7 = vpack.c.bf16 %v2273_v1, %v2269_v61  ;;  %v2285_v61 = vld [vmem:[#allocation7 + $0x88] sm:$0xff] }
 0x6c9   :  { %v2289_v1 = vld [vmem:[#allocation7 + $0xa8] sm:$0xff] }
 0x6ca   :  { %8918 = vmatpush1.bf16.msra.mxu0 %v11854_v11  ;;  %8950 = vmatpush1.bf16.msra.mxu1 %v11858_v14  ;;  %v2275_v11 = vld [vmem:[#allocation7 + $0x38] sm:$0xff] }
 0x6cb   :  { %8920 = vmatprep.subr.bf16.mxu0 %v11862_v17  ;;  %8952 = vmatprep.subr.bf16.mxu1 %v11865_v20  ;;  %v9007_v14 = vpack.c.bf16 %v2275_v11, %v2271_v4  ;;  %v2287_v4 = vld [vmem:[#allocation7 + $0x98] sm:$0xff]  ;;  %v8981_v11 = vpack.c.bf16 %v2280_v26, %v2276_v38  ;;  %v8993_v38 = vpack.c.bf16 %v2304_v25, %v2300_v52  ;;  %v2616_v25 = vld [vmem:[#allocation9 + $0x210] sm:$0xff] }
 0x6ce   :  { %8922 = vmatpush1.bf16.msra.mxu0 %v11871_v24  ;;  %8954 = vmatpush1.bf16.msra.mxu1 %v11875_v27 }
 0x6cf   :  { %8924 = vmatprep.subr.bf16.mxu0 %v11879_v30  ;;  %8956 = vmatprep.subr.bf16.mxu1 %v11882_v33 }
 0x6d2   :  { %8926 = vmatpush1.bf16.msra.mxu0 %v11888_v37  ;;  %8958 = vmatpush1.bf16.msra.mxu1 %v11892_v40 }
 0x6d3   :  { %8928 = vmatprep.subr.bf16.mxu0 %v11896_v43  ;;  %8960 = vmatprep.subr.bf16.mxu1 %v11899_v46 }
 0x6d6   :  { %8930 = vmatpush1.bf16.msra.mxu0 %v11905_v50  ;;  %8962 = vmatpush1.bf16.msra.mxu1 %v11909_v53 }
 0x6d7   :  { %8932 = vmatprep.subr.bf16.mxu0 %v11913_v58  ;;  %8964 = vmatprep.subr.bf16.mxu1 %v11916_v62 }
 0x6da   :  { %8934 = vmatpush1.bf16.msra.mxu0 %v11922_v5  ;;  %8966 = vmatpush1.bf16.msra.mxu1 %v11926_v9 }
 0x6db   :  { %8936 = vmatprep.subr.bf16.mxu0 %v11930_v13  ;;  %8968 = vmatprep.subr.bf16.mxu1 %v11933_v18 }
 0x6de   :  { %8938 = vmatpush1.bf16.msra.mxu0 %v11939_v23  ;;  %8970 = vmatpush1.bf16.msra.mxu1 %v11943_v28 }
 0x6df   :  { %8940 = vmatprep.subr.bf16.mxu0 %v11947_v32  ;;  %8972 = vmatprep.subr.bf16.mxu1 %v11950_v36 }
 0x6e2   :  { %8942 = vmatpush1.bf16.msra.mxu0 %v11956_v39  ;;  %8974 = vmatpush1.bf16.msra.mxu1 %v11960_v41  ;;  %v2268_v41 = vld [vmem:[#allocation7] sm:$0xff] }
 0x6e3   :  { %8976 = vmatprep.subr.bf16.mxu0 %v8975_v7  ;;  %9008 = vmatprep.subr.bf16.mxu1 %v9007_v14  ;;  %v8977_v59 = vpack.c.bf16 %v2272_v2, %v2268_v41  ;;  %v2291_v7 = vld [vmem:[#allocation7 + $0xb8] sm:$0xff]  ;;  %v9013_v14 = vpack.c.bf16 %v2282_v44, %v2278_v19 }
 0x798   :  { %v1979_v17 = vpop.f32.mrb[12].mxu0  ;;  %v2050_v20 = vpop.f32.mrb[12].mxu1 }
 0x799   :  { %v10803_v24 = vadd.f32 %v1979_v17, %v12016_v49  ;;  %v1981_v27 = vpop.f32.mrb[13].mxu0  ;;  %v2052_v30 = vpop.f32.mrb[13].mxu1  ;;  %v10819_v50 = vadd.f32 %v2050_v20, %v12032_v15  ;;  %v2284_v17 = vld [vmem:[#allocation7 + $0x80] sm:$0xff] }
 0x79a   :  { %v10804_v33 = vadd.f32 %v1981_v27, %v12019_v51  ;;  %v10820_v43 = vadd.f32 %v2052_v30, %v12026_v8  ;;  %v2288_v20 = vld [vmem:[#allocation7 + $0xa0] sm:$0xff]  ;;  %v9015_v27 = vpack.c.bf16 %v2291_v7, %v2287_v4  ;;  %v2286_v30 = vld [vmem:[#allocation7 + $0x90] sm:$0xff]  ;;  %v2317_v4 = vld [vmem:[#allocation7 + $0x188] sm:$0xff] }
 0x79b   :  { %v8066_v37 = vmul.f32 -1.442695, %v10803_v24  ;;  %v8983_v24 = vpack.c.bf16 %v2289_v1, %v2285_v61  ;;  %v2310_v61 = vld [vmem:[#allocation7 + $0x150] sm:$0xff]  ;;  %v2321_v7 = vld [vmem:[#allocation7 + $0x1a8] sm:$0xff] }
 0x79c   :  { %v8067_v40 = vmul.f32 -1.442695, %v10804_v33  ;;  %v8068_v46 = vmul.f32 -1.442695, %v10820_v43  ;;  %v2290_v33 = vld [vmem:[#allocation7 + $0xb0] sm:$0xff]  ;;  %v2295_v43 = vld [vmem:[#allocation7 + $0xd8] sm:$0xff] }
 0x79d   :  { %11183 = vpow2.f32 %v8066_v37  ;;  %v2293_v37 = vld [vmem:[#allocation7 + $0xc8] sm:$0xff]  ;;  %v2314_v1 = vld [vmem:[#allocation7 + $0x170] sm:$0xff] }
 0x79e   :  { %11185 = vpow2.f32 %v8067_v40  ;;  %v2297_v40 = vld [vmem:[#allocation7 + $0xe8] sm:$0xff] }
 0x79f   :  { %11187 = vpow2.f32 %v8068_v46  ;;  %v2299_v46 = vld [vmem:[#allocation7 + $0xf8] sm:$0xff] }
 0x7a0   :  { %11189 = vtanh.f32 %v10819_v50  ;;  %v8985_v50 = vpack.c.bf16 %v2288_v20, %v2284_v17  ;;  %v9029_v20 = vpack.c.bf16 %v2314_v1, %v2310_v61  ;;  %v2635_v61 = vld [vmem:[#allocation9 + $0x2a8] sm:$0xff]  ;;  %v2633_v1 = vld [vmem:[#allocation9 + $0x298] sm:$0xff] }
 0x7a7   :  { %v11184_v53 = vpop.eup %11183 }
 0x7a8   :  { %v11186_v58 = vpop.eup %11185  ;;  %v2062_v62 = vadd.f32 1.0, %v11184_v53  ;;  %v9017_v53 = vpack.c.bf16 %v2290_v33, %v2286_v30  ;;  %v8999_v30 = vpack.c.bf16 %v2321_v7, %v2317_v4  ;;  %v2637_v7 = vld [vmem:[#allocation9 + $0x2b8] sm:$0xff] }
 0x7a9   :  { %v2068_v5 = vadd.f32 1.0, %v11186_v58  ;;  %v11188_v9 = vpop.eup %11187  ;;  %v2292_v58 = vld [vmem:[#allocation7 + $0xc0] sm:$0xff] }
 0x7aa   :  { %11191 = vrcp.f32 %v2062_v62  ;;  %v11190_v13 = vpop.eup %11189  ;;  %v2075_v32 = vadd.f32 1.0, %v11188_v9  ;;  %v2296_v62 = vld [vmem:[#allocation7 + $0xe0] sm:$0xff]  ;;  %v9019_v9 = vpack.c.bf16 %v2299_v46, %v2295_v43  ;;  %v2325_v43 = vld [vmem:[#allocation7 + $0x1c8] sm:$0xff] }
 0x7ab   :  { %11193 = vrcp.f32 %v2068_v5  ;;  %v8987_v5 = vpack.c.bf16 %v2297_v40, %v2293_v37  ;;  %v8989_v41 = vpack.c.bf16 %v2296_v62, %v2292_v58  ;;  %v2318_v37 = vld [vmem:[#allocation7 + $0x190] sm:$0xff]  ;;  %v2329_v46 = vld [vmem:[#allocation7 + $0x1e8] sm:$0xff] }
 0x7ac   :  { %11195 = vrcp.f32 %v2075_v32  ;;  %v2303_v32 = vld [vmem:[#allocation7 + $0x118] sm:$0xff]  ;;  %v2322_v40 = vld [vmem:[#allocation7 + $0x1b0] sm:$0xff] }
 0x7ad   :  { %v9033_v62 = vpack.c.bf16 %v2322_v40, %v2318_v37  ;;  %v2643_v37 = vld [vmem:[#allocation9 + $0x2e8] sm:$0xff]  ;;  %v2641_v40 = vld [vmem:[#allocation9 + $0x2d8] sm:$0xff] }
 0x7b4   :  { %v11192_v18 = vpop.eup %11191 }
 0x7b5   :  { %v11194_v23 = vpop.eup %11193  ;;  %v2079_v28 = vmul.f32 %v11192_v18, %v11190_v13  ;;  %v2294_v13 = vld [vmem:[#allocation7 + $0xd0] sm:$0xff] }
 0x7b6   :  { %v2078_v36 = vmul.f32 %v11194_v23, %v12265_v34  ;;  %v11196_v12 = vpop.eup %11195  ;;  %v9011_v34 = vpack.c.bf16 %v2283_v57, %v2279_v3  ;;  %v2298_v18 = vld [vmem:[#allocation7 + $0xf0] sm:$0xff]  ;;  %v2301_v23 = vld [vmem:[#allocation7 + $0x108] sm:$0xff] }
 0x7b7   :  { %v9021_v2 = vpack.c.bf16 %v2298_v18, %v2294_v13  ;;  %v2302_v3 = vld [vmem:[#allocation7 + $0x110] sm:$0xff]  ;;  %v2328_v18 = vld [vmem:[#allocation7 + $0x1e0] sm:$0xff] }
 0x7b8   :  { %v12309_v39 = vadd.f32 %v2079_v28, %v2078_v36  ;;  %v2305_v28 = vld [vmem:[#allocation7 + $0x128] sm:$0xff]  ;;  %v2307_v36 = vld [vmem:[#allocation7 + $0x138] sm:$0xff]  ;;  %v2306_v57 = vld [vmem:[#allocation7 + $0x130] sm:$0xff] }
 0x7b9   :  { %v8991_v63 = vpack.c.bf16 %v2305_v28, %v2301_v23  ;;  %v9023_v54 = vpack.c.bf16 %v2307_v36, %v2303_v32  ;;  %v9025_v26 = vpack.c.bf16 %v2306_v57, %v2302_v3  ;;  %v2326_v23 = vld [vmem:[#allocation7 + $0x1d0] sm:$0xff]  ;;  %v2627_v3 = vld [vmem:[#allocation9 + $0x268] sm:$0xff]  ;;  %v2625_v57 = vld [vmem:[#allocation9 + $0x258] sm:$0xff] }
 0x7ba   :  { %11197 = vtanh.f32 %v12309_v39  ;;  %v2330_v28 = vld [vmem:[#allocation7 + $0x1f0] sm:$0xff] }
 0x7bb   :  { %v9037_v36 = vpack.c.bf16 %v2330_v28, %v2326_v23  ;;  %v2651_v23 = vld [vmem:[#allocation9 + $0x328] sm:$0xff]  ;;  %v2649_v28 = vld [vmem:[#allocation9 + $0x318] sm:$0xff] }
 0x7c4   :  { %v11198_v47 = vpop.eup %11197 }
 0x7c5   :  { %v12312_v6 = vmul.f32 %v11198_v47, %v11196_v12  ;;  %v2309_v12 = vld [vmem:[#allocation7 + $0x148] sm:$0xff] }
 0x7c6   :  { %v2313_v47 = vld [vmem:[#allocation7 + $0x168] sm:$0xff] }
 0x7c7   :  { %2153 = vmatmul.mubr.f32.vlgmr.msra.gmra.mrb[14].mxu0 %v12312_v6  ;;  %2224 = vmatmul.mubr.f32.vlgmr.msra.gmra.mrb[14].mxu1 %v12312_v6  ;;  %v8995_v19 = vpack.c.bf16 %v2313_v47, %v2309_v12  ;;  %v2629_v47 = vld [vmem:[#allocation9 + $0x278] sm:$0xff] }
 0x7c8   :  { %8978 = vmatpush1.bf16.msra.mxu0 %v8977_v59  ;;  %9010 = vmatpush1.bf16.msra.mxu1 %v9009_v21  ;;  %v2311_v59 = vld [vmem:[#allocation7 + $0x158] sm:$0xff] }
 0x7c9   :  { %8980 = vmatprep.subr.bf16.mxu0 %v8979_v35  ;;  %9012 = vmatprep.subr.bf16.mxu1 %v9011_v34  ;;  %v2315_v21 = vld [vmem:[#allocation7 + $0x178] sm:$0xff]  ;;  %v2308_v35 = vld [vmem:[#allocation7 + $0x140] sm:$0xff] }
 0x7ca   :  { %2419 = vmatprep.mubr.f32.mxu0 %v11678_v0  ;;  %2532 = vmatprep.mubr.f32.mxu1 %v11678_v0  ;;  %v2312_v34 = vld [vmem:[#allocation7 + $0x160] sm:$0xff]  ;;  %v9027_v44 = vpack.c.bf16 %v2315_v21, %v2311_v59 }
 0x7cb   :  { %v8997_v17 = vpack.c.bf16 %v2312_v34, %v2308_v35  ;;  %v2622_v59 = vld [vmem:[#allocation9 + $0x240] sm:$0xff]  ;;  %v2624_v35 = vld [vmem:[#allocation9 + $0x250] sm:$0xff] }
 0x7cc   :  { %8982 = vmatpush1.bf16.msra.mxu0 %v8981_v11  ;;  %9014 = vmatpush1.bf16.msra.mxu1 %v9013_v14  ;;  %v2319_v11 = vld [vmem:[#allocation7 + $0x198] sm:$0xff]  ;;  %v2626_v21 = vld [vmem:[#allocation9 + $0x260] sm:$0xff]  ;;  %v2628_v34 = vld [vmem:[#allocation9 + $0x270] sm:$0xff] }
 0x7cd   :  { %8984 = vmatprep.subr.bf16.mxu0 %v8983_v24  ;;  %9016 = vmatprep.subr.bf16.mxu1 %v9015_v27  ;;  %v2323_v14 = vld [vmem:[#allocation7 + $0x1b8] sm:$0xff]  ;;  %v2316_v24 = vld [vmem:[#allocation7 + $0x180] sm:$0xff] }
 0x7ce   :  { %v2320_v27 = vld [vmem:[#allocation7 + $0x1a0] sm:$0xff]  ;;  %v9031_v33 = vpack.c.bf16 %v2323_v14, %v2319_v11 }
 0x7cf   :  { %v9001_v58 = vpack.c.bf16 %v2320_v27, %v2316_v24  ;;  %v2630_v11 = vld [vmem:[#allocation9 + $0x280] sm:$0xff]  ;;  %v2632_v24 = vld [vmem:[#allocation9 + $0x290] sm:$0xff] }
 0x7d0   :  { %8986 = vmatpush1.bf16.msra.mxu0 %v8985_v50  ;;  %9018 = vmatpush1.bf16.msra.mxu1 %v9017_v53  ;;  %v2327_v50 = vld [vmem:[#allocation7 + $0x1d8] sm:$0xff]  ;;  %v2634_v14 = vld [vmem:[#allocation9 + $0x2a0] sm:$0xff]  ;;  %v2636_v27 = vld [vmem:[#allocation9 + $0x2b0] sm:$0xff] }
 0x7d1   :  { %8988 = vmatprep.subr.bf16.mxu0 %v8987_v5  ;;  %9020 = vmatprep.subr.bf16.mxu1 %v9019_v9  ;;  %v2331_v53 = vld [vmem:[#allocation7 + $0x1f8] sm:$0xff]  ;;  %v2324_v5 = vld [vmem:[#allocation7 + $0x1c0] sm:$0xff]  ;;  %v9003_v9 = vpack.c.bf16 %v2329_v46, %v2325_v43 }
 0x7d2   :  { %v9035_v13 = vpack.c.bf16 %v2331_v53, %v2327_v50  ;;  %v9005_v32 = vpack.c.bf16 %v2328_v18, %v2324_v5  ;;  %v2645_v46 = vld [vmem:[#allocation9 + $0x2f8] sm:$0xff]  ;;  %v2638_v50 = vld [vmem:[#allocation9 + $0x2c0] sm:$0xff]  ;;  %v2640_v5 = vld [vmem:[#allocation9 + $0x2d0] sm:$0xff] }
 0x7d3   :  { %v2642_v53 = vld [vmem:[#allocation9 + $0x2e0] sm:$0xff] }
 0x7d4   :  { %8990 = vmatpush1.bf16.msra.mxu0 %v8989_v41  ;;  %9022 = vmatpush1.bf16.msra.mxu1 %v9021_v2  ;;  %v2614_v41 = vld [vmem:[#allocation9 + $0x200] sm:$0xff] }
 0x7d5   :  { %8992 = vmatprep.subr.bf16.mxu0 %v8991_v63  ;;  %9024 = vmatprep.subr.bf16.mxu1 %v9023_v54  ;;  %v2620_v63 = vld [vmem:[#allocation9 + $0x230] sm:$0xff]  ;;  %v2623_v54 = vld [vmem:[#allocation9 + $0x248] sm:$0xff] }
 0x7d6   :  { %v12358_v12 = vpack.c.bf16 %v2627_v3, %v2623_v54 }
 0x7d8   :  { %8994 = vmatpush1.bf16.msra.mxu0 %v8993_v38  ;;  %9026 = vmatpush1.bf16.msra.mxu1 %v9025_v26  ;;  %v12360_v38 = vpack.c.bf16 %v2629_v47, %v2625_v57  ;;  %v12362_v26 = vpack.c.bf16 %v2626_v21, %v2622_v59  ;;  %v2657_v57 = vld [vmem:[#allocation9 + $0x358] sm:$0xff]  ;;  %v2654_v59 = vld [vmem:[#allocation9 + $0x340] sm:$0xff] }
 0x7d9   :  { %8996 = vmatprep.subr.bf16.mxu0 %v8995_v19  ;;  %9028 = vmatprep.subr.bf16.mxu1 %v9027_v44  ;;  %v12365_v19 = vpack.c.bf16 %v2628_v34, %v2624_v35  ;;  %v2631_v44 = vld [vmem:[#allocation9 + $0x288] sm:$0xff]  ;;  %v2661_v47 = vld [vmem:[#allocation9 + $0x378] sm:$0xff]  ;;  %v2658_v35 = vld [vmem:[#allocation9 + $0x360] sm:$0xff] }
 0x7da   :  { %v12370_v4 = vpack.c.bf16 %v2635_v61, %v2631_v44  ;;  %v12406_v21 = vpack.c.bf16 %v2661_v47, %v2657_v57  ;;  %v2656_v34 = vld [vmem:[#allocation9 + $0x350] sm:$0xff]  ;;  %v12409_v61 = vpack.c.bf16 %v2658_v35, %v2654_v59 }
 0x7db   :  { %v2660_v44 = vld [vmem:[#allocation9 + $0x370] sm:$0xff] }
 0x7dc   :  { %8998 = vmatpush1.bf16.msra.mxu0 %v8997_v17  ;;  %9030 = vmatpush1.bf16.msra.mxu1 %v9029_v20  ;;  %v12372_v17 = vpack.c.bf16 %v2637_v7, %v2633_v1  ;;  %v12374_v20 = vpack.c.bf16 %v2634_v14, %v2630_v11  ;;  %v2663_v1 = vld [vmem:[#allocation9 + $0x388] sm:$0xff]  ;;  %v2665_v11 = vld [vmem:[#allocation9 + $0x398] sm:$0xff]  ;;  %v12413_v14 = vpack.c.bf16 %v2660_v44, %v2656_v34 }
 0x7dd   :  { %9000 = vmatprep.subr.bf16.mxu0 %v8999_v30  ;;  %9032 = vmatprep.subr.bf16.mxu1 %v9031_v33  ;;  %v12377_v30 = vpack.c.bf16 %v2636_v27, %v2632_v24  ;;  %v2639_v33 = vld [vmem:[#allocation9 + $0x2c8] sm:$0xff]  ;;  %v2669_v27 = vld [vmem:[#allocation9 + $0x3b8] sm:$0xff] }
 0x7de   :  { %v12382_v43 = vpack.c.bf16 %v2643_v37, %v2639_v33  ;;  %v2667_v7 = vld [vmem:[#allocation9 + $0x3a8] sm:$0xff]  ;;  %v2662_v33 = vld [vmem:[#allocation9 + $0x380] sm:$0xff] }
 0x7df   :  { %v12415_v24 = vpack.c.bf16 %v2667_v7, %v2663_v1  ;;  %v2666_v37 = vld [vmem:[#allocation9 + $0x3a0] sm:$0xff] }
 0x7e0   :  { %9002 = vmatpush1.bf16.msra.mxu0 %v9001_v58  ;;  %9034 = vmatpush1.bf16.msra.mxu1 %v9033_v62  ;;  %v12384_v58 = vpack.c.bf16 %v2645_v46, %v2641_v40  ;;  %v12386_v62 = vpack.c.bf16 %v2642_v53, %v2638_v50  ;;  %v12418_v40 = vpack.c.bf16 %v2669_v27, %v2665_v11  ;;  %v2664_v46 = vld [vmem:[#allocation9 + $0x390] sm:$0xff] }
 0x7e1   :  { %9004 = vmatprep.subr.bf16.mxu0 %v9003_v9  ;;  %9036 = vmatprep.subr.bf16.mxu1 %v9035_v13  ;;  %v2644_v9 = vld [vmem:[#allocation9 + $0x2f0] sm:$0xff]  ;;  %v2647_v13 = vld [vmem:[#allocation9 + $0x308] sm:$0xff]  ;;  %v12421_v53 = vpack.c.bf16 %v2666_v37, %v2662_v33 }
 0x7e2   :  { %v12389_v18 = vpack.c.bf16 %v2644_v9, %v2640_v5  ;;  %v2668_v50 = vld [vmem:[#allocation9 + $0x3b0] sm:$0xff]  ;;  %v2671_v9 = vld [vmem:[#allocation9 + $0x3c8] sm:$0xff] }
 0x7e3   :  { %v12425_v5 = vpack.c.bf16 %v2668_v50, %v2664_v46 }
 0x7e4   :  { %9006 = vmatpush1.bf16.msra.mxu0 %v9005_v32  ;;  %9038 = vmatpush1.bf16.msra.mxu1 %v9037_v36  ;;  %v2653_v32 = vld [vmem:[#allocation9 + $0x338] sm:$0xff]  ;;  %v12393_v36 = vpack.c.bf16 %v2651_v23, %v2647_v13  ;;  %v2675_v13 = vld [vmem:[#allocation9 + $0x3e8] sm:$0xff] }
 0x7e5   :  { %v2673_v23 = vld [vmem:[#allocation9 + $0x3d8] sm:$0xff] }
 0x7e7   :  { %2420 = vmatmul.mubr.f32.vlgmr.msra.gmra.mrb[16].mxu0 %v12038_v60  ;;  %2533 = vmatmul.mubr.f32.vlgmr.msra.gmra.mrb[16].mxu1 %v12038_v60  ;;  %v2615_v60 = vld [vmem:[#allocation9 + $0x208] sm:$0xff] }
 0x7e8   :  { %2425 = vmatprep.mubr.f32.mxu0 %v11678_v0  ;;  %2538 = vmatprep.mubr.f32.mxu1 %v11678_v0 }
 0x7eb   :  { %2426 = vmatmul.mubr.f32.gmra.mrb[18].mxu0 %v12084_v16  ;;  %2539 = vmatmul.mubr.f32.gmra.mrb[18].mxu1 %v12084_v16  ;;  %v2619_v16 = vld [vmem:[#allocation9 + $0x228] sm:$0xff] }
 0x7ec   :  { %2431 = vmatprep.mubr.f32.mxu0 %v11678_v0  ;;  %2544 = vmatprep.mubr.f32.mxu1 %v11678_v0 }
 0x7ef   :  { %2432 = vmatmul.mubr.f32.gmra.mrb[20].mxu0 %v12130_v29  ;;  %2545 = vmatmul.mubr.f32.gmra.mrb[20].mxu1 %v12130_v29  ;;  %v2617_v29 = vld [vmem:[#allocation9 + $0x218] sm:$0xff] }
 0x7f0   :  { %2437 = vmatprep.mubr.f32.mxu0 %v11678_v0  ;;  %2550 = vmatprep.mubr.f32.mxu1 %v11678_v0 }
 0x7f3   :  { %2438 = vmatmul.mubr.f32.gmra.mrb[22].mxu0 %v12176_v56  ;;  %2551 = vmatmul.mubr.f32.gmra.mrb[22].mxu1 %v12176_v56  ;;  %v12346_v56 = vpack.c.bf16 %v2619_v16, %v2615_v60  ;;  %v12395_v60 = vpack.c.bf16 %v2653_v32, %v2649_v28  ;;  %v2646_v16 = vld [vmem:[#allocation9 + $0x300] sm:$0xff]  ;;  %v12430_v28 = vpack.c.bf16 %v2675_v13, %v2671_v9  ;;  %v2677_v32 = vld [vmem:[#allocation9 + $0x3f8] sm:$0xff] }
 0x7f4   :  { %2443 = vmatprep.mubr.f32.mxu0 %v11678_v0  ;;  %2556 = vmatprep.mubr.f32.mxu1 %v11678_v0 }
 0x7f5   :  { %9040 = vmatprep.subr.bf16.mxu0 %v12346_v56 }
 0x7f7   :  { %2444 = vmatmul.mubr.f32.gmra.mrb[24].mxu0 %v12222_v22  ;;  %2557 = vmatmul.mubr.f32.gmra.mrb[24].mxu1 %v12222_v22  ;;  %v2621_v22 = vld [vmem:[#allocation9 + $0x238] sm:$0xff] }
 0x7f8   :  { %2449 = vmatprep.mubr.f32.mxu0 %v11678_v0  ;;  %2562 = vmatprep.mubr.f32.mxu1 %v11678_v0  ;;  %v12348_v2 = vpack.c.bf16 %v2621_v22, %v2617_v29  ;;  %v2650_v29 = vld [vmem:[#allocation9 + $0x320] sm:$0xff]  ;;  %v2648_v22 = vld [vmem:[#allocation9 + $0x310] sm:$0xff] }
 0x7fa   :  { %9072 = vmatprep.subr.bf16.mxu1 %v12348_v2 }
 0x7fb   :  { %2450 = vmatmul.mubr.f32.gmra.mrb[26].mxu0 %v12268_v31  ;;  %2563 = vmatmul.mubr.f32.gmra.mrb[26].mxu1 %v12268_v31  ;;  %v2618_v31 = vld [vmem:[#allocation9 + $0x220] sm:$0xff] }
 0x7fc   :  { %2455 = vmatprep.mubr.f32.mxu0 %v11678_v0  ;;  %2568 = vmatprep.mubr.f32.mxu1 %v11678_v0  ;;  %v12350_v52 = vpack.c.bf16 %v2618_v31, %v2614_v41  ;;  %v12398_v41 = vpack.c.bf16 %v2650_v29, %v2646_v16  ;;  %v2652_v31 = vld [vmem:[#allocation9 + $0x330] sm:$0xff]  ;;  %v2670_v16 = vld [vmem:[#allocation9 + $0x3c0] sm:$0xff] }
 0x7fd   :  { %v12402_v54 = vpack.c.bf16 %v2652_v31, %v2648_v22  ;;  %v2674_v29 = vld [vmem:[#allocation9 + $0x3e0] sm:$0xff]  ;;  %v12432_v22 = vpack.c.bf16 %v2677_v32, %v2673_v23 }
 0x7fe   :  { %9042 = vmatpush1.bf16.msra.mxu0 %v12350_v52  ;;  %v12434_v31 = vpack.c.bf16 %v2674_v29, %v2670_v16 }
 0x7ff   :  { %2456 = vmatmul.mubr.f32.gmra.mrb[28].mxu0 %v12312_v6  ;;  %2569 = vmatmul.mubr.f32.gmra.mrb[28].mxu1 %v12312_v6  ;;  %v12353_v6 = vpack.c.bf16 %v2620_v63, %v2616_v25  ;;  %v2655_v25 = vld [vmem:[#allocation9 + $0x348] sm:$0xff] }
 0x800   :  { %2461 = vmatprep.mubr.f32.mxu0 %v11678_v0  ;;  %2574 = vmatprep.mubr.f32.mxu1 %v11678_v0  ;;  %v2659_v63 = vld [vmem:[#allocation9 + $0x368] sm:$0xff] }
 0x801   :  { %9074 = vmatpush1.bf16.msra.mxu1 %v12353_v6  ;;  %9044 = vmatprep.subr.bf16.mxu0 %v12358_v12  ;;  %v12404_v3 = vpack.c.bf16 %v2659_v63, %v2655_v25  ;;  %v2672_v25 = vld [vmem:[#allocation9 + $0x3d0] sm:$0xff] }
 0x802   :  { %9076 = vmatprep.subr.bf16.mxu1 %v12360_v38  ;;  %9046 = vmatpush1.bf16.msra.mxu0 %v12362_v26  ;;  %v2676_v63 = vld [vmem:[#allocation9 + $0x3f0] sm:$0xff] }
 0x803   :  { %9048 = vmatprep.subr.bf16.mxu0 %v12370_v4  ;;  %v12437_v57 = vpack.c.bf16 %v2676_v63, %v2672_v25 }
 0x805   :  { %9078 = vmatpush1.bf16.msra.mxu1 %v12365_v19 }
 0x806   :  { %9080 = vmatprep.subr.bf16.mxu1 %v12372_v17  ;;  %9050 = vmatpush1.bf16.msra.mxu0 %v12374_v20 }
 0x807   :  { %9052 = vmatprep.subr.bf16.mxu0 %v12382_v43 }
 0x809   :  { %9082 = vmatpush1.bf16.msra.mxu1 %v12377_v30 }
 0x80a   :  { %9084 = vmatprep.subr.bf16.mxu1 %v12384_v58  ;;  %9054 = vmatpush1.bf16.msra.mxu0 %v12386_v62 }
 0x80b   :  { %9056 = vmatprep.subr.bf16.mxu0 %v12393_v36 }
 0x80d   :  { %9086 = vmatpush1.bf16.msra.mxu1 %v12389_v18 }
 0x80e   :  { %9088 = vmatprep.subr.bf16.mxu1 %v12395_v60  ;;  %9058 = vmatpush1.bf16.msra.mxu0 %v12398_v41 }
 0x80f   :  { %9060 = vmatprep.subr.bf16.mxu0 %v12404_v3 }
 0x811   :  { %9090 = vmatpush1.bf16.msra.mxu1 %v12402_v54 }
 0x812   :  { %9092 = vmatprep.subr.bf16.mxu1 %v12406_v21  ;;  %9062 = vmatpush1.bf16.msra.mxu0 %v12409_v61 }
 0x813   :  { %9064 = vmatprep.subr.bf16.mxu0 %v12415_v24 }
 0x815   :  { %9094 = vmatpush1.bf16.msra.mxu1 %v12413_v14 }
 0x816   :  { %9096 = vmatprep.subr.bf16.mxu1 %v12418_v40  ;;  %9066 = vmatpush1.bf16.msra.mxu0 %v12421_v53 }
 0x817   :  { %9068 = vmatprep.subr.bf16.mxu0 %v12430_v28 }
 0x819   :  { %9098 = vmatpush1.bf16.msra.mxu1 %v12425_v5 }
 0x81a   :  { %9100 = vmatprep.subr.bf16.mxu1 %v12432_v22  ;;  %9070 = vmatpush1.bf16.msra.mxu0 %v12434_v31 }
 0x81b   :  { %9104 = vmatprep.subr.bf16.mxu0 %v12346_v56 }
 0x81d   :  { %9102 = vmatpush1.bf16.msra.mxu1 %v12437_v57 }
 0x81e   :  { %9136 = vmatprep.subr.bf16.mxu1 %v12348_v2 }
 0x89a   :  { %v2154_v47 = vpop.f32.mrb[14].mxu0  ;;  %v2225_v59 = vpop.f32.mrb[14].mxu1 }
 0x89b   :  { %v10805_v35 = vadd.f32 %v2154_v47, %v12016_v49  ;;  %v2156_v34 = vpop.f32.mrb[15].mxu0  ;;  %v2227_v44 = vpop.f32.mrb[15].mxu1  ;;  %v10821_v37 = vadd.f32 %v2225_v59, %v12032_v15 }
 0x89c   :  { %v10806_v1 = vadd.f32 %v2156_v34, %v12019_v51  ;;  %v10822_v27 = vadd.f32 %v2227_v44, %v12026_v8 }
 0x89d   :  { %v8069_v7 = vmul.f32 -1.442695, %v10805_v35 }
 0x89e   :  { %v8070_v11 = vmul.f32 -1.442695, %v10806_v1  ;;  %v8071_v33 = vmul.f32 -1.442695, %v10822_v27 }
 0x89f   :  { %11199 = vpow2.f32 %v8069_v7 }
 0x8a0   :  { %11201 = vpow2.f32 %v8070_v11 }
 0x8a1   :  { %11203 = vpow2.f32 %v8071_v33 }
 0x8a2   :  { %11205 = vtanh.f32 %v10821_v37 }
 0x8a9   :  { %v11200_v46 = vpop.eup %11199 }
 0x8aa   :  { %v11202_v50 = vpop.eup %11201  ;;  %v2237_v9 = vadd.f32 1.0, %v11200_v46 }
 0x8ab   :  { %v2243_v13 = vadd.f32 1.0, %v11202_v50  ;;  %v11204_v49 = vpop.eup %11203 }
 0x8ac   :  { %11207 = vrcp.f32 %v2237_v9  ;;  %v11206_v23 = vpop.eup %11205  ;;  %v2250_v29 = vadd.f32 1.0, %v11204_v49 }
 0x8ad   :  { %11209 = vrcp.f32 %v2243_v13 }
 0x8ae   :  { %11211 = vrcp.f32 %v2250_v29 }
 0x8b6   :  { %v11208_v51 = vpop.eup %11207 }
 0x8b7   :  { %v11210_v32 = vpop.eup %11209  ;;  %v2254_v16 = vmul.f32 %v11208_v51, %v11206_v23 }
 0x8b8   :  { %v2253_v25 = vmul.f32 %v11210_v32, %v12309_v39  ;;  %v11212_v15 = vpop.eup %11211  ;;  %v8072_v39 = vld [vmem:[%s13984_s4 + $0x4] sm:$0xf] }
 0x8b9   :  { %v12495_v59 = vrot.slane %v8072_v39, %v12008_v45  ;;  %v12498_v35 = vrot.slane %v8072_v39, %v12013_v48  ;;  %v12503_v46 = vrot.slane %v8072_v39, %v12021_v55  ;;  %v12507_v9 = vrot.slane %v8072_v39, %v12028_v10 }
 0x8ba   :  { %v2255_v8 = vadd.f32 %v2254_v16, %v2253_v25 }
 0x8bc   :  { %11213 = vtanh.f32 %v2255_v8 }
 0x8c6   :  { %v11214_v63 = vpop.eup %11213 }
 0x8c7   :  { %v12449_v47 = vmul.f32 %v11214_v63, %v11212_v15 }
 0x8c9   :  { %2462 = vmatmul.mubr.f32.gmra.mrb[30].mxu0 %v12449_v47  ;;  %2575 = vmatmul.mubr.f32.gmra.mrb[30].mxu1 %v12449_v47 }
 0x8ca   :  { %2746 = vmatprep.mubr.f32.mxu0 %v11678_v0  ;;  %2817 = vmatprep.mubr.f32.mxu1 %v11678_v0 }
 0x8cd   :  { %2747 = vmatmul.mubr.f32.vlgmr.msra.gmra.mrb[16].mxu0 %v11678_v0  ;;  %2818 = vmatmul.mubr.f32.vlgmr.msra.gmra.mrb[16].mxu1 %v11678_v0 }
 0x8ce   :  { %9106 = vmatpush1.bf16.msra.mxu0 %v12350_v52  ;;  %9138 = vmatpush1.bf16.msra.mxu1 %v12353_v6 }
 0x8cf   :  { %9108 = vmatprep.subr.bf16.mxu0 %v12358_v12  ;;  %9140 = vmatprep.subr.bf16.mxu1 %v12360_v38 }
 0x8d0   :  { %2921 = vmatprep.mubr.f32.mxu0 %v11678_v0  ;;  %2992 = vmatprep.mubr.f32.mxu1 %v11678_v0 }
 0x8d2   :  { %9110 = vmatpush1.bf16.msra.mxu0 %v12362_v26  ;;  %9142 = vmatpush1.bf16.msra.mxu1 %v12365_v19 }
 0x8d3   :  { %9112 = vmatprep.subr.bf16.mxu0 %v12370_v4  ;;  %9144 = vmatprep.subr.bf16.mxu1 %v12372_v17 }
 0x8d6   :  { %9114 = vmatpush1.bf16.msra.mxu0 %v12374_v20  ;;  %9146 = vmatpush1.bf16.msra.mxu1 %v12377_v30 }
 0x8d7   :  { %9116 = vmatprep.subr.bf16.mxu0 %v12382_v43  ;;  %9148 = vmatprep.subr.bf16.mxu1 %v12384_v58 }
 0x8da   :  { %9118 = vmatpush1.bf16.msra.mxu0 %v12386_v62  ;;  %9150 = vmatpush1.bf16.msra.mxu1 %v12389_v18 }
 0x8db   :  { %9120 = vmatprep.subr.bf16.mxu0 %v12393_v36  ;;  %9152 = vmatprep.subr.bf16.mxu1 %v12395_v60 }
 0x8de   :  { %9122 = vmatpush1.bf16.msra.mxu0 %v12398_v41  ;;  %9154 = vmatpush1.bf16.msra.mxu1 %v12402_v54 }
 0x8df   :  { %9124 = vmatprep.subr.bf16.mxu0 %v12404_v3  ;;  %9156 = vmatprep.subr.bf16.mxu1 %v12406_v21 }
 0x8e2   :  { %9126 = vmatpush1.bf16.msra.mxu0 %v12409_v61  ;;  %9158 = vmatpush1.bf16.msra.mxu1 %v12413_v14 }
 0x8e3   :  { %9128 = vmatprep.subr.bf16.mxu0 %v12415_v24  ;;  %9160 = vmatprep.subr.bf16.mxu1 %v12418_v40 }
 0x8e6   :  { %9130 = vmatpush1.bf16.msra.mxu0 %v12421_v53  ;;  %9162 = vmatpush1.bf16.msra.mxu1 %v12425_v5 }
 0x8e7   :  { %9132 = vmatprep.subr.bf16.mxu0 %v12430_v28  ;;  %9164 = vmatprep.subr.bf16.mxu1 %v12432_v22 }
 0x8ea   :  { %9134 = vmatpush1.bf16.msra.mxu0 %v12434_v31  ;;  %9166 = vmatpush1.bf16.msra.mxu1 %v12437_v57 }
 0x8eb   :  { %9168 = vmatprep.subr.bf16.mxu0 %v12346_v56  ;;  %9200 = vmatprep.subr.bf16.mxu1 %v12348_v2 }
 0x9a0   :  { %v2748_v34 = vpop.f32.mrb[16].mxu0  ;;  %v2819_v44 = vpop.f32.mrb[16].mxu1 }
 0x9a1   :  { %v10823_v1 = vadd.f32 %v2748_v34, %v12495_v59  ;;  %v2750_v7 = vpop.f32.mrb[17].mxu0  ;;  %v2821_v11 = vpop.f32.mrb[17].mxu1  ;;  %v10839_v49 = vadd.f32 %v2819_v44, %v12507_v9 }
 0x9a2   :  { %v10824_v27 = vadd.f32 %v2750_v7, %v12498_v35  ;;  %v10840_v50 = vadd.f32 %v2821_v11, %v12503_v46 }
 0x9a3   :  { %v8073_v33 = vmul.f32 -1.442695, %v10823_v1 }
 0x9a4   :  { %v8074_v37 = vmul.f32 -1.442695, %v10824_v27  ;;  %v8075_v13 = vmul.f32 -1.442695, %v10840_v50 }
 0x9a5   :  { %11215 = vpow2.f32 %v8073_v33 }
 0x9a6   :  { %11217 = vpow2.f32 %v8074_v37 }
 0x9a7   :  { %11219 = vpow2.f32 %v8075_v13 }
 0x9a8   :  { %11221 = vtanh.f32 %v10839_v49 }
 0x9af   :  { %v11216_v23 = vpop.eup %11215 }
 0x9b0   :  { %v11218_v51 = vpop.eup %11217  ;;  %v2831_v32 = vadd.f32 1.0, %v11216_v23 }
 0x9b1   :  { %v2837_v16 = vadd.f32 1.0, %v11218_v51  ;;  %v11220_v29 = vpop.eup %11219 }
 0x9b2   :  { %11223 = vrcp.f32 %v2831_v32  ;;  %v11222_v25 = vpop.eup %11221  ;;  %v2844_v34 = vadd.f32 1.0, %v11220_v29 }
 0x9b3   :  { %11225 = vrcp.f32 %v2837_v16 }
 0x9b4   :  { %11227 = vrcp.f32 %v2844_v34 }
 0x9bc   :  { %v11224_v8 = vpop.eup %11223 }
 0x9bd   :  { %v11226_v15 = vpop.eup %11225  ;;  %v2848_v63 = vmul.f32 %v11224_v8, %v11222_v25 }
 0x9be   :  { %v2847_v1 = vmul.f32 0.0, %v11226_v15  ;;  %v11228_v44 = vpop.eup %11227 }
 0x9c0   :  { %v12510_v39 = vadd.f32 %v2848_v63, %v2847_v1 }
 0x9c2   :  { %11229 = vtanh.f32 %v12510_v39 }
 0x9cc   :  { %v11230_v7 = vpop.eup %11229 }
 0x9cd   :  { %v12513_v11 = vmul.f32 %v11230_v7, %v11228_v44 }
 0x9cf   :  { %2922 = vmatmul.mubr.f32.vlgmr.msra.gmra.mrb[18].mxu0 %v12513_v11  ;;  %2993 = vmatmul.mubr.f32.vlgmr.msra.gmra.mrb[18].mxu1 %v12513_v11 }
 0x9d0   :  { %9170 = vmatpush1.bf16.msra.mxu0 %v12350_v52  ;;  %9202 = vmatpush1.bf16.msra.mxu1 %v12353_v6 }
 0x9d1   :  { %9172 = vmatprep.subr.bf16.mxu0 %v12358_v12  ;;  %9204 = vmatprep.subr.bf16.mxu1 %v12360_v38 }
 0x9d2   :  { %3096 = vmatprep.mubr.f32.mxu0 %v11678_v0  ;;  %3167 = vmatprep.mubr.f32.mxu1 %v11678_v0 }
 0x9d4   :  { %9174 = vmatpush1.bf16.msra.mxu0 %v12362_v26  ;;  %9206 = vmatpush1.bf16.msra.mxu1 %v12365_v19 }
 0x9d5   :  { %9176 = vmatprep.subr.bf16.mxu0 %v12370_v4  ;;  %9208 = vmatprep.subr.bf16.mxu1 %v12372_v17 }
 0x9d8   :  { %9178 = vmatpush1.bf16.msra.mxu0 %v12374_v20  ;;  %9210 = vmatpush1.bf16.msra.mxu1 %v12377_v30 }
 0x9d9   :  { %9180 = vmatprep.subr.bf16.mxu0 %v12382_v43  ;;  %9212 = vmatprep.subr.bf16.mxu1 %v12384_v58 }
 0x9dc   :  { %9182 = vmatpush1.bf16.msra.mxu0 %v12386_v62  ;;  %9214 = vmatpush1.bf16.msra.mxu1 %v12389_v18 }
 0x9dd   :  { %9184 = vmatprep.subr.bf16.mxu0 %v12393_v36  ;;  %9216 = vmatprep.subr.bf16.mxu1 %v12395_v60 }
 0x9e0   :  { %9186 = vmatpush1.bf16.msra.mxu0 %v12398_v41  ;;  %9218 = vmatpush1.bf16.msra.mxu1 %v12402_v54 }
 0x9e1   :  { %9188 = vmatprep.subr.bf16.mxu0 %v12404_v3  ;;  %9220 = vmatprep.subr.bf16.mxu1 %v12406_v21 }
 0x9e4   :  { %9190 = vmatpush1.bf16.msra.mxu0 %v12409_v61  ;;  %9222 = vmatpush1.bf16.msra.mxu1 %v12413_v14 }
 0x9e5   :  { %9192 = vmatprep.subr.bf16.mxu0 %v12415_v24  ;;  %9224 = vmatprep.subr.bf16.mxu1 %v12418_v40 }
 0x9e8   :  { %9194 = vmatpush1.bf16.msra.mxu0 %v12421_v53  ;;  %9226 = vmatpush1.bf16.msra.mxu1 %v12425_v5 }
 0x9e9   :  { %9196 = vmatprep.subr.bf16.mxu0 %v12430_v28  ;;  %9228 = vmatprep.subr.bf16.mxu1 %v12432_v22 }
 0x9ec   :  { %9198 = vmatpush1.bf16.msra.mxu0 %v12434_v31  ;;  %9230 = vmatpush1.bf16.msra.mxu1 %v12437_v57 }
 0x9ed   :  { %9232 = vmatprep.subr.bf16.mxu0 %v12346_v56  ;;  %9264 = vmatprep.subr.bf16.mxu1 %v12348_v2 }
 0xaa2   :  { %v2923_v27 = vpop.f32.mrb[18].mxu0  ;;  %v2994_v33 = vpop.f32.mrb[18].mxu1 }
 0xaa3   :  { %v10825_v37 = vadd.f32 %v2923_v27, %v12495_v59  ;;  %v2925_v50 = vpop.f32.mrb[19].mxu0  ;;  %v2996_v13 = vpop.f32.mrb[19].mxu1  ;;  %v10841_v29 = vadd.f32 %v2994_v33, %v12507_v9 }
 0xaa4   :  { %v10826_v49 = vadd.f32 %v2925_v50, %v12498_v35  ;;  %v10842_v32 = vadd.f32 %v2996_v13, %v12503_v46 }
 0xaa5   :  { %v8076_v23 = vmul.f32 -1.442695, %v10825_v37 }
 0xaa6   :  { %v8077_v51 = vmul.f32 -1.442695, %v10826_v49  ;;  %v8078_v16 = vmul.f32 -1.442695, %v10842_v32 }
 0xaa7   :  { %11231 = vpow2.f32 %v8076_v23 }
 0xaa8   :  { %11233 = vpow2.f32 %v8077_v51 }
 0xaa9   :  { %11235 = vpow2.f32 %v8078_v16 }
 0xaaa   :  { %11237 = vtanh.f32 %v10841_v29 }
 0xab1   :  { %v11232_v25 = vpop.eup %11231 }
 0xab2   :  { %v11234_v8 = vpop.eup %11233  ;;  %v3006_v15 = vadd.f32 1.0, %v11232_v25 }
 0xab3   :  { %v3012_v63 = vadd.f32 1.0, %v11234_v8  ;;  %v11236_v34 = vpop.eup %11235 }
 0xab4   :  { %11239 = vrcp.f32 %v3006_v15  ;;  %v11238_v1 = vpop.eup %11237  ;;  %v3019_v37 = vadd.f32 1.0, %v11236_v34 }
 0xab5   :  { %11241 = vrcp.f32 %v3012_v63 }
 0xab6   :  { %11243 = vrcp.f32 %v3019_v37 }
 0xabe   :  { %v11240_v44 = vpop.eup %11239 }
 0xabf   :  { %v11242_v7 = vpop.eup %11241  ;;  %v3023_v27 = vmul.f32 %v11240_v44, %v11238_v1 }
 0xac0   :  { %v3022_v50 = vmul.f32 %v11242_v7, %v12510_v39  ;;  %v11244_v33 = vpop.eup %11243 }
 0xac2   :  { %v12556_v13 = vadd.f32 %v3023_v27, %v3022_v50 }
 0xac4   :  { %11245 = vtanh.f32 %v12556_v13 }
 0xace   :  { %v11246_v49 = vpop.eup %11245 }
 0xacf   :  { %v12559_v23 = vmul.f32 %v11246_v49, %v11244_v33 }
 0xad1   :  { %3097 = vmatmul.mubr.f32.vlgmr.msra.gmra.mrb[20].mxu0 %v12559_v23  ;;  %3168 = vmatmul.mubr.f32.vlgmr.msra.gmra.mrb[20].mxu1 %v12559_v23 }
 0xad2   :  { %9234 = vmatpush1.bf16.msra.mxu0 %v12350_v52  ;;  %9266 = vmatpush1.bf16.msra.mxu1 %v12353_v6 }
 0xad3   :  { %9236 = vmatprep.subr.bf16.mxu0 %v12358_v12  ;;  %9268 = vmatprep.subr.bf16.mxu1 %v12360_v38 }
 0xad4   :  { %3271 = vmatprep.mubr.f32.mxu0 %v11678_v0  ;;  %3342 = vmatprep.mubr.f32.mxu1 %v11678_v0 }
 0xad6   :  { %9238 = vmatpush1.bf16.msra.mxu0 %v12362_v26  ;;  %9270 = vmatpush1.bf16.msra.mxu1 %v12365_v19 }
 0xad7   :  { %9240 = vmatprep.subr.bf16.mxu0 %v12370_v4  ;;  %9272 = vmatprep.subr.bf16.mxu1 %v12372_v17 }
 0xada   :  { %9242 = vmatpush1.bf16.msra.mxu0 %v12374_v20  ;;  %9274 = vmatpush1.bf16.msra.mxu1 %v12377_v30 }
 0xadb   :  { %9244 = vmatprep.subr.bf16.mxu0 %v12382_v43  ;;  %9276 = vmatprep.subr.bf16.mxu1 %v12384_v58 }
 0xade   :  { %9246 = vmatpush1.bf16.msra.mxu0 %v12386_v62  ;;  %9278 = vmatpush1.bf16.msra.mxu1 %v12389_v18 }
 0xadf   :  { %9248 = vmatprep.subr.bf16.mxu0 %v12393_v36  ;;  %9280 = vmatprep.subr.bf16.mxu1 %v12395_v60 }
 0xae2   :  { %9250 = vmatpush1.bf16.msra.mxu0 %v12398_v41  ;;  %9282 = vmatpush1.bf16.msra.mxu1 %v12402_v54 }
 0xae3   :  { %9252 = vmatprep.subr.bf16.mxu0 %v12404_v3  ;;  %9284 = vmatprep.subr.bf16.mxu1 %v12406_v21 }
 0xae6   :  { %9254 = vmatpush1.bf16.msra.mxu0 %v12409_v61  ;;  %9286 = vmatpush1.bf16.msra.mxu1 %v12413_v14 }
 0xae7   :  { %9256 = vmatprep.subr.bf16.mxu0 %v12415_v24  ;;  %9288 = vmatprep.subr.bf16.mxu1 %v12418_v40 }
 0xaea   :  { %9258 = vmatpush1.bf16.msra.mxu0 %v12421_v53  ;;  %9290 = vmatpush1.bf16.msra.mxu1 %v12425_v5 }
 0xaeb   :  { %9260 = vmatprep.subr.bf16.mxu0 %v12430_v28  ;;  %9292 = vmatprep.subr.bf16.mxu1 %v12432_v22 }
 0xaee   :  { %9262 = vmatpush1.bf16.msra.mxu0 %v12434_v31  ;;  %9294 = vmatpush1.bf16.msra.mxu1 %v12437_v57 }
 0xaef   :  { %9296 = vmatprep.subr.bf16.mxu0 %v12346_v56  ;;  %9328 = vmatprep.subr.bf16.mxu1 %v12348_v2 }
 0xba4   :  { %v3098_v39 = vpop.f32.mrb[20].mxu0  ;;  %v3169_v51 = vpop.f32.mrb[20].mxu1 }
 0xba5   :  { %v10827_v32 = vadd.f32 %v3098_v39, %v12495_v59  ;;  %v3100_v16 = vpop.f32.mrb[21].mxu0  ;;  %v3171_v29 = vpop.f32.mrb[21].mxu1  ;;  %v10843_v1 = vadd.f32 %v3169_v51, %v12507_v9 }
 0xba6   :  { %v10828_v25 = vadd.f32 %v3100_v16, %v12498_v35  ;;  %v10844_v63 = vadd.f32 %v3171_v29, %v12503_v46 }
 0xba7   :  { %v8079_v8 = vmul.f32 -1.442695, %v10827_v32 }
 0xba8   :  { %v8080_v15 = vmul.f32 -1.442695, %v10828_v25  ;;  %v8081_v34 = vmul.f32 -1.442695, %v10844_v63 }
 0xba9   :  { %11247 = vpow2.f32 %v8079_v8 }
 0xbaa   :  { %11249 = vpow2.f32 %v8080_v15 }
 0xbab   :  { %11251 = vpow2.f32 %v8081_v34 }
 0xbac   :  { %11253 = vtanh.f32 %v10843_v1 }
 0xbb3   :  { %v11248_v44 = vpop.eup %11247 }
 0xbb4   :  { %v11250_v7 = vpop.eup %11249  ;;  %v3181_v27 = vadd.f32 1.0, %v11248_v44 }
 0xbb5   :  { %v3187_v37 = vadd.f32 1.0, %v11250_v7  ;;  %v11252_v50 = vpop.eup %11251 }
 0xbb6   :  { %11255 = vrcp.f32 %v3181_v27  ;;  %v11254_v33 = vpop.eup %11253  ;;  %v3194_v16 = vadd.f32 1.0, %v11252_v50 }
 0xbb7   :  { %11257 = vrcp.f32 %v3187_v37 }
 0xbb8   :  { %11259 = vrcp.f32 %v3194_v16 }
 0xbc0   :  { %v11256_v49 = vpop.eup %11255 }
 0xbc1   :  { %v11258_v39 = vpop.eup %11257  ;;  %v3198_v32 = vmul.f32 %v11256_v49, %v11254_v33 }
 0xbc2   :  { %v3197_v25 = vmul.f32 %v11258_v39, %v12556_v13  ;;  %v11260_v51 = vpop.eup %11259 }
 0xbc4   :  { %v12602_v29 = vadd.f32 %v3198_v32, %v3197_v25 }
 0xbc6   :  { %11261 = vtanh.f32 %v12602_v29 }
 0xbd0   :  { %v11262_v8 = vpop.eup %11261 }
 0xbd1   :  { %v12605_v15 = vmul.f32 %v11262_v8, %v11260_v51 }
 0xbd3   :  { %3272 = vmatmul.mubr.f32.vlgmr.msra.gmra.mrb[22].mxu0 %v12605_v15  ;;  %3343 = vmatmul.mubr.f32.vlgmr.msra.gmra.mrb[22].mxu1 %v12605_v15 }
 0xbd4   :  { %9298 = vmatpush1.bf16.msra.mxu0 %v12350_v52  ;;  %9330 = vmatpush1.bf16.msra.mxu1 %v12353_v6 }
 0xbd5   :  { %9300 = vmatprep.subr.bf16.mxu0 %v12358_v12  ;;  %9332 = vmatprep.subr.bf16.mxu1 %v12360_v38 }
 0xbd6   :  { %3446 = vmatprep.mubr.f32.mxu0 %v11678_v0  ;;  %3517 = vmatprep.mubr.f32.mxu1 %v11678_v0 }
 0xbd8   :  { %9302 = vmatpush1.bf16.msra.mxu0 %v12362_v26  ;;  %9334 = vmatpush1.bf16.msra.mxu1 %v12365_v19 }
 0xbd9   :  { %9304 = vmatprep.subr.bf16.mxu0 %v12370_v4  ;;  %9336 = vmatprep.subr.bf16.mxu1 %v12372_v17 }
 0xbdc   :  { %9306 = vmatpush1.bf16.msra.mxu0 %v12374_v20  ;;  %9338 = vmatpush1.bf16.msra.mxu1 %v12377_v30 }
 0xbdd   :  { %9308 = vmatprep.subr.bf16.mxu0 %v12382_v43  ;;  %9340 = vmatprep.subr.bf16.mxu1 %v12384_v58 }
 0xbe0   :  { %9310 = vmatpush1.bf16.msra.mxu0 %v12386_v62  ;;  %9342 = vmatpush1.bf16.msra.mxu1 %v12389_v18 }
 0xbe1   :  { %9312 = vmatprep.subr.bf16.mxu0 %v12393_v36  ;;  %9344 = vmatprep.subr.bf16.mxu1 %v12395_v60 }
 0xbe4   :  { %9314 = vmatpush1.bf16.msra.mxu0 %v12398_v41  ;;  %9346 = vmatpush1.bf16.msra.mxu1 %v12402_v54 }
 0xbe5   :  { %9316 = vmatprep.subr.bf16.mxu0 %v12404_v3  ;;  %9348 = vmatprep.subr.bf16.mxu1 %v12406_v21 }
 0xbe8   :  { %9318 = vmatpush1.bf16.msra.mxu0 %v12409_v61  ;;  %9350 = vmatpush1.bf16.msra.mxu1 %v12413_v14 }
 0xbe9   :  { %9320 = vmatprep.subr.bf16.mxu0 %v12415_v24  ;;  %9352 = vmatprep.subr.bf16.mxu1 %v12418_v40 }
 0xbec   :  { %9322 = vmatpush1.bf16.msra.mxu0 %v12421_v53  ;;  %9354 = vmatpush1.bf16.msra.mxu1 %v12425_v5 }
 0xbed   :  { %9324 = vmatprep.subr.bf16.mxu0 %v12430_v28  ;;  %9356 = vmatprep.subr.bf16.mxu1 %v12432_v22 }
 0xbf0   :  { %9326 = vmatpush1.bf16.msra.mxu0 %v12434_v31  ;;  %9358 = vmatpush1.bf16.msra.mxu1 %v12437_v57 }
 0xbf1   :  { %9360 = vmatprep.subr.bf16.mxu0 %v12346_v56  ;;  %9392 = vmatprep.subr.bf16.mxu1 %v12348_v2 }
 0xca6   :  { %v3273_v13 = vpop.f32.mrb[22].mxu0  ;;  %v3344_v63 = vpop.f32.mrb[22].mxu1 }
 0xca7   :  { %v10829_v34 = vadd.f32 %v3273_v13, %v12495_v59  ;;  %v3275_v1 = vpop.f32.mrb[23].mxu0  ;;  %v3346_v44 = vpop.f32.mrb[23].mxu1  ;;  %v10845_v49 = vadd.f32 %v3344_v63, %v12507_v9 }
 0xca8   :  { %v10830_v7 = vadd.f32 %v3275_v1, %v12498_v35  ;;  %v10846_v50 = vadd.f32 %v3346_v44, %v12503_v46 }
 0xca9   :  { %v8082_v27 = vmul.f32 -1.442695, %v10829_v34 }
 0xcaa   :  { %v8083_v37 = vmul.f32 -1.442695, %v10830_v7  ;;  %v8084_v33 = vmul.f32 -1.442695, %v10846_v50 }
 0xcab   :  { %11263 = vpow2.f32 %v8082_v27 }
 0xcac   :  { %11265 = vpow2.f32 %v8083_v37 }
 0xcad   :  { %11267 = vpow2.f32 %v8084_v33 }
 0xcae   :  { %11269 = vtanh.f32 %v10845_v49 }
 0xcb5   :  { %v11264_v39 = vpop.eup %11263 }
 0xcb6   :  { %v11266_v32 = vpop.eup %11265  ;;  %v3356_v16 = vadd.f32 1.0, %v11264_v39 }
 0xcb7   :  { %v3362_v25 = vadd.f32 1.0, %v11266_v32  ;;  %v11268_v51 = vpop.eup %11267 }
 0xcb8   :  { %11271 = vrcp.f32 %v3356_v16  ;;  %v11270_v8 = vpop.eup %11269  ;;  %v3369_v7 = vadd.f32 1.0, %v11268_v51 }
 0xcb9   :  { %11273 = vrcp.f32 %v3362_v25 }
 0xcba   :  { %11275 = vrcp.f32 %v3369_v7 }
 0xcc2   :  { %v11272_v13 = vpop.eup %11271 }
 0xcc3   :  { %v11274_v34 = vpop.eup %11273  ;;  %v3373_v1 = vmul.f32 %v11272_v13, %v11270_v8 }
 0xcc4   :  { %v3372_v27 = vmul.f32 %v11274_v34, %v12602_v29  ;;  %v11276_v63 = vpop.eup %11275 }
 0xcc6   :  { %v12648_v44 = vadd.f32 %v3373_v1, %v3372_v27 }
 0xcc8   :  { %11277 = vtanh.f32 %v12648_v44 }
 0xcd2   :  { %v11278_v37 = vpop.eup %11277 }
 0xcd3   :  { %v12651_v50 = vmul.f32 %v11278_v37, %v11276_v63 }
 0xcd5   :  { %3447 = vmatmul.mubr.f32.vlgmr.msra.gmra.mrb[24].mxu0 %v12651_v50  ;;  %3518 = vmatmul.mubr.f32.vlgmr.msra.gmra.mrb[24].mxu1 %v12651_v50 }
 0xcd6   :  { %9362 = vmatpush1.bf16.msra.mxu0 %v12350_v52  ;;  %9394 = vmatpush1.bf16.msra.mxu1 %v12353_v6 }
 0xcd7   :  { %9364 = vmatprep.subr.bf16.mxu0 %v12358_v12  ;;  %9396 = vmatprep.subr.bf16.mxu1 %v12360_v38 }
 0xcd8   :  { %3621 = vmatprep.mubr.f32.mxu0 %v11678_v0  ;;  %3692 = vmatprep.mubr.f32.mxu1 %v11678_v0 }
 0xcda   :  { %9366 = vmatpush1.bf16.msra.mxu0 %v12362_v26  ;;  %9398 = vmatpush1.bf16.msra.mxu1 %v12365_v19 }
 0xcdb   :  { %9368 = vmatprep.subr.bf16.mxu0 %v12370_v4  ;;  %9400 = vmatprep.subr.bf16.mxu1 %v12372_v17 }
 0xcde   :  { %9370 = vmatpush1.bf16.msra.mxu0 %v12374_v20  ;;  %9402 = vmatpush1.bf16.msra.mxu1 %v12377_v30 }
 0xcdf   :  { %9372 = vmatprep.subr.bf16.mxu0 %v12382_v43  ;;  %9404 = vmatprep.subr.bf16.mxu1 %v12384_v58 }
 0xce2   :  { %9374 = vmatpush1.bf16.msra.mxu0 %v12386_v62  ;;  %9406 = vmatpush1.bf16.msra.mxu1 %v12389_v18 }
 0xce3   :  { %9376 = vmatprep.subr.bf16.mxu0 %v12393_v36  ;;  %9408 = vmatprep.subr.bf16.mxu1 %v12395_v60 }
 0xce6   :  { %9378 = vmatpush1.bf16.msra.mxu0 %v12398_v41  ;;  %9410 = vmatpush1.bf16.msra.mxu1 %v12402_v54 }
 0xce7   :  { %9380 = vmatprep.subr.bf16.mxu0 %v12404_v3  ;;  %9412 = vmatprep.subr.bf16.mxu1 %v12406_v21 }
 0xcea   :  { %9382 = vmatpush1.bf16.msra.mxu0 %v12409_v61  ;;  %9414 = vmatpush1.bf16.msra.mxu1 %v12413_v14 }
 0xceb   :  { %9384 = vmatprep.subr.bf16.mxu0 %v12415_v24  ;;  %9416 = vmatprep.subr.bf16.mxu1 %v12418_v40 }
 0xcee   :  { %9386 = vmatpush1.bf16.msra.mxu0 %v12421_v53  ;;  %9418 = vmatpush1.bf16.msra.mxu1 %v12425_v5 }
 0xcef   :  { %9388 = vmatprep.subr.bf16.mxu0 %v12430_v28  ;;  %9420 = vmatprep.subr.bf16.mxu1 %v12432_v22 }
 0xcf2   :  { %9390 = vmatpush1.bf16.msra.mxu0 %v12434_v31  ;;  %9422 = vmatpush1.bf16.msra.mxu1 %v12437_v57 }
 0xcf3   :  { %9424 = vmatprep.subr.bf16.mxu0 %v12346_v56  ;;  %9456 = vmatprep.subr.bf16.mxu1 %v12348_v2 }
 0xda8   :  { %v3448_v29 = vpop.f32.mrb[24].mxu0  ;;  %v3519_v33 = vpop.f32.mrb[24].mxu1 }
 0xda9   :  { %v10831_v49 = vadd.f32 %v3448_v29, %v12495_v59  ;;  %v3450_v39 = vpop.f32.mrb[25].mxu0  ;;  %v3521_v32 = vpop.f32.mrb[25].mxu1  ;;  %v10847_v34 = vadd.f32 %v3519_v33, %v12507_v9 }
 0xdaa   :  { %v10832_v16 = vadd.f32 %v3450_v39, %v12498_v35  ;;  %v10848_v8 = vadd.f32 %v3521_v32, %v12503_v46 }
 0xdab   :  { %v8085_v25 = vmul.f32 -1.442695, %v10831_v49 }
 0xdac   :  { %v8086_v51 = vmul.f32 -1.442695, %v10832_v16  ;;  %v8087_v13 = vmul.f32 -1.442695, %v10848_v8 }
 0xdad   :  { %11279 = vpow2.f32 %v8085_v25 }
 0xdae   :  { %11281 = vpow2.f32 %v8086_v51 }
 0xdaf   :  { %11283 = vpow2.f32 %v8087_v13 }
 0xdb0   :  { %11285 = vtanh.f32 %v10847_v34 }
 0xdb7   :  { %v11280_v1 = vpop.eup %11279 }
 0xdb8   :  { %v11282_v7 = vpop.eup %11281  ;;  %v3531_v27 = vadd.f32 1.0, %v11280_v1 }
 0xdb9   :  { %v3537_v63 = vadd.f32 1.0, %v11282_v7  ;;  %v11284_v37 = vpop.eup %11283 }
 0xdba   :  { %11287 = vrcp.f32 %v3531_v27  ;;  %v11286_v29 = vpop.eup %11285  ;;  %v3544_v25 = vadd.f32 1.0, %v11284_v37 }
 0xdbb   :  { %11289 = vrcp.f32 %v3537_v63 }
 0xdbc   :  { %11291 = vrcp.f32 %v3544_v25 }
 0xdc4   :  { %v11288_v39 = vpop.eup %11287 }
 0xdc5   :  { %v11290_v49 = vpop.eup %11289  ;;  %v3548_v16 = vmul.f32 %v11288_v39, %v11286_v29 }
 0xdc6   :  { %v3547_v51 = vmul.f32 %v11290_v49, %v12648_v44  ;;  %v11292_v33 = vpop.eup %11291 }
 0xdc8   :  { %v12694_v32 = vadd.f32 %v3548_v16, %v3547_v51 }
 0xdca   :  { %11293 = vtanh.f32 %v12694_v32 }
 0xdd4   :  { %v11294_v8 = vpop.eup %11293 }
 0xdd5   :  { %v12697_v13 = vmul.f32 %v11294_v8, %v11292_v33 }
 0xdd7   :  { %3622 = vmatmul.mubr.f32.vlgmr.msra.gmra.mrb[26].mxu0 %v12697_v13  ;;  %3693 = vmatmul.mubr.f32.vlgmr.msra.gmra.mrb[26].mxu1 %v12697_v13 }
 0xdd8   :  { %9426 = vmatpush1.bf16.msra.mxu0 %v12350_v52  ;;  %9458 = vmatpush1.bf16.msra.mxu1 %v12353_v6 }
 0xdd9   :  { %9428 = vmatprep.subr.bf16.mxu0 %v12358_v12  ;;  %9460 = vmatprep.subr.bf16.mxu1 %v12360_v38 }
 0xdda   :  { %3796 = vmatprep.mubr.f32.mxu0 %v11678_v0  ;;  %3867 = vmatprep.mubr.f32.mxu1 %v11678_v0 }
 0xddc   :  { %9430 = vmatpush1.bf16.msra.mxu0 %v12362_v26  ;;  %9462 = vmatpush1.bf16.msra.mxu1 %v12365_v19 }
 0xddd   :  { %9432 = vmatprep.subr.bf16.mxu0 %v12370_v4  ;;  %9464 = vmatprep.subr.bf16.mxu1 %v12372_v17 }
 0xde0   :  { %9434 = vmatpush1.bf16.msra.mxu0 %v12374_v20  ;;  %9466 = vmatpush1.bf16.msra.mxu1 %v12377_v30 }
 0xde1   :  { %9436 = vmatprep.subr.bf16.mxu0 %v12382_v43  ;;  %9468 = vmatprep.subr.bf16.mxu1 %v12384_v58 }
 0xde4   :  { %9438 = vmatpush1.bf16.msra.mxu0 %v12386_v62  ;;  %9470 = vmatpush1.bf16.msra.mxu1 %v12389_v18 }
 0xde5   :  { %9440 = vmatprep.subr.bf16.mxu0 %v12393_v36  ;;  %9472 = vmatprep.subr.bf16.mxu1 %v12395_v60 }
 0xde8   :  { %9442 = vmatpush1.bf16.msra.mxu0 %v12398_v41  ;;  %9474 = vmatpush1.bf16.msra.mxu1 %v12402_v54 }
 0xde9   :  { %9444 = vmatprep.subr.bf16.mxu0 %v12404_v3  ;;  %9476 = vmatprep.subr.bf16.mxu1 %v12406_v21 }
 0xdec   :  { %9446 = vmatpush1.bf16.msra.mxu0 %v12409_v61  ;;  %9478 = vmatpush1.bf16.msra.mxu1 %v12413_v14 }
 0xded   :  { %9448 = vmatprep.subr.bf16.mxu0 %v12415_v24  ;;  %9480 = vmatprep.subr.bf16.mxu1 %v12418_v40 }
 0xdf0   :  { %9450 = vmatpush1.bf16.msra.mxu0 %v12421_v53  ;;  %9482 = vmatpush1.bf16.msra.mxu1 %v12425_v5 }
 0xdf1   :  { %9452 = vmatprep.subr.bf16.mxu0 %v12430_v28  ;;  %9484 = vmatprep.subr.bf16.mxu1 %v12432_v22 }
 0xdf4   :  { %9454 = vmatpush1.bf16.msra.mxu0 %v12434_v31  ;;  %9486 = vmatpush1.bf16.msra.mxu1 %v12437_v57 }
 0xdf5   :  { %9488 = vmatprep.subr.bf16.mxu0 %v12346_v56  ;;  %9520 = vmatprep.subr.bf16.mxu1 %v12348_v2 }
 0xeaa   :  { %v3623_v44 = vpop.f32.mrb[26].mxu0  ;;  %v3694_v34 = vpop.f32.mrb[26].mxu1 }
 0xeab   :  { %v10833_v1 = vadd.f32 %v3623_v44, %v12495_v59  ;;  %v3625_v7 = vpop.f32.mrb[27].mxu0  ;;  %v3696_v27 = vpop.f32.mrb[27].mxu1  ;;  %v10849_v16 = vadd.f32 %v3694_v34, %v12507_v9 }
 0xeac   :  { %v10834_v63 = vadd.f32 %v3625_v7, %v12498_v35  ;;  %v10850_v39 = vadd.f32 %v3696_v27, %v12503_v46 }
 0xead   :  { %v8088_v37 = vmul.f32 -1.442695, %v10833_v1 }
 0xeae   :  { %v8089_v29 = vmul.f32 -1.442695, %v10834_v63  ;;  %v8090_v49 = vmul.f32 -1.442695, %v10850_v39 }
 0xeaf   :  { %11295 = vpow2.f32 %v8088_v37 }
 0xeb0   :  { %11297 = vpow2.f32 %v8089_v29 }
 0xeb1   :  { %11299 = vpow2.f32 %v8090_v49  ;;  %v4090_v49 = vld [vmem:[#allocation7 + $0x210] sm:$0xff] }
 0xeb2   :  { %11301 = vtanh.f32 %v10849_v16  ;;  %v4094_v16 = vld [vmem:[#allocation7 + $0x230] sm:$0xff] }
 0xeb9   :  { %v11296_v56 = vpop.eup %11295 }
 0xeba   :  { %v11298_v25 = vpop.eup %11297  ;;  %v3706_v2 = vadd.f32 1.0, %v11296_v56  ;;  %v4097_v56 = vld [vmem:[#allocation7 + $0x248] sm:$0xff] }
 0xebb   :  { %v3712_v51 = vadd.f32 1.0, %v11298_v25  ;;  %v11300_v33 = vpop.eup %11299  ;;  %v4101_v25 = vld [vmem:[#allocation7 + $0x268] sm:$0xff] }
 0xebc   :  { %11303 = vrcp.f32 %v3706_v2  ;;  %v11302_v8 = vpop.eup %11301  ;;  %v3719_v63 = vadd.f32 1.0, %v11300_v33  ;;  %v4099_v2 = vld [vmem:[#allocation7 + $0x258] sm:$0xff] }
 0xebd   :  { %11305 = vrcp.f32 %v3712_v51  ;;  %v4103_v51 = vld [vmem:[#allocation7 + $0x278] sm:$0xff] }
 0xebe   :  { %11307 = vrcp.f32 %v3719_v63  ;;  %v4100_v63 = vld [vmem:[#allocation7 + $0x260] sm:$0xff] }
 0xec6   :  { %v11304_v44 = vpop.eup %11303 }
 0xec7   :  { %v11306_v1 = vpop.eup %11305  ;;  %v3723_v7 = vmul.f32 %v11304_v44, %v11302_v8 }
 0xec8   :  { %v3722_v37 = vmul.f32 %v11306_v1, %v12694_v32  ;;  %v11308_v34 = vpop.eup %11307  ;;  %v4092_v32 = vld [vmem:[#allocation7 + $0x220] sm:$0xff]  ;;  %v9585_v1 = vpack.c.bf16 %v4094_v16, %v4090_v49 }
 0xec9   :  { %v4120_v16 = vld [vmem:[#allocation7 + $0x300] sm:$0xff] }
 0xeca   :  { %v12740_v27 = vadd.f32 %v3723_v7, %v3722_v37  ;;  %v4096_v7 = vld [vmem:[#allocation7 + $0x240] sm:$0xff] }
 0xecc   :  { %11309 = vtanh.f32 %v12740_v27 }
 0xed6   :  { %v11310_v29 = vpop.eup %11309 }
 0xed7   :  { %v12743_v39 = vmul.f32 %v11310_v29, %v11308_v34  ;;  %v9587_v34 = vpack.c.bf16 %v4103_v51, %v4099_v2  ;;  %v4098_v29 = vld [vmem:[#allocation7 + $0x250] sm:$0xff] }
 0xed8   :  { %v4122_v51 = vld [vmem:[#allocation7 + $0x310] sm:$0xff] }
 0xed9   :  { %3797 = vmatmul.mubr.f32.vlgmr.msra.gmra.mrb[28].mxu0 %v12743_v39  ;;  %3868 = vmatmul.mubr.f32.vlgmr.msra.gmra.mrb[28].mxu1 %v12743_v39 }
 0xeda   :  { %9490 = vmatpush1.bf16.msra.mxu0 %v12350_v52  ;;  %9522 = vmatpush1.bf16.msra.mxu1 %v12353_v6  ;;  %v4089_v52 = vld [vmem:[#allocation7 + $0x208] sm:$0xff] }
 0xedb   :  { %9492 = vmatprep.subr.bf16.mxu0 %v12358_v12  ;;  %9524 = vmatprep.subr.bf16.mxu1 %v12360_v38  ;;  %v4093_v6 = vld [vmem:[#allocation7 + $0x228] sm:$0xff]  ;;  %v4091_v12 = vld [vmem:[#allocation7 + $0x218] sm:$0xff] }
 0xedc   :  { %3971 = vmatprep.mubr.f32.mxu0 %v11678_v0  ;;  %4042 = vmatprep.mubr.f32.mxu1 %v11678_v0  ;;  %v9551_v38 = vpack.c.bf16 %v4093_v6, %v4089_v52  ;;  %v4102_v52 = vld [vmem:[#allocation7 + $0x270] sm:$0xff]  ;;  %v4105_v6 = vld [vmem:[#allocation7 + $0x288] sm:$0xff] }
 0xede   :  { %9494 = vmatpush1.bf16.msra.mxu0 %v12362_v26  ;;  %9526 = vmatpush1.bf16.msra.mxu1 %v12365_v19  ;;  %v4095_v26 = vld [vmem:[#allocation7 + $0x238] sm:$0xff] }
 0xedf   :  { %9496 = vmatprep.subr.bf16.mxu0 %v12370_v4  ;;  %9528 = vmatprep.subr.bf16.mxu1 %v12372_v17  ;;  %v9583_v19 = vpack.c.bf16 %v4095_v26, %v4091_v12  ;;  %v4109_v12 = vld [vmem:[#allocation7 + $0x2a8] sm:$0xff]  ;;  %v4111_v26 = vld [vmem:[#allocation7 + $0x2b8] sm:$0xff] }
 0xee2   :  { %9498 = vmatpush1.bf16.msra.mxu0 %v12374_v20  ;;  %9530 = vmatpush1.bf16.msra.mxu1 %v12377_v30 }
 0xee3   :  { %9500 = vmatprep.subr.bf16.mxu0 %v12382_v43  ;;  %9532 = vmatprep.subr.bf16.mxu1 %v12384_v58 }
 0xee6   :  { %9502 = vmatpush1.bf16.msra.mxu0 %v12386_v62  ;;  %9534 = vmatpush1.bf16.msra.mxu1 %v12389_v18 }
 0xee7   :  { %9504 = vmatprep.subr.bf16.mxu0 %v12393_v36  ;;  %9536 = vmatprep.subr.bf16.mxu1 %v12395_v60 }
 0xeea   :  { %9506 = vmatpush1.bf16.msra.mxu0 %v12398_v41  ;;  %9538 = vmatpush1.bf16.msra.mxu1 %v12402_v54 }
 0xeeb   :  { %9508 = vmatprep.subr.bf16.mxu0 %v12404_v3  ;;  %9540 = vmatprep.subr.bf16.mxu1 %v12406_v21 }
 0xeee   :  { %9510 = vmatpush1.bf16.msra.mxu0 %v12409_v61  ;;  %9542 = vmatpush1.bf16.msra.mxu1 %v12413_v14 }
 0xeef   :  { %9512 = vmatprep.subr.bf16.mxu0 %v12415_v24  ;;  %9544 = vmatprep.subr.bf16.mxu1 %v12418_v40 }
 0xef2   :  { %9514 = vmatpush1.bf16.msra.mxu0 %v12421_v53  ;;  %9546 = vmatpush1.bf16.msra.mxu1 %v12425_v5 }
 0xef3   :  { %9516 = vmatprep.subr.bf16.mxu0 %v12430_v28  ;;  %9548 = vmatprep.subr.bf16.mxu1 %v12432_v22 }
 0xef6   :  { %9518 = vmatpush1.bf16.msra.mxu0 %v12434_v31  ;;  %9550 = vmatpush1.bf16.msra.mxu1 %v12437_v57  ;;  %v4088_v57 = vld [vmem:[#allocation7 + $0x200] sm:$0xff] }
 0xef7   :  { %9552 = vmatprep.subr.bf16.mxu0 %v9551_v38  ;;  %9584 = vmatprep.subr.bf16.mxu1 %v9583_v19  ;;  %v9553_v44 = vpack.c.bf16 %v4092_v32, %v4088_v57  ;;  %v4107_v38 = vld [vmem:[#allocation7 + $0x298] sm:$0xff]  ;;  %v9557_v19 = vpack.c.bf16 %v4100_v63, %v4096_v7 }
 0xef8   :  { %v4127_v57 = vld [vmem:[#allocation7 + $0x338] sm:$0xff] }
 0xef9   :  { %v4135_v7 = vld [vmem:[#allocation7 + $0x378] sm:$0xff] }
 0xfac   :  { %v3798_v4 = vpop.f32.mrb[28].mxu0  ;;  %v3869_v17 = vpop.f32.mrb[28].mxu1 }
 0xfad   :  { %v10835_v20 = vadd.f32 %v3798_v4, %v12495_v59  ;;  %v3800_v30 = vpop.f32.mrb[29].mxu0  ;;  %v3871_v43 = vpop.f32.mrb[29].mxu1  ;;  %v10851_v41 = vadd.f32 %v3869_v17, %v12507_v9  ;;  %v9589_v4 = vpack.c.bf16 %v4102_v52, %v4098_v29  ;;  %v4104_v17 = vld [vmem:[#allocation7 + $0x280] sm:$0xff] }
 0xfae   :  { %v10836_v58 = vadd.f32 %v3800_v30, %v12498_v35  ;;  %v10852_v36 = vadd.f32 %v3871_v43, %v12503_v46  ;;  %v9559_v30 = vpack.c.bf16 %v4109_v12, %v4105_v6  ;;  %v9591_v43 = vpack.c.bf16 %v4111_v26, %v4107_v38  ;;  %v4132_v29 = vld [vmem:[#allocation7 + $0x360] sm:$0xff]  ;;  %v4130_v12 = vld [vmem:[#allocation7 + $0x350] sm:$0xff]  ;;  %v4137_v26 = vld [vmem:[#allocation7 + $0x388] sm:$0xff] }
 0xfaf   :  { %v8091_v62 = vmul.f32 -1.442695, %v10835_v20  ;;  %v4108_v20 = vld [vmem:[#allocation7 + $0x2a0] sm:$0xff]  ;;  %v4134_v38 = vld [vmem:[#allocation7 + $0x370] sm:$0xff] }
 0xfb0   :  { %v8092_v18 = vmul.f32 -1.442695, %v10836_v58  ;;  %v8093_v60 = vmul.f32 -1.442695, %v10852_v36  ;;  %v4106_v58 = vld [vmem:[#allocation7 + $0x290] sm:$0xff]  ;;  %v4117_v36 = vld [vmem:[#allocation7 + $0x2e8] sm:$0xff] }
 0xfb1   :  { %11311 = vpow2.f32 %v8091_v62  ;;  %v4110_v62 = vld [vmem:[#allocation7 + $0x2b0] sm:$0xff] }
 0xfb2   :  { %11313 = vpow2.f32 %v8092_v18  ;;  %v4113_v18 = vld [vmem:[#allocation7 + $0x2c8] sm:$0xff] }
 0xfb3   :  { %11315 = vpow2.f32 %v8093_v60  ;;  %v4115_v60 = vld [vmem:[#allocation7 + $0x2d8] sm:$0xff] }
 0xfb4   :  { %11317 = vtanh.f32 %v10851_v41  ;;  %v4119_v41 = vld [vmem:[#allocation7 + $0x2f8] sm:$0xff] }
 0xfbb   :  { %v11312_v54 = vpop.eup %11311 }
 0xfbc   :  { %v11314_v3 = vpop.eup %11313  ;;  %v3881_v21 = vadd.f32 1.0, %v11312_v54  ;;  %v9561_v54 = vpack.c.bf16 %v4108_v20, %v4104_v17  ;;  %v4143_v17 = vld [vmem:[#allocation7 + $0x3b8] sm:$0xff] }
 0xfbd   :  { %v3887_v61 = vadd.f32 1.0, %v11314_v3  ;;  %v11316_v14 = vpop.eup %11315  ;;  %v9593_v3 = vpack.c.bf16 %v4110_v62, %v4106_v58  ;;  %v4140_v58 = vld [vmem:[#allocation7 + $0x3a0] sm:$0xff] }
 0xfbe   :  { %11319 = vrcp.f32 %v3881_v21  ;;  %v11318_v24 = vpop.eup %11317  ;;  %v3894_v28 = vadd.f32 1.0, %v11316_v14  ;;  %v4112_v21 = vld [vmem:[#allocation7 + $0x2c0] sm:$0xff]  ;;  %v9563_v14 = vpack.c.bf16 %v4117_v36, %v4113_v18  ;;  %v4138_v36 = vld [vmem:[#allocation7 + $0x390] sm:$0xff] }
 0xfbf   :  { %11321 = vrcp.f32 %v3887_v61  ;;  %v4116_v61 = vld [vmem:[#allocation7 + $0x2e0] sm:$0xff] }
 0xfc0   :  { %11323 = vrcp.f32 %v3894_v28  ;;  %v4125_v28 = vld [vmem:[#allocation7 + $0x328] sm:$0xff]  ;;  %v9565_v32 = vpack.c.bf16 %v4116_v61, %v4112_v21  ;;  %v4151_v21 = vld [vmem:[#allocation7 + $0x3f8] sm:$0xff] }
 0xfc8   :  { %v11320_v40 = vpop.eup %11319 }
 0xfc9   :  { %v11322_v53 = vpop.eup %11321  ;;  %v3898_v5 = vmul.f32 %v11320_v40, %v11318_v24  ;;  %v9595_v24 = vpack.c.bf16 %v4119_v41, %v4115_v60  ;;  %v4114_v40 = vld [vmem:[#allocation7 + $0x2d0] sm:$0xff]  ;;  %v4145_v41 = vld [vmem:[#allocation7 + $0x3c8] sm:$0xff] }
 0xfca   :  { %v3897_v22 = vmul.f32 %v11322_v53, %v12740_v27  ;;  %v11324_v33 = vpop.eup %11323  ;;  %v9555_v27 = vpack.c.bf16 %v4101_v25, %v4097_v56  ;;  %v4118_v53 = vld [vmem:[#allocation7 + $0x2f0] sm:$0xff]  ;;  %v4124_v56 = vld [vmem:[#allocation7 + $0x320] sm:$0xff] }
 0xfcb   :  { %v9597_v49 = vpack.c.bf16 %v4118_v53, %v4114_v40  ;;  %v9569_v63 = vpack.c.bf16 %v4124_v56, %v4120_v16  ;;  %v4142_v60 = vld [vmem:[#allocation7 + $0x3b0] sm:$0xff] }
 0xfcc   :  { %v12784_v31 = vadd.f32 %v3898_v5, %v3897_v22  ;;  %v4121_v5 = vld [vmem:[#allocation7 + $0x308] sm:$0xff]  ;;  %v4123_v22 = vld [vmem:[#allocation7 + $0x318] sm:$0xff] }
 0xfcd   :  { %v9567_v25 = vpack.c.bf16 %v4125_v28, %v4121_v5  ;;  %v9599_v2 = vpack.c.bf16 %v4127_v57, %v4123_v22  ;;  %v4148_v5 = vld [vmem:[#allocation7 + $0x3e0] sm:$0xff]  ;;  %v4146_v28 = vld [vmem:[#allocation7 + $0x3d0] sm:$0xff] }
 0xfce   :  { %11325 = vtanh.f32 %v12784_v31  ;;  %v4150_v22 = vld [vmem:[#allocation7 + $0x3f0] sm:$0xff] }
 0xfd8   :  { %v11326_v8 = vpop.eup %11325 }
 0xfd9   :  { %v12787_v37 = vmul.f32 %v11326_v8, %v11324_v33  ;;  %v4126_v33 = vld [vmem:[#allocation7 + $0x330] sm:$0xff]  ;;  %v4129_v8 = vld [vmem:[#allocation7 + $0x348] sm:$0xff] }
 0xfdb   :  { %3972 = vmatmul.mubr.f32.vlgmr.msra.gmra.mrb[30].mxu0 %v12787_v37  ;;  %4043 = vmatmul.mubr.f32.vlgmr.msra.gmra.mrb[30].mxu1 %v12787_v37 }
 0xfdc   :  { %9554 = vmatpush1.bf16.msra.mxu0 %v9553_v44  ;;  %9586 = vmatpush1.bf16.msra.mxu1 %v9585_v1  ;;  %v4133_v44 = vld [vmem:[#allocation7 + $0x368] sm:$0xff]  ;;  %v4131_v1 = vld [vmem:[#allocation7 + $0x358] sm:$0xff] }
 0xfdd   :  { %9556 = vmatprep.subr.bf16.mxu0 %v9555_v27  ;;  %9588 = vmatprep.subr.bf16.mxu1 %v9587_v34  ;;  %v9601_v27 = vpack.c.bf16 %v4126_v33, %v4122_v51  ;;  %v4128_v34 = vld [vmem:[#allocation7 + $0x340] sm:$0xff]  ;;  %v9571_v52 = vpack.c.bf16 %v4133_v44, %v4129_v8  ;;  %v9603_v6 = vpack.c.bf16 %v4135_v7, %v4131_v1  ;;  %v4443_v51 = vld [vmem:[#allocation9 + $0x448] sm:$0xff]  ;;  %v4445_v8 = vld [vmem:[#allocation9 + $0x458] sm:$0xff] }
 0xfde   :  { %4239 = vmatprep.mubr.f32.mxu0 %v11678_v0  ;;  %4352 = vmatprep.mubr.f32.mxu1 %v11678_v0  ;;  %v9573_v20 = vpack.c.bf16 %v4132_v29, %v4128_v34  ;;  %v4447_v33 = vld [vmem:[#allocation9 + $0x468] sm:$0xff]  ;;  %v4449_v1 = vld [vmem:[#allocation9 + $0x478] sm:$0xff]  ;;  %v4442_v7 = vld [vmem:[#allocation9 + $0x440] sm:$0xff] }
 0xfdf   :  { %v12833_v44 = vpack.c.bf16 %v4447_v33, %v4443_v51  ;;  %v4444_v29 = vld [vmem:[#allocation9 + $0x450] sm:$0xff]  ;;  %v4479_v51 = vld [vmem:[#allocation9 + $0x568] sm:$0xff] }
 0xfe0   :  { %9558 = vmatpush1.bf16.msra.mxu0 %v9557_v19  ;;  %9590 = vmatpush1.bf16.msra.mxu1 %v9589_v4  ;;  %v4141_v19 = vld [vmem:[#allocation7 + $0x3a8] sm:$0xff]  ;;  %v4139_v4 = vld [vmem:[#allocation7 + $0x398] sm:$0xff] }
 0xfe1   :  { %9560 = vmatprep.subr.bf16.mxu0 %v9559_v30  ;;  %9592 = vmatprep.subr.bf16.mxu1 %v9591_v43  ;;  %v9605_v30 = vpack.c.bf16 %v4134_v38, %v4130_v12  ;;  %v4136_v43 = vld [vmem:[#allocation7 + $0x380] sm:$0xff]  ;;  %v9575_v62 = vpack.c.bf16 %v4141_v19, %v4137_v26  ;;  %v9607_v18 = vpack.c.bf16 %v4143_v17, %v4139_v4  ;;  %v4451_v12 = vld [vmem:[#allocation9 + $0x488] sm:$0xff]  ;;  %v4453_v26 = vld [vmem:[#allocation9 + $0x498] sm:$0xff] }
 0xfe2   :  { %v9577_v61 = vpack.c.bf16 %v4140_v58, %v4136_v43  ;;  %v4455_v38 = vld [vmem:[#allocation9 + $0x4a8] sm:$0xff]  ;;  %v4457_v4 = vld [vmem:[#allocation9 + $0x4b8] sm:$0xff]  ;;  %v4450_v17 = vld [vmem:[#allocation9 + $0x480] sm:$0xff] }
 0xfe3   :  { %v12845_v19 = vpack.c.bf16 %v4455_v38, %v4451_v12  ;;  %v4452_v58 = vld [vmem:[#allocation9 + $0x490] sm:$0xff] }
 0xfe4   :  { %9562 = vmatpush1.bf16.msra.mxu0 %v9561_v54  ;;  %9594 = vmatpush1.bf16.msra.mxu1 %v9593_v3  ;;  %v4149_v54 = vld [vmem:[#allocation7 + $0x3e8] sm:$0xff]  ;;  %v4147_v3 = vld [vmem:[#allocation7 + $0x3d8] sm:$0xff]  ;;  %v4476_v12 = vld [vmem:[#allocation9 + $0x550] sm:$0xff] }
 0xfe5   :  { %9564 = vmatprep.subr.bf16.mxu0 %v9563_v14  ;;  %9596 = vmatprep.subr.bf16.mxu1 %v9595_v24  ;;  %v9609_v14 = vpack.c.bf16 %v4142_v60, %v4138_v36  ;;  %v4144_v24 = vld [vmem:[#allocation7 + $0x3c0] sm:$0xff]  ;;  %v9579_v40 = vpack.c.bf16 %v4149_v54, %v4145_v41  ;;  %v9611_v53 = vpack.c.bf16 %v4151_v21, %v4147_v3  ;;  %v4459_v36 = vld [vmem:[#allocation9 + $0x4c8] sm:$0xff]  ;;  %v4461_v41 = vld [vmem:[#allocation9 + $0x4d8] sm:$0xff] }
 0xfe6   :  { %v9581_v57 = vpack.c.bf16 %v4148_v5, %v4144_v24  ;;  %v4463_v60 = vld [vmem:[#allocation9 + $0x4e8] sm:$0xff]  ;;  %v4465_v3 = vld [vmem:[#allocation9 + $0x4f8] sm:$0xff]  ;;  %v4458_v21 = vld [vmem:[#allocation9 + $0x4c0] sm:$0xff] }
 0xfe7   :  { %v12857_v54 = vpack.c.bf16 %v4463_v60, %v4459_v36  ;;  %v4467_v5 = vld [vmem:[#allocation9 + $0x508] sm:$0xff]  ;;  %v4480_v38 = vld [vmem:[#allocation9 + $0x570] sm:$0xff]  ;;  %v4489_v36 = vld [vmem:[#allocation9 + $0x5b8] sm:$0xff] }
 0xfe8   :  { %9566 = vmatpush1.bf16.msra.mxu0 %v9565_v32  ;;  %9598 = vmatpush1.bf16.msra.mxu1 %v9597_v49  ;;  %v9613_v32 = vpack.c.bf16 %v4150_v22, %v4146_v28  ;;  %v4434_v49 = vld [vmem:[#allocation9 + $0x400] sm:$0xff]  ;;  %v4471_v22 = vld [vmem:[#allocation9 + $0x528] sm:$0xff] }
 0xfe9   :  { %9568 = vmatprep.subr.bf16.mxu0 %v9567_v25  ;;  %9600 = vmatprep.subr.bf16.mxu1 %v9599_v2  ;;  %v4436_v25 = vld [vmem:[#allocation9 + $0x410] sm:$0xff]  ;;  %v4482_v60 = vld [vmem:[#allocation9 + $0x580] sm:$0xff] }
 0xfea   :  { %v4440_v2 = vld [vmem:[#allocation9 + $0x430] sm:$0xff] }
 0xfec   :  { %9570 = vmatpush1.bf16.msra.mxu0 %v9569_v63  ;;  %9602 = vmatpush1.bf16.msra.mxu1 %v9601_v27  ;;  %v4446_v63 = vld [vmem:[#allocation9 + $0x460] sm:$0xff]  ;;  %v12835_v27 = vpack.c.bf16 %v4449_v1, %v4445_v8  ;;  %v4477_v1 = vld [vmem:[#allocation9 + $0x558] sm:$0xff] }
 0xfed   :  { %9572 = vmatprep.subr.bf16.mxu0 %v9571_v52  ;;  %9604 = vmatprep.subr.bf16.mxu1 %v9603_v6  ;;  %v12837_v34 = vpack.c.bf16 %v4446_v63, %v4442_v7  ;;  %v4448_v52 = vld [vmem:[#allocation9 + $0x470] sm:$0xff]  ;;  %v4481_v7 = vld [vmem:[#allocation9 + $0x578] sm:$0xff]  ;;  %v4474_v63 = vld [vmem:[#allocation9 + $0x540] sm:$0xff] }
 0xfee   :  { %v12840_v6 = vpack.c.bf16 %v4448_v52, %v4444_v29  ;;  %v12881_v29 = vpack.c.bf16 %v4481_v7, %v4477_v1  ;;  %v4478_v52 = vld [vmem:[#allocation9 + $0x560] sm:$0xff]  ;;  %v4496_v1 = vld [vmem:[#allocation9 + $0x5f0] sm:$0xff] }
 0xff0   :  { %9574 = vmatpush1.bf16.msra.mxu0 %v9573_v20  ;;  %9606 = vmatpush1.bf16.msra.mxu1 %v9605_v30  ;;  %v4454_v20 = vld [vmem:[#allocation9 + $0x4a0] sm:$0xff]  ;;  %v12847_v30 = vpack.c.bf16 %v4457_v4, %v4453_v26  ;;  %v12884_v26 = vpack.c.bf16 %v4478_v52, %v4474_v63  ;;  %v4483_v4 = vld [vmem:[#allocation9 + $0x588] sm:$0xff] }
 0xff1   :  { %9576 = vmatprep.subr.bf16.mxu0 %v9575_v62  ;;  %9608 = vmatprep.subr.bf16.mxu1 %v9607_v18  ;;  %v12849_v43 = vpack.c.bf16 %v4454_v20, %v4450_v17  ;;  %v4456_v62 = vld [vmem:[#allocation9 + $0x4b0] sm:$0xff]  ;;  %v4487_v17 = vld [vmem:[#allocation9 + $0x5a8] sm:$0xff]  ;;  %v4485_v20 = vld [vmem:[#allocation9 + $0x598] sm:$0xff] }
 0xff2   :  { %v12852_v18 = vpack.c.bf16 %v4456_v62, %v4452_v58  ;;  %v12888_v58 = vpack.c.bf16 %v4480_v38, %v4476_v12  ;;  %v12890_v62 = vpack.c.bf16 %v4487_v17, %v4483_v4 }
 0xff4   :  { %9578 = vmatpush1.bf16.msra.mxu0 %v9577_v61  ;;  %9610 = vmatpush1.bf16.msra.mxu1 %v9609_v14  ;;  %v4462_v61 = vld [vmem:[#allocation9 + $0x4e0] sm:$0xff]  ;;  %v12859_v14 = vpack.c.bf16 %v4465_v3, %v4461_v41  ;;  %v12893_v3 = vpack.c.bf16 %v4489_v36, %v4485_v20 }
 0xff5   :  { %9580 = vmatprep.subr.bf16.mxu0 %v9579_v40  ;;  %9612 = vmatprep.subr.bf16.mxu1 %v9611_v53  ;;  %v12861_v24 = vpack.c.bf16 %v4462_v61, %v4458_v21  ;;  %v4460_v40 = vld [vmem:[#allocation9 + $0x4d0] sm:$0xff]  ;;  %v4486_v41 = vld [vmem:[#allocation9 + $0x5a0] sm:$0xff] }
 0xff6   :  { %v4464_v53 = vld [vmem:[#allocation9 + $0x4f0] sm:$0xff] }
 0xff7   :  { %v12864_v28 = vpack.c.bf16 %v4464_v53, %v4460_v40  ;;  %v4484_v21 = vld [vmem:[#allocation9 + $0x590] sm:$0xff]  ;;  %v12896_v40 = vpack.c.bf16 %v4486_v41, %v4482_v60 }
 0xff8   :  { %9582 = vmatpush1.bf16.msra.mxu0 %v9581_v57  ;;  %9614 = vmatpush1.bf16.msra.mxu1 %v9613_v32  ;;  %v4469_v57 = vld [vmem:[#allocation9 + $0x518] sm:$0xff]  ;;  %v4488_v61 = vld [vmem:[#allocation9 + $0x5b0] sm:$0xff] }
 0xff9   :  { %v4473_v32 = vld [vmem:[#allocation9 + $0x538] sm:$0xff]  ;;  %v12900_v53 = vpack.c.bf16 %v4488_v61, %v4484_v21 }
 0xffb   :  { %4240 = vmatmul.mubr.f32.vlgmr.msra.gmra.mrb[32].mxu0 %v12513_v11  ;;  %4353 = vmatmul.mubr.f32.vlgmr.msra.gmra.mrb[32].mxu1 %v12513_v11  ;;  %v4435_v11 = vld [vmem:[#allocation9 + $0x408] sm:$0xff] }
 0xffc   :  { %4245 = vmatprep.mubr.f32.mxu0 %v11678_v0  ;;  %4358 = vmatprep.mubr.f32.mxu1 %v11678_v0 }
 0xfff   :  { %4246 = vmatmul.mubr.f32.gmra.mrb[34].mxu0 %v12559_v23  ;;  %4359 = vmatmul.mubr.f32.gmra.mrb[34].mxu1 %v12559_v23  ;;  %v4439_v23 = vld [vmem:[#allocation9 + $0x428] sm:$0xff] }
0x1000   :  { %4251 = vmatprep.mubr.f32.mxu0 %v11678_v0  ;;  %4364 = vmatprep.mubr.f32.mxu1 %v11678_v0 }
0x1003   :  { %4252 = vmatmul.mubr.f32.gmra.mrb[36].mxu0 %v12605_v15  ;;  %4365 = vmatmul.mubr.f32.gmra.mrb[36].mxu1 %v12605_v15  ;;  %v4437_v15 = vld [vmem:[#allocation9 + $0x418] sm:$0xff] }
0x1004   :  { %4257 = vmatprep.mubr.f32.mxu0 %v11678_v0  ;;  %4370 = vmatprep.mubr.f32.mxu1 %v11678_v0 }
0x1007   :  { %4258 = vmatmul.mubr.f32.gmra.mrb[38].mxu0 %v12651_v50  ;;  %4371 = vmatmul.mubr.f32.gmra.mrb[38].mxu1 %v12651_v50  ;;  %v12821_v50 = vpack.c.bf16 %v4439_v23, %v4435_v11  ;;  %v12868_v11 = vpack.c.bf16 %v4471_v22, %v4467_v5  ;;  %v12870_v23 = vpack.c.bf16 %v4473_v32, %v4469_v57  ;;  %v4491_v5 = vld [vmem:[#allocation9 + $0x5c8] sm:$0xff]  ;;  %v4493_v57 = vld [vmem:[#allocation9 + $0x5d8] sm:$0xff] }
0x1008   :  { %4263 = vmatprep.mubr.f32.mxu0 %v11678_v0  ;;  %4376 = vmatprep.mubr.f32.mxu1 %v11678_v0  ;;  %v4495_v22 = vld [vmem:[#allocation9 + $0x5e8] sm:$0xff] }
0x1009   :  { %9616 = vmatprep.subr.bf16.mxu0 %v12821_v50  ;;  %v12905_v32 = vpack.c.bf16 %v4495_v22, %v4491_v5 }
0x100b   :  { %4264 = vmatmul.mubr.f32.gmra.mrb[40].mxu0 %v12697_v13  ;;  %4377 = vmatmul.mubr.f32.gmra.mrb[40].mxu1 %v12697_v13  ;;  %v4441_v13 = vld [vmem:[#allocation9 + $0x438] sm:$0xff] }
0x100c   :  { %4269 = vmatprep.mubr.f32.mxu0 %v11678_v0  ;;  %4382 = vmatprep.mubr.f32.mxu1 %v11678_v0  ;;  %v12823_v16 = vpack.c.bf16 %v4441_v13, %v4437_v15  ;;  %v4466_v15 = vld [vmem:[#allocation9 + $0x500] sm:$0xff] }
0x100d   :  { %v4470_v13 = vld [vmem:[#allocation9 + $0x520] sm:$0xff] }
0x100e   :  { %9648 = vmatprep.subr.bf16.mxu1 %v12823_v16 }
0x100f   :  { %4270 = vmatmul.mubr.f32.gmra.mrb[42].mxu0 %v12743_v39  ;;  %4383 = vmatmul.mubr.f32.gmra.mrb[42].mxu1 %v12743_v39  ;;  %v4438_v39 = vld [vmem:[#allocation9 + $0x420] sm:$0xff] }
0x1010   :  { %4275 = vmatprep.mubr.f32.mxu0 %v11678_v0  ;;  %4388 = vmatprep.mubr.f32.mxu1 %v11678_v0  ;;  %v12825_v56 = vpack.c.bf16 %v4438_v39, %v4434_v49  ;;  %v4468_v49 = vld [vmem:[#allocation9 + $0x510] sm:$0xff]  ;;  %v12873_v39 = vpack.c.bf16 %v4470_v13, %v4466_v15  ;;  %v4497_v15 = vld [vmem:[#allocation9 + $0x5f8] sm:$0xff]  ;;  %v4490_v13 = vld [vmem:[#allocation9 + $0x5c0] sm:$0xff] }
0x1012   :  { %9618 = vmatpush1.bf16.msra.mxu0 %v12825_v56 }
0x1013   :  { %4276 = vmatmul.mubr.f32.gmra.mrb[44].mxu0 %v12787_v37  ;;  %4389 = vmatmul.mubr.f32.gmra.mrb[44].mxu1 %v12787_v37  ;;  %v12828_v37 = vpack.c.bf16 %v4440_v2, %v4436_v25  ;;  %v4472_v25 = vld [vmem:[#allocation9 + $0x530] sm:$0xff]  ;;  %v4475_v2 = vld [vmem:[#allocation9 + $0x548] sm:$0xff] }
0x1014   :  { %4281 = vmatprep.mubr.f32.mxu0 %v11678_v0  ;;  %4394 = vmatprep.mubr.f32.mxu1 %v11678_v0  ;;  %v12877_v33 = vpack.c.bf16 %v4472_v25, %v4468_v49  ;;  %v12879_v8 = vpack.c.bf16 %v4479_v51, %v4475_v2  ;;  %v4494_v49 = vld [vmem:[#allocation9 + $0x5e0] sm:$0xff]  ;;  %v12907_v25 = vpack.c.bf16 %v4497_v15, %v4493_v57  ;;  %v4492_v51 = vld [vmem:[#allocation9 + $0x5d0] sm:$0xff] }
0x1015   :  { %9650 = vmatpush1.bf16.msra.mxu1 %v12828_v37  ;;  %9620 = vmatprep.subr.bf16.mxu0 %v12833_v44  ;;  %v12909_v2 = vpack.c.bf16 %v4494_v49, %v4490_v13  ;;  %v12912_v7 = vpack.c.bf16 %v4496_v1, %v4492_v51 }
0x1016   :  { %9652 = vmatprep.subr.bf16.mxu1 %v12835_v27  ;;  %9622 = vmatpush1.bf16.msra.mxu0 %v12837_v34 }
0x1017   :  { %9624 = vmatprep.subr.bf16.mxu0 %v12845_v19 }
0x1019   :  { %9654 = vmatpush1.bf16.msra.mxu1 %v12840_v6 }
0x101a   :  { %9656 = vmatprep.subr.bf16.mxu1 %v12847_v30  ;;  %9626 = vmatpush1.bf16.msra.mxu0 %v12849_v43 }
0x101b   :  { %9628 = vmatprep.subr.bf16.mxu0 %v12857_v54 }
0x101d   :  { %9658 = vmatpush1.bf16.msra.mxu1 %v12852_v18 }
0x101e   :  { %9660 = vmatprep.subr.bf16.mxu1 %v12859_v14  ;;  %9630 = vmatpush1.bf16.msra.mxu0 %v12861_v24 }
0x101f   :  { %9632 = vmatprep.subr.bf16.mxu0 %v12868_v11 }
0x1021   :  { %9662 = vmatpush1.bf16.msra.mxu1 %v12864_v28 }
0x1022   :  { %9664 = vmatprep.subr.bf16.mxu1 %v12870_v23  ;;  %9634 = vmatpush1.bf16.msra.mxu0 %v12873_v39 }
0x1023   :  { %9636 = vmatprep.subr.bf16.mxu0 %v12879_v8 }
0x1025   :  { %9666 = vmatpush1.bf16.msra.mxu1 %v12877_v33 }
0x1026   :  { %9668 = vmatprep.subr.bf16.mxu1 %v12881_v29  ;;  %9638 = vmatpush1.bf16.msra.mxu0 %v12884_v26 }
0x1027   :  { %9640 = vmatprep.subr.bf16.mxu0 %v12890_v62 }
0x1029   :  { %9670 = vmatpush1.bf16.msra.mxu1 %v12888_v58 }
0x102a   :  { %9672 = vmatprep.subr.bf16.mxu1 %v12893_v3  ;;  %9642 = vmatpush1.bf16.msra.mxu0 %v12896_v40 }
0x102b   :  { %9644 = vmatprep.subr.bf16.mxu0 %v12905_v32 }
0x102d   :  { %9674 = vmatpush1.bf16.msra.mxu1 %v12900_v53 }
0x102e   :  { %9676 = vmatprep.subr.bf16.mxu1 %v12907_v25  ;;  %9646 = vmatpush1.bf16.msra.mxu0 %v12909_v2 }
0x102f   :  { %9680 = vmatprep.subr.bf16.mxu0 %v12821_v50 }
0x1031   :  { %9678 = vmatpush1.bf16.msra.mxu1 %v12912_v7 }
0x1032   :  { %9712 = vmatprep.subr.bf16.mxu1 %v12823_v16 }
0x10ae   :  { %v3973_v63 = vpop.f32.mrb[30].mxu0  ;;  %v4044_v52 = vpop.f32.mrb[30].mxu1 }
0x10af   :  { %v10837_v12 = vadd.f32 %v3973_v63, %v12495_v59  ;;  %v3975_v38 = vpop.f32.mrb[31].mxu0  ;;  %v4046_v4 = vpop.f32.mrb[31].mxu1  ;;  %v10853_v21 = vadd.f32 %v4044_v52, %v12507_v9 }
0x10b0   :  { %v10838_v17 = vadd.f32 %v3975_v38, %v12498_v35  ;;  %v10854_v60 = vadd.f32 %v4046_v4, %v12503_v46 }
0x10b1   :  { %v8094_v20 = vmul.f32 -1.442695, %v10837_v12 }
0x10b2   :  { %v8095_v36 = vmul.f32 -1.442695, %v10838_v17  ;;  %v8096_v41 = vmul.f32 -1.442695, %v10854_v60 }
0x10b3   :  { %11327 = vpow2.f32 %v8094_v20 }
0x10b4   :  { %11329 = vpow2.f32 %v8095_v36 }
0x10b5   :  { %11331 = vpow2.f32 %v8096_v41 }
0x10b6   :  { %11333 = vtanh.f32 %v10853_v21 }
0x10bd   :  { %v11328_v61 = vpop.eup %11327 }
0x10be   :  { %v11330_v5 = vpop.eup %11329  ;;  %v4056_v22 = vadd.f32 1.0, %v11328_v61 }
0x10bf   :  { %v4062_v57 = vadd.f32 1.0, %v11330_v5  ;;  %v11332_v59 = vpop.eup %11331 }
0x10c0   :  { %11335 = vrcp.f32 %v4056_v22  ;;  %v11334_v15 = vpop.eup %11333  ;;  %v4069_v51 = vadd.f32 1.0, %v11332_v59 }
0x10c1   :  { %11337 = vrcp.f32 %v4062_v57 }
0x10c2   :  { %11339 = vrcp.f32 %v4069_v51 }
0x10ca   :  { %v11336_v35 = vpop.eup %11335 }
0x10cb   :  { %v11338_v13 = vpop.eup %11337  ;;  %v4073_v49 = vmul.f32 %v11336_v35, %v11334_v15 }
0x10cc   :  { %v4072_v1 = vmul.f32 %v11338_v13, %v12784_v31  ;;  %v11340_v9 = vpop.eup %11339  ;;  %v8097_v31 = vld [vmem:[%s13984_s4 + $0x8] sm:$0xf] }
0x10cd   :  { %v12970_v12 = vrot.slane %v8097_v31, %v12008_v45  ;;  %v12973_v38 = vrot.slane %v8097_v31, %v12013_v48  ;;  %v12978_v5 = vrot.slane %v8097_v31, %v12021_v55  ;;  %v12982_v57 = vrot.slane %v8097_v31, %v12028_v10 }
0x10ce   :  { %v4074_v46 = vadd.f32 %v4073_v49, %v4072_v1 }
0x10d0   :  { %11341 = vtanh.f32 %v4074_v46 }
0x10da   :  { %v11342_v63 = vpop.eup %11341 }
0x10db   :  { %v12924_v52 = vmul.f32 %v11342_v63, %v11340_v9 }
0x10dd   :  { %4282 = vmatmul.mubr.f32.gmra.mrb[46].mxu0 %v12924_v52  ;;  %4395 = vmatmul.mubr.f32.gmra.mrb[46].mxu1 %v12924_v52 }
0x10de   :  { %4566 = vmatprep.mubr.f32.mxu0 %v11678_v0  ;;  %4637 = vmatprep.mubr.f32.mxu1 %v11678_v0 }
0x10e1   :  { %4567 = vmatmul.mubr.f32.vlgmr.msra.gmra.mrb[32].mxu0 %v11678_v0  ;;  %4638 = vmatmul.mubr.f32.vlgmr.msra.gmra.mrb[32].mxu1 %v11678_v0 }
0x10e2   :  { %9682 = vmatpush1.bf16.msra.mxu0 %v12825_v56  ;;  %9714 = vmatpush1.bf16.msra.mxu1 %v12828_v37 }
0x10e3   :  { %9684 = vmatprep.subr.bf16.mxu0 %v12833_v44  ;;  %9716 = vmatprep.subr.bf16.mxu1 %v12835_v27 }
0x10e4   :  { %4741 = vmatprep.mubr.f32.mxu0 %v11678_v0  ;;  %4812 = vmatprep.mubr.f32.mxu1 %v11678_v0 }
0x10e6   :  { %9686 = vmatpush1.bf16.msra.mxu0 %v12837_v34  ;;  %9718 = vmatpush1.bf16.msra.mxu1 %v12840_v6 }
0x10e7   :  { %9688 = vmatprep.subr.bf16.mxu0 %v12845_v19  ;;  %9720 = vmatprep.subr.bf16.mxu1 %v12847_v30 }
0x10ea   :  { %9690 = vmatpush1.bf16.msra.mxu0 %v12849_v43  ;;  %9722 = vmatpush1.bf16.msra.mxu1 %v12852_v18 }
0x10eb   :  { %9692 = vmatprep.subr.bf16.mxu0 %v12857_v54  ;;  %9724 = vmatprep.subr.bf16.mxu1 %v12859_v14 }
0x10ee   :  { %9694 = vmatpush1.bf16.msra.mxu0 %v12861_v24  ;;  %9726 = vmatpush1.bf16.msra.mxu1 %v12864_v28 }
0x10ef   :  { %9696 = vmatprep.subr.bf16.mxu0 %v12868_v11  ;;  %9728 = vmatprep.subr.bf16.mxu1 %v12870_v23 }
0x10f2   :  { %9698 = vmatpush1.bf16.msra.mxu0 %v12873_v39  ;;  %9730 = vmatpush1.bf16.msra.mxu1 %v12877_v33 }
0x10f3   :  { %9700 = vmatprep.subr.bf16.mxu0 %v12879_v8  ;;  %9732 = vmatprep.subr.bf16.mxu1 %v12881_v29 }
0x10f6   :  { %9702 = vmatpush1.bf16.msra.mxu0 %v12884_v26  ;;  %9734 = vmatpush1.bf16.msra.mxu1 %v12888_v58 }
0x10f7   :  { %9704 = vmatprep.subr.bf16.mxu0 %v12890_v62  ;;  %9736 = vmatprep.subr.bf16.mxu1 %v12893_v3 }
0x10fa   :  { %9706 = vmatpush1.bf16.msra.mxu0 %v12896_v40  ;;  %9738 = vmatpush1.bf16.msra.mxu1 %v12900_v53 }
0x10fb   :  { %9708 = vmatprep.subr.bf16.mxu0 %v12905_v32  ;;  %9740 = vmatprep.subr.bf16.mxu1 %v12907_v25 }
0x10fe   :  { %9710 = vmatpush1.bf16.msra.mxu0 %v12909_v2  ;;  %9742 = vmatpush1.bf16.msra.mxu1 %v12912_v7 }
0x10ff   :  { %9744 = vmatprep.subr.bf16.mxu0 %v12821_v50  ;;  %9776 = vmatprep.subr.bf16.mxu1 %v12823_v16 }
0x11b4   :  { %v4568_v4 = vpop.f32.mrb[32].mxu0  ;;  %v4639_v17 = vpop.f32.mrb[32].mxu1 }
0x11b5   :  { %v10855_v20 = vadd.f32 %v4568_v4, %v12970_v12  ;;  %v4570_v36 = vpop.f32.mrb[33].mxu0  ;;  %v4641_v60 = vpop.f32.mrb[33].mxu1  ;;  %v10871_v15 = vadd.f32 %v4639_v17, %v12982_v57 }
0x11b6   :  { %v10856_v41 = vadd.f32 %v4570_v36, %v12973_v38  ;;  %v10872_v22 = vadd.f32 %v4641_v60, %v12978_v5 }
0x11b7   :  { %v8098_v21 = vmul.f32 -1.442695, %v10855_v20 }
0x11b8   :  { %v8099_v61 = vmul.f32 -1.442695, %v10856_v41  ;;  %v8100_v59 = vmul.f32 -1.442695, %v10872_v22 }
0x11b9   :  { %11343 = vpow2.f32 %v8098_v21 }
0x11ba   :  { %11345 = vpow2.f32 %v8099_v61 }
0x11bb   :  { %11347 = vpow2.f32 %v8100_v59 }
0x11bc   :  { %11349 = vtanh.f32 %v10871_v15 }
0x11c3   :  { %v11344_v35 = vpop.eup %11343 }
0x11c4   :  { %v11346_v13 = vpop.eup %11345  ;;  %v4651_v49 = vadd.f32 1.0, %v11344_v35 }
0x11c5   :  { %v4657_v51 = vadd.f32 1.0, %v11346_v13  ;;  %v11348_v1 = vpop.eup %11347 }
0x11c6   :  { %11351 = vrcp.f32 %v4651_v49  ;;  %v11350_v46 = vpop.eup %11349  ;;  %v4664_v20 = vadd.f32 1.0, %v11348_v1 }
0x11c7   :  { %11353 = vrcp.f32 %v4657_v51 }
0x11c8   :  { %11355 = vrcp.f32 %v4664_v20 }
0x11d0   :  { %v11352_v9 = vpop.eup %11351 }
0x11d1   :  { %v11354_v63 = vpop.eup %11353  ;;  %v4668_v4 = vmul.f32 %v11352_v9, %v11350_v46 }
0x11d2   :  { %v4667_v36 = vmul.f32 0.0, %v11354_v63  ;;  %v11356_v17 = vpop.eup %11355 }
0x11d4   :  { %v12985_v31 = vadd.f32 %v4668_v4, %v4667_v36 }
0x11d6   :  { %11357 = vtanh.f32 %v12985_v31 }
0x11e0   :  { %v11358_v60 = vpop.eup %11357 }
0x11e1   :  { %v12988_v41 = vmul.f32 %v11358_v60, %v11356_v17 }
0x11e3   :  { %4742 = vmatmul.mubr.f32.vlgmr.msra.gmra.mrb[34].mxu0 %v12988_v41  ;;  %4813 = vmatmul.mubr.f32.vlgmr.msra.gmra.mrb[34].mxu1 %v12988_v41 }
0x11e4   :  { %9746 = vmatpush1.bf16.msra.mxu0 %v12825_v56  ;;  %9778 = vmatpush1.bf16.msra.mxu1 %v12828_v37 }
0x11e5   :  { %9748 = vmatprep.subr.bf16.mxu0 %v12833_v44  ;;  %9780 = vmatprep.subr.bf16.mxu1 %v12835_v27 }
0x11e6   :  { %4916 = vmatprep.mubr.f32.mxu0 %v11678_v0  ;;  %4987 = vmatprep.mubr.f32.mxu1 %v11678_v0 }
0x11e8   :  { %9750 = vmatpush1.bf16.msra.mxu0 %v12837_v34  ;;  %9782 = vmatpush1.bf16.msra.mxu1 %v12840_v6 }
0x11e9   :  { %9752 = vmatprep.subr.bf16.mxu0 %v12845_v19  ;;  %9784 = vmatprep.subr.bf16.mxu1 %v12847_v30 }
0x11ec   :  { %9754 = vmatpush1.bf16.msra.mxu0 %v12849_v43  ;;  %9786 = vmatpush1.bf16.msra.mxu1 %v12852_v18 }
0x11ed   :  { %9756 = vmatprep.subr.bf16.mxu0 %v12857_v54  ;;  %9788 = vmatprep.subr.bf16.mxu1 %v12859_v14 }
0x11f0   :  { %9758 = vmatpush1.bf16.msra.mxu0 %v12861_v24  ;;  %9790 = vmatpush1.bf16.msra.mxu1 %v12864_v28 }
0x11f1   :  { %9760 = vmatprep.subr.bf16.mxu0 %v12868_v11  ;;  %9792 = vmatprep.subr.bf16.mxu1 %v12870_v23 }
0x11f4   :  { %9762 = vmatpush1.bf16.msra.mxu0 %v12873_v39  ;;  %9794 = vmatpush1.bf16.msra.mxu1 %v12877_v33 }
0x11f5   :  { %9764 = vmatprep.subr.bf16.mxu0 %v12879_v8  ;;  %9796 = vmatprep.subr.bf16.mxu1 %v12881_v29 }
0x11f8   :  { %9766 = vmatpush1.bf16.msra.mxu0 %v12884_v26  ;;  %9798 = vmatpush1.bf16.msra.mxu1 %v12888_v58 }
0x11f9   :  { %9768 = vmatprep.subr.bf16.mxu0 %v12890_v62  ;;  %9800 = vmatprep.subr.bf16.mxu1 %v12893_v3 }
0x11fc   :  { %9770 = vmatpush1.bf16.msra.mxu0 %v12896_v40  ;;  %9802 = vmatpush1.bf16.msra.mxu1 %v12900_v53 }
0x11fd   :  { %9772 = vmatprep.subr.bf16.mxu0 %v12905_v32  ;;  %9804 = vmatprep.subr.bf16.mxu1 %v12907_v25 }
0x1200   :  { %9774 = vmatpush1.bf16.msra.mxu0 %v12909_v2  ;;  %9806 = vmatpush1.bf16.msra.mxu1 %v12912_v7 }
0x1201   :  { %9808 = vmatprep.subr.bf16.mxu0 %v12821_v50  ;;  %9840 = vmatprep.subr.bf16.mxu1 %v12823_v16 }
0x12b6   :  { %v4743_v21 = vpop.f32.mrb[34].mxu0  ;;  %v4814_v61 = vpop.f32.mrb[34].mxu1 }
0x12b7   :  { %v10857_v22 = vadd.f32 %v4743_v21, %v12970_v12  ;;  %v4745_v59 = vpop.f32.mrb[35].mxu0  ;;  %v4816_v15 = vpop.f32.mrb[35].mxu1  ;;  %v10873_v46 = vadd.f32 %v4814_v61, %v12982_v57 }
0x12b8   :  { %v10858_v35 = vadd.f32 %v4745_v59, %v12973_v38  ;;  %v10874_v51 = vadd.f32 %v4816_v15, %v12978_v5 }
0x12b9   :  { %v8101_v13 = vmul.f32 -1.442695, %v10857_v22 }
0x12ba   :  { %v8102_v49 = vmul.f32 -1.442695, %v10858_v35  ;;  %v8103_v1 = vmul.f32 -1.442695, %v10874_v51 }
0x12bb   :  { %11359 = vpow2.f32 %v8101_v13 }
0x12bc   :  { %11361 = vpow2.f32 %v8102_v49 }
0x12bd   :  { %11363 = vpow2.f32 %v8103_v1 }
0x12be   :  { %11365 = vtanh.f32 %v10873_v46 }
0x12c5   :  { %v11360_v9 = vpop.eup %11359 }
0x12c6   :  { %v11362_v63 = vpop.eup %11361  ;;  %v4826_v4 = vadd.f32 1.0, %v11360_v9 }
0x12c7   :  { %v4832_v20 = vadd.f32 1.0, %v11362_v63  ;;  %v11364_v36 = vpop.eup %11363 }
0x12c8   :  { %11367 = vrcp.f32 %v4826_v4  ;;  %v11366_v17 = vpop.eup %11365  ;;  %v4839_v59 = vadd.f32 1.0, %v11364_v36 }
0x12c9   :  { %11369 = vrcp.f32 %v4832_v20 }
0x12ca   :  { %11371 = vrcp.f32 %v4839_v59 }
0x12d2   :  { %v11368_v60 = vpop.eup %11367 }
0x12d3   :  { %v11370_v21 = vpop.eup %11369  ;;  %v4843_v22 = vmul.f32 %v11368_v60, %v11366_v17 }
0x12d4   :  { %v4842_v35 = vmul.f32 %v11370_v21, %v12985_v31  ;;  %v11372_v61 = vpop.eup %11371 }
0x12d6   :  { %v13031_v15 = vadd.f32 %v4843_v22, %v4842_v35 }
0x12d8   :  { %11373 = vtanh.f32 %v13031_v15 }
0x12e2   :  { %v11374_v13 = vpop.eup %11373 }
0x12e3   :  { %v13034_v49 = vmul.f32 %v11374_v13, %v11372_v61 }
0x12e5   :  { %4917 = vmatmul.mubr.f32.vlgmr.msra.gmra.mrb[36].mxu0 %v13034_v49  ;;  %4988 = vmatmul.mubr.f32.vlgmr.msra.gmra.mrb[36].mxu1 %v13034_v49 }
0x12e6   :  { %9810 = vmatpush1.bf16.msra.mxu0 %v12825_v56  ;;  %9842 = vmatpush1.bf16.msra.mxu1 %v12828_v37 }
0x12e7   :  { %9812 = vmatprep.subr.bf16.mxu0 %v12833_v44  ;;  %9844 = vmatprep.subr.bf16.mxu1 %v12835_v27 }
0x12e8   :  { %5091 = vmatprep.mubr.f32.mxu0 %v11678_v0  ;;  %5162 = vmatprep.mubr.f32.mxu1 %v11678_v0 }
0x12ea   :  { %9814 = vmatpush1.bf16.msra.mxu0 %v12837_v34  ;;  %9846 = vmatpush1.bf16.msra.mxu1 %v12840_v6 }
0x12eb   :  { %9816 = vmatprep.subr.bf16.mxu0 %v12845_v19  ;;  %9848 = vmatprep.subr.bf16.mxu1 %v12847_v30 }
0x12ee   :  { %9818 = vmatpush1.bf16.msra.mxu0 %v12849_v43  ;;  %9850 = vmatpush1.bf16.msra.mxu1 %v12852_v18 }
0x12ef   :  { %9820 = vmatprep.subr.bf16.mxu0 %v12857_v54  ;;  %9852 = vmatprep.subr.bf16.mxu1 %v12859_v14 }
0x12f2   :  { %9822 = vmatpush1.bf16.msra.mxu0 %v12861_v24  ;;  %9854 = vmatpush1.bf16.msra.mxu1 %v12864_v28 }
0x12f3   :  { %9824 = vmatprep.subr.bf16.mxu0 %v12868_v11  ;;  %9856 = vmatprep.subr.bf16.mxu1 %v12870_v23 }
0x12f6   :  { %9826 = vmatpush1.bf16.msra.mxu0 %v12873_v39  ;;  %9858 = vmatpush1.bf16.msra.mxu1 %v12877_v33 }
0x12f7   :  { %9828 = vmatprep.subr.bf16.mxu0 %v12879_v8  ;;  %9860 = vmatprep.subr.bf16.mxu1 %v12881_v29 }
0x12fa   :  { %9830 = vmatpush1.bf16.msra.mxu0 %v12884_v26  ;;  %9862 = vmatpush1.bf16.msra.mxu1 %v12888_v58 }
0x12fb   :  { %9832 = vmatprep.subr.bf16.mxu0 %v12890_v62  ;;  %9864 = vmatprep.subr.bf16.mxu1 %v12893_v3 }
0x12fe   :  { %9834 = vmatpush1.bf16.msra.mxu0 %v12896_v40  ;;  %9866 = vmatpush1.bf16.msra.mxu1 %v12900_v53 }
0x12ff   :  { %9836 = vmatprep.subr.bf16.mxu0 %v12905_v32  ;;  %9868 = vmatprep.subr.bf16.mxu1 %v12907_v25 }
0x1302   :  { %9838 = vmatpush1.bf16.msra.mxu0 %v12909_v2  ;;  %9870 = vmatpush1.bf16.msra.mxu1 %v12912_v7 }
0x1303   :  { %9872 = vmatprep.subr.bf16.mxu0 %v12821_v50  ;;  %9904 = vmatprep.subr.bf16.mxu1 %v12823_v16 }
0x13b8   :  { %v4918_v31 = vpop.f32.mrb[36].mxu0  ;;  %v4989_v51 = vpop.f32.mrb[36].mxu1 }
0x13b9   :  { %v10859_v1 = vadd.f32 %v4918_v31, %v12970_v12  ;;  %v4920_v46 = vpop.f32.mrb[37].mxu0  ;;  %v4991_v9 = vpop.f32.mrb[37].mxu1  ;;  %v10875_v60 = vadd.f32 %v4989_v51, %v12982_v57 }
0x13ba   :  { %v10860_v63 = vadd.f32 %v4920_v46, %v12973_v38  ;;  %v10876_v36 = vadd.f32 %v4991_v9, %v12978_v5 }
0x13bb   :  { %v8104_v4 = vmul.f32 -1.442695, %v10859_v1 }
0x13bc   :  { %v8105_v20 = vmul.f32 -1.442695, %v10860_v63  ;;  %v8106_v17 = vmul.f32 -1.442695, %v10876_v36 }
0x13bd   :  { %11375 = vpow2.f32 %v8104_v4 }
0x13be   :  { %11377 = vpow2.f32 %v8105_v20 }
0x13bf   :  { %11379 = vpow2.f32 %v8106_v17 }
0x13c0   :  { %11381 = vtanh.f32 %v10875_v60 }
0x13c7   :  { %v11376_v21 = vpop.eup %11375 }
0x13c8   :  { %v11378_v22 = vpop.eup %11377  ;;  %v5001_v59 = vadd.f32 1.0, %v11376_v21 }
0x13c9   :  { %v5007_v35 = vadd.f32 1.0, %v11378_v22  ;;  %v11380_v61 = vpop.eup %11379 }
0x13ca   :  { %11383 = vrcp.f32 %v5001_v59  ;;  %v11382_v13 = vpop.eup %11381  ;;  %v5014_v63 = vadd.f32 1.0, %v11380_v61 }
0x13cb   :  { %11385 = vrcp.f32 %v5007_v35 }
0x13cc   :  { %11387 = vrcp.f32 %v5014_v63 }
0x13d4   :  { %v11384_v31 = vpop.eup %11383 }
0x13d5   :  { %v11386_v1 = vpop.eup %11385  ;;  %v5018_v46 = vmul.f32 %v11384_v31, %v11382_v13 }
0x13d6   :  { %v5017_v4 = vmul.f32 %v11386_v1, %v13031_v15  ;;  %v11388_v51 = vpop.eup %11387 }
0x13d8   :  { %v13077_v9 = vadd.f32 %v5018_v46, %v5017_v4 }
0x13da   :  { %11389 = vtanh.f32 %v13077_v9 }
0x13e4   :  { %v11390_v20 = vpop.eup %11389 }
0x13e5   :  { %v13080_v36 = vmul.f32 %v11390_v20, %v11388_v51 }
0x13e7   :  { %5092 = vmatmul.mubr.f32.vlgmr.msra.gmra.mrb[38].mxu0 %v13080_v36  ;;  %5163 = vmatmul.mubr.f32.vlgmr.msra.gmra.mrb[38].mxu1 %v13080_v36 }
0x13e8   :  { %9874 = vmatpush1.bf16.msra.mxu0 %v12825_v56  ;;  %9906 = vmatpush1.bf16.msra.mxu1 %v12828_v37 }
0x13e9   :  { %9876 = vmatprep.subr.bf16.mxu0 %v12833_v44  ;;  %9908 = vmatprep.subr.bf16.mxu1 %v12835_v27 }
0x13ea   :  { %5266 = vmatprep.mubr.f32.mxu0 %v11678_v0  ;;  %5337 = vmatprep.mubr.f32.mxu1 %v11678_v0 }
0x13ec   :  { %9878 = vmatpush1.bf16.msra.mxu0 %v12837_v34  ;;  %9910 = vmatpush1.bf16.msra.mxu1 %v12840_v6 }
0x13ed   :  { %9880 = vmatprep.subr.bf16.mxu0 %v12845_v19  ;;  %9912 = vmatprep.subr.bf16.mxu1 %v12847_v30 }
0x13f0   :  { %9882 = vmatpush1.bf16.msra.mxu0 %v12849_v43  ;;  %9914 = vmatpush1.bf16.msra.mxu1 %v12852_v18 }
0x13f1   :  { %9884 = vmatprep.subr.bf16.mxu0 %v12857_v54  ;;  %9916 = vmatprep.subr.bf16.mxu1 %v12859_v14 }
0x13f4   :  { %9886 = vmatpush1.bf16.msra.mxu0 %v12861_v24  ;;  %9918 = vmatpush1.bf16.msra.mxu1 %v12864_v28 }
0x13f5   :  { %9888 = vmatprep.subr.bf16.mxu0 %v12868_v11  ;;  %9920 = vmatprep.subr.bf16.mxu1 %v12870_v23 }
0x13f8   :  { %9890 = vmatpush1.bf16.msra.mxu0 %v12873_v39  ;;  %9922 = vmatpush1.bf16.msra.mxu1 %v12877_v33 }
0x13f9   :  { %9892 = vmatprep.subr.bf16.mxu0 %v12879_v8  ;;  %9924 = vmatprep.subr.bf16.mxu1 %v12881_v29 }
0x13fc   :  { %9894 = vmatpush1.bf16.msra.mxu0 %v12884_v26  ;;  %9926 = vmatpush1.bf16.msra.mxu1 %v12888_v58 }
0x13fd   :  { %9896 = vmatprep.subr.bf16.mxu0 %v12890_v62  ;;  %9928 = vmatprep.subr.bf16.mxu1 %v12893_v3 }
0x1400   :  { %9898 = vmatpush1.bf16.msra.mxu0 %v12896_v40  ;;  %9930 = vmatpush1.bf16.msra.mxu1 %v12900_v53 }
0x1401   :  { %9900 = vmatprep.subr.bf16.mxu0 %v12905_v32  ;;  %9932 = vmatprep.subr.bf16.mxu1 %v12907_v25 }
0x1404   :  { %9902 = vmatpush1.bf16.msra.mxu0 %v12909_v2  ;;  %9934 = vmatpush1.bf16.msra.mxu1 %v12912_v7 }
0x1405   :  { %9936 = vmatprep.subr.bf16.mxu0 %v12821_v50  ;;  %9968 = vmatprep.subr.bf16.mxu1 %v12823_v16 }
0x14ba   :  { %v5093_v15 = vpop.f32.mrb[38].mxu0  ;;  %v5164_v17 = vpop.f32.mrb[38].mxu1 }
0x14bb   :  { %v10861_v60 = vadd.f32 %v5093_v15, %v12970_v12  ;;  %v5095_v21 = vpop.f32.mrb[39].mxu0  ;;  %v5166_v22 = vpop.f32.mrb[39].mxu1  ;;  %v10877_v1 = vadd.f32 %v5164_v17, %v12982_v57 }
0x14bc   :  { %v10862_v59 = vadd.f32 %v5095_v21, %v12973_v38  ;;  %v10878_v13 = vadd.f32 %v5166_v22, %v12978_v5 }
0x14bd   :  { %v8107_v35 = vmul.f32 -1.442695, %v10861_v60 }
0x14be   :  { %v8108_v61 = vmul.f32 -1.442695, %v10862_v59  ;;  %v8109_v31 = vmul.f32 -1.442695, %v10878_v13 }
0x14bf   :  { %11391 = vpow2.f32 %v8107_v35 }
0x14c0   :  { %11393 = vpow2.f32 %v8108_v61 }
0x14c1   :  { %11395 = vpow2.f32 %v8109_v31 }
0x14c2   :  { %11397 = vtanh.f32 %v10877_v1 }
0x14c9   :  { %v11392_v46 = vpop.eup %11391 }
0x14ca   :  { %v11394_v63 = vpop.eup %11393  ;;  %v5176_v4 = vadd.f32 1.0, %v11392_v46 }
0x14cb   :  { %v5182_v51 = vadd.f32 1.0, %v11394_v63  ;;  %v11396_v20 = vpop.eup %11395 }
0x14cc   :  { %11399 = vrcp.f32 %v5176_v4  ;;  %v11398_v15 = vpop.eup %11397  ;;  %v5189_v35 = vadd.f32 1.0, %v11396_v20 }
0x14cd   :  { %11401 = vrcp.f32 %v5182_v51 }
0x14ce   :  { %11403 = vrcp.f32 %v5189_v35 }
0x14d6   :  { %v11400_v21 = vpop.eup %11399 }
0x14d7   :  { %v11402_v60 = vpop.eup %11401  ;;  %v5193_v59 = vmul.f32 %v11400_v21, %v11398_v15 }
0x14d8   :  { %v5192_v61 = vmul.f32 %v11402_v60, %v13077_v9  ;;  %v11404_v17 = vpop.eup %11403 }
0x14da   :  { %v13123_v22 = vadd.f32 %v5193_v59, %v5192_v61 }
0x14dc   :  { %11405 = vtanh.f32 %v13123_v22 }
0x14e6   :  { %v11406_v13 = vpop.eup %11405 }
0x14e7   :  { %v13126_v31 = vmul.f32 %v11406_v13, %v11404_v17 }
0x14e9   :  { %5267 = vmatmul.mubr.f32.vlgmr.msra.gmra.mrb[40].mxu0 %v13126_v31  ;;  %5338 = vmatmul.mubr.f32.vlgmr.msra.gmra.mrb[40].mxu1 %v13126_v31 }
0x14ea   :  { %9938 = vmatpush1.bf16.msra.mxu0 %v12825_v56  ;;  %9970 = vmatpush1.bf16.msra.mxu1 %v12828_v37 }
0x14eb   :  { %9940 = vmatprep.subr.bf16.mxu0 %v12833_v44  ;;  %9972 = vmatprep.subr.bf16.mxu1 %v12835_v27 }
0x14ec   :  { %5441 = vmatprep.mubr.f32.mxu0 %v11678_v0  ;;  %5512 = vmatprep.mubr.f32.mxu1 %v11678_v0 }
0x14ee   :  { %9942 = vmatpush1.bf16.msra.mxu0 %v12837_v34  ;;  %9974 = vmatpush1.bf16.msra.mxu1 %v12840_v6 }
0x14ef   :  { %9944 = vmatprep.subr.bf16.mxu0 %v12845_v19  ;;  %9976 = vmatprep.subr.bf16.mxu1 %v12847_v30 }
0x14f2   :  { %9946 = vmatpush1.bf16.msra.mxu0 %v12849_v43  ;;  %9978 = vmatpush1.bf16.msra.mxu1 %v12852_v18 }
0x14f3   :  { %9948 = vmatprep.subr.bf16.mxu0 %v12857_v54  ;;  %9980 = vmatprep.subr.bf16.mxu1 %v12859_v14 }
0x14f6   :  { %9950 = vmatpush1.bf16.msra.mxu0 %v12861_v24  ;;  %9982 = vmatpush1.bf16.msra.mxu1 %v12864_v28 }
0x14f7   :  { %9952 = vmatprep.subr.bf16.mxu0 %v12868_v11  ;;  %9984 = vmatprep.subr.bf16.mxu1 %v12870_v23 }
0x14fa   :  { %9954 = vmatpush1.bf16.msra.mxu0 %v12873_v39  ;;  %9986 = vmatpush1.bf16.msra.mxu1 %v12877_v33 }
0x14fb   :  { %9956 = vmatprep.subr.bf16.mxu0 %v12879_v8  ;;  %9988 = vmatprep.subr.bf16.mxu1 %v12881_v29 }
0x14fe   :  { %9958 = vmatpush1.bf16.msra.mxu0 %v12884_v26  ;;  %9990 = vmatpush1.bf16.msra.mxu1 %v12888_v58 }
0x14ff   :  { %9960 = vmatprep.subr.bf16.mxu0 %v12890_v62  ;;  %9992 = vmatprep.subr.bf16.mxu1 %v12893_v3 }
0x1502   :  { %9962 = vmatpush1.bf16.msra.mxu0 %v12896_v40  ;;  %9994 = vmatpush1.bf16.msra.mxu1 %v12900_v53 }
0x1503   :  { %9964 = vmatprep.subr.bf16.mxu0 %v12905_v32  ;;  %9996 = vmatprep.subr.bf16.mxu1 %v12907_v25 }
0x1506   :  { %9966 = vmatpush1.bf16.msra.mxu0 %v12909_v2  ;;  %9998 = vmatpush1.bf16.msra.mxu1 %v12912_v7 }
0x1507   :  { %10000 = vmatprep.subr.bf16.mxu0 %v12821_v50  ;;  %10032 = vmatprep.subr.bf16.mxu1 %v12823_v16 }
0x15bc   :  { %v5268_v9 = vpop.f32.mrb[40].mxu0  ;;  %v5339_v1 = vpop.f32.mrb[40].mxu1 }
0x15bd   :  { %v10863_v46 = vadd.f32 %v5268_v9, %v12970_v12  ;;  %v5270_v63 = vpop.f32.mrb[41].mxu0  ;;  %v5341_v4 = vpop.f32.mrb[41].mxu1  ;;  %v10879_v59 = vadd.f32 %v5339_v1, %v12982_v57 }
0x15be   :  { %v10864_v51 = vadd.f32 %v5270_v63, %v12973_v38  ;;  %v10880_v21 = vadd.f32 %v5341_v4, %v12978_v5 }
0x15bf   :  { %v8110_v20 = vmul.f32 -1.442695, %v10863_v46 }
0x15c0   :  { %v8111_v15 = vmul.f32 -1.442695, %v10864_v51  ;;  %v8112_v60 = vmul.f32 -1.442695, %v10880_v21 }
0x15c1   :  { %11407 = vpow2.f32 %v8110_v20 }
0x15c2   :  { %11409 = vpow2.f32 %v8111_v15 }
0x15c3   :  { %11411 = vpow2.f32 %v8112_v60 }
0x15c4   :  { %11413 = vtanh.f32 %v10879_v59 }
0x15cb   :  { %v11408_v35 = vpop.eup %11407 }
0x15cc   :  { %v11410_v61 = vpop.eup %11409  ;;  %v5351_v17 = vadd.f32 1.0, %v11408_v35 }
0x15cd   :  { %v5357_v13 = vadd.f32 1.0, %v11410_v61  ;;  %v11412_v9 = vpop.eup %11411 }
0x15ce   :  { %11415 = vrcp.f32 %v5351_v17  ;;  %v11414_v42 = vpop.eup %11413  ;;  %v5364_v20 = vadd.f32 1.0, %v11412_v9 }
0x15cf   :  { %11417 = vrcp.f32 %v5357_v13 }
0x15d0   :  { %11419 = vrcp.f32 %v5364_v20 }
0x15d8   :  { %v11416_v63 = vpop.eup %11415 }
0x15d9   :  { %v11418_v46 = vpop.eup %11417  ;;  %v5368_v51 = vmul.f32 %v11416_v63, %v11414_v42 }
0x15da   :  { %v5367_v15 = vmul.f32 %v11418_v46, %v13123_v22  ;;  %v11420_v1 = vpop.eup %11419 }
0x15dc   :  { %v13169_v4 = vadd.f32 %v5368_v51, %v5367_v15 }
0x15de   :  { %11421 = vtanh.f32 %v13169_v4 }
0x15e8   :  { %v11422_v21 = vpop.eup %11421 }
0x15e9   :  { %v13172_v60 = vmul.f32 %v11422_v21, %v11420_v1 }
0x15eb   :  { %5442 = vmatmul.mubr.f32.vlgmr.msra.gmra.mrb[42].mxu0 %v13172_v60  ;;  %5513 = vmatmul.mubr.f32.vlgmr.msra.gmra.mrb[42].mxu1 %v13172_v60 }
0x15ec   :  { %10002 = vmatpush1.bf16.msra.mxu0 %v12825_v56  ;;  %10034 = vmatpush1.bf16.msra.mxu1 %v12828_v37 }
0x15ed   :  { %10004 = vmatprep.subr.bf16.mxu0 %v12833_v44  ;;  %10036 = vmatprep.subr.bf16.mxu1 %v12835_v27 }
0x15ee   :  { %5616 = vmatprep.mubr.f32.mxu0 %v11678_v0  ;;  %5687 = vmatprep.mubr.f32.mxu1 %v11678_v0 }
0x15f0   :  { %10006 = vmatpush1.bf16.msra.mxu0 %v12837_v34  ;;  %10038 = vmatpush1.bf16.msra.mxu1 %v12840_v6 }
0x15f1   :  { %10008 = vmatprep.subr.bf16.mxu0 %v12845_v19  ;;  %10040 = vmatprep.subr.bf16.mxu1 %v12847_v30 }
0x15f4   :  { %10010 = vmatpush1.bf16.msra.mxu0 %v12849_v43  ;;  %10042 = vmatpush1.bf16.msra.mxu1 %v12852_v18 }
0x15f5   :  { %10012 = vmatprep.subr.bf16.mxu0 %v12857_v54  ;;  %10044 = vmatprep.subr.bf16.mxu1 %v12859_v14 }
0x15f8   :  { %10014 = vmatpush1.bf16.msra.mxu0 %v12861_v24  ;;  %10046 = vmatpush1.bf16.msra.mxu1 %v12864_v28 }
0x15f9   :  { %10016 = vmatprep.subr.bf16.mxu0 %v12868_v11  ;;  %10048 = vmatprep.subr.bf16.mxu1 %v12870_v23 }
0x15fc   :  { %10018 = vmatpush1.bf16.msra.mxu0 %v12873_v39  ;;  %10050 = vmatpush1.bf16.msra.mxu1 %v12877_v33 }
0x15fd   :  { %10020 = vmatprep.subr.bf16.mxu0 %v12879_v8  ;;  %10052 = vmatprep.subr.bf16.mxu1 %v12881_v29 }
0x1600   :  { %10022 = vmatpush1.bf16.msra.mxu0 %v12884_v26  ;;  %10054 = vmatpush1.bf16.msra.mxu1 %v12888_v58 }
0x1601   :  { %10024 = vmatprep.subr.bf16.mxu0 %v12890_v62  ;;  %10056 = vmatprep.subr.bf16.mxu1 %v12893_v3 }
0x1604   :  { %10026 = vmatpush1.bf16.msra.mxu0 %v12896_v40  ;;  %10058 = vmatpush1.bf16.msra.mxu1 %v12900_v53 }
0x1605   :  { %10028 = vmatprep.subr.bf16.mxu0 %v12905_v32  ;;  %10060 = vmatprep.subr.bf16.mxu1 %v12907_v25 }
0x1608   :  { %10030 = vmatpush1.bf16.msra.mxu0 %v12909_v2  ;;  %10062 = vmatpush1.bf16.msra.mxu1 %v12912_v7 }
0x1609   :  { %10064 = vmatprep.subr.bf16.mxu0 %v12821_v50  ;;  %10096 = vmatprep.subr.bf16.mxu1 %v12823_v16 }
0x16be   :  { %v5443_v42 = vpop.f32.mrb[42].mxu0  ;;  %v5514_v22 = vpop.f32.mrb[42].mxu1 }
0x16bf   :  { %v10865_v59 = vadd.f32 %v5443_v42, %v12970_v12  ;;  %v5445_v35 = vpop.f32.mrb[43].mxu0  ;;  %v5516_v61 = vpop.f32.mrb[43].mxu1  ;;  %v10881_v51 = vadd.f32 %v5514_v22, %v12982_v57 }
0x16c0   :  { %v10866_v17 = vadd.f32 %v5445_v35, %v12973_v38  ;;  %v10882_v63 = vadd.f32 %v5516_v61, %v12978_v5 }
0x16c1   :  { %v8113_v13 = vmul.f32 -1.442695, %v10865_v59 }
0x16c2   :  { %v8114_v9 = vmul.f32 -1.442695, %v10866_v17  ;;  %v8115_v46 = vmul.f32 -1.442695, %v10882_v63 }
0x16c3   :  { %11423 = vpow2.f32 %v8113_v13 }
0x16c4   :  { %11425 = vpow2.f32 %v8114_v9 }
0x16c5   :  { %11427 = vpow2.f32 %v8115_v46  ;;  %v5910_v46 = vld [vmem:[#allocation7 + $0x410] sm:$0xff] }
0x16c6   :  { %11429 = vtanh.f32 %v10881_v51  ;;  %v5914_v51 = vld [vmem:[#allocation7 + $0x430] sm:$0xff] }
0x16cd   :  { %v11424_v50 = vpop.eup %11423 }
0x16ce   :  { %v11426_v20 = vpop.eup %11425  ;;  %v5526_v16 = vadd.f32 1.0, %v11424_v50  ;;  %v5917_v50 = vld [vmem:[#allocation7 + $0x448] sm:$0xff] }
0x16cf   :  { %v5532_v15 = vadd.f32 1.0, %v11426_v20  ;;  %v11428_v1 = vpop.eup %11427  ;;  %v5921_v20 = vld [vmem:[#allocation7 + $0x468] sm:$0xff] }
0x16d0   :  { %11431 = vrcp.f32 %v5526_v16  ;;  %v11430_v21 = vpop.eup %11429  ;;  %v5539_v17 = vadd.f32 1.0, %v11428_v1  ;;  %v5919_v16 = vld [vmem:[#allocation7 + $0x458] sm:$0xff] }
0x16d1   :  { %11433 = vrcp.f32 %v5532_v15  ;;  %v5923_v15 = vld [vmem:[#allocation7 + $0x478] sm:$0xff] }
0x16d2   :  { %11435 = vrcp.f32 %v5539_v17  ;;  %v5920_v17 = vld [vmem:[#allocation7 + $0x460] sm:$0xff] }
0x16da   :  { %v11432_v42 = vpop.eup %11431 }
0x16db   :  { %v11434_v59 = vpop.eup %11433  ;;  %v5543_v35 = vmul.f32 %v11432_v42, %v11430_v21 }
0x16dc   :  { %v5542_v13 = vmul.f32 %v11434_v59, %v13169_v4  ;;  %v11436_v22 = vpop.eup %11435  ;;  %v5912_v4 = vld [vmem:[#allocation7 + $0x420] sm:$0xff]  ;;  %v10161_v59 = vpack.c.bf16 %v5914_v51, %v5910_v46 }
0x16dd   :  { %v5940_v51 = vld [vmem:[#allocation7 + $0x500] sm:$0xff] }
0x16de   :  { %v13215_v61 = vadd.f32 %v5543_v35, %v5542_v13  ;;  %v5916_v35 = vld [vmem:[#allocation7 + $0x440] sm:$0xff] }
0x16e0   :  { %11437 = vtanh.f32 %v13215_v61 }
0x16ea   :  { %v11438_v9 = vpop.eup %11437 }
0x16eb   :  { %v13218_v63 = vmul.f32 %v11438_v9, %v11436_v22  ;;  %v10163_v22 = vpack.c.bf16 %v5923_v15, %v5919_v16  ;;  %v5918_v9 = vld [vmem:[#allocation7 + $0x450] sm:$0xff] }
0x16ec   :  { %v5942_v15 = vld [vmem:[#allocation7 + $0x510] sm:$0xff] }
0x16ed   :  { %5617 = vmatmul.mubr.f32.vlgmr.msra.gmra.mrb[44].mxu0 %v13218_v63  ;;  %5688 = vmatmul.mubr.f32.vlgmr.msra.gmra.mrb[44].mxu1 %v13218_v63 }
0x16ee   :  { %10066 = vmatpush1.bf16.msra.mxu0 %v12825_v56  ;;  %10098 = vmatpush1.bf16.msra.mxu1 %v12828_v37  ;;  %v5909_v56 = vld [vmem:[#allocation7 + $0x408] sm:$0xff] }
0x16ef   :  { %10068 = vmatprep.subr.bf16.mxu0 %v12833_v44  ;;  %10100 = vmatprep.subr.bf16.mxu1 %v12835_v27  ;;  %v5913_v37 = vld [vmem:[#allocation7 + $0x428] sm:$0xff]  ;;  %v5911_v44 = vld [vmem:[#allocation7 + $0x418] sm:$0xff] }
0x16f0   :  { %5791 = vmatprep.mubr.f32.mxu0 %v11678_v0  ;;  %5862 = vmatprep.mubr.f32.mxu1 %v11678_v0  ;;  %v10127_v27 = vpack.c.bf16 %v5913_v37, %v5909_v56  ;;  %v5922_v56 = vld [vmem:[#allocation7 + $0x470] sm:$0xff]  ;;  %v5925_v37 = vld [vmem:[#allocation7 + $0x488] sm:$0xff] }
0x16f2   :  { %10070 = vmatpush1.bf16.msra.mxu0 %v12837_v34  ;;  %10102 = vmatpush1.bf16.msra.mxu1 %v12840_v6  ;;  %v5915_v34 = vld [vmem:[#allocation7 + $0x438] sm:$0xff] }
0x16f3   :  { %10072 = vmatprep.subr.bf16.mxu0 %v12845_v19  ;;  %10104 = vmatprep.subr.bf16.mxu1 %v12847_v30  ;;  %v10159_v6 = vpack.c.bf16 %v5915_v34, %v5911_v44  ;;  %v5929_v44 = vld [vmem:[#allocation7 + $0x4a8] sm:$0xff]  ;;  %v5931_v34 = vld [vmem:[#allocation7 + $0x4b8] sm:$0xff] }
0x16f6   :  { %10074 = vmatpush1.bf16.msra.mxu0 %v12849_v43  ;;  %10106 = vmatpush1.bf16.msra.mxu1 %v12852_v18 }
0x16f7   :  { %10076 = vmatprep.subr.bf16.mxu0 %v12857_v54  ;;  %10108 = vmatprep.subr.bf16.mxu1 %v12859_v14 }
0x16fa   :  { %10078 = vmatpush1.bf16.msra.mxu0 %v12861_v24  ;;  %10110 = vmatpush1.bf16.msra.mxu1 %v12864_v28 }
0x16fb   :  { %10080 = vmatprep.subr.bf16.mxu0 %v12868_v11  ;;  %10112 = vmatprep.subr.bf16.mxu1 %v12870_v23 }
0x16fe   :  { %10082 = vmatpush1.bf16.msra.mxu0 %v12873_v39  ;;  %10114 = vmatpush1.bf16.msra.mxu1 %v12877_v33 }
0x16ff   :  { %10084 = vmatprep.subr.bf16.mxu0 %v12879_v8  ;;  %10116 = vmatprep.subr.bf16.mxu1 %v12881_v29 }
0x1702   :  { %10086 = vmatpush1.bf16.msra.mxu0 %v12884_v26  ;;  %10118 = vmatpush1.bf16.msra.mxu1 %v12888_v58 }
0x1703   :  { %10088 = vmatprep.subr.bf16.mxu0 %v12890_v62  ;;  %10120 = vmatprep.subr.bf16.mxu1 %v12893_v3 }
0x1706   :  { %10090 = vmatpush1.bf16.msra.mxu0 %v12896_v40  ;;  %10122 = vmatpush1.bf16.msra.mxu1 %v12900_v53 }
0x1707   :  { %10092 = vmatprep.subr.bf16.mxu0 %v12905_v32  ;;  %10124 = vmatprep.subr.bf16.mxu1 %v12907_v25 }
0x170a   :  { %10094 = vmatpush1.bf16.msra.mxu0 %v12909_v2  ;;  %10126 = vmatpush1.bf16.msra.mxu1 %v12912_v7  ;;  %v5908_v7 = vld [vmem:[#allocation7 + $0x400] sm:$0xff] }
0x170b   :  { %10128 = vmatprep.subr.bf16.mxu0 %v10127_v27  ;;  %10160 = vmatprep.subr.bf16.mxu1 %v10159_v6  ;;  %v10129_v42 = vpack.c.bf16 %v5912_v4, %v5908_v7  ;;  %v5927_v27 = vld [vmem:[#allocation7 + $0x498] sm:$0xff]  ;;  %v10133_v6 = vpack.c.bf16 %v5920_v17, %v5916_v35 }
0x170c   :  { %v5947_v7 = vld [vmem:[#allocation7 + $0x538] sm:$0xff] }
0x170d   :  { %v5955_v35 = vld [vmem:[#allocation7 + $0x578] sm:$0xff] }
0x17c0   :  { %v5618_v19 = vpop.f32.mrb[44].mxu0  ;;  %v5689_v30 = vpop.f32.mrb[44].mxu1 }
0x17c1   :  { %v10867_v43 = vadd.f32 %v5618_v19, %v12970_v12  ;;  %v5620_v18 = vpop.f32.mrb[45].mxu0  ;;  %v5691_v54 = vpop.f32.mrb[45].mxu1  ;;  %v10883_v39 = vadd.f32 %v5689_v30, %v12982_v57  ;;  %v10165_v19 = vpack.c.bf16 %v5922_v56, %v5918_v9  ;;  %v5924_v30 = vld [vmem:[#allocation7 + $0x480] sm:$0xff] }
0x17c2   :  { %v10868_v14 = vadd.f32 %v5620_v18, %v12973_v38  ;;  %v10884_v11 = vadd.f32 %v5691_v54, %v12978_v5  ;;  %v10135_v18 = vpack.c.bf16 %v5929_v44, %v5925_v37  ;;  %v10167_v54 = vpack.c.bf16 %v5931_v34, %v5927_v27  ;;  %v5952_v9 = vld [vmem:[#allocation7 + $0x560] sm:$0xff]  ;;  %v5950_v44 = vld [vmem:[#allocation7 + $0x550] sm:$0xff]  ;;  %v5957_v34 = vld [vmem:[#allocation7 + $0x588] sm:$0xff] }
0x17c3   :  { %v8116_v24 = vmul.f32 -1.442695, %v10867_v43  ;;  %v5928_v43 = vld [vmem:[#allocation7 + $0x4a0] sm:$0xff]  ;;  %v5954_v27 = vld [vmem:[#allocation7 + $0x570] sm:$0xff] }
0x17c4   :  { %v8117_v28 = vmul.f32 -1.442695, %v10868_v14  ;;  %v8118_v23 = vmul.f32 -1.442695, %v10884_v11  ;;  %v5926_v14 = vld [vmem:[#allocation7 + $0x490] sm:$0xff]  ;;  %v5937_v11 = vld [vmem:[#allocation7 + $0x4e8] sm:$0xff] }
0x17c5   :  { %11439 = vpow2.f32 %v8116_v24  ;;  %v5930_v24 = vld [vmem:[#allocation7 + $0x4b0] sm:$0xff] }
0x17c6   :  { %11441 = vpow2.f32 %v8117_v28  ;;  %v5933_v28 = vld [vmem:[#allocation7 + $0x4c8] sm:$0xff] }
0x17c7   :  { %11443 = vpow2.f32 %v8118_v23  ;;  %v5935_v23 = vld [vmem:[#allocation7 + $0x4d8] sm:$0xff] }
0x17c8   :  { %11445 = vtanh.f32 %v10883_v39  ;;  %v5939_v39 = vld [vmem:[#allocation7 + $0x4f8] sm:$0xff] }
0x17cf   :  { %v11440_v33 = vpop.eup %11439 }
0x17d0   :  { %v11442_v8 = vpop.eup %11441  ;;  %v5701_v29 = vadd.f32 1.0, %v11440_v33  ;;  %v10137_v33 = vpack.c.bf16 %v5928_v43, %v5924_v30  ;;  %v5963_v30 = vld [vmem:[#allocation7 + $0x5b8] sm:$0xff] }
0x17d1   :  { %v5707_v26 = vadd.f32 1.0, %v11442_v8  ;;  %v11444_v58 = vpop.eup %11443  ;;  %v10169_v8 = vpack.c.bf16 %v5930_v24, %v5926_v14  ;;  %v5960_v14 = vld [vmem:[#allocation7 + $0x5a0] sm:$0xff] }
0x17d2   :  { %11447 = vrcp.f32 %v5701_v29  ;;  %v11446_v62 = vpop.eup %11445  ;;  %v5714_v32 = vadd.f32 1.0, %v11444_v58  ;;  %v5932_v29 = vld [vmem:[#allocation7 + $0x4c0] sm:$0xff]  ;;  %v10139_v58 = vpack.c.bf16 %v5937_v11, %v5933_v28  ;;  %v5958_v11 = vld [vmem:[#allocation7 + $0x590] sm:$0xff] }
0x17d3   :  { %11449 = vrcp.f32 %v5707_v26  ;;  %v5936_v26 = vld [vmem:[#allocation7 + $0x4e0] sm:$0xff] }
0x17d4   :  { %11451 = vrcp.f32 %v5714_v32  ;;  %v5945_v32 = vld [vmem:[#allocation7 + $0x528] sm:$0xff]  ;;  %v10141_v4 = vpack.c.bf16 %v5936_v26, %v5932_v29  ;;  %v5971_v29 = vld [vmem:[#allocation7 + $0x5f8] sm:$0xff] }
0x17dc   :  { %v11448_v3 = vpop.eup %11447 }
0x17dd   :  { %v11450_v40 = vpop.eup %11449  ;;  %v5718_v53 = vmul.f32 %v11448_v3, %v11446_v62  ;;  %v10171_v62 = vpack.c.bf16 %v5939_v39, %v5935_v23  ;;  %v5934_v3 = vld [vmem:[#allocation7 + $0x4d0] sm:$0xff]  ;;  %v5965_v39 = vld [vmem:[#allocation7 + $0x5c8] sm:$0xff] }
0x17de   :  { %v5717_v25 = vmul.f32 %v11450_v40, %v13215_v61  ;;  %v11452_v1 = vpop.eup %11451  ;;  %v10131_v61 = vpack.c.bf16 %v5921_v20, %v5917_v50  ;;  %v5938_v40 = vld [vmem:[#allocation7 + $0x4f0] sm:$0xff]  ;;  %v5944_v50 = vld [vmem:[#allocation7 + $0x520] sm:$0xff] }
0x17df   :  { %v10173_v46 = vpack.c.bf16 %v5938_v40, %v5934_v3  ;;  %v10145_v17 = vpack.c.bf16 %v5944_v50, %v5940_v51  ;;  %v5962_v23 = vld [vmem:[#allocation7 + $0x5b0] sm:$0xff] }
0x17e0   :  { %v13259_v2 = vadd.f32 %v5718_v53, %v5717_v25  ;;  %v5941_v53 = vld [vmem:[#allocation7 + $0x508] sm:$0xff]  ;;  %v5943_v25 = vld [vmem:[#allocation7 + $0x518] sm:$0xff] }
0x17e1   :  { %v10143_v20 = vpack.c.bf16 %v5945_v32, %v5941_v53  ;;  %v10175_v16 = vpack.c.bf16 %v5947_v7, %v5943_v25  ;;  %v5968_v53 = vld [vmem:[#allocation7 + $0x5e0] sm:$0xff]  ;;  %v5966_v32 = vld [vmem:[#allocation7 + $0x5d0] sm:$0xff] }
0x17e2   :  { %11453 = vtanh.f32 %v13259_v2  ;;  %v5970_v25 = vld [vmem:[#allocation7 + $0x5f0] sm:$0xff] }
0x17ec   :  { %v11454_v21 = vpop.eup %11453 }
0x17ed   :  { %v13262_v13 = vmul.f32 %v11454_v21, %v11452_v1  ;;  %v5946_v1 = vld [vmem:[#allocation7 + $0x530] sm:$0xff]  ;;  %v5949_v21 = vld [vmem:[#allocation7 + $0x548] sm:$0xff] }
0x17ef   :  { %5792 = vmatmul.mubr.f32.vlgmr.msra.gmra.mrb[46].mxu0 %v13262_v13  ;;  %5863 = vmatmul.mubr.f32.vlgmr.msra.gmra.mrb[46].mxu1 %v13262_v13 }
0x17f0   :  { %10130 = vmatpush1.bf16.msra.mxu0 %v10129_v42  ;;  %10162 = vmatpush1.bf16.msra.mxu1 %v10161_v59  ;;  %v5953_v42 = vld [vmem:[#allocation7 + $0x568] sm:$0xff]  ;;  %v5951_v59 = vld [vmem:[#allocation7 + $0x558] sm:$0xff] }
0x17f1   :  { %10132 = vmatprep.subr.bf16.mxu0 %v10131_v61  ;;  %10164 = vmatprep.subr.bf16.mxu1 %v10163_v22  ;;  %v10177_v61 = vpack.c.bf16 %v5946_v1, %v5942_v15  ;;  %v5948_v22 = vld [vmem:[#allocation7 + $0x540] sm:$0xff]  ;;  %v10147_v56 = vpack.c.bf16 %v5953_v42, %v5949_v21  ;;  %v10179_v37 = vpack.c.bf16 %v5955_v35, %v5951_v59  ;;  %v6263_v15 = vld [vmem:[#allocation9 + $0x648] sm:$0xff]  ;;  %v6265_v21 = vld [vmem:[#allocation9 + $0x658] sm:$0xff] }
0x17f2   :  { %6059 = vmatprep.mubr.f32.mxu0 %v11678_v0  ;;  %6172 = vmatprep.mubr.f32.mxu1 %v11678_v0  ;;  %v10149_v43 = vpack.c.bf16 %v5952_v9, %v5948_v22  ;;  %v6267_v1 = vld [vmem:[#allocation9 + $0x668] sm:$0xff]  ;;  %v6269_v59 = vld [vmem:[#allocation9 + $0x678] sm:$0xff]  ;;  %v6262_v35 = vld [vmem:[#allocation9 + $0x640] sm:$0xff] }
0x17f3   :  { %v13308_v42 = vpack.c.bf16 %v6267_v1, %v6263_v15  ;;  %v6264_v9 = vld [vmem:[#allocation9 + $0x650] sm:$0xff]  ;;  %v6299_v15 = vld [vmem:[#allocation9 + $0x768] sm:$0xff] }
0x17f4   :  { %10134 = vmatpush1.bf16.msra.mxu0 %v10133_v6  ;;  %10166 = vmatpush1.bf16.msra.mxu1 %v10165_v19  ;;  %v5961_v6 = vld [vmem:[#allocation7 + $0x5a8] sm:$0xff]  ;;  %v5959_v19 = vld [vmem:[#allocation7 + $0x598] sm:$0xff] }
0x17f5   :  { %10136 = vmatprep.subr.bf16.mxu0 %v10135_v18  ;;  %10168 = vmatprep.subr.bf16.mxu1 %v10167_v54  ;;  %v10181_v18 = vpack.c.bf16 %v5954_v27, %v5950_v44  ;;  %v5956_v54 = vld [vmem:[#allocation7 + $0x580] sm:$0xff]  ;;  %v10151_v24 = vpack.c.bf16 %v5961_v6, %v5957_v34  ;;  %v10183_v28 = vpack.c.bf16 %v5963_v30, %v5959_v19  ;;  %v6271_v44 = vld [vmem:[#allocation9 + $0x688] sm:$0xff]  ;;  %v6273_v34 = vld [vmem:[#allocation9 + $0x698] sm:$0xff] }
0x17f6   :  { %v10153_v26 = vpack.c.bf16 %v5960_v14, %v5956_v54  ;;  %v6275_v27 = vld [vmem:[#allocation9 + $0x6a8] sm:$0xff]  ;;  %v6277_v19 = vld [vmem:[#allocation9 + $0x6b8] sm:$0xff]  ;;  %v6270_v30 = vld [vmem:[#allocation9 + $0x680] sm:$0xff] }
0x17f7   :  { %v13320_v6 = vpack.c.bf16 %v6275_v27, %v6271_v44  ;;  %v6272_v14 = vld [vmem:[#allocation9 + $0x690] sm:$0xff] }
0x17f8   :  { %10138 = vmatpush1.bf16.msra.mxu0 %v10137_v33  ;;  %10170 = vmatpush1.bf16.msra.mxu1 %v10169_v8  ;;  %v5969_v33 = vld [vmem:[#allocation7 + $0x5e8] sm:$0xff]  ;;  %v5967_v8 = vld [vmem:[#allocation7 + $0x5d8] sm:$0xff]  ;;  %v6296_v44 = vld [vmem:[#allocation9 + $0x750] sm:$0xff] }
0x17f9   :  { %10140 = vmatprep.subr.bf16.mxu0 %v10139_v58  ;;  %10172 = vmatprep.subr.bf16.mxu1 %v10171_v62  ;;  %v10185_v58 = vpack.c.bf16 %v5962_v23, %v5958_v11  ;;  %v5964_v62 = vld [vmem:[#allocation7 + $0x5c0] sm:$0xff]  ;;  %v10155_v3 = vpack.c.bf16 %v5969_v33, %v5965_v39  ;;  %v10187_v40 = vpack.c.bf16 %v5971_v29, %v5967_v8  ;;  %v6279_v11 = vld [vmem:[#allocation9 + $0x6c8] sm:$0xff]  ;;  %v6281_v39 = vld [vmem:[#allocation9 + $0x6d8] sm:$0xff] }
0x17fa   :  { %v10157_v7 = vpack.c.bf16 %v5968_v53, %v5964_v62  ;;  %v6283_v23 = vld [vmem:[#allocation9 + $0x6e8] sm:$0xff]  ;;  %v6285_v8 = vld [vmem:[#allocation9 + $0x6f8] sm:$0xff]  ;;  %v6278_v29 = vld [vmem:[#allocation9 + $0x6c0] sm:$0xff] }
0x17fb   :  { %v13332_v33 = vpack.c.bf16 %v6283_v23, %v6279_v11  ;;  %v6287_v53 = vld [vmem:[#allocation9 + $0x708] sm:$0xff]  ;;  %v6300_v27 = vld [vmem:[#allocation9 + $0x770] sm:$0xff]  ;;  %v6309_v11 = vld [vmem:[#allocation9 + $0x7b8] sm:$0xff] }
0x17fc   :  { %10142 = vmatpush1.bf16.msra.mxu0 %v10141_v4  ;;  %10174 = vmatpush1.bf16.msra.mxu1 %v10173_v46  ;;  %v10189_v4 = vpack.c.bf16 %v5970_v25, %v5966_v32  ;;  %v6254_v46 = vld [vmem:[#allocation9 + $0x600] sm:$0xff]  ;;  %v6291_v25 = vld [vmem:[#allocation9 + $0x728] sm:$0xff] }
0x17fd   :  { %10144 = vmatprep.subr.bf16.mxu0 %v10143_v20  ;;  %10176 = vmatprep.subr.bf16.mxu1 %v10175_v16  ;;  %v6256_v20 = vld [vmem:[#allocation9 + $0x610] sm:$0xff]  ;;  %v6302_v23 = vld [vmem:[#allocation9 + $0x780] sm:$0xff] }
0x17fe   :  { %v6260_v16 = vld [vmem:[#allocation9 + $0x630] sm:$0xff] }
0x1800   :  { %10146 = vmatpush1.bf16.msra.mxu0 %v10145_v17  ;;  %10178 = vmatpush1.bf16.msra.mxu1 %v10177_v61  ;;  %v6266_v17 = vld [vmem:[#allocation9 + $0x660] sm:$0xff]  ;;  %v13310_v61 = vpack.c.bf16 %v6269_v59, %v6265_v21  ;;  %v6297_v59 = vld [vmem:[#allocation9 + $0x758] sm:$0xff] }
0x1801   :  { %10148 = vmatprep.subr.bf16.mxu0 %v10147_v56  ;;  %10180 = vmatprep.subr.bf16.mxu1 %v10179_v37  ;;  %v13312_v22 = vpack.c.bf16 %v6266_v17, %v6262_v35  ;;  %v6268_v56 = vld [vmem:[#allocation9 + $0x670] sm:$0xff]  ;;  %v6301_v35 = vld [vmem:[#allocation9 + $0x778] sm:$0xff]  ;;  %v6294_v17 = vld [vmem:[#allocation9 + $0x740] sm:$0xff] }
0x1802   :  { %v13315_v37 = vpack.c.bf16 %v6268_v56, %v6264_v9  ;;  %v13356_v9 = vpack.c.bf16 %v6301_v35, %v6297_v59  ;;  %v6298_v56 = vld [vmem:[#allocation9 + $0x760] sm:$0xff]  ;;  %v6316_v59 = vld [vmem:[#allocation9 + $0x7f0] sm:$0xff] }
0x1804   :  { %10150 = vmatpush1.bf16.msra.mxu0 %v10149_v43  ;;  %10182 = vmatpush1.bf16.msra.mxu1 %v10181_v18  ;;  %v6274_v43 = vld [vmem:[#allocation9 + $0x6a0] sm:$0xff]  ;;  %v13322_v18 = vpack.c.bf16 %v6277_v19, %v6273_v34  ;;  %v13359_v34 = vpack.c.bf16 %v6298_v56, %v6294_v17  ;;  %v6303_v19 = vld [vmem:[#allocation9 + $0x788] sm:$0xff] }
0x1805   :  { %10152 = vmatprep.subr.bf16.mxu0 %v10151_v24  ;;  %10184 = vmatprep.subr.bf16.mxu1 %v10183_v28  ;;  %v13324_v54 = vpack.c.bf16 %v6274_v43, %v6270_v30  ;;  %v6276_v24 = vld [vmem:[#allocation9 + $0x6b0] sm:$0xff]  ;;  %v6307_v30 = vld [vmem:[#allocation9 + $0x7a8] sm:$0xff]  ;;  %v6305_v43 = vld [vmem:[#allocation9 + $0x798] sm:$0xff] }
0x1806   :  { %v13327_v28 = vpack.c.bf16 %v6276_v24, %v6272_v14  ;;  %v13363_v14 = vpack.c.bf16 %v6300_v27, %v6296_v44  ;;  %v13365_v24 = vpack.c.bf16 %v6307_v30, %v6303_v19 }
0x1808   :  { %10154 = vmatpush1.bf16.msra.mxu0 %v10153_v26  ;;  %10186 = vmatpush1.bf16.msra.mxu1 %v10185_v58  ;;  %v6282_v26 = vld [vmem:[#allocation9 + $0x6e0] sm:$0xff]  ;;  %v13334_v58 = vpack.c.bf16 %v6285_v8, %v6281_v39  ;;  %v13368_v8 = vpack.c.bf16 %v6309_v11, %v6305_v43 }
0x1809   :  { %10156 = vmatprep.subr.bf16.mxu0 %v10155_v3  ;;  %10188 = vmatprep.subr.bf16.mxu1 %v10187_v40  ;;  %v13336_v62 = vpack.c.bf16 %v6282_v26, %v6278_v29  ;;  %v6280_v3 = vld [vmem:[#allocation9 + $0x6d0] sm:$0xff]  ;;  %v6306_v39 = vld [vmem:[#allocation9 + $0x7a0] sm:$0xff] }
0x180a   :  { %v6284_v40 = vld [vmem:[#allocation9 + $0x6f0] sm:$0xff] }
0x180b   :  { %v13339_v32 = vpack.c.bf16 %v6284_v40, %v6280_v3  ;;  %v6304_v29 = vld [vmem:[#allocation9 + $0x790] sm:$0xff]  ;;  %v13371_v3 = vpack.c.bf16 %v6306_v39, %v6302_v23 }
0x180c   :  { %10158 = vmatpush1.bf16.msra.mxu0 %v10157_v7  ;;  %10190 = vmatpush1.bf16.msra.mxu1 %v10189_v4  ;;  %v6289_v7 = vld [vmem:[#allocation9 + $0x718] sm:$0xff]  ;;  %v6308_v26 = vld [vmem:[#allocation9 + $0x7b0] sm:$0xff] }
0x180d   :  { %v6293_v4 = vld [vmem:[#allocation9 + $0x738] sm:$0xff]  ;;  %v13375_v40 = vpack.c.bf16 %v6308_v26, %v6304_v29 }
0x180f   :  { %6060 = vmatmul.mubr.f32.vlgmr.msra.gmra.mrb[48].mxu0 %v12988_v41  ;;  %6173 = vmatmul.mubr.f32.vlgmr.msra.gmra.mrb[48].mxu1 %v12988_v41  ;;  %v6255_v41 = vld [vmem:[#allocation9 + $0x608] sm:$0xff] }
0x1810   :  { %6065 = vmatprep.mubr.f32.mxu0 %v11678_v0  ;;  %6178 = vmatprep.mubr.f32.mxu1 %v11678_v0 }
0x1813   :  { %6066 = vmatmul.mubr.f32.gmra.mrb[50].mxu0 %v13034_v49  ;;  %6179 = vmatmul.mubr.f32.gmra.mrb[50].mxu1 %v13034_v49  ;;  %v6259_v49 = vld [vmem:[#allocation9 + $0x628] sm:$0xff] }
0x1814   :  { %6071 = vmatprep.mubr.f32.mxu0 %v11678_v0  ;;  %6184 = vmatprep.mubr.f32.mxu1 %v11678_v0 }
0x1817   :  { %6072 = vmatmul.mubr.f32.gmra.mrb[52].mxu0 %v13080_v36  ;;  %6185 = vmatmul.mubr.f32.gmra.mrb[52].mxu1 %v13080_v36  ;;  %v6257_v36 = vld [vmem:[#allocation9 + $0x618] sm:$0xff] }
0x1818   :  { %6077 = vmatprep.mubr.f32.mxu0 %v11678_v0  ;;  %6190 = vmatprep.mubr.f32.mxu1 %v11678_v0 }
0x181b   :  { %6078 = vmatmul.mubr.f32.gmra.mrb[54].mxu0 %v13126_v31  ;;  %6191 = vmatmul.mubr.f32.gmra.mrb[54].mxu1 %v13126_v31  ;;  %v13296_v31 = vpack.c.bf16 %v6259_v49, %v6255_v41  ;;  %v13343_v41 = vpack.c.bf16 %v6291_v25, %v6287_v53  ;;  %v13345_v49 = vpack.c.bf16 %v6293_v4, %v6289_v7  ;;  %v6311_v53 = vld [vmem:[#allocation9 + $0x7c8] sm:$0xff]  ;;  %v6313_v7 = vld [vmem:[#allocation9 + $0x7d8] sm:$0xff] }
0x181c   :  { %6083 = vmatprep.mubr.f32.mxu0 %v11678_v0  ;;  %6196 = vmatprep.mubr.f32.mxu1 %v11678_v0  ;;  %v6315_v25 = vld [vmem:[#allocation9 + $0x7e8] sm:$0xff] }
0x181d   :  { %10192 = vmatprep.subr.bf16.mxu0 %v13296_v31  ;;  %v13380_v4 = vpack.c.bf16 %v6315_v25, %v6311_v53 }
0x181f   :  { %6084 = vmatmul.mubr.f32.gmra.mrb[56].mxu0 %v13172_v60  ;;  %6197 = vmatmul.mubr.f32.gmra.mrb[56].mxu1 %v13172_v60  ;;  %v6261_v60 = vld [vmem:[#allocation9 + $0x638] sm:$0xff] }
0x1820   :  { %6089 = vmatprep.mubr.f32.mxu0 %v11678_v0  ;;  %6202 = vmatprep.mubr.f32.mxu1 %v11678_v0  ;;  %v13298_v51 = vpack.c.bf16 %v6261_v60, %v6257_v36  ;;  %v6286_v36 = vld [vmem:[#allocation9 + $0x700] sm:$0xff] }
0x1821   :  { %v6290_v60 = vld [vmem:[#allocation9 + $0x720] sm:$0xff] }
0x1822   :  { %10224 = vmatprep.subr.bf16.mxu1 %v13298_v51 }
0x1823   :  { %6090 = vmatmul.mubr.f32.gmra.mrb[58].mxu0 %v13218_v63  ;;  %6203 = vmatmul.mubr.f32.gmra.mrb[58].mxu1 %v13218_v63  ;;  %v6258_v63 = vld [vmem:[#allocation9 + $0x620] sm:$0xff] }
0x1824   :  { %6095 = vmatprep.mubr.f32.mxu0 %v11678_v0  ;;  %6208 = vmatprep.mubr.f32.mxu1 %v11678_v0  ;;  %v13300_v50 = vpack.c.bf16 %v6258_v63, %v6254_v46  ;;  %v6288_v46 = vld [vmem:[#allocation9 + $0x710] sm:$0xff]  ;;  %v13348_v63 = vpack.c.bf16 %v6290_v60, %v6286_v36  ;;  %v6317_v36 = vld [vmem:[#allocation9 + $0x7f8] sm:$0xff]  ;;  %v6310_v60 = vld [vmem:[#allocation9 + $0x7c0] sm:$0xff] }
0x1826   :  { %10194 = vmatpush1.bf16.msra.mxu0 %v13300_v50 }
0x1827   :  { %6096 = vmatmul.mubr.f32.gmra.mrb[60].mxu0 %v13262_v13  ;;  %6209 = vmatmul.mubr.f32.gmra.mrb[60].mxu1 %v13262_v13  ;;  %v13303_v13 = vpack.c.bf16 %v6260_v16, %v6256_v20  ;;  %v6292_v20 = vld [vmem:[#allocation9 + $0x730] sm:$0xff]  ;;  %v6295_v16 = vld [vmem:[#allocation9 + $0x748] sm:$0xff] }
0x1828   :  { %6101 = vmatprep.mubr.f32.mxu0 %v11678_v0  ;;  %6214 = vmatprep.mubr.f32.mxu1 %v11678_v0  ;;  %v13352_v1 = vpack.c.bf16 %v6292_v20, %v6288_v46  ;;  %v13354_v21 = vpack.c.bf16 %v6299_v15, %v6295_v16  ;;  %v6314_v46 = vld [vmem:[#allocation9 + $0x7e0] sm:$0xff]  ;;  %v13382_v20 = vpack.c.bf16 %v6317_v36, %v6313_v7  ;;  %v6312_v15 = vld [vmem:[#allocation9 + $0x7d0] sm:$0xff] }
0x1829   :  { %10226 = vmatpush1.bf16.msra.mxu1 %v13303_v13  ;;  %10196 = vmatprep.subr.bf16.mxu0 %v13308_v42  ;;  %v13384_v16 = vpack.c.bf16 %v6314_v46, %v6310_v60  ;;  %v13387_v35 = vpack.c.bf16 %v6316_v59, %v6312_v15 }
0x182a   :  { %10228 = vmatprep.subr.bf16.mxu1 %v13310_v61  ;;  %10198 = vmatpush1.bf16.msra.mxu0 %v13312_v22 }
0x182b   :  { %10200 = vmatprep.subr.bf16.mxu0 %v13320_v6 }
0x182d   :  { %10230 = vmatpush1.bf16.msra.mxu1 %v13315_v37 }
0x182e   :  { %10232 = vmatprep.subr.bf16.mxu1 %v13322_v18  ;;  %10202 = vmatpush1.bf16.msra.mxu0 %v13324_v54 }
0x182f   :  { %10204 = vmatprep.subr.bf16.mxu0 %v13332_v33 }
0x1831   :  { %10234 = vmatpush1.bf16.msra.mxu1 %v13327_v28 }
0x1832   :  { %10236 = vmatprep.subr.bf16.mxu1 %v13334_v58  ;;  %10206 = vmatpush1.bf16.msra.mxu0 %v13336_v62 }
0x1833   :  { %10208 = vmatprep.subr.bf16.mxu0 %v13343_v41 }
0x1835   :  { %10238 = vmatpush1.bf16.msra.mxu1 %v13339_v32 }
0x1836   :  { %10240 = vmatprep.subr.bf16.mxu1 %v13345_v49  ;;  %10210 = vmatpush1.bf16.msra.mxu0 %v13348_v63 }
0x1837   :  { %10212 = vmatprep.subr.bf16.mxu0 %v13354_v21 }
0x1839   :  { %10242 = vmatpush1.bf16.msra.mxu1 %v13352_v1 }
0x183a   :  { %10244 = vmatprep.subr.bf16.mxu1 %v13356_v9  ;;  %10214 = vmatpush1.bf16.msra.mxu0 %v13359_v34 }
0x183b   :  { %10216 = vmatprep.subr.bf16.mxu0 %v13365_v24 }
0x183d   :  { %10246 = vmatpush1.bf16.msra.mxu1 %v13363_v14 }
0x183e   :  { %10248 = vmatprep.subr.bf16.mxu1 %v13368_v8  ;;  %10218 = vmatpush1.bf16.msra.mxu0 %v13371_v3 }
0x183f   :  { %10220 = vmatprep.subr.bf16.mxu0 %v13380_v4 }
0x1841   :  { %10250 = vmatpush1.bf16.msra.mxu1 %v13375_v40 }
0x1842   :  { %10252 = vmatprep.subr.bf16.mxu1 %v13382_v20  ;;  %10222 = vmatpush1.bf16.msra.mxu0 %v13384_v16 }
0x1843   :  { %10256 = vmatprep.subr.bf16.mxu0 %v13296_v31 }
0x1845   :  { %10254 = vmatpush1.bf16.msra.mxu1 %v13387_v35 }
0x1846   :  { %10288 = vmatprep.subr.bf16.mxu1 %v13298_v51 }
0x18c2   :  { %v5793_v17 = vpop.f32.mrb[46].mxu0  ;;  %v5864_v56 = vpop.f32.mrb[46].mxu1 }
0x18c3   :  { %v10869_v44 = vadd.f32 %v5793_v17, %v12970_v12  ;;  %v5795_v27 = vpop.f32.mrb[47].mxu0  ;;  %v5866_v19 = vpop.f32.mrb[47].mxu1  ;;  %v10885_v29 = vadd.f32 %v5864_v56, %v12982_v57 }
0x18c4   :  { %v10870_v30 = vadd.f32 %v5795_v27, %v12973_v38  ;;  %v10886_v23 = vadd.f32 %v5866_v19, %v12978_v5 }
0x18c5   :  { %v8119_v43 = vmul.f32 -1.442695, %v10869_v44 }
0x18c6   :  { %v8120_v11 = vmul.f32 -1.442695, %v10870_v30  ;;  %v8121_v39 = vmul.f32 -1.442695, %v10886_v23 }
0x18c7   :  { %11455 = vpow2.f32 %v8119_v43 }
0x18c8   :  { %11457 = vpow2.f32 %v8120_v11 }
0x18c9   :  { %11459 = vpow2.f32 %v8121_v39 }
0x18ca   :  { %11461 = vtanh.f32 %v10885_v29 }
0x18d1   :  { %v11456_v26 = vpop.eup %11455 }
0x18d2   :  { %v11458_v53 = vpop.eup %11457  ;;  %v5876_v25 = vadd.f32 1.0, %v11456_v26 }
0x18d3   :  { %v5882_v7 = vadd.f32 1.0, %v11458_v53  ;;  %v11460_v12 = vpop.eup %11459 }
0x18d4   :  { %11463 = vrcp.f32 %v5876_v25  ;;  %v11462_v36 = vpop.eup %11461  ;;  %v5889_v15 = vadd.f32 1.0, %v11460_v12 }
0x18d5   :  { %11465 = vrcp.f32 %v5882_v7 }
0x18d6   :  { %11467 = vrcp.f32 %v5889_v15 }
0x18de   :  { %v11464_v38 = vpop.eup %11463 }
0x18df   :  { %v11466_v60 = vpop.eup %11465  ;;  %v5893_v46 = vmul.f32 %v11464_v38, %v11462_v36 }
0x18e0   :  { %v5892_v59 = vmul.f32 %v11466_v60, %v13259_v2  ;;  %v11468_v57 = vpop.eup %11467  ;;  %v8122_v2 = vld [vmem:[%s13984_s4 + $0xc] sm:$0xf] }
0x18e1   :  { %v13445_v44 = vrot.slane %v8122_v2, %v12008_v45  ;;  %v13448_v27 = vrot.slane %v8122_v2, %v12013_v48  ;;  %v13453_v53 = vrot.slane %v8122_v2, %v12021_v55  ;;  %v13457_v48 = vrot.slane %v8122_v2, %v12028_v10 }
0x18e2   :  { %v5894_v5 = vadd.f32 %v5893_v46, %v5892_v59 }
0x18e4   :  { %11469 = vtanh.f32 %v5894_v5 }
0x18ee   :  { %v11470_v17 = vpop.eup %11469 }
0x18ef   :  { %v13399_v56 = vmul.f32 %v11470_v17, %v11468_v57 }
0x18f1   :  { %6102 = vmatmul.mubr.f32.gmra.mrb[62].mxu0 %v13399_v56  ;;  %6215 = vmatmul.mubr.f32.gmra.mrb[62].mxu1 %v13399_v56 }
0x18f2   :  { %6386 = vmatprep.mubr.f32.mxu0 %v11678_v0  ;;  %6457 = vmatprep.mubr.f32.mxu1 %v11678_v0 }
0x18f5   :  { %6387 = vmatmul.mubr.f32.vlgmr.msra.gmra.mrb[48].mxu0 %v11678_v0  ;;  %6458 = vmatmul.mubr.f32.vlgmr.msra.gmra.mrb[48].mxu1 %v11678_v0 }
0x18f6   :  { %10258 = vmatpush1.bf16.msra.mxu0 %v13300_v50  ;;  %10290 = vmatpush1.bf16.msra.mxu1 %v13303_v13 }
0x18f7   :  { %10260 = vmatprep.subr.bf16.mxu0 %v13308_v42  ;;  %10292 = vmatprep.subr.bf16.mxu1 %v13310_v61 }
0x18f8   :  { %6561 = vmatprep.mubr.f32.mxu0 %v11678_v0  ;;  %6632 = vmatprep.mubr.f32.mxu1 %v11678_v0 }
0x18fa   :  { %10262 = vmatpush1.bf16.msra.mxu0 %v13312_v22  ;;  %10294 = vmatpush1.bf16.msra.mxu1 %v13315_v37 }
0x18fb   :  { %10264 = vmatprep.subr.bf16.mxu0 %v13320_v6  ;;  %10296 = vmatprep.subr.bf16.mxu1 %v13322_v18 }
0x18fe   :  { %10266 = vmatpush1.bf16.msra.mxu0 %v13324_v54  ;;  %10298 = vmatpush1.bf16.msra.mxu1 %v13327_v28 }
0x18ff   :  { %10268 = vmatprep.subr.bf16.mxu0 %v13332_v33  ;;  %10300 = vmatprep.subr.bf16.mxu1 %v13334_v58 }
0x1902   :  { %10270 = vmatpush1.bf16.msra.mxu0 %v13336_v62  ;;  %10302 = vmatpush1.bf16.msra.mxu1 %v13339_v32 }
0x1903   :  { %10272 = vmatprep.subr.bf16.mxu0 %v13343_v41  ;;  %10304 = vmatprep.subr.bf16.mxu1 %v13345_v49 }
0x1906   :  { %10274 = vmatpush1.bf16.msra.mxu0 %v13348_v63  ;;  %10306 = vmatpush1.bf16.msra.mxu1 %v13352_v1 }
0x1907   :  { %10276 = vmatprep.subr.bf16.mxu0 %v13354_v21  ;;  %10308 = vmatprep.subr.bf16.mxu1 %v13356_v9 }
0x190a   :  { %10278 = vmatpush1.bf16.msra.mxu0 %v13359_v34  ;;  %10310 = vmatpush1.bf16.msra.mxu1 %v13363_v14 }
0x190b   :  { %10280 = vmatprep.subr.bf16.mxu0 %v13365_v24  ;;  %10312 = vmatprep.subr.bf16.mxu1 %v13368_v8 }
0x190e   :  { %10282 = vmatpush1.bf16.msra.mxu0 %v13371_v3  ;;  %10314 = vmatpush1.bf16.msra.mxu1 %v13375_v40 }
0x190f   :  { %10284 = vmatprep.subr.bf16.mxu0 %v13380_v4  ;;  %10316 = vmatprep.subr.bf16.mxu1 %v13382_v20 }
0x1912   :  { %10286 = vmatpush1.bf16.msra.mxu0 %v13384_v16  ;;  %10318 = vmatpush1.bf16.msra.mxu1 %v13387_v35 }
0x1913   :  { %10320 = vmatprep.subr.bf16.mxu0 %v13296_v31  ;;  %10352 = vmatprep.subr.bf16.mxu1 %v13298_v51 }
0x19c8   :  { %v6388_v19 = vpop.f32.mrb[48].mxu0  ;;  %v6459_v30 = vpop.f32.mrb[48].mxu1 }
0x19c9   :  { %v10887_v43 = vadd.f32 %v6388_v19, %v13445_v44  ;;  %v6390_v11 = vpop.f32.mrb[49].mxu0  ;;  %v6461_v23 = vpop.f32.mrb[49].mxu1  ;;  %v10903_v7 = vadd.f32 %v6459_v30, %v13457_v48 }
0x19ca   :  { %v10888_v39 = vadd.f32 %v6390_v11, %v13448_v27  ;;  %v10904_v45 = vadd.f32 %v6461_v23, %v13453_v53 }
0x19cb   :  { %v8123_v29 = vmul.f32 -1.442695, %v10887_v43 }
0x19cc   :  { %v8124_v26 = vmul.f32 -1.442695, %v10888_v39  ;;  %v8125_v25 = vmul.f32 -1.442695, %v10904_v45 }
0x19cd   :  { %11471 = vpow2.f32 %v8123_v29 }
0x19ce   :  { %11473 = vpow2.f32 %v8124_v26 }
0x19cf   :  { %11475 = vpow2.f32 %v8125_v25 }
0x19d0   :  { %11477 = vtanh.f32 %v10903_v7 }
0x19d7   :  { %v11472_v12 = vpop.eup %11471 }
0x19d8   :  { %v11474_v36 = vpop.eup %11473  ;;  %v6471_v38 = vadd.f32 1.0, %v11472_v12 }
0x19d9   :  { %v6477_v60 = vadd.f32 1.0, %v11474_v36  ;;  %v11476_v55 = vpop.eup %11475 }
0x19da   :  { %11479 = vrcp.f32 %v6471_v38  ;;  %v11478_v46 = vpop.eup %11477  ;;  %v6484_v57 = vadd.f32 1.0, %v11476_v55 }
0x19db   :  { %11481 = vrcp.f32 %v6477_v60 }
0x19dc   :  { %11483 = vrcp.f32 %v6484_v57 }
0x19e4   :  { %v11480_v15 = vpop.eup %11479 }
0x19e5   :  { %v11482_v59 = vpop.eup %11481  ;;  %v6488_v5 = vmul.f32 %v11480_v15, %v11478_v46 }
0x19e6   :  { %v6487_v17 = vmul.f32 0.0, %v11482_v59  ;;  %v11484_v2 = vpop.eup %11483 }
0x19e8   :  { %v13460_v10 = vadd.f32 %v6488_v5, %v6487_v17 }
0x19ea   :  { %11485 = vtanh.f32 %v13460_v10 }
0x19f4   :  { %v11486_v19 = vpop.eup %11485 }
0x19f5   :  { %v6491_v30 = vmul.f32 %v11486_v19, %v11484_v2 }
0x19f7   :  { %6562 = vmatmul.mubr.f32.vlgmr.msra.gmra.mrb[50].mxu0 %v6491_v30  ;;  %6633 = vmatmul.mubr.f32.vlgmr.msra.gmra.mrb[50].mxu1 %v6491_v30 }
0x19f8   :  { %10322 = vmatpush1.bf16.msra.mxu0 %v13300_v50  ;;  %10354 = vmatpush1.bf16.msra.mxu1 %v13303_v13 }
0x19f9   :  { %10324 = vmatprep.subr.bf16.mxu0 %v13308_v42  ;;  %10356 = vmatprep.subr.bf16.mxu1 %v13310_v61 }
0x19fa   :  { %6736 = vmatprep.mubr.f32.mxu0 %v11678_v0  ;;  %6807 = vmatprep.mubr.f32.mxu1 %v11678_v0 }
0x19fc   :  { %10326 = vmatpush1.bf16.msra.mxu0 %v13312_v22  ;;  %10358 = vmatpush1.bf16.msra.mxu1 %v13315_v37 }
0x19fd   :  { %10328 = vmatprep.subr.bf16.mxu0 %v13320_v6  ;;  %10360 = vmatprep.subr.bf16.mxu1 %v13322_v18 }
0x1a00   :  { %10330 = vmatpush1.bf16.msra.mxu0 %v13324_v54  ;;  %10362 = vmatpush1.bf16.msra.mxu1 %v13327_v28 }
0x1a01   :  { %10332 = vmatprep.subr.bf16.mxu0 %v13332_v33  ;;  %10364 = vmatprep.subr.bf16.mxu1 %v13334_v58 }
0x1a04   :  { %10334 = vmatpush1.bf16.msra.mxu0 %v13336_v62  ;;  %10366 = vmatpush1.bf16.msra.mxu1 %v13339_v32 }
0x1a05   :  { %10336 = vmatprep.subr.bf16.mxu0 %v13343_v41  ;;  %10368 = vmatprep.subr.bf16.mxu1 %v13345_v49 }
0x1a08   :  { %10338 = vmatpush1.bf16.msra.mxu0 %v13348_v63  ;;  %10370 = vmatpush1.bf16.msra.mxu1 %v13352_v1 }
0x1a09   :  { %10340 = vmatprep.subr.bf16.mxu0 %v13354_v21  ;;  %10372 = vmatprep.subr.bf16.mxu1 %v13356_v9 }
0x1a0c   :  { %10342 = vmatpush1.bf16.msra.mxu0 %v13359_v34  ;;  %10374 = vmatpush1.bf16.msra.mxu1 %v13363_v14 }
0x1a0d   :  { %10344 = vmatprep.subr.bf16.mxu0 %v13365_v24  ;;  %10376 = vmatprep.subr.bf16.mxu1 %v13368_v8 }
0x1a10   :  { %10346 = vmatpush1.bf16.msra.mxu0 %v13371_v3  ;;  %10378 = vmatpush1.bf16.msra.mxu1 %v13375_v40 }
0x1a11   :  { %10348 = vmatprep.subr.bf16.mxu0 %v13380_v4  ;;  %10380 = vmatprep.subr.bf16.mxu1 %v13382_v20 }
0x1a14   :  { %10350 = vmatpush1.bf16.msra.mxu0 %v13384_v16  ;;  %10382 = vmatpush1.bf16.msra.mxu1 %v13387_v35 }
0x1a15   :  { %10384 = vmatprep.subr.bf16.mxu0 %v13296_v31  ;;  %10416 = vmatprep.subr.bf16.mxu1 %v13298_v51 }
0x1aca   :  { %v6563_v43 = vpop.f32.mrb[50].mxu0  ;;  %v6634_v11 = vpop.f32.mrb[50].mxu1 }
0x1acb   :  { %v10889_v23 = vadd.f32 %v6563_v43, %v13445_v44  ;;  %v6565_v39 = vpop.f32.mrb[51].mxu0  ;;  %v6636_v29 = vpop.f32.mrb[51].mxu1  ;;  %v10905_v36 = vadd.f32 %v6634_v11, %v13457_v48 }
0x1acc   :  { %v10890_v26 = vadd.f32 %v6565_v39, %v13448_v27  ;;  %v10906_v7 = vadd.f32 %v6636_v29, %v13453_v53 }
0x1acd   :  { %v8126_v45 = vmul.f32 -1.442695, %v10889_v23 }
0x1ace   :  { %v8127_v25 = vmul.f32 -1.442695, %v10890_v26  ;;  %v8128_v12 = vmul.f32 -1.442695, %v10906_v7 }
0x1acf   :  { %11487 = vpow2.f32 %v8126_v45 }
0x1ad0   :  { %11489 = vpow2.f32 %v8127_v25 }
0x1ad1   :  { %11491 = vpow2.f32 %v8128_v12 }
0x1ad2   :  { %11493 = vtanh.f32 %v10905_v36 }
0x1ad9   :  { %v11488_v38 = vpop.eup %11487 }
0x1ada   :  { %v11490_v60 = vpop.eup %11489  ;;  %v6646_v55 = vadd.f32 1.0, %v11488_v38 }
0x1adb   :  { %v6652_v46 = vadd.f32 1.0, %v11490_v60  ;;  %v11492_v15 = vpop.eup %11491 }
0x1adc   :  { %11495 = vrcp.f32 %v6646_v55  ;;  %v11494_v59 = vpop.eup %11493  ;;  %v6659_v2 = vadd.f32 1.0, %v11492_v15 }
0x1add   :  { %11497 = vrcp.f32 %v6652_v46 }
0x1ade   :  { %11499 = vrcp.f32 %v6659_v2 }
0x1ae6   :  { %v11496_v5 = vpop.eup %11495 }
0x1ae7   :  { %v11498_v57 = vpop.eup %11497  ;;  %v6663_v17 = vmul.f32 %v11496_v5, %v11494_v59 }
0x1ae8   :  { %v6662_v19 = vmul.f32 %v11498_v57, %v13460_v10  ;;  %v11500_v43 = vpop.eup %11499 }
0x1aea   :  { %v13502_v30 = vadd.f32 %v6663_v17, %v6662_v19 }
0x1aec   :  { %11501 = vtanh.f32 %v13502_v30 }
0x1af6   :  { %v11502_v11 = vpop.eup %11501 }
0x1af7   :  { %v6666_v23 = vmul.f32 %v11502_v11, %v11500_v43 }
0x1af9   :  { %6737 = vmatmul.mubr.f32.vlgmr.msra.gmra.mrb[52].mxu0 %v6666_v23  ;;  %6808 = vmatmul.mubr.f32.vlgmr.msra.gmra.mrb[52].mxu1 %v6666_v23 }
0x1afa   :  { %10386 = vmatpush1.bf16.msra.mxu0 %v13300_v50  ;;  %10418 = vmatpush1.bf16.msra.mxu1 %v13303_v13 }
0x1afb   :  { %10388 = vmatprep.subr.bf16.mxu0 %v13308_v42  ;;  %10420 = vmatprep.subr.bf16.mxu1 %v13310_v61 }
0x1afc   :  { %6911 = vmatprep.mubr.f32.mxu0 %v11678_v0  ;;  %6982 = vmatprep.mubr.f32.mxu1 %v11678_v0 }
0x1afe   :  { %10390 = vmatpush1.bf16.msra.mxu0 %v13312_v22  ;;  %10422 = vmatpush1.bf16.msra.mxu1 %v13315_v37 }
0x1aff   :  { %10392 = vmatprep.subr.bf16.mxu0 %v13320_v6  ;;  %10424 = vmatprep.subr.bf16.mxu1 %v13322_v18 }
0x1b02   :  { %10394 = vmatpush1.bf16.msra.mxu0 %v13324_v54  ;;  %10426 = vmatpush1.bf16.msra.mxu1 %v13327_v28 }
0x1b03   :  { %10396 = vmatprep.subr.bf16.mxu0 %v13332_v33  ;;  %10428 = vmatprep.subr.bf16.mxu1 %v13334_v58 }
0x1b06   :  { %10398 = vmatpush1.bf16.msra.mxu0 %v13336_v62  ;;  %10430 = vmatpush1.bf16.msra.mxu1 %v13339_v32 }
0x1b07   :  { %10400 = vmatprep.subr.bf16.mxu0 %v13343_v41  ;;  %10432 = vmatprep.subr.bf16.mxu1 %v13345_v49 }
0x1b0a   :  { %10402 = vmatpush1.bf16.msra.mxu0 %v13348_v63  ;;  %10434 = vmatpush1.bf16.msra.mxu1 %v13352_v1 }
0x1b0b   :  { %10404 = vmatprep.subr.bf16.mxu0 %v13354_v21  ;;  %10436 = vmatprep.subr.bf16.mxu1 %v13356_v9 }
0x1b0e   :  { %10406 = vmatpush1.bf16.msra.mxu0 %v13359_v34  ;;  %10438 = vmatpush1.bf16.msra.mxu1 %v13363_v14 }
0x1b0f   :  { %10408 = vmatprep.subr.bf16.mxu0 %v13365_v24  ;;  %10440 = vmatprep.subr.bf16.mxu1 %v13368_v8 }
0x1b12   :  { %10410 = vmatpush1.bf16.msra.mxu0 %v13371_v3  ;;  %10442 = vmatpush1.bf16.msra.mxu1 %v13375_v40 }
0x1b13   :  { %10412 = vmatprep.subr.bf16.mxu0 %v13380_v4  ;;  %10444 = vmatprep.subr.bf16.mxu1 %v13382_v20 }
0x1b16   :  { %10414 = vmatpush1.bf16.msra.mxu0 %v13384_v16  ;;  %10446 = vmatpush1.bf16.msra.mxu1 %v13387_v35 }
0x1b17   :  { %10448 = vmatprep.subr.bf16.mxu0 %v13296_v31  ;;  %10480 = vmatprep.subr.bf16.mxu1 %v13298_v51 }
0x1bcc   :  { %v6738_v10 = vpop.f32.mrb[52].mxu0  ;;  %v6809_v39 = vpop.f32.mrb[52].mxu1 }
0x1bcd   :  { %v10891_v29 = vadd.f32 %v6738_v10, %v13445_v44  ;;  %v6740_v26 = vpop.f32.mrb[53].mxu0  ;;  %v6811_v45 = vpop.f32.mrb[53].mxu1  ;;  %v10907_v60 = vadd.f32 %v6809_v39, %v13457_v48 }
0x1bce   :  { %v10892_v25 = vadd.f32 %v6740_v26, %v13448_v27  ;;  %v10908_v36 = vadd.f32 %v6811_v45, %v13453_v53 }
0x1bcf   :  { %v8129_v7 = vmul.f32 -1.442695, %v10891_v29 }
0x1bd0   :  { %v8130_v12 = vmul.f32 -1.442695, %v10892_v25  ;;  %v8131_v38 = vmul.f32 -1.442695, %v10908_v36 }
0x1bd1   :  { %11503 = vpow2.f32 %v8129_v7 }
0x1bd2   :  { %11505 = vpow2.f32 %v8130_v12 }
0x1bd3   :  { %11507 = vpow2.f32 %v8131_v38 }
0x1bd4   :  { %11509 = vtanh.f32 %v10907_v60 }
0x1bdb   :  { %v11504_v55 = vpop.eup %11503 }
0x1bdc   :  { %v11506_v46 = vpop.eup %11505  ;;  %v6821_v15 = vadd.f32 1.0, %v11504_v55 }
0x1bdd   :  { %v6827_v59 = vadd.f32 1.0, %v11506_v46  ;;  %v11508_v5 = vpop.eup %11507 }
0x1bde   :  { %11511 = vrcp.f32 %v6821_v15  ;;  %v11510_v57 = vpop.eup %11509  ;;  %v6834_v43 = vadd.f32 1.0, %v11508_v5 }
0x1bdf   :  { %11513 = vrcp.f32 %v6827_v59 }
0x1be0   :  { %11515 = vrcp.f32 %v6834_v43 }
0x1be8   :  { %v11512_v17 = vpop.eup %11511 }
0x1be9   :  { %v11514_v2 = vpop.eup %11513  ;;  %v6838_v19 = vmul.f32 %v11512_v17, %v11510_v57 }
0x1bea   :  { %v6837_v11 = vmul.f32 %v11514_v2, %v13502_v30  ;;  %v11516_v10 = vpop.eup %11515 }
0x1bec   :  { %v13544_v23 = vadd.f32 %v6838_v19, %v6837_v11 }
0x1bee   :  { %11517 = vtanh.f32 %v13544_v23 }
0x1bf8   :  { %v11518_v39 = vpop.eup %11517 }
0x1bf9   :  { %v6841_v29 = vmul.f32 %v11518_v39, %v11516_v10 }
0x1bfb   :  { %6912 = vmatmul.mubr.f32.vlgmr.msra.gmra.mrb[54].mxu0 %v6841_v29  ;;  %6983 = vmatmul.mubr.f32.vlgmr.msra.gmra.mrb[54].mxu1 %v6841_v29 }
0x1bfc   :  { %10450 = vmatpush1.bf16.msra.mxu0 %v13300_v50  ;;  %10482 = vmatpush1.bf16.msra.mxu1 %v13303_v13 }
0x1bfd   :  { %10452 = vmatprep.subr.bf16.mxu0 %v13308_v42  ;;  %10484 = vmatprep.subr.bf16.mxu1 %v13310_v61 }
0x1bfe   :  { %7086 = vmatprep.mubr.f32.mxu0 %v11678_v0  ;;  %7157 = vmatprep.mubr.f32.mxu1 %v11678_v0 }
0x1c00   :  { %10454 = vmatpush1.bf16.msra.mxu0 %v13312_v22  ;;  %10486 = vmatpush1.bf16.msra.mxu1 %v13315_v37 }
0x1c01   :  { %10456 = vmatprep.subr.bf16.mxu0 %v13320_v6  ;;  %10488 = vmatprep.subr.bf16.mxu1 %v13322_v18 }
0x1c04   :  { %10458 = vmatpush1.bf16.msra.mxu0 %v13324_v54  ;;  %10490 = vmatpush1.bf16.msra.mxu1 %v13327_v28 }
0x1c05   :  { %10460 = vmatprep.subr.bf16.mxu0 %v13332_v33  ;;  %10492 = vmatprep.subr.bf16.mxu1 %v13334_v58 }
0x1c08   :  { %10462 = vmatpush1.bf16.msra.mxu0 %v13336_v62  ;;  %10494 = vmatpush1.bf16.msra.mxu1 %v13339_v32 }
0x1c09   :  { %10464 = vmatprep.subr.bf16.mxu0 %v13343_v41  ;;  %10496 = vmatprep.subr.bf16.mxu1 %v13345_v49 }
0x1c0c   :  { %10466 = vmatpush1.bf16.msra.mxu0 %v13348_v63  ;;  %10498 = vmatpush1.bf16.msra.mxu1 %v13352_v1 }
0x1c0d   :  { %10468 = vmatprep.subr.bf16.mxu0 %v13354_v21  ;;  %10500 = vmatprep.subr.bf16.mxu1 %v13356_v9 }
0x1c10   :  { %10470 = vmatpush1.bf16.msra.mxu0 %v13359_v34  ;;  %10502 = vmatpush1.bf16.msra.mxu1 %v13363_v14 }
0x1c11   :  { %10472 = vmatprep.subr.bf16.mxu0 %v13365_v24  ;;  %10504 = vmatprep.subr.bf16.mxu1 %v13368_v8 }
0x1c14   :  { %10474 = vmatpush1.bf16.msra.mxu0 %v13371_v3  ;;  %10506 = vmatpush1.bf16.msra.mxu1 %v13375_v40 }
0x1c15   :  { %10476 = vmatprep.subr.bf16.mxu0 %v13380_v4  ;;  %10508 = vmatprep.subr.bf16.mxu1 %v13382_v20 }
0x1c18   :  { %10478 = vmatpush1.bf16.msra.mxu0 %v13384_v16  ;;  %10510 = vmatpush1.bf16.msra.mxu1 %v13387_v35 }
0x1c19   :  { %10512 = vmatprep.subr.bf16.mxu0 %v13296_v31  ;;  %10544 = vmatprep.subr.bf16.mxu1 %v13298_v51 }
0x1cce   :  { %v6913_v30 = vpop.f32.mrb[54].mxu0  ;;  %v6984_v26 = vpop.f32.mrb[54].mxu1 }
0x1ccf   :  { %v10893_v45 = vadd.f32 %v6913_v30, %v13445_v44  ;;  %v6915_v25 = vpop.f32.mrb[55].mxu0  ;;  %v6986_v7 = vpop.f32.mrb[55].mxu1  ;;  %v10909_v46 = vadd.f32 %v6984_v26, %v13457_v48 }
0x1cd0   :  { %v10894_v12 = vadd.f32 %v6915_v25, %v13448_v27  ;;  %v10910_v60 = vadd.f32 %v6986_v7, %v13453_v53 }
0x1cd1   :  { %v8132_v36 = vmul.f32 -1.442695, %v10893_v45 }
0x1cd2   :  { %v8133_v38 = vmul.f32 -1.442695, %v10894_v12  ;;  %v8134_v55 = vmul.f32 -1.442695, %v10910_v60 }
0x1cd3   :  { %11519 = vpow2.f32 %v8132_v36 }
0x1cd4   :  { %11521 = vpow2.f32 %v8133_v38 }
0x1cd5   :  { %11523 = vpow2.f32 %v8134_v55 }
0x1cd6   :  { %11525 = vtanh.f32 %v10909_v46 }
0x1cdd   :  { %v11520_v15 = vpop.eup %11519 }
0x1cde   :  { %v11522_v59 = vpop.eup %11521  ;;  %v6996_v5 = vadd.f32 1.0, %v11520_v15 }
0x1cdf   :  { %v7002_v57 = vadd.f32 1.0, %v11522_v59  ;;  %v11524_v17 = vpop.eup %11523 }
0x1ce0   :  { %11527 = vrcp.f32 %v6996_v5  ;;  %v11526_v2 = vpop.eup %11525  ;;  %v7009_v10 = vadd.f32 1.0, %v11524_v17 }
0x1ce1   :  { %11529 = vrcp.f32 %v7002_v57 }
0x1ce2   :  { %11531 = vrcp.f32 %v7009_v10 }
0x1cea   :  { %v11528_v19 = vpop.eup %11527 }
0x1ceb   :  { %v11530_v43 = vpop.eup %11529  ;;  %v7013_v11 = vmul.f32 %v11528_v19, %v11526_v2 }
0x1cec   :  { %v7012_v39 = vmul.f32 %v11530_v43, %v13544_v23  ;;  %v11532_v30 = vpop.eup %11531 }
0x1cee   :  { %v13586_v29 = vadd.f32 %v7013_v11, %v7012_v39 }
0x1cf0   :  { %11533 = vtanh.f32 %v13586_v29 }
0x1cfa   :  { %v11534_v26 = vpop.eup %11533 }
0x1cfb   :  { %v7016_v45 = vmul.f32 %v11534_v26, %v11532_v30 }
0x1cfd   :  { %7087 = vmatmul.mubr.f32.vlgmr.msra.gmra.mrb[56].mxu0 %v7016_v45  ;;  %7158 = vmatmul.mubr.f32.vlgmr.msra.gmra.mrb[56].mxu1 %v7016_v45 }
0x1cfe   :  { %10514 = vmatpush1.bf16.msra.mxu0 %v13300_v50  ;;  %10546 = vmatpush1.bf16.msra.mxu1 %v13303_v13 }
0x1cff   :  { %10516 = vmatprep.subr.bf16.mxu0 %v13308_v42  ;;  %10548 = vmatprep.subr.bf16.mxu1 %v13310_v61 }
0x1d00   :  { %7261 = vmatprep.mubr.f32.mxu0 %v11678_v0  ;;  %7332 = vmatprep.mubr.f32.mxu1 %v11678_v0 }
0x1d02   :  { %10518 = vmatpush1.bf16.msra.mxu0 %v13312_v22  ;;  %10550 = vmatpush1.bf16.msra.mxu1 %v13315_v37 }
0x1d03   :  { %10520 = vmatprep.subr.bf16.mxu0 %v13320_v6  ;;  %10552 = vmatprep.subr.bf16.mxu1 %v13322_v18 }
0x1d06   :  { %10522 = vmatpush1.bf16.msra.mxu0 %v13324_v54  ;;  %10554 = vmatpush1.bf16.msra.mxu1 %v13327_v28 }
0x1d07   :  { %10524 = vmatprep.subr.bf16.mxu0 %v13332_v33  ;;  %10556 = vmatprep.subr.bf16.mxu1 %v13334_v58 }
0x1d0a   :  { %10526 = vmatpush1.bf16.msra.mxu0 %v13336_v62  ;;  %10558 = vmatpush1.bf16.msra.mxu1 %v13339_v32 }
0x1d0b   :  { %10528 = vmatprep.subr.bf16.mxu0 %v13343_v41  ;;  %10560 = vmatprep.subr.bf16.mxu1 %v13345_v49 }
0x1d0e   :  { %10530 = vmatpush1.bf16.msra.mxu0 %v13348_v63  ;;  %10562 = vmatpush1.bf16.msra.mxu1 %v13352_v1 }
0x1d0f   :  { %10532 = vmatprep.subr.bf16.mxu0 %v13354_v21  ;;  %10564 = vmatprep.subr.bf16.mxu1 %v13356_v9 }
0x1d12   :  { %10534 = vmatpush1.bf16.msra.mxu0 %v13359_v34  ;;  %10566 = vmatpush1.bf16.msra.mxu1 %v13363_v14 }
0x1d13   :  { %10536 = vmatprep.subr.bf16.mxu0 %v13365_v24  ;;  %10568 = vmatprep.subr.bf16.mxu1 %v13368_v8 }
0x1d16   :  { %10538 = vmatpush1.bf16.msra.mxu0 %v13371_v3  ;;  %10570 = vmatpush1.bf16.msra.mxu1 %v13375_v40 }
0x1d17   :  { %10540 = vmatprep.subr.bf16.mxu0 %v13380_v4  ;;  %10572 = vmatprep.subr.bf16.mxu1 %v13382_v20 }
0x1d1a   :  { %10542 = vmatpush1.bf16.msra.mxu0 %v13384_v16  ;;  %10574 = vmatpush1.bf16.msra.mxu1 %v13387_v35 }
0x1d1b   :  { %10576 = vmatprep.subr.bf16.mxu0 %v13296_v31  ;;  %10608 = vmatprep.subr.bf16.mxu1 %v13298_v51 }
0x1dd0   :  { %v7088_v23 = vpop.f32.mrb[56].mxu0  ;;  %v7159_v25 = vpop.f32.mrb[56].mxu1 }
0x1dd1   :  { %v10895_v7 = vadd.f32 %v7088_v23, %v13445_v44  ;;  %v7090_v12 = vpop.f32.mrb[57].mxu0  ;;  %v7161_v36 = vpop.f32.mrb[57].mxu1  ;;  %v10911_v59 = vadd.f32 %v7159_v25, %v13457_v48 }
0x1dd2   :  { %v10896_v38 = vadd.f32 %v7090_v12, %v13448_v27  ;;  %v10912_v46 = vadd.f32 %v7161_v36, %v13453_v53 }
0x1dd3   :  { %v8135_v60 = vmul.f32 -1.442695, %v10895_v7 }
0x1dd4   :  { %v8136_v55 = vmul.f32 -1.442695, %v10896_v38  ;;  %v8137_v15 = vmul.f32 -1.442695, %v10912_v46 }
0x1dd5   :  { %11535 = vpow2.f32 %v8135_v60 }
0x1dd6   :  { %11537 = vpow2.f32 %v8136_v55 }
0x1dd7   :  { %11539 = vpow2.f32 %v8137_v15 }
0x1dd8   :  { %11541 = vtanh.f32 %v10911_v59 }
0x1ddf   :  { %v11536_v5 = vpop.eup %11535 }
0x1de0   :  { %v11538_v57 = vpop.eup %11537  ;;  %v7171_v17 = vadd.f32 1.0, %v11536_v5 }
0x1de1   :  { %v7177_v2 = vadd.f32 1.0, %v11538_v57  ;;  %v11540_v19 = vpop.eup %11539 }
0x1de2   :  { %11543 = vrcp.f32 %v7171_v17  ;;  %v11542_v43 = vpop.eup %11541  ;;  %v7184_v30 = vadd.f32 1.0, %v11540_v19 }
0x1de3   :  { %11545 = vrcp.f32 %v7177_v2 }
0x1de4   :  { %11547 = vrcp.f32 %v7184_v30 }
0x1dec   :  { %v11544_v11 = vpop.eup %11543 }
0x1ded   :  { %v11546_v10 = vpop.eup %11545  ;;  %v7188_v39 = vmul.f32 %v11544_v11, %v11542_v43 }
0x1dee   :  { %v7187_v26 = vmul.f32 %v11546_v10, %v13586_v29  ;;  %v11548_v23 = vpop.eup %11547 }
0x1df0   :  { %v13628_v45 = vadd.f32 %v7188_v39, %v7187_v26 }
0x1df2   :  { %11549 = vtanh.f32 %v13628_v45 }
0x1dfc   :  { %v11550_v25 = vpop.eup %11549 }
0x1dfd   :  { %v7191_v7 = vmul.f32 %v11550_v25, %v11548_v23 }
0x1dff   :  { %7262 = vmatmul.mubr.f32.vlgmr.msra.gmra.mrb[58].mxu0 %v7191_v7  ;;  %7333 = vmatmul.mubr.f32.vlgmr.msra.gmra.mrb[58].mxu1 %v7191_v7 }
0x1e00   :  { %10578 = vmatpush1.bf16.msra.mxu0 %v13300_v50  ;;  %10610 = vmatpush1.bf16.msra.mxu1 %v13303_v13 }
0x1e01   :  { %10580 = vmatprep.subr.bf16.mxu0 %v13308_v42  ;;  %10612 = vmatprep.subr.bf16.mxu1 %v13310_v61 }
0x1e02   :  { %7436 = vmatprep.mubr.f32.mxu0 %v11678_v0  ;;  %7507 = vmatprep.mubr.f32.mxu1 %v11678_v0 }
0x1e04   :  { %10582 = vmatpush1.bf16.msra.mxu0 %v13312_v22  ;;  %10614 = vmatpush1.bf16.msra.mxu1 %v13315_v37 }
0x1e05   :  { %10584 = vmatprep.subr.bf16.mxu0 %v13320_v6  ;;  %10616 = vmatprep.subr.bf16.mxu1 %v13322_v18 }
0x1e08   :  { %10586 = vmatpush1.bf16.msra.mxu0 %v13324_v54  ;;  %10618 = vmatpush1.bf16.msra.mxu1 %v13327_v28 }
0x1e09   :  { %10588 = vmatprep.subr.bf16.mxu0 %v13332_v33  ;;  %10620 = vmatprep.subr.bf16.mxu1 %v13334_v58 }
0x1e0c   :  { %10590 = vmatpush1.bf16.msra.mxu0 %v13336_v62  ;;  %10622 = vmatpush1.bf16.msra.mxu1 %v13339_v32 }
0x1e0d   :  { %10592 = vmatprep.subr.bf16.mxu0 %v13343_v41  ;;  %10624 = vmatprep.subr.bf16.mxu1 %v13345_v49 }
0x1e10   :  { %10594 = vmatpush1.bf16.msra.mxu0 %v13348_v63  ;;  %10626 = vmatpush1.bf16.msra.mxu1 %v13352_v1 }
0x1e11   :  { %10596 = vmatprep.subr.bf16.mxu0 %v13354_v21  ;;  %10628 = vmatprep.subr.bf16.mxu1 %v13356_v9 }
0x1e14   :  { %10598 = vmatpush1.bf16.msra.mxu0 %v13359_v34  ;;  %10630 = vmatpush1.bf16.msra.mxu1 %v13363_v14 }
0x1e15   :  { %10600 = vmatprep.subr.bf16.mxu0 %v13365_v24  ;;  %10632 = vmatprep.subr.bf16.mxu1 %v13368_v8 }
0x1e18   :  { %10602 = vmatpush1.bf16.msra.mxu0 %v13371_v3  ;;  %10634 = vmatpush1.bf16.msra.mxu1 %v13375_v40 }
0x1e19   :  { %10604 = vmatprep.subr.bf16.mxu0 %v13380_v4  ;;  %10636 = vmatprep.subr.bf16.mxu1 %v13382_v20 }
0x1e1c   :  { %10606 = vmatpush1.bf16.msra.mxu0 %v13384_v16  ;;  %10638 = vmatpush1.bf16.msra.mxu1 %v13387_v35 }
0x1e1d   :  { %10640 = vmatprep.subr.bf16.mxu0 %v13296_v31  ;;  %10672 = vmatprep.subr.bf16.mxu1 %v13298_v51 }
0x1ed2   :  { %v7263_v29 = vpop.f32.mrb[58].mxu0  ;;  %v7334_v12 = vpop.f32.mrb[58].mxu1 }
0x1ed3   :  { %v10897_v36 = vadd.f32 %v7263_v29, %v13445_v44  ;;  %v7265_v38 = vpop.f32.mrb[59].mxu0  ;;  %v7336_v60 = vpop.f32.mrb[59].mxu1  ;;  %v10913_v57 = vadd.f32 %v7334_v12, %v13457_v48 }
0x1ed4   :  { %v10898_v55 = vadd.f32 %v7265_v38, %v13448_v27  ;;  %v10914_v59 = vadd.f32 %v7336_v60, %v13453_v53 }
0x1ed5   :  { %v8138_v46 = vmul.f32 -1.442695, %v10897_v36 }
0x1ed6   :  { %v8139_v15 = vmul.f32 -1.442695, %v10898_v55  ;;  %v8140_v5 = vmul.f32 -1.442695, %v10914_v59  ;;  %v7725_v55 = vld [vmem:[%s13985_s5 + $0x10] sm:$0xff]  ;;  %v7744_v59 = vld [vmem:[%s13985_s5 + $0xa8] sm:$0xff] }
0x1ed7   :  { %11551 = vpow2.f32 %v8138_v46  ;;  %v7726_v46 = vld [vmem:[%s13985_s5 + $0x18] sm:$0xff] }
0x1ed8   :  { %11553 = vpow2.f32 %v8139_v15  ;;  %v7743_v15 = vld [vmem:[%s13985_s5 + $0xa0] sm:$0xff] }
0x1ed9   :  { %11555 = vpow2.f32 %v8140_v5  ;;  %v10709_v5 = vpack.c.bf16 %v7726_v46, %v7725_v55  ;;  %v7777_v55 = vld [vmem:[%s13985_s5 + $0x1b0] sm:$0xff]  ;;  %v7778_v46 = vld [vmem:[%s13985_s5 + $0x1b8] sm:$0xff] }
0x1eda   :  { %11557 = vtanh.f32 %v10913_v57  ;;  %v10711_v57 = vpack.c.bf16 %v7744_v59, %v7743_v15  ;;  %v10747_v15 = vpack.c.bf16 %v7778_v46, %v7777_v55  ;;  %v7761_v59 = vld [vmem:[%s13985_s5 + $0x130] sm:$0xff] }
0x1ee1   :  { %v11552_v31 = vpop.eup %11551 }
0x1ee2   :  { %v11554_v17 = vpop.eup %11553  ;;  %v7346_v51 = vadd.f32 1.0, %v11552_v31  ;;  %v7727_v31 = vld [vmem:[%s13985_s5 + $0x20] sm:$0xff] }
0x1ee3   :  { %v7352_v2 = vadd.f32 1.0, %v11554_v17  ;;  %v11556_v19 = vpop.eup %11555  ;;  %v7728_v17 = vld [vmem:[%s13985_s5 + $0x28] sm:$0xff] }
0x1ee4   :  { %11559 = vrcp.f32 %v7346_v51  ;;  %v11558_v43 = vpop.eup %11557  ;;  %v7359_v30 = vadd.f32 1.0, %v11556_v19  ;;  %v7745_v51 = vld [vmem:[%s13985_s5 + $0xb0] sm:$0xff] }
0x1ee5   :  { %11561 = vrcp.f32 %v7352_v2  ;;  %v7746_v2 = vld [vmem:[%s13985_s5 + $0xb8] sm:$0xff] }
0x1ee6   :  { %11563 = vrcp.f32 %v7359_v30  ;;  %v10715_v19 = vpack.c.bf16 %v7746_v2, %v7745_v51  ;;  %v7763_v2 = vld [vmem:[%s13985_s5 + $0x140] sm:$0xff] }
0x1eee   :  { %v11560_v11 = vpop.eup %11559 }
0x1eef   :  { %v11562_v10 = vpop.eup %11561  ;;  %v7363_v39 = vmul.f32 %v11560_v11, %v11558_v43  ;;  %v7729_v43 = vld [vmem:[%s13985_s5 + $0x30] sm:$0xff]  ;;  %v7730_v11 = vld [vmem:[%s13985_s5 + $0x38] sm:$0xff] }
0x1ef0   :  { %v7362_v26 = vmul.f32 %v11562_v10, %v13628_v45  ;;  %v11564_v25 = vpop.eup %11563  ;;  %v7747_v10 = vld [vmem:[%s13985_s5 + $0xc0] sm:$0xff]  ;;  %v10717_v30 = vpack.c.bf16 %v7730_v11, %v7729_v43  ;;  %v7781_v43 = vld [vmem:[%s13985_s5 + $0x1d0] sm:$0xff]  ;;  %v7782_v11 = vld [vmem:[%s13985_s5 + $0x1d8] sm:$0xff] }
0x1ef2   :  { %v13670_v23 = vadd.f32 %v7363_v39, %v7362_v26  ;;  %v7748_v39 = vld [vmem:[%s13985_s5 + $0xc8] sm:$0xff] }
0x1ef3   :  { %v10719_v26 = vpack.c.bf16 %v7748_v39, %v7747_v10  ;;  %v10755_v10 = vpack.c.bf16 %v7782_v11, %v7781_v43  ;;  %v7765_v39 = vld [vmem:[%s13985_s5 + $0x150] sm:$0xff] }
0x1ef4   :  { %11565 = vtanh.f32 %v13670_v23 }
0x1efe   :  { %v11566_v7 = vpop.eup %11565 }
0x1eff   :  { %v7366_v29 = vmul.f32 %v11566_v7, %v11564_v25  ;;  %v7732_v25 = vld [vmem:[%s13985_s5 + $0x48] sm:$0xff]  ;;  %v7749_v7 = vld [vmem:[%s13985_s5 + $0xd0] sm:$0xff] }
0x1f01   :  { %7437 = vmatmul.mubr.f32.vlgmr.msra.gmra.mrb[60].mxu0 %v7366_v29  ;;  %7508 = vmatmul.mubr.f32.vlgmr.msra.gmra.mrb[60].mxu1 %v7366_v29  ;;  %v7750_v29 = vld [vmem:[%s13985_s5 + $0xd8] sm:$0xff] }
0x1f02   :  { %10642 = vmatpush1.bf16.msra.mxu0 %v13300_v50  ;;  %10674 = vmatpush1.bf16.msra.mxu1 %v13303_v13  ;;  %v7739_v50 = vld [vmem:[%s13985_s5 + $0x80] sm:$0xff]  ;;  %v7740_v13 = vld [vmem:[%s13985_s5 + $0x88] sm:$0xff] }
0x1f03   :  { %10644 = vmatprep.subr.bf16.mxu0 %v13308_v42  ;;  %10676 = vmatprep.subr.bf16.mxu1 %v13310_v61  ;;  %v10703_v42 = vpack.c.bf16 %v7740_v13, %v7739_v50  ;;  %v10723_v13 = vpack.c.bf16 %v7750_v29, %v7749_v7  ;;  %v7767_v7 = vld [vmem:[%s13985_s5 + $0x160] sm:$0xff] }
0x1f04   :  { %7611 = vmatprep.mubr.f32.mxu0 %v11678_v0  ;;  %7682 = vmatprep.mubr.f32.mxu1 %v11678_v0 }
0x1f06   :  { %10646 = vmatpush1.bf16.msra.mxu0 %v13312_v22  ;;  %10678 = vmatpush1.bf16.msra.mxu1 %v13315_v37 }
0x1f07   :  { %10648 = vmatprep.subr.bf16.mxu0 %v13320_v6  ;;  %10680 = vmatprep.subr.bf16.mxu1 %v13322_v18 }
0x1f0a   :  { %10650 = vmatpush1.bf16.msra.mxu0 %v13324_v54  ;;  %10682 = vmatpush1.bf16.msra.mxu1 %v13327_v28 }
0x1f0b   :  { %10652 = vmatprep.subr.bf16.mxu0 %v13332_v33  ;;  %10684 = vmatprep.subr.bf16.mxu1 %v13334_v58 }
0x1f0e   :  { %10654 = vmatpush1.bf16.msra.mxu0 %v13336_v62  ;;  %10686 = vmatpush1.bf16.msra.mxu1 %v13339_v32 }
0x1f0f   :  { %10656 = vmatprep.subr.bf16.mxu0 %v13343_v41  ;;  %10688 = vmatprep.subr.bf16.mxu1 %v13345_v49 }
0x1f12   :  { %10658 = vmatpush1.bf16.msra.mxu0 %v13348_v63  ;;  %10690 = vmatpush1.bf16.msra.mxu1 %v13352_v1 }
0x1f13   :  { %10660 = vmatprep.subr.bf16.mxu0 %v13354_v21  ;;  %10692 = vmatprep.subr.bf16.mxu1 %v13356_v9 }
0x1f16   :  { %10662 = vmatpush1.bf16.msra.mxu0 %v13359_v34  ;;  %10694 = vmatpush1.bf16.msra.mxu1 %v13363_v14 }
0x1f17   :  { %10664 = vmatprep.subr.bf16.mxu0 %v13365_v24  ;;  %10696 = vmatprep.subr.bf16.mxu1 %v13368_v8 }
0x1f1a   :  { %10666 = vmatpush1.bf16.msra.mxu0 %v13371_v3  ;;  %10698 = vmatpush1.bf16.msra.mxu1 %v13375_v40 }
0x1f1b   :  { %10668 = vmatprep.subr.bf16.mxu0 %v13380_v4  ;;  %10700 = vmatprep.subr.bf16.mxu1 %v13382_v20  ;;  %v7723_v4 = vld [vmem:[%s13985_s5] sm:$0xff]  ;;  %v7724_v20 = vld [vmem:[%s13985_s5 + $0x8] sm:$0xff] }
0x1f1c   :  { %v10705_v36 = vpack.c.bf16 %v7724_v20, %v7723_v4  ;;  %v7757_v4 = vld [vmem:[%s13985_s5 + $0x110] sm:$0xff]  ;;  %v7758_v20 = vld [vmem:[%s13985_s5 + $0x118] sm:$0xff] }
0x1f1e   :  { %10670 = vmatpush1.bf16.msra.mxu0 %v13384_v16  ;;  %10702 = vmatpush1.bf16.msra.mxu1 %v13387_v35  ;;  %v7741_v16 = vld [vmem:[%s13985_s5 + $0x90] sm:$0xff]  ;;  %v7742_v35 = vld [vmem:[%s13985_s5 + $0x98] sm:$0xff] }
0x1f1f   :  { %10704 = vmatprep.subr.bf16.mxu0 %v10703_v42  ;;  %v10707_v60 = vpack.c.bf16 %v7742_v35, %v7741_v16  ;;  %v7733_v42 = vld [vmem:[%s13985_s5 + $0x50] sm:$0xff]  ;;  %v10741_v16 = vpack.c.bf16 %v7758_v20, %v7757_v4  ;;  %v7775_v35 = vld [vmem:[%s13985_s5 + $0x1a0] sm:$0xff] }
0x1fd4   :  { %v7438_v61 = vpop.f32.mrb[60].mxu0  ;;  %v7509_v22 = vpop.f32.mrb[60].mxu1 }
0x1fd5   :  { %v10899_v37 = vadd.f32 %v7438_v61, %v13445_v44  ;;  %v7440_v6 = vpop.f32.mrb[61].mxu0  ;;  %v7511_v18 = vpop.f32.mrb[61].mxu1  ;;  %v10915_v32 = vadd.f32 %v7509_v22, %v13457_v48  ;;  %v7734_v61 = vld [vmem:[%s13985_s5 + $0x58] sm:$0xff]  ;;  %v7751_v22 = vld [vmem:[%s13985_s5 + $0xe0] sm:$0xff] }
0x1fd6   :  { %v10900_v54 = vadd.f32 %v7440_v6, %v13448_v27  ;;  %v10916_v58 = vadd.f32 %v7511_v18, %v13453_v53  ;;  %v10725_v6 = vpack.c.bf16 %v7734_v61, %v7733_v42  ;;  %v7786_v42 = vld [vmem:[%s13985_s5 + $0x1f8] sm:$0xff] }
0x1fd7   :  { %v8141_v28 = vmul.f32 -1.442695, %v10899_v37  ;;  %v7752_v37 = vld [vmem:[%s13985_s5 + $0xe8] sm:$0xff] }
0x1fd8   :  { %v8142_v33 = vmul.f32 -1.442695, %v10900_v54  ;;  %v8143_v62 = vmul.f32 -1.442695, %v10916_v58  ;;  %v10727_v18 = vpack.c.bf16 %v7752_v37, %v7751_v22  ;;  %v7735_v54 = vld [vmem:[%s13985_s5 + $0x60] sm:$0xff]  ;;  %v7754_v58 = vld [vmem:[%s13985_s5 + $0xf8] sm:$0xff] }
0x1fd9   :  { %11567 = vpow2.f32 %v8141_v28  ;;  %v7736_v28 = vld [vmem:[%s13985_s5 + $0x68] sm:$0xff]  ;;  %v7769_v37 = vld [vmem:[%s13985_s5 + $0x170] sm:$0xff] }
0x1fda   :  { %11569 = vpow2.f32 %v8142_v33  ;;  %v7753_v33 = vld [vmem:[%s13985_s5 + $0xf0] sm:$0xff] }
0x1fdb   :  { %11571 = vpow2.f32 %v8143_v62  ;;  %v10729_v62 = vpack.c.bf16 %v7736_v28, %v7735_v54  ;;  %v7935_v54 = vld [vmem:[%s13987_s7] sm:$0xff]  ;;  %v7936_v28 = vld [vmem:[%s13987_s7 + $0x8] sm:$0xff] }
0x1fdc   :  { %11573 = vtanh.f32 %v10915_v32  ;;  %v10731_v32 = vpack.c.bf16 %v7754_v58, %v7753_v33  ;;  %v7937_v33 = vld [vmem:[%s13987_s7 + $0x10] sm:$0xff]  ;;  %v11679_v58 = vmov 0.0|0.0  }
0x1fe3   :  { %v11568_v41 = vpop.eup %11567 }
0x1fe4   :  { %v11570_v49 = vpop.eup %11569  ;;  %v7521_v63 = vadd.f32 1.0, %v11568_v41  ;;  %v7737_v41 = vld [vmem:[%s13985_s5 + $0x70] sm:$0xff] }
0x1fe5   :  { %v7527_v1 = vadd.f32 1.0, %v11570_v49  ;;  %v11572_v21 = vpop.eup %11571  ;;  %v7738_v49 = vld [vmem:[%s13985_s5 + $0x78] sm:$0xff] }
0x1fe6   :  { %11575 = vrcp.f32 %v7521_v63  ;;  %v11574_v9 = vpop.eup %11573  ;;  %v7534_v8 = vadd.f32 1.0, %v11572_v21  ;;  %v10733_v63 = vpack.c.bf16 %v7738_v49, %v7737_v41  ;;  %v7772_v21 = vld [vmem:[%s13985_s5 + $0x188] sm:$0xff]  ;;  %v7939_v49 = vld [vmem:[%s13987_s7 + $0x20] sm:$0xff] }
0x1fe7   :  { %11577 = vrcp.f32 %v7527_v1  ;;  %v7771_v1 = vld [vmem:[%s13985_s5 + $0x180] sm:$0xff] }
0x1fe8   :  { %11579 = vrcp.f32 %v7534_v8  ;;  %v7774_v8 = vld [vmem:[%s13985_s5 + $0x198] sm:$0xff] }
0x1ff0   :  { %v11576_v34 = vpop.eup %11575 }
0x1ff1   :  { %v11578_v14 = vpop.eup %11577  ;;  %v7538_v24 = vmul.f32 %v11576_v34, %v11574_v9  ;;  %v10735_v9 = vpack.c.bf16 %v7772_v21, %v7771_v1  ;;  %v7755_v34 = vld [vmem:[%s13985_s5 + $0x100] sm:$0xff]  ;;  %v7941_v21 = vld [vmem:[%s13987_s7 + $0x30] sm:$0xff] }
0x1ff2   :  { %v7537_v3 = vmul.f32 %v11578_v14, %v13670_v23  ;;  %v11580_v45 = vpop.eup %11579  ;;  %v7731_v23 = vld [vmem:[%s13985_s5 + $0x40] sm:$0xff]  ;;  %v7756_v14 = vld [vmem:[%s13985_s5 + $0x108] sm:$0xff] }
0x1ff3   :  { %v10721_v50 = vpack.c.bf16 %v7732_v25, %v7731_v23  ;;  %10736 = vmatprep.subr.bf16.mxu1 %v10735_v9  ;;  %v7783_v23 = vld [vmem:[%s13985_s5 + $0x1e0] sm:$0xff]  ;;  %v7784_v25 = vld [vmem:[%s13985_s5 + $0x1e8] sm:$0xff]  ;;  %v7942_v9 = vld [vmem:[%s13987_s7 + $0x38] sm:$0xff] }
0x1ff4   :  { %v13716_v40 = vadd.f32 %v7538_v24, %v7537_v3  ;;  %v10737_v24 = vpack.c.bf16 %v7756_v14, %v7755_v34  ;;  %v10759_v29 = vpack.c.bf16 %v7784_v25, %v7783_v23  ;;  %v10777_v34 = vpack.c.bf16 %v7942_v9, %v7941_v21  ;;  %v7943_v14 = vld [vmem:[%s13987_s7 + $0x40] sm:$0xff]  ;;  %v7949_v25 = vld [vmem:[%s13987_s7 + $0x70] sm:$0xff] }
0x1ff6   :  { %11581 = vtanh.f32 %v13716_v40 }
0x2000   :  { %v11582_v12 = vpop.eup %11581 }
0x2001   :  { %v7541_v38 = vmul.f32 %v11582_v12, %v11580_v45  ;;  %v7776_v45 = vld [vmem:[%s13985_s5 + $0x1a8] sm:$0xff] }
0x2002   :  { %v10743_v12 = vpack.c.bf16 %v7776_v45, %v7775_v35 }
0x2003   :  { %7612 = vmatmul.mubr.f32.vlgmr.msra.gmra.mrb[62].mxu0 %v7541_v38  ;;  %7683 = vmatmul.mubr.f32.vlgmr.msra.gmra.mrb[62].mxu1 %v7541_v38  ;;  %v7760_v38 = vld [vmem:[%s13985_s5 + $0x128] sm:$0xff] }
0x2004   :  { %10706 = vmatpush3.bf16.msra.mxu0 %v10705_v36  ;;  %7858 = vmatprep.mubr.f32.mxu0 %v12924_v52  ;;  %v10713_v52 = vpack.c.bf16 %v7728_v17, %v7727_v31  ;;  %v7759_v36 = vld [vmem:[%s13985_s5 + $0x120] sm:$0xff]  ;;  %v7780_v17 = vld [vmem:[%s13985_s5 + $0x1c8] sm:$0xff] }
0x2005   :  { %10708 = vmatprep.subr.bf16.mxu0 %v10707_v60  ;;  %10738 = vmatpush3.bf16.msra.mxu1 %v10737_v24  ;;  %v10745_v60 = vpack.c.bf16 %v7760_v38, %v7759_v36  ;;  %v7779_v31 = vld [vmem:[%s13985_s5 + $0x1c0] sm:$0xff]  ;;  %v7944_v24 = vld [vmem:[%s13987_s7 + $0x48] sm:$0xff] }
0x2006   :  { %v10751_v51 = vpack.c.bf16 %v7780_v17, %v7779_v31 }
0x2008   :  { %10710 = vmatpush3.bf16.msra.mxu0 %v10709_v5  ;;  %v7762_v5 = vld [vmem:[%s13985_s5 + $0x138] sm:$0xff] }
0x2009   :  { %10712 = vmatprep.subr.bf16.mxu0 %v10711_v57  ;;  %v10749_v57 = vpack.c.bf16 %v7762_v5, %v7761_v59 }
0x200c   :  { %10714 = vmatpush3.bf16.msra.mxu0 %v10713_v52  ;;  %v7764_v52 = vld [vmem:[%s13985_s5 + $0x148] sm:$0xff] }
0x200d   :  { %10716 = vmatprep.subr.bf16.mxu0 %v10715_v19  ;;  %v10753_v19 = vpack.c.bf16 %v7764_v52, %v7763_v2 }
0x2010   :  { %10718 = vmatpush3.bf16.msra.mxu0 %v10717_v30  ;;  %v7766_v30 = vld [vmem:[%s13985_s5 + $0x158] sm:$0xff] }
0x2011   :  { %10720 = vmatprep.subr.bf16.mxu0 %v10719_v26  ;;  %v10757_v26 = vpack.c.bf16 %v7766_v30, %v7765_v39 }
0x2014   :  { %10722 = vmatpush3.bf16.msra.mxu0 %v10721_v50  ;;  %v7768_v50 = vld [vmem:[%s13985_s5 + $0x168] sm:$0xff] }
0x2015   :  { %10724 = vmatprep.subr.bf16.mxu0 %v10723_v13  ;;  %v7785_v13 = vld [vmem:[%s13985_s5 + $0x1f0] sm:$0xff]  ;;  %v10761_v61 = vpack.c.bf16 %v7768_v50, %v7767_v7 }
0x2016   :  { %v10763_v22 = vpack.c.bf16 %v7786_v42, %v7785_v13 }
0x2018   :  { %10726 = vmatpush3.bf16.msra.mxu0 %v10725_v6  ;;  %v7770_v6 = vld [vmem:[%s13985_s5 + $0x178] sm:$0xff] }
0x2019   :  { %10728 = vmatprep.subr.bf16.mxu0 %v10727_v18  ;;  %v10765_v18 = vpack.c.bf16 %v7770_v6, %v7769_v37  ;;  %v13991_v6 = vlaneseq }
0x201c   :  { %10730 = vmatpush3.bf16.msra.mxu0 %v10729_v62  ;;  %v10768_v62 = vpack.c.bf16 %v7936_v28, %v7935_v54  ;;  %v8148_v54 = vld [vmem:[%s13988_s8] ss:$0 sm:$0xff] }
0x201d   :  { %10732 = vmatprep.subr.bf16.mxu0 %v10731_v32  ;;  %v7938_v32 = vld [vmem:[%s13987_s7 + $0x18] sm:$0xff] }
0x201e   :  { %v10771_v41 = vpack.c.bf16 %v7938_v32, %v7937_v33 }
0x2020   :  { %10734 = vmatpush3.bf16.msra.mxu0 %v10733_v63  ;;  %v7940_v63 = vld [vmem:[%s13987_s7 + $0x28] sm:$0xff] }
0x2021   :  { %10767 = vmatprep.subr.bf16.mxu0 %v11679_v58  ;;  %v10774_v1 = vpack.c.bf16 %v7940_v63, %v7939_v49 }
0x2023   :  { %7859 = vmatmul.mubr.f32.vlgmr.msra.gmra.mrb[64].mxu0 %v12449_v47  ;;  %v7773_v47 = vld [vmem:[%s13985_s5 + $0x190] sm:$0xff] }
0x2024   :  { %v10739_v3 = vpack.c.bf16 %v7774_v8, %v7773_v47  ;;  %10769 = vmatpush3.bf16.msra.mxu0 %v10768_v62  ;;  %v10780_v47 = vpack.c.bf16 %v7944_v24, %v7943_v14  ;;  %v7945_v8 = vld [vmem:[%s13987_s7 + $0x50] sm:$0xff]  ;;  %8268 = vmatprep.mubr.msk.f32.mxu0 %vm11680_vm0, %v11678_v0 }
0x2025   :  { %10770 = vmatprep.subr.bf16.mxu0 %v11679_v58 }
0x2026   :  { %10740 = vmatprep.subr.bf16.mxu1 %v10739_v3  ;;  %v7946_v3 = vld [vmem:[%s13987_s7 + $0x58] sm:$0xff] }
0x2027   :  { %10742 = vmatpush3.bf16.msra.mxu1 %v10741_v16  ;;  %v10783_v4 = vpack.c.bf16 %v7946_v3, %v7945_v8 }
0x2028   :  { %10744 = vmatprep.subr.bf16.mxu1 %v10743_v12  ;;  %10772 = vmatpush3.bf16.msra.mxu0 %v10771_v41 }
0x2029   :  { %10773 = vmatprep.subr.bf16.mxu0 %v11679_v58 }
0x202b   :  { %10746 = vmatpush3.bf16.msra.mxu1 %v10745_v60 }
0x202c   :  { %10748 = vmatprep.subr.bf16.mxu1 %v10747_v15  ;;  %10775 = vmatpush3.bf16.msra.mxu0 %v10774_v1 }
0x202d   :  { %10776 = vmatprep.subr.bf16.mxu0 %v11679_v58 }
0x202f   :  { %10750 = vmatpush3.bf16.msra.mxu1 %v10749_v57 }
0x2030   :  { %10752 = vmatprep.subr.bf16.mxu1 %v10751_v51  ;;  %10778 = vmatpush3.bf16.msra.mxu0 %v10777_v34 }
0x2031   :  { %10779 = vmatprep.subr.bf16.mxu0 %v11679_v58 }
0x2033   :  { %10754 = vmatpush3.bf16.msra.mxu1 %v10753_v19 }
0x2034   :  { %10756 = vmatprep.subr.bf16.mxu1 %v10755_v10  ;;  %10781 = vmatpush3.bf16.msra.mxu0 %v10780_v47 }
0x2035   :  { %10782 = vmatprep.subr.bf16.mxu0 %v11679_v58 }
0x2037   :  { %10758 = vmatpush3.bf16.msra.mxu1 %v10757_v26  ;;  %v7947_v26 = vld [vmem:[%s13987_s7 + $0x60] sm:$0xff] }
0x2038   :  { %10760 = vmatprep.subr.bf16.mxu1 %v10759_v29  ;;  %10784 = vmatpush3.bf16.msra.mxu0 %v10783_v4  ;;  %v8147_v29 = vld [vmem:[%s13986_s6] ss:$0 sm:$0xff] }
0x2039   :  { %10785 = vmatprep.subr.bf16.mxu0 %v11679_v58 }
0x203b   :  { %10762 = vmatpush3.bf16.msra.mxu1 %v10761_v61 }
0x203c   :  { %10764 = vmatprep.subr.bf16.mxu1 %v10763_v22 }
0x203f   :  { %10766 = vmatpush3.bf16.msra.mxu1 %v10765_v18  ;;  %v8029_v18 = vand.u32 127, %v13991_v6 }
0x2041   :  { %vm8030_vm1 = vcmp.lt.s32.totalorder %v8029_v18, 2 }
0x20d6   :  { %v7613_v20 = vpop.f32.mrb[62].mxu0  ;;  %v7684_v16 = vpop.f32.mrb[62].mxu1 }
0x20d7   :  { %v10901_v35 = vadd.f32 %v7613_v20, %v13445_v44  ;;  %v7615_v45 = vpop.f32.mrb[63].mxu0  ;;  %v7686_v12 = vpop.f32.mrb[63].mxu1  ;;  %v10917_v15 = vadd.f32 %v7684_v16, %v13457_v48 }
0x20d8   :  { %v10902_v36 = vadd.f32 %v7615_v45, %v13448_v27  ;;  %v10918_v55 = vadd.f32 %v7686_v12, %v13453_v53 }
0x20d9   :  { %v8144_v38 = vmul.f32 -1.442695, %v10901_v35 }
0x20da   :  { %v8145_v60 = vmul.f32 -1.442695, %v10902_v36  ;;  %v8146_v46 = vmul.f32 -1.442695, %v10918_v55 }
0x20db   :  { %11583 = vpow2.f32 %v8144_v38 }
0x20dc   :  { %11585 = vpow2.f32 %v8145_v60 }
0x20dd   :  { %11587 = vpow2.f32 %v8146_v46 }
0x20de   :  { %11589 = vtanh.f32 %v10917_v15 }
0x20e5   :  { %v11584_v59 = vpop.eup %11583 }
0x20e6   :  { %v11586_v5 = vpop.eup %11585  ;;  %v7696_v57 = vadd.f32 1.0, %v11584_v59 }
0x20e7   :  { %v7702_v31 = vadd.f32 1.0, %v11586_v5  ;;  %v11588_v44 = vpop.eup %11587 }
0x20e8   :  { %11591 = vrcp.f32 %v7696_v57  ;;  %v11590_v17 = vpop.eup %11589  ;;  %v7709_v52 = vadd.f32 1.0, %v11588_v44 }
0x20e9   :  { %11593 = vrcp.f32 %v7702_v31 }
0x20ea   :  { %11595 = vrcp.f32 %v7709_v52 }
0x20f2   :  { %v11592_v27 = vpop.eup %11591 }
0x20f3   :  { %v11594_v51 = vpop.eup %11593  ;;  %v7713_v2 = vmul.f32 %v11592_v27, %v11590_v17 }
0x20f4   :  { %v7712_v19 = vmul.f32 %v11594_v51, %v13716_v40  ;;  %v11596_v10 = vpop.eup %11595  ;;  %v7948_v40 = vld [vmem:[%s13987_s7 + $0x68] sm:$0xff] }
0x20f5   :  { %v10786_v23 = vpack.c.bf16 %v7948_v40, %v7947_v26 }
0x20f6   :  { %v8181_v53 = vpop.f32.mrb[64].mxu0  ;;  %v7714_v43 = vadd.f32 %v7713_v2, %v7712_v19 }
0x20f7   :  { %v8182_v48 = vpop.f32.mrb[65].mxu0  ;;  %10787 = vmatpush3.bf16.msra.mxu0 %v10786_v23 }
0x20f8   :  { %v8183_v11 = vadd.f32 %v8182_v48, %v8181_v53  ;;  %11597 = vtanh.f32 %v7714_v43  ;;  %10788 = vmatprep.subr.bf16.mxu0 %v11679_v58 }
0x20fa   :  { %v7861_v42 = vadd.f32 %v8183_v11, %v8147_v29 }
0x2102   :  { %v11598_v39 = vpop.eup %11597 }
0x2103   :  { %v7716_v30 = vmul.f32 %v11598_v39, %v11596_v10 }
0x2105   :  { %7928 = vmatprep.mubr.f32.mxu1 %v7716_v30 }
0x2106   :  { %7929 = vmatmul.mubr.f32.vlgmr.msra.gmra.mrb[64].mxu1 %v13399_v56  ;;  %v7950_v56 = vld [vmem:[%s13987_s7 + $0x78] sm:$0xff] }
0x2107   :  { %v10789_v7 = vpack.c.bf16 %v7950_v56, %v7949_v25 }
0x2109   :  { %10790 = vmatpush3.bf16.msra.mxu0 %v10789_v7 }
0x21d9   :  { %v8216_v50 = vpop.f32.mrb[64].mxu1 }
0x21da   :  { %v8217_v13 = vpop.f32.mrb[65].mxu1 }
0x21db   :  { %v8218_v61 = vadd.f32 %v8217_v13, %v8216_v50 }
0x21dd   :  { %v7931_v22 = vadd.f32 %v8218_v61, %v7861_v42 }
0x21df   :  { %v7934_v37 = vmax.f32 %v7931_v22, 0.0 }
0x21e1   :  { %8269 = vmatmul.mubr.f32.vlgmr.msra.gmra.mrb[66].mxu0 %v7934_v37 }
0x22b4   :  { %v8024_v28 = vpop.f32.mrb[66].mxu0 }
0x22b5   :  { %v8025_v0 = vadd.f32 %v8148_v54, %v8024_v28  ;;  %v8270_v33 = vpop.f32.mrb[67].mxu0 }
0x22b7   :  { %v8031_v58 = vsel %vm8030_vm1, %v8025_v0, -1e+30 }
0x22b8   :  { %8032 = vmax.xlane.f32.xlu0 %v8031_v58 }
0x2345   :  { %v8033_v62 = vpop.xlane.xlu0 %8032 }
0x2346   :  { %v8034_v32 = vsub.f32 %v8031_v58, %v8033_v62 }
0x2348   :  { %v8035_v41 = vmul.f32 1.442695, %v8034_v32 }
0x234a   :  { %11599 = vpow2.f32 %v8035_v41 }
0x2354   :  { %v11600_v49 = vpop.eup %11599 }
0x2355   :  { %8037 = vadd.xlane.f32.xlu0 %v11600_v49 }
0x23e2   :  { %v8038_v63 = vpop.xlane.xlu0 %8037 }
0x23e3   :  { %11601 = vrcp.f32 %v8038_v63 }
0x23ed   :  { %v11602_v1 = vpop.eup %11601 }
0x23ee   :  { %v8040_v21 = vmul.f32 %v11602_v1, %v11600_v49 }
0x23f0   :  { %8041 = vst [vmem:[%s13989_s9] sm:$0xff] %v8040_v21 }
0x23f1   :  { %8046 = vsyncpa [#allocation6], 1 }
0x23f2   :  { %8047 = vsyncpa [#allocation8], 1 }

</bundles_post_ra>
